<compile_context>
chip_gen: v6e
topology: v6e:2x2x1
jax: 0.10.0
libtpu: 0.0.40
codegen_flags: <defaults>
</compile_context>

<pallas_src>
import functools

import jax
import jax.numpy as jnp
import numpy as np
from jax.experimental import pallas as pl
from jax.experimental.pallas import tpu as pltpu

BN_EPS = 1e-5


# --------------------------------------------------------------------------
# Static helpers (run once at setup time, not per forward pass)
# --------------------------------------------------------------------------
def _conv_names(num_res_blocks):
    return ["stem"] + [f"rb{r}_{j}" for r in range(num_res_blocks) for j in (1, 2)]


def _tap_shifts(W):
    """Flattened row-major pixel shift for each of the 9 taps of a 3x3, pad=1 conv."""
    return [(kh - 1) * W + (kw - 1) for kh in range(3) for kw in range(3)]


def _tap_masks(H, W):
    """(9, 1, H*W) float 0/1 masks: 1 where the tap's input pixel (h+dh, w+dw) is in-bounds."""
    hh, ww = np.meshgrid(np.arange(H), np.arange(W), indexing="ij")
    masks = np.zeros((9, 1, H * W), np.float32)
    k = 0
    for dh in (-1, 0, 1):
        for dw in (-1, 0, 1):
            ok = (hh + dh >= 0) & (hh + dh < H) & (ww + dw >= 0) & (ww + dw < W)
            masks[k, 0, :] = ok.reshape(-1).astype(np.float32)
            k += 1
    return jnp.asarray(masks)


# --------------------------------------------------------------------------
# Fused Pallas kernel: Conv3x3+BN+ReLU stem followed by basic ResBlocks
# --------------------------------------------------------------------------
def _make_repnet_kernel(B, H, W, C, stem_cin_pad, num_res_blocks, use_bf16_mxu):
    HW = H * W
    BHW = B * HW
    shifts = _tap_shifts(W)
    n_convs = 1 + 2 * num_res_blocks

    def kernel(*refs):
        x_ref, mask_ref = refs[0], refs[1]
        o_ref = refs[2 + 3 * n_convs]
        stage_ref, cur_ref, tmp_ref = refs[3 + 3 * n_convs:]

        def stage_taps(src_ref, cin):
            # Build the K-stacked im2col operand [X_0; X_1; ...; X_8] of shape
            # (9*cin, B*HW) in VMEM scratch.  Each tap is a lane roll of the whole
            # merged (cin, B*HW) slab; wrapped / cross-image pixels are exactly the
            # out-of-bounds ones, zeroed by the (B-tiled) boundary masks.
            for k, s in enumerate(shifts):
                if s == 0:  # centre tap: no shift, mask == 1
                    xk = src_ref[...]
                else:
                    xk = pltpu.roll(src_ref[...], shift=(-s) % BHW, axis=1) * mask_ref[k]
                stage_ref[k * cin:(k + 1) * cin, :] = xk.astype(stage_ref.dtype)

        def conv_bn(src_ref, cin, w_ref, g_ref, b_ref):
            """3x3 conv (pad 1, no bias) as ONE MXU matmul, + BN (training-mode stats)."""
            stage_taps(src_ref, cin)
            w = w_ref[...]  # (C, 9*cin), packed offline
            if use_bf16_mxu:
                w = w.astype(jnp.bfloat16)
            z = jnp.dot(w, stage_ref[0:9 * cin, :],
                        preferred_element_type=jnp.float32)          # (C, B*HW) f32
            # BatchNorm2d, biased batch statistics over (N, H, W), single pass:
            inv_n = 1.0 / float(BHW)
            mean = jnp.sum(z, axis=1, keepdims=True) * inv_n          # (C, 1)
            ex2 = jnp.sum(z * z, axis=1, keepdims=True) * inv_n       # (C, 1)
            var = ex2 - mean * mean
            scale = g_ref[...] * jax.lax.rsqrt(var + BN_EPS)          # (C, 1)
            shift = b_ref[...] - mean * scale
            return z * scale + shift

        p = 2
        # stem: Conv3x3 -> BN -> ReLU
        cur_ref[...] = jnp.maximum(
            conv_bn(x_ref, stem_cin_pad, refs[p], refs[p + 1], refs[p + 2]), 0.0)
        p += 3

        # basic ResBlocks: [Conv->BN->ReLU, Conv->BN] + identity, ReLU
        for _ in range(num_res_blocks):
            tmp_ref[...] = jnp.maximum(
                conv_bn(cur_ref, C, refs[p], refs[p + 1], refs[p + 2]), 0.0)
            p += 3
            h = conv_bn(tmp_ref, C, refs[p], refs[p + 1], refs[p + 2])
            p += 3
            cur_ref[...] = jnp.maximum(h + cur_ref[...], 0.0)

        # lane-dense, aligned final stores: columns [b*HW, (b+1)*HW) per batch element
        y = cur_ref[...]
        for b in range(B):
            o_ref[b] = y[:, b * HW:(b + 1) * HW]

    return kernel


# --------------------------------------------------------------------------
# Parameters (torch layout) and one-time offline re-layout for the kernel
# --------------------------------------------------------------------------
def init_params(key, obs_channels, num_channels, num_res_blocks):
    """Deterministic synthetic parameters in the torch layout:
       Conv2d weight (Cout, Cin, 3, 3) (bias=False everywhere), BN gamma/beta (C,)."""
    C = num_channels
    names = _conv_names(num_res_blocks)
    keys = jax.random.split(key, 3 * len(names))
    params = {}
    cin = obs_channels
    for i, name in enumerate(names):
        fan_in = float(np.sqrt(9 * cin))
        params[f"{name}_w"] = jax.random.normal(
            keys[3 * i], (C, cin, 3, 3), jnp.float32) / fan_in
        params[f"{name}_gamma"] = 1.0 + 0.1 * jax.random.normal(
            keys[3 * i + 1], (C,), jnp.float32)
        params[f"{name}_beta"] = 0.1 * jax.random.normal(
            keys[3 * i + 2], (C,), jnp.float32)
        cin = C
    return params


def pack_params(params, obs_channels, num_channels, num_res_blocks, H, W, B,
                use_bf16_mxu=False):
    """One-time offline re-layout so the kernel needs no runtime weight transposes:
         Conv (Cout, Cin, 3, 3) -> K-stacked (Cout, 9*Cin_padded)  [tap-major K blocks]
         BN (C,)                -> (C, 1)
         boundary masks         -> (9, 1, B*H*W), tiled B times along the lane axis."""
    C = num_channels
    pad_to = 16 if use_bf16_mxu else 8              # bf16 packs 16 rows per sublane tile
    stem_cin_pad = -(-obs_channels // pad_to) * pad_to
    masks = jnp.tile(_tap_masks(H, W), (1, 1, B))   # (9, 1, B*HW)
    args = [masks]
    cin_pad = stem_cin_pad
    for name in _conv_names(num_res_blocks):
        w = params[f"{name}_w"]                     # (Cout, Cin, 3, 3)
        cout, cin = w.shape[:2]
        wt = jnp.transpose(w, (0, 2, 3, 1)).reshape(cout, 9, cin)  # (Cout, 9, Cin), k=kh*3+kw
        if cin_pad > cin:
            wt = jnp.pad(wt, ((0, 0), (0, 0), (0, cin_pad - cin)))
        args += [wt.reshape(cout, 9 * cin_pad),
                 params[f"{name}_gamma"].reshape(C, 1),
                 params[f"{name}_beta"].reshape(C, 1)]
        cin_pad = C
    return args, stem_cin_pad


# --------------------------------------------------------------------------
# Forward wrapper: single fused pallas_call
# --------------------------------------------------------------------------
def representation_network_forward(packed_args, x, *, num_channels, num_res_blocks,
                                   stem_cin_pad, use_bf16_mxu=False):
    """x: NCHW (B, C_in, H, W). Returns NCHW (B, num_channels, H, W)."""
    B, Cin, H, W = x.shape
    HW = H * W
    BHW = B * HW
    C = num_channels

    # (B, Cin, H, W) -> (Cin_pad, B*HW): tiny one-time layout op (a few KB), done by XLA.
    x2 = x.reshape(B, Cin, HW)
    if stem_cin_pad != Cin:                          # zero channels: exact, tiny
        x2 = jnp.pad(x2, ((0, 0), (0, stem_cin_pad - Cin), (0, 0)))
    x2 = jnp.transpose(x2, (1, 0, 2)).reshape(stem_cin_pad, BHW)

    stage_dtype = jnp.bfloat16 if use_bf16_mxu else jnp.float32
    stage_rows = 9 * max(stem_cin_pad, C)
    scratch = [
        pltpu.VMEM((stage_rows, BHW), stage_dtype),   # K-stacked im2col operand
        pltpu.VMEM((C, BHW), jnp.float32),            # current activation / residual
        pltpu.VMEM((C, BHW), jnp.float32),            # resblock intermediate
    ]

    inputs = [x2] + list(packed_args)
    vmem = pl.BlockSpec(memory_space=pltpu.MemorySpace.VMEM)  # whole arrays resident in VMEM,
    out = pl.pallas_call(                                     # no grid, no double-buffering
        _make_repnet_kernel(B, H, W, C, stem_cin_pad, num_res_blocks, use_bf16_mxu),
        out_shape=jax.ShapeDtypeStruct((B, C, HW), jnp.float32),
        in_specs=[vmem] * len(inputs),
        out_specs=vmem,
        scratch_shapes=scratch,
        compiler_params=pltpu.CompilerParams(vmem_limit_bytes=32 * 1024 * 1024),
    )(*inputs)
    return out.reshape(B, C, H, W)                            # free view back to NCHW


# --------------------------------------------------------------------------
# Pure-JAX reference of the torch forward pass (for correctness checking)
# --------------------------------------------------------------------------
def reference_forward(params, x, *, num_res_blocks):
    def conv3x3(h, w):
        return jax.lax.conv_general_dilated(
            h, w, window_strides=(1, 1), padding=((1, 1), (1, 1)),
            dimension_numbers=("NCHW", "OIHW", "NCHW"),
            precision=jax.lax.Precision.HIGHEST)

    def bn(h, gamma, beta):
        mean = jnp.mean(h, axis=(0, 2, 3), keepdims=True)
        var = jnp.mean((h - mean) ** 2, axis=(0, 2, 3), keepdims=True)
        h = (h - mean) * jax.lax.rsqrt(var + BN_EPS)
        return h * gamma.reshape(1, -1, 1, 1) + beta.reshape(1, -1, 1, 1)

    h = jnp.maximum(bn(conv3x3(x, params["stem_w"]),
                       params["stem_gamma"], params["stem_beta"]), 0.0)
    for r in range(num_res_blocks):
        idn = h
        y = jnp.maximum(bn(conv3x3(h, params[f"rb{r}_1_w"]),
                           params[f"rb{r}_1_gamma"], params[f"rb{r}_1_beta"]), 0.0)
        y = bn(conv3x3(y, params[f"rb{r}_2_w"]),
               params[f"rb{r}_2_gamma"], params[f"rb{r}_2_beta"])
        h = jnp.maximum(y + idn, 0.0)
    return h


if __name__ == "__main__":
    OBS_SHAPE = (4, 16, 16)          # (C_in, H, W): small downsample=False configuration
    NUM_CHANNELS = 64
    NUM_RES_BLOCKS = 1
    BATCH = 2

    key = jax.random.PRNGKey(0)
    pkey, xkey = jax.random.split(key)
    params = init_params(pkey, OBS_SHAPE[0], NUM_CHANNELS, NUM_RES_BLOCKS)
    packed, stem_cin_pad = pack_params(
        params, OBS_SHAPE[0], NUM_CHANNELS, NUM_RES_BLOCKS,
        OBS_SHAPE[1], OBS_SHAPE[2], BATCH, use_bf16_mxu=False)

    x = jax.random.normal(xkey, (BATCH,) + OBS_SHAPE, jnp.float32)

    fwd = jax.jit(functools.partial(
        representation_network_forward,
        num_channels=NUM_CHANNELS, num_res_blocks=NUM_RES_BLOCKS,
        stem_cin_pad=stem_cin_pad, use_bf16_mxu=False))
    out = jax.block_until_ready(fwd(packed, x))

    assert out.shape == (BATCH, NUM_CHANNELS, OBS_SHAPE[1], OBS_SHAPE[2]), out.shape
    assert bool(jnp.all(jnp.isfinite(out)))

    # Cross-check against a pure-JAX reference of the torch forward pass (all-f32 path).
    ref = jax.block_until_ready(
        jax.jit(functools.partial(reference_forward,
                                  num_res_blocks=NUM_RES_BLOCKS))(params, x))
    np.testing.assert_allclose(np.asarray(out), np.asarray(ref), rtol=1e-3, atol=1e-4)

    print("KERNEL_OK")
</pallas_src>

<mosaic_0001>
module attributes {stable_mosaic.version = 11 : i64} {
  func.func @kernel(%arg0: memref<8x512xf32, #tpu.memory_space<vmem>>, %arg1: memref<9x1x512xf32, #tpu.memory_space<vmem>>, %arg2: memref<64x72xf32, #tpu.memory_space<vmem>>, %arg3: memref<64x1xf32, #tpu.memory_space<vmem>>, %arg4: memref<64x1xf32, #tpu.memory_space<vmem>>, %arg5: memref<64x576xf32, #tpu.memory_space<vmem>>, %arg6: memref<64x1xf32, #tpu.memory_space<vmem>>, %arg7: memref<64x1xf32, #tpu.memory_space<vmem>>, %arg8: memref<64x576xf32, #tpu.memory_space<vmem>>, %arg9: memref<64x1xf32, #tpu.memory_space<vmem>>, %arg10: memref<64x1xf32, #tpu.memory_space<vmem>>, %arg11: memref<2x64x256xf32, #tpu.memory_space<vmem>>, %arg12: memref<576x512xf32, #tpu.memory_space<vmem>>, %arg13: memref<64x512xf32, #tpu.memory_space<vmem>>, %arg14: memref<64x512xf32, #tpu.memory_space<vmem>>) attributes {dimension_semantics = [], scalar_prefetch = 0 : i64, scratch_operands = 3 : i64, tpu.core_type = #tpu.core_type<tc>} {
    %c0 = arith.constant 0 : index
    %c0_0 = arith.constant 0 : index
    %0 = vector.load %arg0[%c0, %c0_0] : memref<8x512xf32, #tpu.memory_space<vmem>>, vector<8x512xf32>
    %c17_i32 = arith.constant 17 : i32
    %1 = tpu.dynamic_rotate %0 by %c17_i32 dim 1 : vector<8x512xf32>, i32 -> vector<8x512xf32>
    %c0_1 = arith.constant 0 : index
    %c0_2 = arith.constant 0 : index
    %c0_3 = arith.constant 0 : index
    %2 = vector.load %arg1[%c0_1, %c0_2, %c0_3] : memref<9x1x512xf32, #tpu.memory_space<vmem>>, vector<1x1x512xf32>
    %3 = vector.shape_cast %2 : vector<1x1x512xf32> to vector<1x512xf32>
    %4 = vector.broadcast %3 : vector<1x512xf32> to vector<8x512xf32>
    %5 = arith.mulf %1, %4 : vector<8x512xf32>
    %c0_4 = arith.constant 0 : index
    %c0_5 = arith.constant 0 : index
    %6 = vector.load %arg12[%c0_4, %c0_5] : memref<576x512xf32, #tpu.memory_space<vmem>>, vector<8x512xf32>
    tpu.vector_store %arg12[%c0_4, %c0_5], %5 {strides = array<i32>} : memref<576x512xf32, #tpu.memory_space<vmem>>, vector<8x512xf32>,
    %c0_6 = arith.constant 0 : index
    %c0_7 = arith.constant 0 : index
    %7 = vector.load %arg0[%c0_6, %c0_7] : memref<8x512xf32, #tpu.memory_space<vmem>>, vector<8x512xf32>
    %c16_i32 = arith.constant 16 : i32
    %8 = tpu.dynamic_rotate %7 by %c16_i32 dim 1 : vector<8x512xf32>, i32 -> vector<8x512xf32>
    %c1 = arith.constant 1 : index
    %c0_8 = arith.constant 0 : index
    %c0_9 = arith.constant 0 : index
    %9 = vector.load %arg1[%c1, %c0_8, %c0_9] : memref<9x1x512xf32, #tpu.memory_space<vmem>>, vector<1x1x512xf32>
    %10 = vector.shape_cast %9 : vector<1x1x512xf32> to vector<1x512xf32>
    %11 = vector.broadcast %10 : vector<1x512xf32> to vector<8x512xf32>
    %12 = arith.mulf %8, %11 : vector<8x512xf32>
    %c8 = arith.constant 8 : index
    %c0_10 = arith.constant 0 : index
    %13 = vector.load %arg12[%c8, %c0_10] : memref<576x512xf32, #tpu.memory_space<vmem>>, vector<8x512xf32>
    tpu.vector_store %arg12[%c8, %c0_10], %12 {strides = array<i32>} : memref<576x512xf32, #tpu.memory_space<vmem>>, vector<8x512xf32>,
    %c0_11 = arith.constant 0 : index
    %c0_12 = arith.constant 0 : index
    %14 = vector.load %arg0[%c0_11, %c0_12] : memref<8x512xf32, #tpu.memory_space<vmem>>, vector<8x512xf32>
    %c15_i32 = arith.constant 15 : i32
    %15 = tpu.dynamic_rotate %14 by %c15_i32 dim 1 : vector<8x512xf32>, i32 -> vector<8x512xf32>
    %c2 = arith.constant 2 : index
    %c0_13 = arith.constant 0 : index
    %c0_14 = arith.constant 0 : index
    %16 = vector.load %arg1[%c2, %c0_13, %c0_14] : memref<9x1x512xf32, #tpu.memory_space<vmem>>, vector<1x1x512xf32>
    %17 = vector.shape_cast %16 : vector<1x1x512xf32> to vector<1x512xf32>
    %18 = vector.broadcast %17 : vector<1x512xf32> to vector<8x512xf32>
    %19 = arith.mulf %15, %18 : vector<8x512xf32>
    %c16 = arith.constant 16 : index
    %c0_15 = arith.constant 0 : index
    %20 = vector.load %arg12[%c16, %c0_15] : memref<576x512xf32, #tpu.memory_space<vmem>>, vector<8x512xf32>
    tpu.vector_store %arg12[%c16, %c0_15], %19 {strides = array<i32>} : memref<576x512xf32, #tpu.memory_space<vmem>>, vector<8x512xf32>,
    %c0_16 = arith.constant 0 : index
    %c0_17 = arith.constant 0 : index
    %21 = vector.load %arg0[%c0_16, %c0_17] : memref<8x512xf32, #tpu.memory_space<vmem>>, vector<8x512xf32>
    %c1_i32 = arith.constant 1 : i32
    %22 = tpu.dynamic_rotate %21 by %c1_i32 dim 1 : vector<8x512xf32>, i32 -> vector<8x512xf32>
    %c3 = arith.constant 3 : index
    %c0_18 = arith.constant 0 : index
    %c0_19 = arith.constant 0 : index
    %23 = vector.load %arg1[%c3, %c0_18, %c0_19] : memref<9x1x512xf32, #tpu.memory_space<vmem>>, vector<1x1x512xf32>
    %24 = vector.shape_cast %23 : vector<1x1x512xf32> to vector<1x512xf32>
    %25 = vector.broadcast %24 : vector<1x512xf32> to vector<8x512xf32>
    %26 = arith.mulf %22, %25 : vector<8x512xf32>
    %c24 = arith.constant 24 : index
    %c0_20 = arith.constant 0 : index
    %27 = vector.load %arg12[%c24, %c0_20] : memref<576x512xf32, #tpu.memory_space<vmem>>, vector<8x512xf32>
    tpu.vector_store %arg12[%c24, %c0_20], %26 {strides = array<i32>} : memref<576x512xf32, #tpu.memory_space<vmem>>, vector<8x512xf32>,
    %c0_21 = arith.constant 0 : index
    %c0_22 = arith.constant 0 : index
    %28 = vector.load %arg0[%c0_21, %c0_22] : memref<8x512xf32, #tpu.memory_space<vmem>>, vector<8x512xf32>
    %c32 = arith.constant 32 : index
    %c0_23 = arith.constant 0 : index
    %29 = vector.load %arg12[%c32, %c0_23] : memref<576x512xf32, #tpu.memory_space<vmem>>, vector<8x512xf32>
    tpu.vector_store %arg12[%c32, %c0_23], %28 {strides = array<i32>} : memref<576x512xf32, #tpu.memory_space<vmem>>, vector<8x512xf32>,
    %c0_24 = arith.constant 0 : index
    %c0_25 = arith.constant 0 : index
    %30 = vector.load %arg0[%c0_24, %c0_25] : memref<8x512xf32, #tpu.memory_space<vmem>>, vector<8x512xf32>
    %c511_i32 = arith.constant 511 : i32
    %31 = tpu.dynamic_rotate %30 by %c511_i32 dim 1 : vector<8x512xf32>, i32 -> vector<8x512xf32>
    %c5 = arith.constant 5 : index
    %c0_26 = arith.constant 0 : index
    %c0_27 = arith.constant 0 : index
    %32 = vector.load %arg1[%c5, %c0_26, %c0_27] : memref<9x1x512xf32, #tpu.memory_space<vmem>>, vector<1x1x512xf32>
    %33 = vector.shape_cast %32 : vector<1x1x512xf32> to vector<1x512xf32>
    %34 = vector.broadcast %33 : vector<1x512xf32> to vector<8x512xf32>
    %35 = arith.mulf %31, %34 : vector<8x512xf32>
    %c40 = arith.constant 40 : index
    %c0_28 = arith.constant 0 : index
    %36 = vector.load %arg12[%c40, %c0_28] : memref<576x512xf32, #tpu.memory_space<vmem>>, vector<8x512xf32>
    tpu.vector_store %arg12[%c40, %c0_28], %35 {strides = array<i32>} : memref<576x512xf32, #tpu.memory_space<vmem>>, vector<8x512xf32>,
    %c0_29 = arith.constant 0 : index
    %c0_30 = arith.constant 0 : index
    %37 = vector.load %arg0[%c0_29, %c0_30] : memref<8x512xf32, #tpu.memory_space<vmem>>, vector<8x512xf32>
    %c497_i32 = arith.constant 497 : i32
    %38 = tpu.dynamic_rotate %37 by %c497_i32 dim 1 : vector<8x512xf32>, i32 -> vector<8x512xf32>
    %c6 = arith.constant 6 : index
    %c0_31 = arith.constant 0 : index
    %c0_32 = arith.constant 0 : index
    %39 = vector.load %arg1[%c6, %c0_31, %c0_32] : memref<9x1x512xf32, #tpu.memory_space<vmem>>, vector<1x1x512xf32>
    %40 = vector.shape_cast %39 : vector<1x1x512xf32> to vector<1x512xf32>
    %41 = vector.broadcast %40 : vector<1x512xf32> to vector<8x512xf32>
    %42 = arith.mulf %38, %41 : vector<8x512xf32>
    %c48 = arith.constant 48 : index
    %c0_33 = arith.constant 0 : index
    %43 = vector.load %arg12[%c48, %c0_33] : memref<576x512xf32, #tpu.memory_space<vmem>>, vector<8x512xf32>
    tpu.vector_store %arg12[%c48, %c0_33], %42 {strides = array<i32>} : memref<576x512xf32, #tpu.memory_space<vmem>>, vector<8x512xf32>,
    %c0_34 = arith.constant 0 : index
    %c0_35 = arith.constant 0 : index
    %44 = vector.load %arg0[%c0_34, %c0_35] : memref<8x512xf32, #tpu.memory_space<vmem>>, vector<8x512xf32>
    %c496_i32 = arith.constant 496 : i32
    %45 = tpu.dynamic_rotate %44 by %c496_i32 dim 1 : vector<8x512xf32>, i32 -> vector<8x512xf32>
    %c7 = arith.constant 7 : index
    %c0_36 = arith.constant 0 : index
    %c0_37 = arith.constant 0 : index
    %46 = vector.load %arg1[%c7, %c0_36, %c0_37] : memref<9x1x512xf32, #tpu.memory_space<vmem>>, vector<1x1x512xf32>
    %47 = vector.shape_cast %46 : vector<1x1x512xf32> to vector<1x512xf32>
    %48 = vector.broadcast %47 : vector<1x512xf32> to vector<8x512xf32>
    %49 = arith.mulf %45, %48 : vector<8x512xf32>
    %c56 = arith.constant 56 : index
    %c0_38 = arith.constant 0 : index
    %50 = vector.load %arg12[%c56, %c0_38] : memref<576x512xf32, #tpu.memory_space<vmem>>, vector<8x512xf32>
    tpu.vector_store %arg12[%c56, %c0_38], %49 {strides = array<i32>} : memref<576x512xf32, #tpu.memory_space<vmem>>, vector<8x512xf32>,
    %c0_39 = arith.constant 0 : index
    %c0_40 = arith.constant 0 : index
    %51 = vector.load %arg0[%c0_39, %c0_40] : memref<8x512xf32, #tpu.memory_space<vmem>>, vector<8x512xf32>
    %c495_i32 = arith.constant 495 : i32
    %52 = tpu.dynamic_rotate %51 by %c495_i32 dim 1 : vector<8x512xf32>, i32 -> vector<8x512xf32>
    %c8_41 = arith.constant 8 : index
    %c0_42 = arith.constant 0 : index
    %c0_43 = arith.constant 0 : index
    %53 = vector.load %arg1[%c8_41, %c0_42, %c0_43] : memref<9x1x512xf32, #tpu.memory_space<vmem>>, vector<1x1x512xf32>
    %54 = vector.shape_cast %53 : vector<1x1x512xf32> to vector<1x512xf32>
    %55 = vector.broadcast %54 : vector<1x512xf32> to vector<8x512xf32>
    %56 = arith.mulf %52, %55 : vector<8x512xf32>
    %c64 = arith.constant 64 : index
    %c0_44 = arith.constant 0 : index
    %57 = vector.load %arg12[%c64, %c0_44] : memref<576x512xf32, #tpu.memory_space<vmem>>, vector<8x512xf32>
    tpu.vector_store %arg12[%c64, %c0_44], %56 {strides = array<i32>} : memref<576x512xf32, #tpu.memory_space<vmem>>, vector<8x512xf32>,
    %c0_45 = arith.constant 0 : index
    %c0_46 = arith.constant 0 : index
    %58 = vector.load %arg2[%c0_45, %c0_46] : memref<64x72xf32, #tpu.memory_space<vmem>>, vector<64x72xf32>
    %c0_47 = arith.constant 0 : index
    %c0_48 = arith.constant 0 : index
    %59 = vector.load %arg12[%c0_47, %c0_48] : memref<576x512xf32, #tpu.memory_space<vmem>>, vector<72x512xf32>
    %cst = arith.constant dense<0.000000e+00> : vector<64x512xf32>
    %60 = tpu.matmul %58, %59, %cst {dimension_numbers = #tpu.dot_dimension_numbers<[1], [0], [0], [1], [0, 0, 1, 1], [], []>} : vector<64x72xf32>, vector<72x512xf32>, vector<64x512xf32> -> vector<64x512xf32>
    %cst_49 = arith.constant dense<0.000000e+00> : vector<64xf32>
    %61 = vector.multi_reduction <add>, %60, %cst_49 [1] : vector<64x512xf32> to vector<64xf32>
    %62 = vector.shape_cast %61 : vector<64xf32> to vector<64x1xf32>
    %cst_50 = arith.constant 0.001953125 : f32
    %63 = vector.broadcast %cst_50 : f32 to vector<64x1xf32>
    %64 = arith.mulf %62, %63 : vector<64x1xf32>
    %65 = arith.mulf %60, %60 : vector<64x512xf32>
    %cst_51 = arith.constant dense<0.000000e+00> : vector<64xf32>
    %66 = vector.multi_reduction <add>, %65, %cst_51 [1] : vector<64x512xf32> to vector<64xf32>
    %67 = vector.shape_cast %66 : vector<64xf32> to vector<64x1xf32>
    %cst_52 = arith.constant 0.001953125 : f32
    %68 = vector.broadcast %cst_52 : f32 to vector<64x1xf32>
    %69 = arith.mulf %67, %68 : vector<64x1xf32>
    %70 = arith.mulf %64, %64 : vector<64x1xf32>
    %71 = arith.subf %69, %70 : vector<64x1xf32>
    %c0_53 = arith.constant 0 : index
    %c0_54 = arith.constant 0 : index
    %72 = vector.load %arg3[%c0_53, %c0_54] : memref<64x1xf32, #tpu.memory_space<vmem>>, vector<64x1xf32>
    %cst_55 = arith.constant 9.99999974E-6 : f32
    %73 = vector.broadcast %cst_55 : f32 to vector<64x1xf32>
    %74 = arith.addf %71, %73 : vector<64x1xf32>
    %75 = math.rsqrt %74 : vector<64x1xf32>
    %76 = arith.mulf %72, %75 : vector<64x1xf32>
    %c0_56 = arith.constant 0 : index
    %c0_57 = arith.constant 0 : index
    %77 = vector.load %arg4[%c0_56, %c0_57] : memref<64x1xf32, #tpu.memory_space<vmem>>, vector<64x1xf32>
    %78 = arith.mulf %64, %76 : vector<64x1xf32>
    %79 = arith.subf %77, %78 : vector<64x1xf32>
    %80 = vector.broadcast %76 : vector<64x1xf32> to vector<64x512xf32>
    %81 = arith.mulf %60, %80 : vector<64x512xf32>
    %82 = vector.broadcast %79 : vector<64x1xf32> to vector<64x512xf32>
    %83 = arith.addf %81, %82 : vector<64x512xf32>
    %cst_58 = arith.constant 0.000000e+00 : f32
    %84 = vector.broadcast %cst_58 : f32 to vector<64x512xf32>
    %85 = arith.maximumf %83, %84 : vector<64x512xf32>
    %c0_59 = arith.constant 0 : index
    %c0_60 = arith.constant 0 : index
    %86 = vector.load %arg13[%c0_59, %c0_60] : memref<64x512xf32, #tpu.memory_space<vmem>>, vector<64x512xf32>
    tpu.vector_store %arg13[%c0_59, %c0_60], %85 {strides = array<i32>} : memref<64x512xf32, #tpu.memory_space<vmem>>, vector<64x512xf32>,
    %c0_61 = arith.constant 0 : index
    %c0_62 = arith.constant 0 : index
    %87 = vector.load %arg13[%c0_61, %c0_62] : memref<64x512xf32, #tpu.memory_space<vmem>>, vector<64x512xf32>
    %c17_i32_63 = arith.constant 17 : i32
    %88 = tpu.dynamic_rotate %87 by %c17_i32_63 dim 1 : vector<64x512xf32>, i32 -> vector<64x512xf32>
    %c0_64 = arith.constant 0 : index
    %c0_65 = arith.constant 0 : index
    %c0_66 = arith.constant 0 : index
    %89 = vector.load %arg1[%c0_64, %c0_65, %c0_66] : memref<9x1x512xf32, #tpu.memory_space<vmem>>, vector<1x1x512xf32>
    %90 = vector.shape_cast %89 : vector<1x1x512xf32> to vector<1x512xf32>
    %91 = vector.broadcast %90 : vector<1x512xf32> to vector<64x512xf32>
    %92 = arith.mulf %88, %91 : vector<64x512xf32>
    %c0_67 = arith.constant 0 : index
    %c0_68 = arith.constant 0 : index
    %93 = vector.load %arg12[%c0_67, %c0_68] : memref<576x512xf32, #tpu.memory_space<vmem>>, vector<64x512xf32>
    tpu.vector_store %arg12[%c0_67, %c0_68], %92 {strides = array<i32>} : memref<576x512xf32, #tpu.memory_space<vmem>>, vector<64x512xf32>,
    %c0_69 = arith.constant 0 : index
    %c0_70 = arith.constant 0 : index
    %94 = vector.load %arg13[%c0_69, %c0_70] : memref<64x512xf32, #tpu.memory_space<vmem>>, vector<64x512xf32>
    %c16_i32_71 = arith.constant 16 : i32
    %95 = tpu.dynamic_rotate %94 by %c16_i32_71 dim 1 : vector<64x512xf32>, i32 -> vector<64x512xf32>
    %c1_72 = arith.constant 1 : index
    %c0_73 = arith.constant 0 : index
    %c0_74 = arith.constant 0 : index
    %96 = vector.load %arg1[%c1_72, %c0_73, %c0_74] : memref<9x1x512xf32, #tpu.memory_space<vmem>>, vector<1x1x512xf32>
    %97 = vector.shape_cast %96 : vector<1x1x512xf32> to vector<1x512xf32>
    %98 = vector.broadcast %97 : vector<1x512xf32> to vector<64x512xf32>
    %99 = arith.mulf %95, %98 : vector<64x512xf32>
    %c64_75 = arith.constant 64 : index
    %c0_76 = arith.constant 0 : index
    %100 = vector.load %arg12[%c64_75, %c0_76] : memref<576x512xf32, #tpu.memory_space<vmem>>, vector<64x512xf32>
    tpu.vector_store %arg12[%c64_75, %c0_76], %99 {strides = array<i32>} : memref<576x512xf32, #tpu.memory_space<vmem>>, vector<64x512xf32>,
    %c0_77 = arith.constant 0 : index
    %c0_78 = arith.constant 0 : index
    %101 = vector.load %arg13[%c0_77, %c0_78] : memref<64x512xf32, #tpu.memory_space<vmem>>, vector<64x512xf32>
    %c15_i32_79 = arith.constant 15 : i32
    %102 = tpu.dynamic_rotate %101 by %c15_i32_79 dim 1 : vector<64x512xf32>, i32 -> vector<64x512xf32>
    %c2_80 = arith.constant 2 : index
    %c0_81 = arith.constant 0 : index
    %c0_82 = arith.constant 0 : index
    %103 = vector.load %arg1[%c2_80, %c0_81, %c0_82] : memref<9x1x512xf32, #tpu.memory_space<vmem>>, vector<1x1x512xf32>
    %104 = vector.shape_cast %103 : vector<1x1x512xf32> to vector<1x512xf32>
    %105 = vector.broadcast %104 : vector<1x512xf32> to vector<64x512xf32>
    %106 = arith.mulf %102, %105 : vector<64x512xf32>
    %c128 = arith.constant 128 : index
    %c0_83 = arith.constant 0 : index
    %107 = vector.load %arg12[%c128, %c0_83] : memref<576x512xf32, #tpu.memory_space<vmem>>, vector<64x512xf32>
    tpu.vector_store %arg12[%c128, %c0_83], %106 {strides = array<i32>} : memref<576x512xf32, #tpu.memory_space<vmem>>, vector<64x512xf32>,
    %c0_84 = arith.constant 0 : index
    %c0_85 = arith.constant 0 : index
    %108 = vector.load %arg13[%c0_84, %c0_85] : memref<64x512xf32, #tpu.memory_space<vmem>>, vector<64x512xf32>
    %c1_i32_86 = arith.constant 1 : i32
    %109 = tpu.dynamic_rotate %108 by %c1_i32_86 dim 1 : vector<64x512xf32>, i32 -> vector<64x512xf32>
    %c3_87 = arith.constant 3 : index
    %c0_88 = arith.constant 0 : index
    %c0_89 = arith.constant 0 : index
    %110 = vector.load %arg1[%c3_87, %c0_88, %c0_89] : memref<9x1x512xf32, #tpu.memory_space<vmem>>, vector<1x1x512xf32>
    %111 = vector.shape_cast %110 : vector<1x1x512xf32> to vector<1x512xf32>
    %112 = vector.broadcast %111 : vector<1x512xf32> to vector<64x512xf32>
    %113 = arith.mulf %109, %112 : vector<64x512xf32>
    %c192 = arith.constant 192 : index
    %c0_90 = arith.constant 0 : index
    %114 = vector.load %arg12[%c192, %c0_90] : memref<576x512xf32, #tpu.memory_space<vmem>>, vector<64x512xf32>
    tpu.vector_store %arg12[%c192, %c0_90], %113 {strides = array<i32>} : memref<576x512xf32, #tpu.memory_space<vmem>>, vector<64x512xf32>,
    %c0_91 = arith.constant 0 : index
    %c0_92 = arith.constant 0 : index
    %115 = vector.load %arg13[%c0_91, %c0_92] : memref<64x512xf32, #tpu.memory_space<vmem>>, vector<64x512xf32>
    %c256 = arith.constant 256 : index
    %c0_93 = arith.constant 0 : index
    %116 = vector.load %arg12[%c256, %c0_93] : memref<576x512xf32, #tpu.memory_space<vmem>>, vector<64x512xf32>
    tpu.vector_store %arg12[%c256, %c0_93], %115 {strides = array<i32>} : memref<576x512xf32, #tpu.memory_space<vmem>>, vector<64x512xf32>,
    %c0_94 = arith.constant 0 : index
    %c0_95 = arith.constant 0 : index
    %117 = vector.load %arg13[%c0_94, %c0_95] : memref<64x512xf32, #tpu.memory_space<vmem>>, vector<64x512xf32>
    %c511_i32_96 = arith.constant 511 : i32
    %118 = tpu.dynamic_rotate %117 by %c511_i32_96 dim 1 : vector<64x512xf32>, i32 -> vector<64x512xf32>
    %c5_97 = arith.constant 5 : index
    %c0_98 = arith.constant 0 : index
    %c0_99 = arith.constant 0 : index
    %119 = vector.load %arg1[%c5_97, %c0_98, %c0_99] : memref<9x1x512xf32, #tpu.memory_space<vmem>>, vector<1x1x512xf32>
    %120 = vector.shape_cast %119 : vector<1x1x512xf32> to vector<1x512xf32>
    %121 = vector.broadcast %120 : vector<1x512xf32> to vector<64x512xf32>
    %122 = arith.mulf %118, %121 : vector<64x512xf32>
    %c320 = arith.constant 320 : index
    %c0_100 = arith.constant 0 : index
    %123 = vector.load %arg12[%c320, %c0_100] : memref<576x512xf32, #tpu.memory_space<vmem>>, vector<64x512xf32>
    tpu.vector_store %arg12[%c320, %c0_100], %122 {strides = array<i32>} : memref<576x512xf32, #tpu.memory_space<vmem>>, vector<64x512xf32>,
    %c0_101 = arith.constant 0 : index
    %c0_102 = arith.constant 0 : index
    %124 = vector.load %arg13[%c0_101, %c0_102] : memref<64x512xf32, #tpu.memory_space<vmem>>, vector<64x512xf32>
    %c497_i32_103 = arith.constant 497 : i32
    %125 = tpu.dynamic_rotate %124 by %c497_i32_103 dim 1 : vector<64x512xf32>, i32 -> vector<64x512xf32>
    %c6_104 = arith.constant 6 : index
    %c0_105 = arith.constant 0 : index
    %c0_106 = arith.constant 0 : index
    %126 = vector.load %arg1[%c6_104, %c0_105, %c0_106] : memref<9x1x512xf32, #tpu.memory_space<vmem>>, vector<1x1x512xf32>
    %127 = vector.shape_cast %126 : vector<1x1x512xf32> to vector<1x512xf32>
    %128 = vector.broadcast %127 : vector<1x512xf32> to vector<64x512xf32>
    %129 = arith.mulf %125, %128 : vector<64x512xf32>
    %c384 = arith.constant 384 : index
    %c0_107 = arith.constant 0 : index
    %130 = vector.load %arg12[%c384, %c0_107] : memref<576x512xf32, #tpu.memory_space<vmem>>, vector<64x512xf32>
    tpu.vector_store %arg12[%c384, %c0_107], %129 {strides = array<i32>} : memref<576x512xf32, #tpu.memory_space<vmem>>, vector<64x512xf32>,
    %c0_108 = arith.constant 0 : index
    %c0_109 = arith.constant 0 : index
    %131 = vector.load %arg13[%c0_108, %c0_109] : memref<64x512xf32, #tpu.memory_space<vmem>>, vector<64x512xf32>
    %c496_i32_110 = arith.constant 496 : i32
    %132 = tpu.dynamic_rotate %131 by %c496_i32_110 dim 1 : vector<64x512xf32>, i32 -> vector<64x512xf32>
    %c7_111 = arith.constant 7 : index
    %c0_112 = arith.constant 0 : index
    %c0_113 = arith.constant 0 : index
    %133 = vector.load %arg1[%c7_111, %c0_112, %c0_113] : memref<9x1x512xf32, #tpu.memory_space<vmem>>, vector<1x1x512xf32>
    %134 = vector.shape_cast %133 : vector<1x1x512xf32> to vector<1x512xf32>
    %135 = vector.broadcast %134 : vector<1x512xf32> to vector<64x512xf32>
    %136 = arith.mulf %132, %135 : vector<64x512xf32>
    %c448 = arith.constant 448 : index
    %c0_114 = arith.constant 0 : index
    %137 = vector.load %arg12[%c448, %c0_114] : memref<576x512xf32, #tpu.memory_space<vmem>>, vector<64x512xf32>
    tpu.vector_store %arg12[%c448, %c0_114], %136 {strides = array<i32>} : memref<576x512xf32, #tpu.memory_space<vmem>>, vector<64x512xf32>,
    %c0_115 = arith.constant 0 : index
    %c0_116 = arith.constant 0 : index
    %138 = vector.load %arg13[%c0_115, %c0_116] : memref<64x512xf32, #tpu.memory_space<vmem>>, vector<64x512xf32>
    %c495_i32_117 = arith.constant 495 : i32
    %139 = tpu.dynamic_rotate %138 by %c495_i32_117 dim 1 : vector<64x512xf32>, i32 -> vector<64x512xf32>
    %c8_118 = arith.constant 8 : index
    %c0_119 = arith.constant 0 : index
    %c0_120 = arith.constant 0 : index
    %140 = vector.load %arg1[%c8_118, %c0_119, %c0_120] : memref<9x1x512xf32, #tpu.memory_space<vmem>>, vector<1x1x512xf32>
    %141 = vector.shape_cast %140 : vector<1x1x512xf32> to vector<1x512xf32>
    %142 = vector.broadcast %141 : vector<1x512xf32> to vector<64x512xf32>
    %143 = arith.mulf %139, %142 : vector<64x512xf32>
    %c512 = arith.constant 512 : index
    %c0_121 = arith.constant 0 : index
    %144 = vector.load %arg12[%c512, %c0_121] : memref<576x512xf32, #tpu.memory_space<vmem>>, vector<64x512xf32>
    tpu.vector_store %arg12[%c512, %c0_121], %143 {strides = array<i32>} : memref<576x512xf32, #tpu.memory_space<vmem>>, vector<64x512xf32>,
    %c0_122 = arith.constant 0 : index
    %c0_123 = arith.constant 0 : index
    %145 = vector.load %arg5[%c0_122, %c0_123] : memref<64x576xf32, #tpu.memory_space<vmem>>, vector<64x576xf32>
    %c0_124 = arith.constant 0 : index
    %c0_125 = arith.constant 0 : index
    %146 = vector.load %arg12[%c0_124, %c0_125] : memref<576x512xf32, #tpu.memory_space<vmem>>, vector<576x512xf32>
    %cst_126 = arith.constant dense<0.000000e+00> : vector<64x512xf32>
    %147 = tpu.matmul %145, %146, %cst_126 {dimension_numbers = #tpu.dot_dimension_numbers<[1], [0], [0], [1], [0, 0, 1, 1], [], []>} : vector<64x576xf32>, vector<576x512xf32>, vector<64x512xf32> -> vector<64x512xf32>
    %cst_127 = arith.constant dense<0.000000e+00> : vector<64xf32>
    %148 = vector.multi_reduction <add>, %147, %cst_127 [1] : vector<64x512xf32> to vector<64xf32>
    %149 = vector.shape_cast %148 : vector<64xf32> to vector<64x1xf32>
    %cst_128 = arith.constant 0.001953125 : f32
    %150 = vector.broadcast %cst_128 : f32 to vector<64x1xf32>
    %151 = arith.mulf %149, %150 : vector<64x1xf32>
    %152 = arith.mulf %147, %147 : vector<64x512xf32>
    %cst_129 = arith.constant dense<0.000000e+00> : vector<64xf32>
    %153 = vector.multi_reduction <add>, %152, %cst_129 [1] : vector<64x512xf32> to vector<64xf32>
    %154 = vector.shape_cast %153 : vector<64xf32> to vector<64x1xf32>
    %cst_130 = arith.constant 0.001953125 : f32
    %155 = vector.broadcast %cst_130 : f32 to vector<64x1xf32>
    %156 = arith.mulf %154, %155 : vector<64x1xf32>
    %157 = arith.mulf %151, %151 : vector<64x1xf32>
    %158 = arith.subf %156, %157 : vector<64x1xf32>
    %c0_131 = arith.constant 0 : index
    %c0_132 = arith.constant 0 : index
    %159 = vector.load %arg6[%c0_131, %c0_132] : memref<64x1xf32, #tpu.memory_space<vmem>>, vector<64x1xf32>
    %cst_133 = arith.constant 9.99999974E-6 : f32
    %160 = vector.broadcast %cst_133 : f32 to vector<64x1xf32>
    %161 = arith.addf %158, %160 : vector<64x1xf32>
    %162 = math.rsqrt %161 : vector<64x1xf32>
    %163 = arith.mulf %159, %162 : vector<64x1xf32>
    %c0_134 = arith.constant 0 : index
    %c0_135 = arith.constant 0 : index
    %164 = vector.load %arg7[%c0_134, %c0_135] : memref<64x1xf32, #tpu.memory_space<vmem>>, vector<64x1xf32>
    %165 = arith.mulf %151, %163 : vector<64x1xf32>
    %166 = arith.subf %164, %165 : vector<64x1xf32>
    %167 = vector.broadcast %163 : vector<64x1xf32> to vector<64x512xf32>
    %168 = arith.mulf %147, %167 : vector<64x512xf32>
    %169 = vector.broadcast %166 : vector<64x1xf32> to vector<64x512xf32>
    %170 = arith.addf %168, %169 : vector<64x512xf32>
    %cst_136 = arith.constant 0.000000e+00 : f32
    %171 = vector.broadcast %cst_136 : f32 to vector<64x512xf32>
    %172 = arith.maximumf %170, %171 : vector<64x512xf32>
    %c0_137 = arith.constant 0 : index
    %c0_138 = arith.constant 0 : index
    %173 = vector.load %arg14[%c0_137, %c0_138] : memref<64x512xf32, #tpu.memory_space<vmem>>, vector<64x512xf32>
    tpu.vector_store %arg14[%c0_137, %c0_138], %172 {strides = array<i32>} : memref<64x512xf32, #tpu.memory_space<vmem>>, vector<64x512xf32>,
    %c0_139 = arith.constant 0 : index
    %c0_140 = arith.constant 0 : index
    %174 = vector.load %arg14[%c0_139, %c0_140] : memref<64x512xf32, #tpu.memory_space<vmem>>, vector<64x512xf32>
    %c17_i32_141 = arith.constant 17 : i32
    %175 = tpu.dynamic_rotate %174 by %c17_i32_141 dim 1 : vector<64x512xf32>, i32 -> vector<64x512xf32>
    %c0_142 = arith.constant 0 : index
    %c0_143 = arith.constant 0 : index
    %c0_144 = arith.constant 0 : index
    %176 = vector.load %arg1[%c0_142, %c0_143, %c0_144] : memref<9x1x512xf32, #tpu.memory_space<vmem>>, vector<1x1x512xf32>
    %177 = vector.shape_cast %176 : vector<1x1x512xf32> to vector<1x512xf32>
    %178 = vector.broadcast %177 : vector<1x512xf32> to vector<64x512xf32>
    %179 = arith.mulf %175, %178 : vector<64x512xf32>
    %c0_145 = arith.constant 0 : index
    %c0_146 = arith.constant 0 : index
    %180 = vector.load %arg12[%c0_145, %c0_146] : memref<576x512xf32, #tpu.memory_space<vmem>>, vector<64x512xf32>
    tpu.vector_store %arg12[%c0_145, %c0_146], %179 {strides = array<i32>} : memref<576x512xf32, #tpu.memory_space<vmem>>, vector<64x512xf32>,
    %c0_147 = arith.constant 0 : index
    %c0_148 = arith.constant 0 : index
    %181 = vector.load %arg14[%c0_147, %c0_148] : memref<64x512xf32, #tpu.memory_space<vmem>>, vector<64x512xf32>
    %c16_i32_149 = arith.constant 16 : i32
    %182 = tpu.dynamic_rotate %181 by %c16_i32_149 dim 1 : vector<64x512xf32>, i32 -> vector<64x512xf32>
    %c1_150 = arith.constant 1 : index
    %c0_151 = arith.constant 0 : index
    %c0_152 = arith.constant 0 : index
    %183 = vector.load %arg1[%c1_150, %c0_151, %c0_152] : memref<9x1x512xf32, #tpu.memory_space<vmem>>, vector<1x1x512xf32>
    %184 = vector.shape_cast %183 : vector<1x1x512xf32> to vector<1x512xf32>
    %185 = vector.broadcast %184 : vector<1x512xf32> to vector<64x512xf32>
    %186 = arith.mulf %182, %185 : vector<64x512xf32>
    %c64_153 = arith.constant 64 : index
    %c0_154 = arith.constant 0 : index
    %187 = vector.load %arg12[%c64_153, %c0_154] : memref<576x512xf32, #tpu.memory_space<vmem>>, vector<64x512xf32>
    tpu.vector_store %arg12[%c64_153, %c0_154], %186 {strides = array<i32>} : memref<576x512xf32, #tpu.memory_space<vmem>>, vector<64x512xf32>,
    %c0_155 = arith.constant 0 : index
    %c0_156 = arith.constant 0 : index
    %188 = vector.load %arg14[%c0_155, %c0_156] : memref<64x512xf32, #tpu.memory_space<vmem>>, vector<64x512xf32>
    %c15_i32_157 = arith.constant 15 : i32
    %189 = tpu.dynamic_rotate %188 by %c15_i32_157 dim 1 : vector<64x512xf32>, i32 -> vector<64x512xf32>
    %c2_158 = arith.constant 2 : index
    %c0_159 = arith.constant 0 : index
    %c0_160 = arith.constant 0 : index
    %190 = vector.load %arg1[%c2_158, %c0_159, %c0_160] : memref<9x1x512xf32, #tpu.memory_space<vmem>>, vector<1x1x512xf32>
    %191 = vector.shape_cast %190 : vector<1x1x512xf32> to vector<1x512xf32>
    %192 = vector.broadcast %191 : vector<1x512xf32> to vector<64x512xf32>
    %193 = arith.mulf %189, %192 : vector<64x512xf32>
    %c128_161 = arith.constant 128 : index
    %c0_162 = arith.constant 0 : index
    %194 = vector.load %arg12[%c128_161, %c0_162] : memref<576x512xf32, #tpu.memory_space<vmem>>, vector<64x512xf32>
    tpu.vector_store %arg12[%c128_161, %c0_162], %193 {strides = array<i32>} : memref<576x512xf32, #tpu.memory_space<vmem>>, vector<64x512xf32>,
    %c0_163 = arith.constant 0 : index
    %c0_164 = arith.constant 0 : index
    %195 = vector.load %arg14[%c0_163, %c0_164] : memref<64x512xf32, #tpu.memory_space<vmem>>, vector<64x512xf32>
    %c1_i32_165 = arith.constant 1 : i32
    %196 = tpu.dynamic_rotate %195 by %c1_i32_165 dim 1 : vector<64x512xf32>, i32 -> vector<64x512xf32>
    %c3_166 = arith.constant 3 : index
    %c0_167 = arith.constant 0 : index
    %c0_168 = arith.constant 0 : index
    %197 = vector.load %arg1[%c3_166, %c0_167, %c0_168] : memref<9x1x512xf32, #tpu.memory_space<vmem>>, vector<1x1x512xf32>
    %198 = vector.shape_cast %197 : vector<1x1x512xf32> to vector<1x512xf32>
    %199 = vector.broadcast %198 : vector<1x512xf32> to vector<64x512xf32>
    %200 = arith.mulf %196, %199 : vector<64x512xf32>
    %c192_169 = arith.constant 192 : index
    %c0_170 = arith.constant 0 : index
    %201 = vector.load %arg12[%c192_169, %c0_170] : memref<576x512xf32, #tpu.memory_space<vmem>>, vector<64x512xf32>
    tpu.vector_store %arg12[%c192_169, %c0_170], %200 {strides = array<i32>} : memref<576x512xf32, #tpu.memory_space<vmem>>, vector<64x512xf32>,
    %c0_171 = arith.constant 0 : index
    %c0_172 = arith.constant 0 : index
    %202 = vector.load %arg14[%c0_171, %c0_172] : memref<64x512xf32, #tpu.memory_space<vmem>>, vector<64x512xf32>
    %c256_173 = arith.constant 256 : index
    %c0_174 = arith.constant 0 : index
    %203 = vector.load %arg12[%c256_173, %c0_174] : memref<576x512xf32, #tpu.memory_space<vmem>>, vector<64x512xf32>
    tpu.vector_store %arg12[%c256_173, %c0_174], %202 {strides = array<i32>} : memref<576x512xf32, #tpu.memory_space<vmem>>, vector<64x512xf32>,
    %c0_175 = arith.constant 0 : index
    %c0_176 = arith.constant 0 : index
    %204 = vector.load %arg14[%c0_175, %c0_176] : memref<64x512xf32, #tpu.memory_space<vmem>>, vector<64x512xf32>
    %c511_i32_177 = arith.constant 511 : i32
    %205 = tpu.dynamic_rotate %204 by %c511_i32_177 dim 1 : vector<64x512xf32>, i32 -> vector<64x512xf32>
    %c5_178 = arith.constant 5 : index
    %c0_179 = arith.constant 0 : index
    %c0_180 = arith.constant 0 : index
    %206 = vector.load %arg1[%c5_178, %c0_179, %c0_180] : memref<9x1x512xf32, #tpu.memory_space<vmem>>, vector<1x1x512xf32>
    %207 = vector.shape_cast %206 : vector<1x1x512xf32> to vector<1x512xf32>
    %208 = vector.broadcast %207 : vector<1x512xf32> to vector<64x512xf32>
    %209 = arith.mulf %205, %208 : vector<64x512xf32>
    %c320_181 = arith.constant 320 : index
    %c0_182 = arith.constant 0 : index
    %210 = vector.load %arg12[%c320_181, %c0_182] : memref<576x512xf32, #tpu.memory_space<vmem>>, vector<64x512xf32>
    tpu.vector_store %arg12[%c320_181, %c0_182], %209 {strides = array<i32>} : memref<576x512xf32, #tpu.memory_space<vmem>>, vector<64x512xf32>,
    %c0_183 = arith.constant 0 : index
    %c0_184 = arith.constant 0 : index
    %211 = vector.load %arg14[%c0_183, %c0_184] : memref<64x512xf32, #tpu.memory_space<vmem>>, vector<64x512xf32>
    %c497_i32_185 = arith.constant 497 : i32
    %212 = tpu.dynamic_rotate %211 by %c497_i32_185 dim 1 : vector<64x512xf32>, i32 -> vector<64x512xf32>
    %c6_186 = arith.constant 6 : index
    %c0_187 = arith.constant 0 : index
    %c0_188 = arith.constant 0 : index
    %213 = vector.load %arg1[%c6_186, %c0_187, %c0_188] : memref<9x1x512xf32, #tpu.memory_space<vmem>>, vector<1x1x512xf32>
    %214 = vector.shape_cast %213 : vector<1x1x512xf32> to vector<1x512xf32>
    %215 = vector.broadcast %214 : vector<1x512xf32> to vector<64x512xf32>
    %216 = arith.mulf %212, %215 : vector<64x512xf32>
    %c384_189 = arith.constant 384 : index
    %c0_190 = arith.constant 0 : index
    %217 = vector.load %arg12[%c384_189, %c0_190] : memref<576x512xf32, #tpu.memory_space<vmem>>, vector<64x512xf32>
    tpu.vector_store %arg12[%c384_189, %c0_190], %216 {strides = array<i32>} : memref<576x512xf32, #tpu.memory_space<vmem>>, vector<64x512xf32>,
    %c0_191 = arith.constant 0 : index
    %c0_192 = arith.constant 0 : index
    %218 = vector.load %arg14[%c0_191, %c0_192] : memref<64x512xf32, #tpu.memory_space<vmem>>, vector<64x512xf32>
    %c496_i32_193 = arith.constant 496 : i32
    %219 = tpu.dynamic_rotate %218 by %c496_i32_193 dim 1 : vector<64x512xf32>, i32 -> vector<64x512xf32>
    %c7_194 = arith.constant 7 : index
    %c0_195 = arith.constant 0 : index
    %c0_196 = arith.constant 0 : index
    %220 = vector.load %arg1[%c7_194, %c0_195, %c0_196] : memref<9x1x512xf32, #tpu.memory_space<vmem>>, vector<1x1x512xf32>
    %221 = vector.shape_cast %220 : vector<1x1x512xf32> to vector<1x512xf32>
    %222 = vector.broadcast %221 : vector<1x512xf32> to vector<64x512xf32>
    %223 = arith.mulf %219, %222 : vector<64x512xf32>
    %c448_197 = arith.constant 448 : index
    %c0_198 = arith.constant 0 : index
    %224 = vector.load %arg12[%c448_197, %c0_198] : memref<576x512xf32, #tpu.memory_space<vmem>>, vector<64x512xf32>
    tpu.vector_store %arg12[%c448_197, %c0_198], %223 {strides = array<i32>} : memref<576x512xf32, #tpu.memory_space<vmem>>, vector<64x512xf32>,
    %c0_199 = arith.constant 0 : index
    %c0_200 = arith.constant 0 : index
    %225 = vector.load %arg14[%c0_199, %c0_200] : memref<64x512xf32, #tpu.memory_space<vmem>>, vector<64x512xf32>
    %c495_i32_201 = arith.constant 495 : i32
    %226 = tpu.dynamic_rotate %225 by %c495_i32_201 dim 1 : vector<64x512xf32>, i32 -> vector<64x512xf32>
    %c8_202 = arith.constant 8 : index
    %c0_203 = arith.constant 0 : index
    %c0_204 = arith.constant 0 : index
    %227 = vector.load %arg1[%c8_202, %c0_203, %c0_204] : memref<9x1x512xf32, #tpu.memory_space<vmem>>, vector<1x1x512xf32>
    %228 = vector.shape_cast %227 : vector<1x1x512xf32> to vector<1x512xf32>
    %229 = vector.broadcast %228 : vector<1x512xf32> to vector<64x512xf32>
    %230 = arith.mulf %226, %229 : vector<64x512xf32>
    %c512_205 = arith.constant 512 : index
    %c0_206 = arith.constant 0 : index
    %231 = vector.load %arg12[%c512_205, %c0_206] : memref<576x512xf32, #tpu.memory_space<vmem>>, vector<64x512xf32>
    tpu.vector_store %arg12[%c512_205, %c0_206], %230 {strides = array<i32>} : memref<576x512xf32, #tpu.memory_space<vmem>>, vector<64x512xf32>,
    %c0_207 = arith.constant 0 : index
    %c0_208 = arith.constant 0 : index
    %232 = vector.load %arg8[%c0_207, %c0_208] : memref<64x576xf32, #tpu.memory_space<vmem>>, vector<64x576xf32>
    %c0_209 = arith.constant 0 : index
    %c0_210 = arith.constant 0 : index
    %233 = vector.load %arg12[%c0_209, %c0_210] : memref<576x512xf32, #tpu.memory_space<vmem>>, vector<576x512xf32>
    %cst_211 = arith.constant dense<0.000000e+00> : vector<64x512xf32>
    %234 = tpu.matmul %232, %233, %cst_211 {dimension_numbers = #tpu.dot_dimension_numbers<[1], [0], [0], [1], [0, 0, 1, 1], [], []>} : vector<64x576xf32>, vector<576x512xf32>, vector<64x512xf32> -> vector<64x512xf32>
    %cst_212 = arith.constant dense<0.000000e+00> : vector<64xf32>
    %235 = vector.multi_reduction <add>, %234, %cst_212 [1] : vector<64x512xf32> to vector<64xf32>
    %236 = vector.shape_cast %235 : vector<64xf32> to vector<64x1xf32>
    %cst_213 = arith.constant 0.001953125 : f32
    %237 = vector.broadcast %cst_213 : f32 to vector<64x1xf32>
    %238 = arith.mulf %236, %237 : vector<64x1xf32>
    %239 = arith.mulf %234, %234 : vector<64x512xf32>
    %cst_214 = arith.constant dense<0.000000e+00> : vector<64xf32>
    %240 = vector.multi_reduction <add>, %239, %cst_214 [1] : vector<64x512xf32> to vector<64xf32>
    %241 = vector.shape_cast %240 : vector<64xf32> to vector<64x1xf32>
    %cst_215 = arith.constant 0.001953125 : f32
    %242 = vector.broadcast %cst_215 : f32 to vector<64x1xf32>
    %243 = arith.mulf %241, %242 : vector<64x1xf32>
    %244 = arith.mulf %238, %238 : vector<64x1xf32>
    %245 = arith.subf %243, %244 : vector<64x1xf32>
    %c0_216 = arith.constant 0 : index
    %c0_217 = arith.constant 0 : index
    %246 = vector.load %arg9[%c0_216, %c0_217] : memref<64x1xf32, #tpu.memory_space<vmem>>, vector<64x1xf32>
    %cst_218 = arith.constant 9.99999974E-6 : f32
    %247 = vector.broadcast %cst_218 : f32 to vector<64x1xf32>
    %248 = arith.addf %245, %247 : vector<64x1xf32>
    %249 = math.rsqrt %248 : vector<64x1xf32>
    %250 = arith.mulf %246, %249 : vector<64x1xf32>
    %c0_219 = arith.constant 0 : index
    %c0_220 = arith.constant 0 : index
    %251 = vector.load %arg10[%c0_219, %c0_220] : memref<64x1xf32, #tpu.memory_space<vmem>>, vector<64x1xf32>
    %252 = arith.mulf %238, %250 : vector<64x1xf32>
    %253 = arith.subf %251, %252 : vector<64x1xf32>
    %254 = vector.broadcast %250 : vector<64x1xf32> to vector<64x512xf32>
    %255 = arith.mulf %234, %254 : vector<64x512xf32>
    %256 = vector.broadcast %253 : vector<64x1xf32> to vector<64x512xf32>
    %257 = arith.addf %255, %256 : vector<64x512xf32>
    %c0_221 = arith.constant 0 : index
    %c0_222 = arith.constant 0 : index
    %258 = vector.load %arg13[%c0_221, %c0_222] : memref<64x512xf32, #tpu.memory_space<vmem>>, vector<64x512xf32>
    %259 = arith.addf %257, %258 : vector<64x512xf32>
    %cst_223 = arith.constant 0.000000e+00 : f32
    %260 = vector.broadcast %cst_223 : f32 to vector<64x512xf32>
    %261 = arith.maximumf %259, %260 : vector<64x512xf32>
    %c0_224 = arith.constant 0 : index
    %c0_225 = arith.constant 0 : index
    %262 = vector.load %arg13[%c0_224, %c0_225] : memref<64x512xf32, #tpu.memory_space<vmem>>, vector<64x512xf32>
    tpu.vector_store %arg13[%c0_224, %c0_225], %261 {strides = array<i32>} : memref<64x512xf32, #tpu.memory_space<vmem>>, vector<64x512xf32>,
    %c0_226 = arith.constant 0 : index
    %c0_227 = arith.constant 0 : index
    %263 = vector.load %arg13[%c0_226, %c0_227] : memref<64x512xf32, #tpu.memory_space<vmem>>, vector<64x512xf32>
    %264 = vector.extract_strided_slice %263 {offsets = [0, 0], sizes = [64, 256], strides = [1, 1]} : vector<64x512xf32> to vector<64x256xf32>
    %c0_228 = arith.constant 0 : index
    %c0_229 = arith.constant 0 : index
    %c0_230 = arith.constant 0 : index
    %265 = vector.load %arg11[%c0_228, %c0_229, %c0_230] : memref<2x64x256xf32, #tpu.memory_space<vmem>>, vector<1x64x256xf32>
    %266 = vector.shape_cast %265 : vector<1x64x256xf32> to vector<64x256xf32>
    %267 = vector.shape_cast %264 : vector<64x256xf32> to vector<1x64x256xf32>
    tpu.vector_store %arg11[%c0_228, %c0_229, %c0_230], %267 {strides = array<i32>} : memref<2x64x256xf32, #tpu.memory_space<vmem>>, vector<1x64x256xf32>,
    %268 = vector.extract_strided_slice %263 {offsets = [0, 256], sizes = [64, 256], strides = [1, 1]} : vector<64x512xf32> to vector<64x256xf32>
    %c1_231 = arith.constant 1 : index
    %c0_232 = arith.constant 0 : index
    %c0_233 = arith.constant 0 : index
    %269 = vector.load %arg11[%c1_231, %c0_232, %c0_233] : memref<2x64x256xf32, #tpu.memory_space<vmem>>, vector<1x64x256xf32>
    %270 = vector.shape_cast %269 : vector<1x64x256xf32> to vector<64x256xf32>
    %271 = vector.shape_cast %268 : vector<64x256xf32> to vector<1x64x256xf32>
    tpu.vector_store %arg11[%c1_231, %c0_232, %c0_233], %271 {strides = array<i32>} : memref<2x64x256xf32, #tpu.memory_space<vmem>>, vector<1x64x256xf32>,
    return
  }
}

</mosaic_0001>

<bundles_post_ra>
// kernel: representation_network_forward.1
= control target key start
LH: loop header
LB: loop body
LE: loop exit
PB: predicated region body
PF: predicated region fallthrough
CT: control target
= control target key end

     0   :  { %16 = vsyncpa [#allocation6], 0  ;;  %s7908_s17 = smov [#allocation5]   ;;  %s15210_s0 = inlined_call_operand.vmem [shape: f32[8,512], index: 0, kind: input, shape index: {}]   ;;  %s15211_s1 = inlined_call_operand.vmem [shape: f32[9,1,512], index: 1, kind: input, shape index: {}]   ;;  %s15212_s2 = inlined_call_operand.vmem [shape: f32[64,72], index: 2, kind: input, shape index: {}]   ;;  %s15213_s3 = inlined_call_operand.vmem [shape: f32[64,1], index: 3, kind: input, shape index: {}]   ;;  %s15214_s4 = inlined_call_operand.vmem [shape: f32[64,1], index: 4, kind: input, shape index: {}]   ;;  %s15215_s5 = inlined_call_operand.vmem [shape: f32[64,576], index: 5, kind: input, shape index: {}]   ;;  %s15216_s6 = inlined_call_operand.vmem [shape: f32[64,1], index: 6, kind: input, shape index: {}]   ;;  %s15217_s7 = inlined_call_operand.vmem [shape: f32[64,1], index: 7, kind: input, shape index: {}]   ;;  %s15218_s8 = inlined_call_operand.hbm [shape: f32[64,576], index: 8, kind: input, shape index: {}]   ;;  %s15219_s9 = inlined_call_operand.vmem [shape: f32[64,1], index: 9, kind: input, shape index: {}]   ;;  %s15220_s10 = inlined_call_operand.vmem [shape: f32[64,1], index: 10, kind: input, shape index: {}]   ;;  %s15221_s11 = inlined_call_operand.vmem [shape: f32[2,64,256], index: 11, kind: output, shape index: {}]  }
   0x1   :  { %s38_s18 = sshll.u32 %s7908_s17, 4  ;;  %s39_s18 = int_to_ptr.vmem [resolvable:$true] %s38_s18 }
   0x2   :  { %s7894_s19 = scalar_lea.vmem %s39_s18, 5120  ;;  %p7899_p1 = scmp.lt.s32.totalorder %s39_s18, %s39_s18 }
   0x3   :  { %p7895_p0 = scmp.ne.s32.totalorder %s39_s18, %s7894_s19  ;;  %p7900_p2 = scmp.lt.s32.totalorder %s7894_s19, %s7894_s19 }
   0x5   :  { %p7901_p3 = por %p7900_p2, %p7899_p1 }
   0x7   :  { %p7902_p4 = pnand %p7901_p3, %p7895_p0 }
   0x9   :  { %7905 = shalt.err (!%p7902_p4)
}
   0xa   :  { %s7909_s20 = smov 640   ;;  %s7910_s21 = smov 40  }
   0xb   :  { %44 = dma.hbm_to_vmem [thread:$0]  %s15218_s8, 5120, %s39_s18, [#allocation6], %s7909_s20, %s7909_s20, %s7910_s21  }
   0xc   :  { %7906 = dma.done.wait [#allocation6], 5120  }
   0xd   :  { %7907 = vsyncadd [#allocation6], 4294962176  ;;  %v7987_v0 = vld [vmem:[%s15210_s0 + $0x8] sm:$0xff]  ;;  %v7992_v1 = vld [vmem:[%s15210_s0] sm:$0xff]  ;;  %s7911_s28 = smov 111   ;;  %s7912_s30 = smov 112   ;;  %v64_v5 = vlaneseq }
   0xe   :  { %403 = vrot.lane.b32.xlu0 %v7987_v0, %s7911_s28  ;;  %401 = vrot.lane.b32.xlu1 %v7992_v1, %s7911_s28  ;;  %v8001_v2 = vld [vmem:[%s15210_s0 + $0x10] sm:$0xff]  ;;  %s7913_s12 = smov 113   ;;  %v8018_v3 = vld [vmem:[%s15210_s0 + $0x18] sm:$0xff]  ;;  %s7914_s15 = smov 127   ;;  %v15222_v4 = vmov 0.0   ;;  %vm489_vm8 = vcmask 588800  }
   0xf   :  { %s7915_s0 = smov 1   ;;  %s7916_s16 = smov 15   ;;  %578 = vmatprep.mubr.f32.mxu0 %v15222_v4  ;;  %691 = vmatprep.mubr.f32.mxu1 %v15222_v4  ;;  %v74_v6 = vshrl.u32 %v64_v5, 7  ;;  %v8070_v7 = vand.u32 127, %v64_v5  ;;  %v7717_v12 = vld [vmem:[%s15211_s1 + $0x20] sm:$0xf] }
  0x10   :  { %s7917_s17 = smov 16   ;;  %s7919_s18 = smov 17   ;;  %v8085_v15 = vld [vmem:[%s15211_s1 + $0x1c] sm:$0xf]  ;;  %v8099_v24 = vld [vmem:[%s15211_s1 + $0x18] sm:$0xf] }
  0x11   :  { %15730 = vst [vmem:[#allocation8_spill] sm:$0xff] %v8070_v7  ;;  %v8072_v8 = vsub.s32 1, %v74_v6  ;;  %v8074_v9 = vsub.s32 0, %v74_v6  ;;  %vm409_vm0 = vcmp.lt.s32.totalorder %v8070_v7, 111  ;;  %vm361_vm1 = vcmp.lt.s32.totalorder %v8070_v7, 112 }
  0x12   :  { %405 = vrot.lane.b32.xlu0 %v8001_v2, %s7911_s28  ;;  %355 = vrot.lane.b32.xlu1 %v7987_v0, %s7912_s30  ;;  %vm313_vm2 = vcmp.lt.s32.totalorder %v8070_v7, 113  ;;  %v8106_v29 = vsub.s32 3, %v74_v6  ;;  %v8110_v33 = vsub.s32 2, %v74_v6  ;;  %v7714_v41 = vld [vmem:[%s15211_s1 + $0x14] sm:$0xf]  ;;  %vm265_vm3 = vcmp.lt.s32.totalorder %v8070_v7, 127 }
  0x13   :  { %15731 = vst [vmem:[#allocation9_spill] sm:$0xff] %v8072_v8  ;;  %15732 = vst [vmem:[#allocation10_spill] sm:$0xff] %v8074_v9  ;;  %v424_v13 = vrot.slane %v7717_v12, %v8072_v8  ;;  %v420_v14 = vrot.slane %v7717_v12, %v8074_v9  ;;  %v376_v21 = vrot.slane %v8085_v15, %v8072_v8  ;;  %vm209_vm4 = vcmp.lt.s32.totalorder %v8070_v7, 1 }
  0x14   :  { %v372_v22 = vrot.slane %v8085_v15, %v8074_v9  ;;  %15733 = vst [vmem:[#allocation11_spill] sm:$0xff] %v8106_v29  ;;  %v328_v32 = vrot.slane %v8099_v24, %v8072_v8  ;;  %15734 = vst [vmem:[#allocation12_spill] sm:$0xff] %v8110_v33  ;;  %v324_v38 = vrot.slane %v8099_v24, %v8074_v9  ;;  %vm161_vm5 = vcmp.lt.s32.totalorder %v8070_v7, 15 }
  0x15   :  { %v432_v39 = vrot.slane %v7717_v12, %v8106_v29  ;;  %v428_v40 = vrot.slane %v7717_v12, %v8110_v33  ;;  %v280_v50 = vrot.slane %v7714_v41, %v8072_v8  ;;  %v384_v55 = vrot.slane %v8085_v15, %v8106_v29  ;;  %v8149_v12 = vld [vmem:[%s15211_s1 + $0xc] sm:$0xf] }
  0x16   :  { %357 = vrot.lane.b32.xlu0 %v8001_v2, %s7912_s30  ;;  %353 = vrot.lane.b32.xlu1 %v7992_v1, %s7912_s30  ;;  %v276_v56 = vrot.slane %v7714_v41, %v8074_v9  ;;  %v380_v57 = vrot.slane %v8085_v15, %v8110_v33  ;;  %v336_v63 = vrot.slane %v8099_v24, %v8106_v29  ;;  %vm113_vm6 = vcmp.lt.s32.totalorder %v8070_v7, 16 }
  0x17   :  { %vm66_vm7 = vcmp.lt.s32.totalorder %v8070_v7, 17  ;;  %vm3252_vm9 = vcmask 523264  }
  0x1a   :  { %309 = vrot.lane.b32.xlu1 %v8001_v2, %s7913_s12  ;;  %307 = vrot.lane.b32.xlu0 %v7987_v0, %s7913_s12 }
  0x1e   :  { %407 = vrot.lane.b32.xlu0 %v8018_v3, %s7911_s28  ;;  %305 = vrot.lane.b32.xlu1 %v7992_v1, %s7913_s12 }
  0x22   :  { %261 = vrot.lane.b32.xlu1 %v8001_v2, %s7914_s15  ;;  %259 = vrot.lane.b32.xlu0 %v7987_v0, %s7914_s15 }
  0x26   :  { %359 = vrot.lane.b32.xlu0 %v8018_v3, %s7912_s30  ;;  %257 = vrot.lane.b32.xlu1 %v7992_v1, %s7914_s15 }
  0x2a   :  { %311 = vrot.lane.b32.xlu0 %v8018_v3, %s7913_s12  ;;  %201 = vrot.lane.b32.xlu1 %v7992_v1, %s7915_s0 }
  0x2e   :  { %203 = vrot.lane.b32.xlu0 %v7987_v0, %s7915_s0  ;;  %263 = vrot.lane.b32.xlu1 %v8018_v3, %s7914_s15 }
  0x32   :  { %207 = vrot.lane.b32.xlu0 %v8018_v3, %s7915_s0  ;;  %153 = vrot.lane.b32.xlu1 %v7992_v1, %s7916_s16 }
  0x36   :  { %155 = vrot.lane.b32.xlu0 %v7987_v0, %s7916_s16  ;;  %159 = vrot.lane.b32.xlu1 %v8018_v3, %s7916_s16 }
  0x3a   :  { %107 = vrot.lane.b32.xlu1 %v7987_v0, %s7917_s17  ;;  %105 = vrot.lane.b32.xlu0 %v7992_v1, %s7917_s17 }
  0x3e   :  { %111 = vrot.lane.b32.xlu1 %v8018_v3, %s7917_s17  ;;  %205 = vrot.lane.b32.xlu0 %v8001_v2, %s7915_s0 }
  0x42   :  { %58 = vrot.lane.b32.xlu1 %v7987_v0, %s7919_s18  ;;  %56 = vrot.lane.b32.xlu0 %v7992_v1, %s7919_s18 }
  0x46   :  { %62 = vrot.lane.b32.xlu1 %v8018_v3, %s7919_s18  ;;  %157 = vrot.lane.b32.xlu0 %v8001_v2, %s7916_s16 }
  0x4a   :  { %60 = vrot.lane.b32.xlu1 %v8001_v2, %s7919_s18  ;;  %109 = vrot.lane.b32.xlu0 %v8001_v2, %s7917_s17 }
  0x80   :  { %v404_v10 = vpop.permute.xlu0 %403  ;;  %v402_v11 = vpop.permute.xlu1 %401 }
  0x81   :  { %v412_v18 = vsel %vm409_vm0, %v402_v11, %v404_v10 }
  0x82   :  { %v437_v23 = vmul.f32 %v420_v14, %v412_v18 }
  0x84   :  { %v406_v16 = vpop.permute.xlu0 %405  ;;  %v356_v17 = vpop.permute.xlu1 %355 }
  0x85   :  { %v411_v19 = vsel %vm409_vm0, %v404_v10, %v406_v16 }
  0x86   :  { %v438_v20 = vmul.f32 %v424_v13, %v411_v19 }
  0x88   :  { %528 = vmatprep.subr.mxu0 %v438_v20  ;;  %v358_v25 = vpop.permute.xlu0 %357  ;;  %v354_v26 = vpop.permute.xlu1 %353  ;;  %v288_v20 = vrot.slane %v7714_v41, %v8106_v29 }
  0x89   :  { %v363_v27 = vsel %vm361_vm1, %v356_v17, %v358_v25  ;;  %v364_v28 = vsel %vm361_vm1, %v354_v26, %v356_v17  ;;  %529 = vmatpush1.msra.mxu0 %v437_v23  ;;  %v224_v17 = vrot.slane %v8149_v12, %v8072_v8 }
  0x8a   :  { %v390_v30 = vmul.f32 %v376_v21, %v363_v27  ;;  %v389_v31 = vmul.f32 %v372_v22, %v364_v28  ;;  %v284_v21 = vrot.slane %v7714_v41, %v8110_v33  ;;  %v220_v28 = vrot.slane %v8149_v12, %v8074_v9 }
  0x8c   :  { %530 = vmatprep.subr.mxu0 %v390_v30  ;;  %v310_v34 = vpop.permute.xlu1 %309  ;;  %v308_v35 = vpop.permute.xlu0 %307  ;;  %v8173_v30 = vld [vmem:[%s15211_s1 + $0x8] sm:$0xf] }
  0x8d   :  { %v315_v36 = vsel %vm313_vm2, %v308_v35, %v310_v34  ;;  %531 = vmatpush1.msra.mxu0 %v389_v31 }
  0x8e   :  { %v342_v37 = vmul.f32 %v328_v32, %v315_v36  ;;  %v176_v36 = vrot.slane %v8173_v30, %v8072_v8 }
  0x90   :  { %532 = vmatprep.subr.mxu0 %v342_v37  ;;  %v408_v42 = vpop.permute.xlu0 %407  ;;  %v306_v43 = vpop.permute.xlu1 %305  ;;  %v172_v37 = vrot.slane %v8173_v30, %v8074_v9 }
  0x91   :  { %v316_v44 = vsel %vm313_vm2, %v306_v43, %v308_v35  ;;  %v413_v45 = vsel %vm409_vm0, %v408_v42, %v402_v11  ;;  %v410_v46 = vsel %vm409_vm0, %v406_v16, %v408_v42  ;;  %v332_v11 = vrot.slane %v8099_v24, %v8110_v33 }
  0x92   :  { %v341_v47 = vmul.f32 %v324_v38, %v316_v44  ;;  %v440_v48 = vmul.f32 %v432_v39, %v413_v45  ;;  %v439_v49 = vmul.f32 %v428_v40, %v410_v46  ;;  %v8186_v38 = vld [vmem:[%s15211_s1 + $0x4] sm:$0xf] }
  0x93   :  { %v128_v44 = vrot.slane %v8186_v38, %v8072_v8 }
  0x94   :  { %533 = vmatpush1.msra.mxu0 %v341_v47  ;;  %641 = vmatprep.subr.mxu1 %v440_v48  ;;  %v262_v51 = vpop.permute.xlu1 %261  ;;  %v260_v52 = vpop.permute.xlu0 %259  ;;  %v124_v48 = vrot.slane %v8186_v38, %v8074_v9 }
  0x95   :  { %v267_v53 = vsel %vm265_vm3, %v260_v52, %v262_v51  ;;  %642 = vmatpush1.msra.mxu1 %v439_v49  ;;  %v232_v49 = vrot.slane %v8149_v12, %v8106_v29 }
  0x96   :  { %v294_v54 = vmul.f32 %v280_v50, %v267_v53  ;;  %v228_v50 = vrot.slane %v8149_v12, %v8110_v33 }
  0x98   :  { %534 = vmatprep.subr.mxu0 %v294_v54  ;;  %v360_v58 = vpop.permute.xlu0 %359  ;;  %v258_v59 = vpop.permute.xlu1 %257 }
  0x99   :  { %v362_v60 = vsel %vm361_vm1, %v358_v25, %v360_v58  ;;  %v365_v61 = vsel %vm361_vm1, %v360_v58, %v354_v26  ;;  %v268_v62 = vsel %vm265_vm3, %v258_v59, %v260_v52 }
  0x9a   :  { %v392_v5 = vmul.f32 %v384_v55, %v365_v61  ;;  %v293_v6 = vmul.f32 %v276_v56, %v268_v62  ;;  %v391_v10 = vmul.f32 %v380_v57, %v362_v60 }
  0x9c   :  { %643 = vmatprep.subr.mxu1 %v392_v5  ;;  %v312_v13 = vpop.permute.xlu0 %311  ;;  %535 = vmatpush1.msra.mxu0 %v293_v6  ;;  %v202_v14 = vpop.permute.xlu1 %201 }
  0x9d   :  { %v314_v15 = vsel %vm313_vm2, %v310_v34, %v312_v13  ;;  %v317_v16 = vsel %vm313_vm2, %v312_v13, %v306_v43  ;;  %644 = vmatpush1.msra.mxu1 %v391_v10  ;;  %536 = vmatprep.subr.mxu0 %v7987_v0  ;;  %v184_v10 = vrot.slane %v8173_v30, %v8106_v29 }
  0x9e   :  { %v344_v18 = vmul.f32 %v336_v63, %v317_v16  ;;  %v343_v19 = vmul.f32 %v332_v11, %v314_v15  ;;  %537 = vmatpush1.msra.mxu0 %v7992_v1  ;;  %v180_v11 = vrot.slane %v8173_v30, %v8110_v33 }
  0xa0   :  { %645 = vmatprep.subr.mxu1 %v344_v18  ;;  %v204_v22 = vpop.permute.xlu0 %203  ;;  %v264_v23 = vpop.permute.xlu1 %263 }
  0xa1   :  { %v212_v24 = vsel %vm209_vm4, %v202_v14, %v204_v22  ;;  %v266_v0 = vsel %vm265_vm3, %v262_v51, %v264_v23  ;;  %v269_v25 = vsel %vm265_vm3, %v264_v23, %v258_v59  ;;  %646 = vmatpush1.msra.mxu1 %v343_v19  ;;  %v71_v51 = vld [vmem:[%s15211_s1] sm:$0xf] }
  0xa2   :  { %v238_v26 = vmul.f32 %v224_v17, %v212_v24  ;;  %v296_v27 = vmul.f32 %v288_v20, %v269_v25  ;;  %v295_v1 = vmul.f32 %v284_v21, %v266_v0  ;;  %v80_v60 = vrot.slane %v71_v51, %v8072_v8 }
  0xa3   :  { %v76_v6 = vrot.slane %v71_v51, %v8074_v9  ;;  %v136_v17 = vrot.slane %v8186_v38, %v8106_v29  ;;  %v132_v21 = vrot.slane %v8186_v38, %v8110_v33  ;;  %v88_v0 = vrot.slane %v71_v51, %v8106_v29  ;;  %v449_v38 = vld [vmem:[%s15212_s2 + $0x20] sm:$0xff] }
  0xa4   :  { %v208_v31 = vpop.permute.xlu0 %207  ;;  %538 = vmatprep.subr.mxu0 %v238_v26  ;;  %647 = vmatprep.subr.mxu1 %v296_v27  ;;  %v154_v32 = vpop.permute.xlu1 %153 }
  0xa5   :  { %v213_v34 = vsel %vm209_vm4, %v208_v31, %v202_v14  ;;  %648 = vmatpush1.msra.mxu1 %v295_v1  ;;  %v84_v1 = vrot.slane %v71_v51, %v8110_v33 }
  0xa6   :  { %v237_v35 = vmul.f32 %v220_v28, %v213_v34  ;;  %649 = vmatprep.subr.mxu1 %v8018_v3 }
  0xa7   :  { %650 = vmatpush1.msra.mxu1 %v8001_v2 }
  0xa8   :  { %539 = vmatpush1.msra.mxu0 %v237_v35  ;;  %v156_v39 = vpop.permute.xlu0 %155  ;;  %v160_v40 = vpop.permute.xlu1 %159 }
  0xa9   :  { %v164_v41 = vsel %vm161_vm5, %v154_v32, %v156_v39  ;;  %v165_v42 = vsel %vm161_vm5, %v160_v40, %v154_v32  ;;  %v446_v32 = vld [vmem:[%s15212_s2 + $0x8] sm:$0xff] }
  0xaa   :  { %v190_v43 = vmul.f32 %v176_v36, %v164_v41  ;;  %v189_v3 = vmul.f32 %v172_v37, %v165_v42  ;;  %v447_v36 = vld [vmem:[%s15212_s2 + $0x10] sm:$0xff]  ;;  %v448_v37 = vld [vmem:[%s15212_s2 + $0x18] sm:$0xff] }
  0xab   :  { %v452_v41 = vld [vmem:[%s15212_s2 + $0x38] sm:$0xff] }
  0xac   :  { %540 = vmatprep.subr.mxu0 %v190_v43  ;;  %v108_v45 = vpop.permute.xlu1 %107  ;;  %v106_v46 = vpop.permute.xlu0 %105 }
  0xad   :  { %v116_v2 = vsel %vm113_vm6, %v106_v46, %v108_v45  ;;  %541 = vmatpush1.msra.mxu0 %v189_v3 }
  0xae   :  { %v142_v47 = vmul.f32 %v128_v44, %v116_v2 }
  0xb0   :  { %v112_v52 = vpop.permute.xlu1 %111  ;;  %542 = vmatprep.subr.mxu0 %v142_v47  ;;  %v206_v53 = vpop.permute.xlu0 %205 }
  0xb1   :  { %v117_v54 = vsel %vm113_vm6, %v112_v52, %v106_v46  ;;  %v210_v55 = vsel %vm209_vm4, %v206_v53, %v208_v31  ;;  %v211_v56 = vsel %vm209_vm4, %v204_v22, %v206_v53  ;;  %v445_v22 = vld [vmem:[%s15212_s2] sm:$0xff] }
  0xb2   :  { %v141_v57 = vmul.f32 %v124_v48, %v117_v54  ;;  %v240_v58 = vmul.f32 %v232_v49, %v210_v55  ;;  %v239_v59 = vmul.f32 %v228_v50, %v211_v56 }
  0xb4   :  { %543 = vmatpush1.msra.mxu0 %v141_v57  ;;  %651 = vmatprep.subr.mxu1 %v240_v58  ;;  %v59_v61 = vpop.permute.xlu1 %58  ;;  %v57_v62 = vpop.permute.xlu0 %56 }
  0xb5   :  { %v69_v63 = vsel %vm66_vm7, %v57_v62, %v59_v61  ;;  %652 = vmatpush1.msra.mxu1 %v239_v59 }
  0xb6   :  { %v94_v5 = vmul.f32 %v80_v60, %v69_v63 }
  0xb8   :  { %v63_v12 = vpop.permute.xlu1 %62  ;;  %544 = vmatprep.subr.mxu0 %v94_v5  ;;  %v158_v13 = vpop.permute.xlu0 %157 }
  0xb9   :  { %v70_v14 = vsel %vm66_vm7, %v63_v12, %v57_v62  ;;  %v162_v15 = vsel %vm161_vm5, %v158_v13, %v160_v40  ;;  %v163_v16 = vsel %vm161_vm5, %v156_v39, %v158_v13  ;;  %v450_v39 = vld [vmem:[%s15212_s2 + $0x28] sm:$0xff]  ;;  %v451_v40 = vld [vmem:[%s15212_s2 + $0x30] sm:$0xff] }
  0xba   :  { %v93_v18 = vmul.f32 %v76_v6, %v70_v14  ;;  %v192_v19 = vmul.f32 %v184_v10, %v162_v15  ;;  %v191_v20 = vmul.f32 %v180_v11, %v163_v16 }
  0xbc   :  { %v61_v23 = vpop.permute.xlu1 %60  ;;  %545 = vmatpush1.msra.mxu0 %v93_v18  ;;  %653 = vmatprep.subr.mxu1 %v192_v19  ;;  %v110_v24 = vpop.permute.xlu0 %109 }
  0xbd   :  { %v67_v25 = vsel %vm66_vm7, %v61_v23, %v63_v12  ;;  %v114_v26 = vsel %vm113_vm6, %v110_v24, %v112_v52  ;;  %v115_v27 = vsel %vm113_vm6, %v108_v45, %v110_v24  ;;  %654 = vmatpush1.msra.mxu1 %v191_v20  ;;  %v68_v28 = vsel %vm66_vm7, %v59_v61, %v61_v23 }
  0xbe   :  { %7718 = vmatmul.mubr.msk.f32.vlgmr.msra.gmra.mxu0 %vm489_vm8, %v445_v22  ;;  %v144_v30 = vmul.f32 %v136_v17, %v114_v26  ;;  %v143_v31 = vmul.f32 %v132_v21, %v115_v27  ;;  %v96_v34 = vmul.f32 %v88_v0, %v67_v25  ;;  %v95_v35 = vmul.f32 %v84_v1, %v68_v28 }
  0xbf   :  { %584 = vmatprep.mubr.f32.mxu0 %v15222_v4 }
  0xc0   :  { %655 = vmatprep.subr.mxu1 %v144_v30 }
  0xc1   :  { %656 = vmatpush1.msra.mxu1 %v143_v31 }
  0xc2   :  { %657 = vmatprep.subr.mxu1 %v96_v34  ;;  %7719 = vmatmul.mubr.msk.f32.gmra.mxu0 %vm489_vm8, %v446_v32 }
  0xc3   :  { %658 = vmatpush1.msra.mxu1 %v95_v35  ;;  %590 = vmatprep.mubr.f32.mxu0 %v15222_v4 }
  0xc4   :  { %7726 = vmatmul.mubr.msk.f32.vlgmr.msra.gmra.mxu1 %vm489_vm8, %v445_v22 }
  0xc5   :  { %697 = vmatprep.mubr.f32.mxu1 %v15222_v4 }
  0xc6   :  { %7720 = vmatmul.mubr.msk.f32.gmra.mxu0 %vm489_vm8, %v447_v36 }
  0xc7   :  { %596 = vmatprep.mubr.f32.mxu0 %v15222_v4 }
  0xc8   :  { %7727 = vmatmul.mubr.msk.f32.gmra.mxu1 %vm489_vm8, %v446_v32 }
  0xc9   :  { %703 = vmatprep.mubr.f32.mxu1 %v15222_v4 }
  0xca   :  { %7721 = vmatmul.mubr.msk.f32.gmra.mxu0 %vm489_vm8, %v448_v37 }
  0xcb   :  { %602 = vmatprep.mubr.f32.mxu0 %v15222_v4 }
  0xcc   :  { %7728 = vmatmul.mubr.msk.f32.gmra.mxu1 %vm489_vm8, %v447_v36 }
  0xcd   :  { %709 = vmatprep.mubr.f32.mxu1 %v15222_v4 }
  0xce   :  { %7722 = vmatmul.mubr.msk.f32.gmra.mxu0 %vm489_vm8, %v449_v38 }
  0xcf   :  { %608 = vmatprep.mubr.f32.mxu0 %v15222_v4 }
  0xd0   :  { %7729 = vmatmul.mubr.msk.f32.gmra.mxu1 %vm489_vm8, %v448_v37 }
  0xd1   :  { %715 = vmatprep.mubr.f32.mxu1 %v15222_v4 }
  0xd2   :  { %7723 = vmatmul.mubr.msk.f32.gmra.mxu0 %vm489_vm8, %v450_v39 }
  0xd3   :  { %614 = vmatprep.mubr.f32.mxu0 %v15222_v4 }
  0xd4   :  { %7730 = vmatmul.mubr.msk.f32.gmra.mxu1 %vm489_vm8, %v449_v38 }
  0xd5   :  { %721 = vmatprep.mubr.f32.mxu1 %v15222_v4 }
  0xd6   :  { %7724 = vmatmul.mubr.msk.f32.gmra.mxu0 %vm489_vm8, %v451_v40 }
  0xd7   :  { %620 = vmatprep.mubr.f32.mxu0 %v15222_v4 }
  0xd8   :  { %7731 = vmatmul.mubr.msk.f32.gmra.mxu1 %vm489_vm8, %v450_v39 }
  0xd9   :  { %727 = vmatprep.mubr.f32.mxu1 %v15222_v4 }
  0xda   :  { %7725 = vmatmul.mubr.msk.f32.gmra.mxu0 %vm489_vm8, %v452_v41 }
  0xdc   :  { %7732 = vmatmul.mubr.msk.f32.gmra.mxu1 %vm489_vm8, %v451_v40 }
  0xdd   :  { %733 = vmatprep.mubr.f32.mxu1 %v15222_v4 }
  0xe0   :  { %7733 = vmatmul.mubr.msk.f32.gmra.mxu1 %vm489_vm8, %v452_v41 }
 0x17e   :  { %v8296_v42 = vpop.f32.mrf.mxu0 }
 0x17f   :  { %v788_v43 = vmul.f32 %v8296_v42, %v8296_v42 }
 0x180   :  { %v8300_v3 = vpop.f32.mrf.mxu0 }
 0x181   :  { %v789_v44 = vmul.f32 %v8300_v3, %v8300_v3  ;;  %v740_v46 = vadd.f32 %v8300_v3, %v8296_v42 }
 0x182   :  { %v8304_v45 = vpop.f32.mrf.mxu0 }
 0x183   :  { %v792_v2 = vmul.f32 %v8304_v45, %v8304_v45  ;;  %v820_v49 = vadd.f32 %v789_v44, %v788_v43 }
 0x184   :  { %v8310_v47 = vpop.f32.mrf.mxu1  ;;  %v8312_v48 = vpop.f32.mrf.mxu0 }
 0x185   :  { %v790_v50 = vmul.f32 %v8310_v47, %v8310_v47  ;;  %v745_v51 = vadd.f32 %v8312_v48, %v8304_v45  ;;  %v793_v52 = vmul.f32 %v8312_v48, %v8312_v48  ;;  %v741_v53 = vadd.f32 %v740_v46, %v8310_v47 }
 0x186   :  { %v8321_v54 = vpop.f32.mrf.mxu1  ;;  %v8323_v55 = vpop.f32.mrf.mxu0 }
 0x187   :  { %v742_v56 = vadd.f32 %v741_v53, %v8321_v54  ;;  %v791_v57 = vmul.f32 %v8321_v54, %v8321_v54  ;;  %v821_v58 = vadd.f32 %v820_v49, %v790_v50  ;;  %v796_v60 = vmul.f32 %v8323_v55, %v8323_v55 }
 0x188   :  { %v8328_v59 = vpop.f32.mrf.mxu1  ;;  %v8332_v61 = vpop.f32.mrf.mxu0  ;;  %v825_v62 = vadd.f32 %v793_v52, %v792_v2 }
 0x189   :  { %v794_v63 = vmul.f32 %v8328_v59, %v8328_v59  ;;  %743 = vadd.xlane.f32.xlu0 %v742_v56  ;;  %v746_v5 = vadd.f32 %v745_v51, %v8328_v59  ;;  %v750_v6 = vadd.f32 %v8332_v61, %v8323_v55  ;;  %v797_v11 = vmul.f32 %v8332_v61, %v8332_v61 }
 0x18a   :  { %v8339_v10 = vpop.f32.mrf.mxu1  ;;  %v8343_v12 = vpop.f32.mrf.mxu0  ;;  %v822_v13 = vadd.f32 %v821_v58, %v791_v57 }
 0x18b   :  { %v747_v14 = vadd.f32 %v746_v5, %v8339_v10  ;;  %v795_v15 = vmul.f32 %v8339_v10, %v8339_v10  ;;  %v826_v16 = vadd.f32 %v825_v62, %v794_v63  ;;  %v800_v18 = vmul.f32 %v8343_v12, %v8343_v12 }
 0x18c   :  { %v8348_v17 = vpop.f32.mrf.mxu1  ;;  %v8352_v19 = vpop.f32.mrf.mxu0  ;;  %v830_v20 = vadd.f32 %v797_v11, %v796_v60 }
 0x18d   :  { %823 = vadd.xlane.f32.xlu0 %v822_v13  ;;  %748 = vadd.xlane.f32.xlu1 %v747_v14  ;;  %v798_v21 = vmul.f32 %v8348_v17, %v8348_v17  ;;  %v827_v22 = vadd.f32 %v826_v16, %v795_v15  ;;  %v751_v23 = vadd.f32 %v750_v6, %v8348_v17 }
 0x18e   :  { %v8357_v24 = vpop.f32.mrf.mxu1  ;;  %v755_v0 = vadd.f32 %v8352_v19, %v8343_v12  ;;  %v801_v25 = vmul.f32 %v8352_v19, %v8352_v19  ;;  %v8363_v26 = vpop.f32.mrf.mxu0 }
 0x18f   :  { %v799_v27 = vmul.f32 %v8357_v24, %v8357_v24  ;;  %v831_v1 = vadd.f32 %v830_v20, %v798_v21  ;;  %v804_v28 = vmul.f32 %v8363_v26, %v8363_v26  ;;  %v752_v34 = vadd.f32 %v751_v23, %v8357_v24 }
 0x190   :  { %v8369_v30 = vpop.f32.mrf.mxu1  ;;  %v8371_v31 = vpop.f32.mrf.mxu0  ;;  %v835_v32 = vadd.f32 %v801_v25, %v800_v18 }
 0x191   :  { %828 = vadd.xlane.f32.xlu1 %v827_v22  ;;  %v832_v35 = vadd.f32 %v831_v1, %v799_v27  ;;  %v802_v36 = vmul.f32 %v8369_v30, %v8369_v30  ;;  %v805_v37 = vmul.f32 %v8371_v31, %v8371_v31  ;;  %v760_v38 = vadd.f32 %v8371_v31, %v8363_v26 }
 0x192   :  { %v8380_v39 = vpop.f32.mrf.mxu1  ;;  %v756_v40 = vadd.f32 %v755_v0, %v8369_v30  ;;  %v8383_v41 = vpop.f32.mrf.mxu0 }
 0x193   :  { %833 = vadd.xlane.f32.xlu0 %v832_v35  ;;  %v808_v43 = vmul.f32 %v8383_v41, %v8383_v41  ;;  %v803_v44 = vmul.f32 %v8380_v39, %v8380_v39  ;;  %v836_v46 = vadd.f32 %v835_v32, %v802_v36  ;;  %v840_v2 = vadd.f32 %v805_v37, %v804_v28 }
 0x194   :  { %v8389_v49 = vpop.f32.mrf.mxu1  ;;  %v8391_v50 = vpop.f32.mrf.mxu0  ;;  %v757_v52 = vadd.f32 %v756_v40, %v8380_v39 }
 0x195   :  { %753 = vadd.xlane.f32.xlu1 %v752_v34  ;;  %v806_v51 = vmul.f32 %v8389_v49, %v8389_v49  ;;  %v837_v53 = vadd.f32 %v836_v46, %v803_v44  ;;  %v809_v56 = vmul.f32 %v8391_v50, %v8391_v50  ;;  %v765_v58 = vadd.f32 %v8391_v50, %v8383_v41 }
 0x196   :  { %v8398_v57 = vpop.f32.mrf.mxu1  ;;  %v761_v60 = vadd.f32 %v760_v38, %v8389_v49  ;;  %v8403_v62 = vpop.f32.mrf.mxu0 }
 0x197   :  { %838 = vadd.xlane.f32.xlu0 %v837_v53  ;;  %v807_v63 = vmul.f32 %v8398_v57, %v8398_v57  ;;  %v841_v5 = vadd.f32 %v840_v2, %v806_v51  ;;  %v812_v6 = vmul.f32 %v8403_v62, %v8403_v62  ;;  %v845_v11 = vadd.f32 %v809_v56, %v808_v43 }
 0x198   :  { %v8409_v13 = vpop.f32.mrf.mxu1  ;;  %v8411_v14 = vpop.f32.mrf.mxu0  ;;  %v762_v15 = vadd.f32 %v761_v60, %v8398_v57 }
 0x199   :  { %758 = vadd.xlane.f32.xlu1 %v757_v52  ;;  %v810_v16 = vmul.f32 %v8409_v13, %v8409_v13  ;;  %v842_v18 = vadd.f32 %v841_v5, %v807_v63  ;;  %v813_v20 = vmul.f32 %v8411_v14, %v8411_v14  ;;  %v770_v22 = vadd.f32 %v8411_v14, %v8403_v62 }
 0x19a   :  { %v8418_v21 = vpop.f32.mrf.mxu1  ;;  %v766_v23 = vadd.f32 %v765_v58, %v8409_v13  ;;  %v8423_v0 = vpop.f32.mrf.mxu0 }
 0x19b   :  { %843 = vadd.xlane.f32.xlu0 %v842_v18  ;;  %v811_v25 = vmul.f32 %v8418_v21, %v8418_v21  ;;  %v846_v27 = vadd.f32 %v845_v11, %v810_v16  ;;  %v816_v1 = vmul.f32 %v8423_v0, %v8423_v0  ;;  %v850_v28 = vadd.f32 %v813_v20, %v812_v6 }
 0x19c   :  { %v767_v32 = vadd.f32 %v766_v23, %v8418_v21  ;;  %v8430_v34 = vpop.f32.mrf.mxu1  ;;  %v8432_v35 = vpop.f32.mrf.mxu0  ;;  %v7920_v16 = vmov 0  }
 0x19d   :  { %763 = vadd.xlane.f32.xlu1 %v762_v15  ;;  %v814_v36 = vmul.f32 %v8430_v34, %v8430_v34  ;;  %v847_v37 = vadd.f32 %v846_v27, %v811_v25  ;;  %v775_v38 = vadd.f32 %v8432_v35, %v8423_v0  ;;  %v817_v40 = vmul.f32 %v8432_v35, %v8432_v35 }
 0x19e   :  { %v8440_v43 = vpop.f32.mrf.mxu1  ;;  %v771_v44 = vadd.f32 %v770_v22, %v8430_v34  ;;  %7809 = vset.pattern.permute.xlu1 %v7920_v16  ;;  %7810 = vset.pattern.permute.xlu0 %v7920_v16 }
 0x19f   :  { %848 = vadd.xlane.f32.xlu0 %v847_v37  ;;  %v815_v46 = vmul.f32 %v8440_v43, %v8440_v43  ;;  %v851_v2 = vadd.f32 %v850_v28, %v814_v36  ;;  %v855_v51 = vadd.f32 %v817_v40, %v816_v1 }
 0x1a0   :  { %v772_v52 = vadd.f32 %v771_v44, %v8440_v43  ;;  %v8446_v53 = vpop.f32.mrf.mxu1 }
 0x1a1   :  { %768 = vadd.xlane.f32.xlu1 %v767_v32  ;;  %v818_v56 = vmul.f32 %v8446_v53, %v8446_v53  ;;  %v776_v58 = vadd.f32 %v775_v38, %v8446_v53  ;;  %v852_v63 = vadd.f32 %v851_v2, %v815_v46 }
 0x1a2   :  { %v8451_v60 = vpop.f32.mrf.mxu1 }
 0x1a3   :  { %773 = vadd.xlane.f32.xlu0 %v772_v52  ;;  %v777_v5 = vadd.f32 %v776_v58, %v8451_v60  ;;  %v819_v6 = vmul.f32 %v8451_v60, %v8451_v60  ;;  %v856_v11 = vadd.f32 %v855_v51, %v818_v56 }
 0x1a5   :  { %778 = vadd.xlane.f32.xlu1 %v777_v5  ;;  %v857_v15 = vadd.f32 %v856_v11, %v819_v6 }
 0x1a7   :  { %853 = vadd.xlane.f32.xlu0 %v852_v63 }
 0x1ab   :  { %858 = vadd.xlane.f32.xlu0 %v857_v15 }
 0x212   :  { %v744_v18 = vpop.xlane.xlu0 %743 }
 0x213   :  { %v780_v20 = vmul.f32 0.001953125, %v744_v18 }
 0x215   :  { %v868_v25 = vmul.f32 %v780_v20, %v780_v20 }
 0x216   :  { %v824_v22 = vpop.xlane.xlu0 %823  ;;  %v749_v23 = vpop.xlane.xlu1 %748 }
 0x217   :  { %v860_v27 = vmul.f32 0.001953125, %v824_v22  ;;  %v781_v1 = vmul.f32 0.001953125, %v749_v23 }
 0x219   :  { %v876_v28 = vsub.f32 %v860_v27, %v868_v25  ;;  %v869_v32 = vmul.f32 %v781_v1, %v781_v1 }
 0x21a   :  { %v829_v36 = vpop.xlane.xlu1 %828 }
 0x21b   :  { %v892_v37 = vadd.f32 1e-05, %v876_v28  ;;  %v861_v38 = vmul.f32 0.001953125, %v829_v36  ;;  %v884_v28 = vld [vmem:[%s15213_s3] sm:$0xff] }
 0x21c   :  { %v834_v40 = vpop.xlane.xlu0 %833 }
 0x21d   :  { %7811 = vrsqrt.f32 %v892_v37  ;;  %v877_v44 = vsub.f32 %v861_v38, %v869_v32  ;;  %v862_v52 = vmul.f32 0.001953125, %v834_v40 }
 0x21e   :  { %v754_v46 = vpop.xlane.xlu1 %753 }
 0x21f   :  { %v893_v2 = vadd.f32 1e-05, %v877_v44  ;;  %v782_v51 = vmul.f32 0.001953125, %v754_v46 }
 0x220   :  { %v839_v56 = vpop.xlane.xlu0 %838 }
 0x221   :  { %7813 = vrsqrt.f32 %v893_v2  ;;  %v870_v58 = vmul.f32 %v782_v51, %v782_v51  ;;  %v863_v11 = vmul.f32 0.001953125, %v839_v56  ;;  %v885_v56 = vld [vmem:[%s15213_s3 + $0x8] sm:$0xff] }
 0x222   :  { %v759_v63 = vpop.xlane.xlu1 %758 }
 0x223   :  { %v878_v5 = vsub.f32 %v862_v52, %v870_v58  ;;  %v8456_v6 = vmul.f32 0.001953125, %v759_v63  ;;  %v916_v58 = vld [vmem:[%s15214_s4] sm:$0xff] }
 0x224   :  { %v844_v15 = vpop.xlane.xlu0 %843 }
 0x225   :  { %v894_v16 = vadd.f32 1e-05, %v878_v5  ;;  %v871_v18 = vmul.f32 %v8456_v6, %v8456_v6  ;;  %v864_v27 = vmul.f32 0.001953125, %v844_v15 }
 0x226   :  { %v764_v22 = vpop.xlane.xlu1 %763 }
 0x227   :  { %7815 = vrsqrt.f32 %v894_v16  ;;  %v879_v23 = vsub.f32 %v863_v11, %v871_v18  ;;  %v8460_v25 = vmul.f32 0.001953125, %v764_v22 }
 0x228   :  { %v849_v32 = vpop.xlane.xlu0 %848 }
 0x229   :  { %v895_v36 = vadd.f32 1e-05, %v879_v23  ;;  %v872_v37 = vmul.f32 %v8460_v25, %v8460_v25  ;;  %v865_v44 = vmul.f32 0.001953125, %v849_v32 }
 0x22a   :  { %v7812_v38 = vpop.eup %7811  ;;  %v769_v40 = vpop.xlane.xlu1 %768 }
 0x22b   :  { %7817 = vrsqrt.f32 %v895_v36  ;;  %v880_v46 = vsub.f32 %v864_v27, %v872_v37  ;;  %v908_v2 = vmul.f32 %v7812_v38, %v884_v28  ;;  %v785_v52 = vmul.f32 0.001953125, %v769_v40 }
 0x22c   :  { %v774_v63 = vpop.xlane.xlu0 %773 }
 0x22d   :  { %v896_v5 = vadd.f32 1e-05, %v880_v46  ;;  %942 = vperm.xlu1 %7809, %v908_v2   ;;  %v873_v11 = vmul.f32 %v785_v52, %v785_v52  ;;  %v924_v15 = vmul.f32 %v908_v2, %v780_v20  ;;  %v8473_v18 = vmul.f32 0.001953125, %v774_v63  ;;  %v886_v20 = vld [vmem:[%s15213_s3 + $0x10] sm:$0xff] }
 0x22e   :  { %v7814_v16 = vpop.eup %7813  ;;  %v779_v22 = vpop.xlane.xlu1 %778 }
 0x22f   :  { %7819 = vrsqrt.f32 %v896_v5  ;;  %v909_v23 = vmul.f32 %v7814_v16, %v885_v56  ;;  %v932_v27 = vsub.f32 %v916_v58, %v924_v15  ;;  %v881_v28 = vsub.f32 %v865_v44, %v873_v11  ;;  %v917_v44 = vld [vmem:[%s15214_s4 + $0x8] sm:$0xff]  ;;  %v918_v11 = vld [vmem:[%s15214_s4 + $0x10] sm:$0xff] }
 0x230   :  { %v854_v32 = vpop.xlane.xlu0 %853  ;;  %v787_v36 = vmul.f32 0.001953125, %v779_v22  ;;  %v874_v38 = vmul.f32 %v8473_v18, %v8473_v18 }
 0x231   :  { %947 = vperm.xlu0 %7810, %v909_v23   ;;  %1014 = vperm.xlu1 %7809, %v932_v27   ;;  %v897_v37 = vadd.f32 1e-05, %v881_v28  ;;  %v866_v40 = vmul.f32 0.001953125, %v854_v32  ;;  %v925_v46 = vmul.f32 %v909_v23, %v781_v1  ;;  %v887_v1 = vld [vmem:[%s15213_s3 + $0x18] sm:$0xff] }
 0x232   :  { %v875_v2 = vmul.f32 %v787_v36, %v787_v36 }
 0x233   :  { %7821 = vrsqrt.f32 %v897_v37  ;;  %v882_v15 = vsub.f32 %v866_v40, %v874_v38  ;;  %v933_v22 = vsub.f32 %v917_v44, %v925_v46  ;;  %v888_v38 = vld [vmem:[%s15213_s3 + $0x20] sm:$0xff]  ;;  %v919_v44 = vld [vmem:[%s15214_s4 + $0x18] sm:$0xff] }
 0x234   :  { %v7816_v63 = vpop.eup %7815  ;;  %v859_v56 = vpop.xlane.xlu0 %858 }
 0x235   :  { %v910_v58 = vmul.f32 %v7816_v63, %v886_v20  ;;  %v867_v5 = vmul.f32 0.001953125, %v859_v56  ;;  %v898_v37 = vadd.f32 1e-05, %v882_v15 }
 0x237   :  { %952 = vperm.xlu1 %7809, %v910_v58   ;;  %v926_v16 = vmul.f32 %v910_v58, %v782_v51  ;;  %v883_v27 = vsub.f32 %v867_v5, %v875_v2  ;;  %v889_v51 = vld [vmem:[%s15213_s3 + $0x28] sm:$0xff] }
 0x238   :  { %v7818_v28 = vpop.eup %7817  ;;  %v921_v58 = vld [vmem:[%s15214_s4 + $0x28] sm:$0xff] }
 0x239   :  { %v934_v23 = vsub.f32 %v918_v11, %v926_v16  ;;  %v899_v32 = vadd.f32 1e-05, %v883_v27  ;;  %v911_v20 = vmul.f32 %v7818_v28, %v887_v1  ;;  %v891_v16 = vld [vmem:[%s15213_s3 + $0x38] sm:$0xff]  ;;  %v920_v27 = vld [vmem:[%s15214_s4 + $0x20] sm:$0xff] }
 0x23a   :  { %v923_v1 = vld [vmem:[%s15214_s4 + $0x38] sm:$0xff] }
 0x23b   :  { %1024 = vperm.xlu0 %7810, %v934_v23   ;;  %1019 = vperm.xlu1 %7809, %v933_v22   ;;  %7823 = vrsqrt.f32 %v899_v32  ;;  %v927_v46 = vmul.f32 %v911_v20, %v8456_v6 }
 0x23c   :  { %v7820_v63 = vpop.eup %7819  ;;  %7825 = vrsqrt.f32 %v898_v37  ;;  %v890_v37 = vld [vmem:[%s15213_s3 + $0x30] sm:$0xff] }
 0x23d   :  { %v912_v40 = vmul.f32 %v7820_v63, %v888_v38  ;;  %v935_v5 = vsub.f32 %v919_v44, %v927_v46  ;;  %v922_v38 = vld [vmem:[%s15214_s4 + $0x30] sm:$0xff] }
 0x23f   :  { %957 = vperm.xlu1 %7809, %v911_v20   ;;  %v928_v6 = vmul.f32 %v912_v40, %v8460_v25 }
 0x240   :  { %v7822_v2 = vpop.eup %7821 }
 0x241   :  { %v913_v56 = vmul.f32 %v7822_v2, %v889_v51 }
 0x243   :  { %962 = vperm.xlu1 %7809, %v912_v40   ;;  %v929_v11 = vmul.f32 %v913_v56, %v785_v52  ;;  %v936_v52 = vsub.f32 %v920_v27, %v928_v6 }
 0x245   :  { %v937_v15 = vsub.f32 %v921_v58, %v929_v11 }
 0x247   :  { %1029 = vperm.xlu1 %7809, %v935_v5   ;;  %1039 = vperm.xlu0 %7810, %v937_v15  }
 0x248   :  { %v7824_v22 = vpop.eup %7823 }
 0x249   :  { %v915_v28 = vmul.f32 %v7824_v22, %v891_v16  ;;  %v7826_v32 = vpop.eup %7825 }
 0x24a   :  { %v914_v25 = vmul.f32 %v7826_v32, %v890_v37 }
 0x24b   :  { %967 = vperm.xlu1 %7809, %v913_v56   ;;  %v931_v23 = vmul.f32 %v915_v28, %v787_v36 }
 0x24c   :  { %v930_v63 = vmul.f32 %v914_v25, %v8473_v18 }
 0x24d   :  { %v939_v20 = vsub.f32 %v923_v1, %v931_v23 }
 0x24e   :  { %v938_v51 = vsub.f32 %v922_v38, %v930_v63 }
 0x24f   :  { %1034 = vperm.xlu1 %7809, %v936_v52   ;;  %1049 = vperm.xlu0 %7810, %v939_v20  }
 0x253   :  { %972 = vperm.xlu1 %7809, %v914_v25  }
 0x257   :  { %977 = vperm.xlu1 %7809, %v915_v28  }
 0x25b   :  { %1044 = vperm.xlu1 %7809, %v938_v51  }
 0x2a8   :  { %v943_v36 = vpop.permute.xlu1 %942 }
 0x2a9   :  { %v980_v40 = vmul.f32 %v943_v36, %v8296_v42  ;;  %v981_v46 = vmul.f32 %v943_v36, %v8300_v3  ;;  %v983_v44 = vmul.f32 %v943_v36, %v8321_v54  ;;  %v982_v15 = vmul.f32 %v943_v36, %v8310_v47 }
 0x2ac   :  { %v1015_v2 = vpop.permute.xlu1 %1014  ;;  %v948_v16 = vpop.permute.xlu0 %947 }
 0x2ad   :  { %v1052_v56 = vadd.f32 %v1015_v2, %v980_v40  ;;  %v1053_v58 = vadd.f32 %v1015_v2, %v981_v46  ;;  %v1055_v5 = vadd.f32 %v1015_v2, %v983_v44  ;;  %v1054_v42 = vadd.f32 %v1015_v2, %v982_v15 }
 0x2ae   :  { %v984_v22 = vmul.f32 %v948_v16, %v8304_v45  ;;  %v985_v28 = vmul.f32 %v948_v16, %v8312_v48  ;;  %v986_v45 = vmul.f32 %v948_v16, %v8328_v59  ;;  %v987_v37 = vmul.f32 %v948_v16, %v8339_v10 }
 0x2af   :  { %v8522_v11 = vmax.f32 %v1052_v56, 0.0  ;;  %v8524_v18 = vmax.f32 %v1053_v58, 0.0  ;;  %v8531_v3 = vmax.f32 %v1055_v5, 0.0  ;;  %v8537_v54 = vmax.f32 %v1054_v42, 0.0 }
 0x2b1   :  { %15735 = vst [vmem:[#allocation13_spill] sm:$0xff] %v8522_v11  ;;  %15736 = vst [vmem:[#allocation14_spill] sm:$0xff] %v8524_v18  ;;  %1410 = vrot.lane.b32.xlu1 %v8524_v18, %s7917_s17  ;;  %1180 = vrot.lane.b32.xlu0 %v8522_v11, %s7919_s18 }
 0x2b2   :  { %15737 = vst [vmem:[#allocation15_spill] sm:$0xff] %v8531_v3  ;;  %15738 = vst [vmem:[#allocation16_spill] sm:$0xff] %v8537_v54  ;;  %v953_v47 = vpop.permute.xlu1 %952 }
 0x2b3   :  { %v988_v51 = vmul.f32 %v953_v47, %v8323_v55  ;;  %v989_v36 = vmul.f32 %v953_v47, %v8332_v61  ;;  %v991_v44 = vmul.f32 %v953_v47, %v8357_v24  ;;  %v990_v58 = vmul.f32 %v953_v47, %v8348_v17 }
 0x2b5   :  { %1442 = vrot.lane.b32.xlu1 %v8531_v3, %s7917_s17  ;;  %1196 = vrot.lane.b32.xlu0 %v8524_v18, %s7919_s18 }
 0x2b6   :  { %v1020_v6 = vpop.permute.xlu1 %1019  ;;  %v1025_v38 = vpop.permute.xlu0 %1024 }
 0x2b7   :  { %v1056_v27 = vadd.f32 %v1020_v6, %v984_v22  ;;  %v1057_v1 = vadd.f32 %v1020_v6, %v985_v28  ;;  %v1058_v23 = vadd.f32 %v1020_v6, %v986_v45  ;;  %v1059_v59 = vadd.f32 %v1020_v6, %v987_v37 }
 0x2b8   :  { %v1060_v40 = vadd.f32 %v1025_v38, %v988_v51  ;;  %v1061_v46 = vadd.f32 %v1025_v38, %v989_v36  ;;  %v1063_v55 = vadd.f32 %v1025_v38, %v991_v44  ;;  %v1062_v24 = vadd.f32 %v1025_v38, %v990_v58 }
 0x2b9   :  { %2132 = vrot.lane.b32.xlu1 %v8537_v54, %s7914_s15  ;;  %1212 = vrot.lane.b32.xlu0 %v8537_v54, %s7919_s18  ;;  %v8573_v52 = vmax.f32 %v1056_v27, 0.0  ;;  %v8580_v32 = vmax.f32 %v1057_v1, 0.0  ;;  %v8586_v48 = vmax.f32 %v1058_v23, 0.0  ;;  %v8597_v20 = vmax.f32 %v1059_v59, 0.0 }
 0x2ba   :  { %v8611_v10 = vpop.permute.xlu1 %957  ;;  %v8646_v61 = vmax.f32 %v1060_v40, 0.0  ;;  %v8648_v56 = vmax.f32 %v1061_v46, 0.0  ;;  %v8657_v15 = vmax.f32 %v1063_v55, 0.0  ;;  %v8663_v42 = vmax.f32 %v1062_v24, 0.0 }
 0x2bb   :  { %15739 = vst [vmem:[#allocation17_spill] sm:$0xff] %v8573_v52  ;;  %15740 = vst [vmem:[#allocation18_spill] sm:$0xff] %v8580_v32  ;;  %v992_v59 = vmul.f32 %v8611_v10, %v8343_v12  ;;  %v993_v40 = vmul.f32 %v8611_v10, %v8352_v19  ;;  %v994_v58 = vmul.f32 %v8611_v10, %v8369_v30 }
 0x2bc   :  { %15741 = vst [vmem:[#allocation19_spill] sm:$0xff] %v8586_v48  ;;  %15742 = vst [vmem:[#allocation20_spill] sm:$0xff] %v8597_v20 }
 0x2bd   :  { %1822 = vrot.lane.b32.xlu1 %v8522_v11, %s7915_s0  ;;  %1228 = vrot.lane.b32.xlu0 %v8531_v3, %s7919_s18  ;;  %15743 = vst [vmem:[#allocation21_spill] sm:$0xff] %v8646_v61  ;;  %15744 = vst [vmem:[#allocation22_spill] sm:$0xff] %v8648_v56 }
 0x2be   :  { %v8621_v25 = vpop.permute.xlu1 %962  ;;  %15745 = vst [vmem:[#allocation23_spill] sm:$0xff] %v8657_v15  ;;  %15746 = vst [vmem:[#allocation24_spill] sm:$0xff] %v8663_v42 }
 0x2c1   :  { %2544 = vrot.lane.b32.xlu1 %v8524_v18, %s7912_s30  ;;  %1394 = vrot.lane.b32.xlu0 %v8522_v11, %s7917_s17 }
 0x2c2   :  { %v8627_v63 = vpop.permute.xlu1 %1029  ;;  %v8677_v16 = vpop.permute.xlu0 %1039 }
 0x2c3   :  { %v1064_v38 = vadd.f32 %v8627_v63, %v992_v59  ;;  %v1065_v12 = vadd.f32 %v8627_v63, %v993_v40  ;;  %v1066_v19 = vadd.f32 %v8627_v63, %v994_v58 }
 0x2c5   :  { %2528 = vrot.lane.b32.xlu1 %v8522_v11, %s7912_s30  ;;  %2116 = vrot.lane.b32.xlu0 %v8524_v18, %s7914_s15  ;;  %v8729_v46 = vmax.f32 %v1064_v38, 0.0  ;;  %v8742_v24 = vmax.f32 %v1065_v12, 0.0  ;;  %v8752_v30 = vmax.f32 %v1066_v19, 0.0  ;;  %v995_v12 = vmul.f32 %v8611_v10, %v8380_v39 }
 0x2c6   :  { %v8639_v2 = vpop.permute.xlu1 %967 }
 0x2c7   :  { %15754 = vst [vmem:[#allocation32_spill] sm:$0xff] %v8729_v46  ;;  %15756 = vst [vmem:[#allocation34_spill] sm:$0xff] %v8742_v24  ;;  %v1067_v58 = vadd.f32 %v8627_v63, %v995_v12 }
 0x2c8   :  { %15759 = vst [vmem:[#allocation37_spill] sm:$0xff] %v8752_v30 }
 0x2c9   :  { %1608 = vrot.lane.b32.xlu1 %v8522_v11, %s7916_s16  ;;  %2100 = vrot.lane.b32.xlu0 %v8522_v11, %s7914_s15  ;;  %v8773_v19 = vmax.f32 %v1067_v58, 0.0 }
 0x2ca   :  { %v8651_v5 = vpop.permute.xlu1 %1034  ;;  %v8683_v6 = vpop.permute.xlu0 %1049 }
 0x2cb   :  { %15764 = vst [vmem:[#allocation42_spill] sm:$0xff] %v8773_v19 }
 0x2cd   :  { %2330 = vrot.lane.b32.xlu1 %v8524_v18, %s7913_s12  ;;  %1838 = vrot.lane.b32.xlu0 %v8524_v18, %s7915_s0 }
 0x2ce   :  { %v8665_v17 = vpop.permute.xlu1 %972 }
 0x2d1   :  { %2314 = vrot.lane.b32.xlu1 %v8522_v11, %s7913_s12  ;;  %1870 = vrot.lane.b32.xlu0 %v8531_v3, %s7915_s0 }
 0x2d2   :  { %v8671_v47 = vpop.permute.xlu1 %977 }
 0x2d5   :  { %1426 = vrot.lane.b32.xlu1 %v8537_v54, %s7917_s17  ;;  %2560 = vrot.lane.b32.xlu0 %v8537_v54, %s7912_s30 }
 0x2d6   :  { %v8685_v22 = vpop.permute.xlu1 %1044 }
 0x2d9   :  { %1624 = vrot.lane.b32.xlu0 %v8524_v18, %s7916_s16  ;;  %1182 = vrot.lane.b32.xlu1 %v8573_v52, %s7919_s18 }
 0x2dd   :  { %1656 = vrot.lane.b32.xlu0 %v8531_v3, %s7916_s16  ;;  %1198 = vrot.lane.b32.xlu1 %v8580_v32, %s7919_s18 }
 0x2e1   :  { %2346 = vrot.lane.b32.xlu0 %v8537_v54, %s7913_s12  ;;  %1214 = vrot.lane.b32.xlu1 %v8586_v48, %s7919_s18 }
 0x2e5   :  { %1396 = vrot.lane.b32.xlu0 %v8573_v52, %s7917_s17  ;;  %1412 = vrot.lane.b32.xlu1 %v8580_v32, %s7917_s17 }
 0x2e9   :  { %2118 = vrot.lane.b32.xlu0 %v8580_v32, %s7914_s15  ;;  %1444 = vrot.lane.b32.xlu1 %v8597_v20, %s7917_s17 }
 0x2ed   :  { %2102 = vrot.lane.b32.xlu0 %v8573_v52, %s7914_s15  ;;  %2134 = vrot.lane.b32.xlu1 %v8586_v48, %s7914_s15 }
 0x2f1   :  { %1840 = vrot.lane.b32.xlu0 %v8580_v32, %s7915_s0  ;;  %1230 = vrot.lane.b32.xlu1 %v8597_v20, %s7919_s18 }
 0x2f5   :  { %1872 = vrot.lane.b32.xlu0 %v8597_v20, %s7915_s0  ;;  %1824 = vrot.lane.b32.xlu1 %v8573_v52, %s7915_s0 }
 0x2f9   :  { %2562 = vrot.lane.b32.xlu0 %v8586_v48, %s7912_s30  ;;  %2546 = vrot.lane.b32.xlu1 %v8580_v32, %s7912_s30 }
 0x2fd   :  { %1626 = vrot.lane.b32.xlu0 %v8580_v32, %s7916_s16  ;;  %2530 = vrot.lane.b32.xlu1 %v8573_v52, %s7912_s30 }
 0x301   :  { %1658 = vrot.lane.b32.xlu0 %v8597_v20, %s7916_s16  ;;  %1610 = vrot.lane.b32.xlu1 %v8573_v52, %s7916_s16 }
 0x305   :  { %2348 = vrot.lane.b32.xlu0 %v8586_v48, %s7913_s12  ;;  %2332 = vrot.lane.b32.xlu1 %v8580_v32, %s7913_s12 }
 0x309   :  { %1428 = vrot.lane.b32.xlu0 %v8586_v48, %s7917_s17  ;;  %2316 = vrot.lane.b32.xlu1 %v8573_v52, %s7913_s12 }
 0x30d   :  { %1184 = vrot.lane.b32.xlu0 %v8646_v61, %s7919_s18  ;;  %1414 = vrot.lane.b32.xlu1 %v8648_v56, %s7917_s17 }
 0x311   :  { %1200 = vrot.lane.b32.xlu0 %v8648_v56, %s7919_s18  ;;  %1446 = vrot.lane.b32.xlu1 %v8657_v15, %s7917_s17 }
 0x315   :  { %1216 = vrot.lane.b32.xlu0 %v8663_v42, %s7919_s18  ;;  %2136 = vrot.lane.b32.xlu1 %v8663_v42, %s7914_s15 }
 0x319   :  { %1398 = vrot.lane.b32.xlu0 %v8646_v61, %s7917_s17  ;;  %1826 = vrot.lane.b32.xlu1 %v8646_v61, %s7915_s0 }
 0x31d   :  { %2120 = vrot.lane.b32.xlu0 %v8648_v56, %s7914_s15  ;;  %2548 = vrot.lane.b32.xlu1 %v8648_v56, %s7912_s30 }
 0x321   :  { %2104 = vrot.lane.b32.xlu0 %v8646_v61, %s7914_s15  ;;  %2532 = vrot.lane.b32.xlu1 %v8646_v61, %s7912_s30 }
 0x323   :  { %v8691_v27 = vpop.permute.xlu0 %1180  ;;  %v8693_v28 = vpop.permute.xlu1 %1410 }
 0x324   :  { %15747 = vst [vmem:[#allocation25_spill] sm:$0xff] %v8691_v27  ;;  %15748 = vst [vmem:[#allocation26_spill] sm:$0xff] %v8693_v28 }
 0x325   :  { %1232 = vrot.lane.b32.xlu0 %v8657_v15, %s7919_s18  ;;  %1612 = vrot.lane.b32.xlu1 %v8646_v61, %s7916_s16 }
 0x327   :  { %v8699_v1 = vpop.permute.xlu0 %1196  ;;  %v8701_v45 = vpop.permute.xlu1 %1442 }
 0x328   :  { %15749 = vst [vmem:[#allocation27_spill] sm:$0xff] %v8699_v1 }
 0x329   :  { %1842 = vrot.lane.b32.xlu0 %v8648_v56, %s7915_s0  ;;  %2334 = vrot.lane.b32.xlu1 %v8648_v56, %s7913_s12 }
 0x32b   :  { %v8707_v23 = vpop.permute.xlu0 %1212  ;;  %v8709_v37 = vpop.permute.xlu1 %2132 }
 0x32c   :  { %15750 = vst [vmem:[#allocation28_spill] sm:$0xff] %v8707_v23  ;;  %15751 = vst [vmem:[#allocation29_spill] sm:$0xff] %v8709_v37 }
 0x32d   :  { %1874 = vrot.lane.b32.xlu0 %v8657_v15, %s7915_s0  ;;  %2318 = vrot.lane.b32.xlu1 %v8646_v61, %s7913_s12 }
 0x32f   :  { %v8718_v51 = vpop.permute.xlu0 %1228  ;;  %v8720_v36 = vpop.permute.xlu1 %1822 }
 0x330   :  { %15752 = vst [vmem:[#allocation30_spill] sm:$0xff] %v8718_v51  ;;  %15753 = vst [vmem:[#allocation31_spill] sm:$0xff] %v8720_v36 }
 0x331   :  { %2564 = vrot.lane.b32.xlu0 %v8663_v42, %s7912_s30  ;;  %1430 = vrot.lane.b32.xlu1 %v8663_v42, %s7917_s17 }
 0x333   :  { %v8731_v44 = vpop.permute.xlu0 %1394  ;;  %v8733_v55 = vpop.permute.xlu1 %2544 }
 0x334   :  { %15755 = vst [vmem:[#allocation33_spill] sm:$0xff] %v8733_v55  ;;  %v999_v55 = vmul.f32 %v8621_v25, %v8398_v57 }
 0x335   :  { %1628 = vrot.lane.b32.xlu0 %v8648_v56, %s7916_s16  ;;  %1186 = vrot.lane.b32.xlu1 %v8729_v46, %s7919_s18 }
 0x337   :  { %v8744_v59 = vpop.permute.xlu0 %2116  ;;  %v8746_v38 = vpop.permute.xlu1 %2528 }
 0x338   :  { %15757 = vst [vmem:[#allocation35_spill] sm:$0xff] %v8744_v59  ;;  %15758 = vst [vmem:[#allocation36_spill] sm:$0xff] %v8746_v38  ;;  %v996_v38 = vmul.f32 %v8621_v25, %v8363_v26  ;;  %v998_v26 = vmul.f32 %v8621_v25, %v8389_v49 }
 0x339   :  { %1660 = vrot.lane.b32.xlu0 %v8657_v15, %s7916_s16  ;;  %1202 = vrot.lane.b32.xlu1 %v8742_v24, %s7919_s18 }
 0x33a   :  { %v1070_v57 = vadd.f32 %v8651_v5, %v998_v26 }
 0x33b   :  { %v8754_v40 = vpop.permute.xlu0 %2100  ;;  %v8756_v4 = vpop.permute.xlu1 %1608 }
 0x33c   :  { %15760 = vst [vmem:[#allocation38_spill] sm:$0xff] %v8754_v40  ;;  %15761 = vst [vmem:[#allocation39_spill] sm:$0xff] %v8756_v4  ;;  %v8881_v49 = vmax.f32 %v1070_v57, 0.0 }
 0x33d   :  { %2350 = vrot.lane.b32.xlu0 %v8663_v42, %s7913_s12  ;;  %1218 = vrot.lane.b32.xlu1 %v8752_v30, %s7919_s18 }
 0x33e   :  { %15786 = vst [vmem:[#allocation64_spill] sm:$0xff] %v8881_v49 }
 0x33f   :  { %v8765_v23 = vpop.permute.xlu0 %1838  ;;  %v8767_v33 = vpop.permute.xlu1 %2330 }
 0x340   :  { %15762 = vst [vmem:[#allocation40_spill] sm:$0xff] %v8765_v23  ;;  %15763 = vst [vmem:[#allocation41_spill] sm:$0xff] %v8767_v33 }
 0x341   :  { %1400 = vrot.lane.b32.xlu0 %v8729_v46, %s7917_s17  ;;  %1416 = vrot.lane.b32.xlu1 %v8742_v24, %s7917_s17 }
 0x343   :  { %v8775_v39 = vpop.permute.xlu0 %1870  ;;  %v8777_v10 = vpop.permute.xlu1 %2314 }
 0x344   :  { %15765 = vst [vmem:[#allocation43_spill] sm:$0xff] %v8775_v39  ;;  %15766 = vst [vmem:[#allocation44_spill] sm:$0xff] %v8777_v10 }
 0x345   :  { %2122 = vrot.lane.b32.xlu0 %v8742_v24, %s7914_s15  ;;  %1448 = vrot.lane.b32.xlu1 %v8773_v19, %s7917_s17 }
 0x347   :  { %v8783_v63 = vpop.permute.xlu0 %2560  ;;  %v8785_v12 = vpop.permute.xlu1 %1426 }
 0x348   :  { %15767 = vst [vmem:[#allocation45_spill] sm:$0xff] %v8783_v63  ;;  %15768 = vst [vmem:[#allocation46_spill] sm:$0xff] %v8785_v12  ;;  %v997_v63 = vmul.f32 %v8621_v25, %v8371_v31  ;;  %v1068_v31 = vadd.f32 %v8651_v5, %v996_v38 }
 0x349   :  { %2106 = vrot.lane.b32.xlu0 %v8729_v46, %s7914_s15  ;;  %2138 = vrot.lane.b32.xlu1 %v8752_v30, %s7914_s15 }
 0x34a   :  { %v1069_v39 = vadd.f32 %v8651_v5, %v997_v63  ;;  %v1071_v63 = vadd.f32 %v8651_v5, %v999_v55  ;;  %v8869_v38 = vmax.f32 %v1068_v31, 0.0 }
 0x34b   :  { %v8791_v58 = vpop.permute.xlu0 %1624  ;;  %v8793_v29 = vpop.permute.xlu1 %1182 }
 0x34c   :  { %15769 = vst [vmem:[#allocation47_spill] sm:$0xff] %v8791_v58  ;;  %15770 = vst [vmem:[#allocation48_spill] sm:$0xff] %v8793_v29  ;;  %v8856_v51 = vmax.f32 %v1069_v39, 0.0  ;;  %v8871_v55 = vmax.f32 %v1071_v63, 0.0 }
 0x34d   :  { %1844 = vrot.lane.b32.xlu0 %v8742_v24, %s7915_s0  ;;  %1234 = vrot.lane.b32.xlu1 %v8773_v19, %s7919_s18  ;;  %15782 = vst [vmem:[#allocation60_spill] sm:$0xff] %v8869_v38 }
 0x34e   :  { %15779 = vst [vmem:[#allocation57_spill] sm:$0xff] %v8856_v51  ;;  %15783 = vst [vmem:[#allocation61_spill] sm:$0xff] %v8871_v55 }
 0x34f   :  { %v8799_v10 = vpop.permute.xlu0 %1656  ;;  %v8801_v33 = vpop.permute.xlu1 %1198 }
 0x350   :  { %15771 = vst [vmem:[#allocation49_spill] sm:$0xff] %v8799_v10  ;;  %15772 = vst [vmem:[#allocation50_spill] sm:$0xff] %v8801_v33 }
 0x351   :  { %1876 = vrot.lane.b32.xlu0 %v8773_v19, %s7915_s0  ;;  %1828 = vrot.lane.b32.xlu1 %v8729_v46, %s7915_s0 }
 0x353   :  { %v8807_v12 = vpop.permute.xlu0 %2346  ;;  %v8809_v4 = vpop.permute.xlu1 %1214 }
 0x354   :  { %15773 = vst [vmem:[#allocation51_spill] sm:$0xff] %v8807_v12  ;;  %15774 = vst [vmem:[#allocation52_spill] sm:$0xff] %v8809_v4 }
 0x355   :  { %2566 = vrot.lane.b32.xlu0 %v8752_v30, %s7912_s30  ;;  %2550 = vrot.lane.b32.xlu1 %v8742_v24, %s7912_s30 }
 0x357   :  { %v8815_v58 = vpop.permute.xlu0 %1396  ;;  %v8817_v10 = vpop.permute.xlu1 %1412 }
 0x359   :  { %1630 = vrot.lane.b32.xlu0 %v8742_v24, %s7916_s16  ;;  %2534 = vrot.lane.b32.xlu1 %v8729_v46, %s7912_s30 }
 0x35b   :  { %v8823_v29 = vpop.permute.xlu0 %2118  ;;  %v8825_v12 = vpop.permute.xlu1 %1444 }
 0x35d   :  { %1662 = vrot.lane.b32.xlu0 %v8773_v19, %s7916_s16  ;;  %1614 = vrot.lane.b32.xlu1 %v8729_v46, %s7916_s16 }
 0x35f   :  { %v8831_v4 = vpop.permute.xlu0 %2102  ;;  %v8833_v33 = vpop.permute.xlu1 %2134 }
 0x360   :  { %15775 = vst [vmem:[#allocation53_spill] sm:$0xff] %v8831_v4  ;;  %15776 = vst [vmem:[#allocation54_spill] sm:$0xff] %v8833_v33 }
 0x361   :  { %2352 = vrot.lane.b32.xlu0 %v8752_v30, %s7913_s12  ;;  %2336 = vrot.lane.b32.xlu1 %v8742_v24, %s7913_s12 }
 0x363   :  { %v8842_v36 = vpop.permute.xlu0 %1840  ;;  %v8844_v23 = vpop.permute.xlu1 %1230 }
 0x364   :  { %15777 = vst [vmem:[#allocation55_spill] sm:$0xff] %v8842_v36  ;;  %15778 = vst [vmem:[#allocation56_spill] sm:$0xff] %v8844_v23 }
 0x365   :  { %1432 = vrot.lane.b32.xlu0 %v8752_v30, %s7917_s17  ;;  %2320 = vrot.lane.b32.xlu1 %v8729_v46, %s7913_s12 }
 0x367   :  { %v8858_v36 = vpop.permute.xlu0 %1872  ;;  %v8860_v23 = vpop.permute.xlu1 %1824 }
 0x368   :  { %15780 = vst [vmem:[#allocation58_spill] sm:$0xff] %v8858_v36  ;;  %15781 = vst [vmem:[#allocation59_spill] sm:$0xff] %v8860_v23 }
 0x369   :  { %2764 = vrot.lane.b32.xlu0 %v8742_v24, %s7911_s28  ;;  %1418 = vrot.lane.b32.xlu1 %v8856_v51, %s7917_s17 }
 0x36b   :  { %v8873_v39 = vpop.permute.xlu0 %2562  ;;  %v8875_v36 = vpop.permute.xlu1 %2546 }
 0x36c   :  { %15784 = vst [vmem:[#allocation62_spill] sm:$0xff] %v8873_v39  ;;  %15785 = vst [vmem:[#allocation63_spill] sm:$0xff] %v8875_v36 }
 0x36d   :  { %1188 = vrot.lane.b32.xlu0 %v8869_v38, %s7919_s18  ;;  %1450 = vrot.lane.b32.xlu1 %v8871_v55, %s7917_s17 }
 0x36f   :  { %v8883_v25 = vpop.permute.xlu0 %1626  ;;  %v8885_v24 = vpop.permute.xlu1 %2530 }
 0x370   :  { %15787 = vst [vmem:[#allocation65_spill] sm:$0xff] %v8883_v25  ;;  %15788 = vst [vmem:[#allocation66_spill] sm:$0xff] %v8885_v24 }
 0x371   :  { %1204 = vrot.lane.b32.xlu0 %v8856_v51, %s7919_s18  ;;  %2140 = vrot.lane.b32.xlu1 %v8881_v49, %s7914_s15 }
 0x373   :  { %v8891_v5 = vpop.permute.xlu0 %1658  ;;  %v8893_v31 = vpop.permute.xlu1 %1610 }
 0x374   :  { %15789 = vst [vmem:[#allocation67_spill] sm:$0xff] %v8891_v5  ;;  %15790 = vst [vmem:[#allocation68_spill] sm:$0xff] %v8893_v31 }
 0x375   :  { %1220 = vrot.lane.b32.xlu0 %v8881_v49, %s7919_s18  ;;  %1830 = vrot.lane.b32.xlu1 %v8869_v38, %s7915_s0 }
 0x377   :  { %v8899_v63 = vpop.permute.xlu0 %2348  ;;  %v8901_v26 = vpop.permute.xlu1 %2332 }
 0x378   :  { %15791 = vst [vmem:[#allocation69_spill] sm:$0xff] %v8899_v63  ;;  %15792 = vst [vmem:[#allocation70_spill] sm:$0xff] %v8901_v26 }
 0x379   :  { %1402 = vrot.lane.b32.xlu0 %v8869_v38, %s7917_s17  ;;  %2552 = vrot.lane.b32.xlu1 %v8856_v51, %s7912_s30 }
 0x37b   :  { %v8907_v57 = vpop.permute.xlu0 %1428  ;;  %v8909_v5 = vpop.permute.xlu1 %2316 }
 0x37c   :  { %15793 = vst [vmem:[#allocation71_spill] sm:$0xff] %v8907_v57  ;;  %15794 = vst [vmem:[#allocation72_spill] sm:$0xff] %v8909_v5 }
 0x37d   :  { %2124 = vrot.lane.b32.xlu0 %v8856_v51, %s7914_s15  ;;  %2536 = vrot.lane.b32.xlu1 %v8869_v38, %s7912_s30 }
 0x37f   :  { %v8915_v31 = vpop.permute.xlu0 %1184  ;;  %v8917_v63 = vpop.permute.xlu1 %1414 }
 0x380   :  { %15795 = vst [vmem:[#allocation73_spill] sm:$0xff] %v8915_v31 }
 0x381   :  { %2108 = vrot.lane.b32.xlu0 %v8869_v38, %s7914_s15  ;;  %1616 = vrot.lane.b32.xlu1 %v8869_v38, %s7916_s16 }
 0x383   :  { %v8923_v26 = vpop.permute.xlu0 %1200  ;;  %v8925_v57 = vpop.permute.xlu1 %1446 }
 0x384   :  { %15796 = vst [vmem:[#allocation74_spill] sm:$0xff] %v8923_v26 }
 0x385   :  { %1236 = vrot.lane.b32.xlu0 %v8871_v55, %s7919_s18  ;;  %2338 = vrot.lane.b32.xlu1 %v8856_v51, %s7913_s12 }
 0x387   :  { %v8931_v5 = vpop.permute.xlu0 %1216  ;;  %v8933_v25 = vpop.permute.xlu1 %2136 }
 0x388   :  { %15797 = vst [vmem:[#allocation75_spill] sm:$0xff] %v8931_v5  ;;  %15798 = vst [vmem:[#allocation76_spill] sm:$0xff] %v8933_v25  ;;  %v1000_v5 = vmul.f32 %v8639_v2, %v8383_v41  ;;  %v1002_v41 = vmul.f32 %v8639_v2, %v8409_v13 }
 0x389   :  { %1846 = vrot.lane.b32.xlu0 %v8856_v51, %s7915_s0  ;;  %2322 = vrot.lane.b32.xlu1 %v8869_v38, %s7913_s12 }
 0x38a   :  { %v1072_v31 = vadd.f32 %v8677_v16, %v1000_v5 }
 0x38b   :  { %v8939_v24 = vpop.permute.xlu0 %1398  ;;  %v8941_v36 = vpop.permute.xlu1 %1826 }
 0x38c   :  { %15799 = vst [vmem:[#allocation77_spill] sm:$0xff] %v8941_v36  ;;  %v1001_v36 = vmul.f32 %v8639_v2, %v8391_v50  ;;  %v8971_v1 = vmax.f32 %v1072_v31, 0.0 }
 0x38d   :  { %1878 = vrot.lane.b32.xlu0 %v8871_v55, %s7915_s0  ;;  %1434 = vrot.lane.b32.xlu1 %v8881_v49, %s7917_s17 }
 0x38e   :  { %15803 = vst [vmem:[#allocation81_spill] sm:$0xff] %v8971_v1 }
 0x38f   :  { %v8949_v39 = vpop.permute.xlu0 %2120  ;;  %v8951_v23 = vpop.permute.xlu1 %2548 }
 0x390   :  { %15800 = vst [vmem:[#allocation78_spill] sm:$0xff] %v8951_v23  ;;  %v1073_v23 = vadd.f32 %v8677_v16, %v1001_v36  ;;  %v1003_v36 = vmul.f32 %v8639_v2, %v8418_v21 }
 0x391   :  { %2568 = vrot.lane.b32.xlu0 %v8881_v49, %s7912_s30  ;;  %2766 = vrot.lane.b32.xlu1 %v8856_v51, %s7911_s28 }
 0x393   :  { %v8960_v26 = vpop.permute.xlu0 %2104  ;;  %v8962_v27 = vpop.permute.xlu1 %2532 }
 0x394   :  { %15801 = vst [vmem:[#allocation79_spill] sm:$0xff] %v8960_v26  ;;  %15802 = vst [vmem:[#allocation80_spill] sm:$0xff] %v8962_v27  ;;  %v1074_v27 = vadd.f32 %v8677_v16, %v1002_v41 }
 0x395   :  { %1632 = vrot.lane.b32.xlu0 %v8856_v51, %s7916_s16  ;;  %2750 = vrot.lane.b32.xlu1 %v8869_v38, %s7911_s28  ;;  %v8982_v38 = vmax.f32 %v1073_v23, 0.0  ;;  %v1075_v23 = vadd.f32 %v8677_v16, %v1003_v36 }
 0x396   :  { %v8994_v31 = vmax.f32 %v1074_v27, 0.0 }
 0x397   :  { %v8973_v50 = vpop.permute.xlu0 %1232  ;;  %v8975_v5 = vpop.permute.xlu1 %1612  ;;  %15806 = vst [vmem:[#allocation84_spill] sm:$0xff] %v8982_v38  ;;  %v9013_v21 = vmax.f32 %v1075_v23, 0.0 }
 0x398   :  { %15804 = vst [vmem:[#allocation82_spill] sm:$0xff] %v8973_v50  ;;  %15805 = vst [vmem:[#allocation83_spill] sm:$0xff] %v8975_v5 }
 0x399   :  { %1664 = vrot.lane.b32.xlu0 %v8871_v55, %s7916_s16  ;;  %1190 = vrot.lane.b32.xlu1 %v8971_v1, %s7919_s18  ;;  %15809 = vst [vmem:[#allocation87_spill] sm:$0xff] %v8994_v31  ;;  %15814 = vst [vmem:[#allocation92_spill] sm:$0xff] %v9013_v21 }
 0x39b   :  { %v8984_v51 = vpop.permute.xlu0 %1842  ;;  %v8986_v13 = vpop.permute.xlu1 %2334 }
 0x39c   :  { %15807 = vst [vmem:[#allocation85_spill] sm:$0xff] %v8984_v51  ;;  %15808 = vst [vmem:[#allocation86_spill] sm:$0xff] %v8986_v13 }
 0x39d   :  { %2354 = vrot.lane.b32.xlu0 %v8881_v49, %s7913_s12  ;;  %1206 = vrot.lane.b32.xlu1 %v8982_v38, %s7919_s18 }
 0x39f   :  { %v8996_v5 = vpop.permute.xlu0 %1874  ;;  %v8998_v41 = vpop.permute.xlu1 %2318 }
 0x3a0   :  { %15810 = vst [vmem:[#allocation88_spill] sm:$0xff] %v8996_v5  ;;  %15811 = vst [vmem:[#allocation89_spill] sm:$0xff] %v8998_v41 }
 0x3a1   :  { %2782 = vrot.lane.b32.xlu0 %v8881_v49, %s7911_s28  ;;  %1222 = vrot.lane.b32.xlu1 %v8994_v31, %s7919_s18 }
 0x3a3   :  { %v9005_v13 = vpop.permute.xlu0 %2564  ;;  %v9007_v51 = vpop.permute.xlu1 %1430 }
 0x3a4   :  { %15812 = vst [vmem:[#allocation90_spill] sm:$0xff] %v9005_v13  ;;  %15813 = vst [vmem:[#allocation91_spill] sm:$0xff] %v9007_v51 }
 0x3a5   :  { %1404 = vrot.lane.b32.xlu0 %v8971_v1, %s7917_s17  ;;  %1420 = vrot.lane.b32.xlu1 %v8982_v38, %s7917_s17 }
 0x3a7   :  { %v9015_v2 = vpop.permute.xlu0 %1628  ;;  %v9017_v27 = vpop.permute.xlu1 %1186 }
 0x3a8   :  { %15815 = vst [vmem:[#allocation93_spill] sm:$0xff] %v9015_v2  ;;  %15816 = vst [vmem:[#allocation94_spill] sm:$0xff] %v9017_v27 }
 0x3a9   :  { %2126 = vrot.lane.b32.xlu0 %v8982_v38, %s7914_s15  ;;  %1452 = vrot.lane.b32.xlu1 %v9013_v21, %s7917_s17 }
 0x3ab   :  { %v9023_v16 = vpop.permute.xlu0 %1660  ;;  %v9025_v36 = vpop.permute.xlu1 %1202 }
 0x3ac   :  { %15817 = vst [vmem:[#allocation95_spill] sm:$0xff] %v9023_v16  ;;  %15818 = vst [vmem:[#allocation96_spill] sm:$0xff] %v9025_v36 }
 0x3ad   :  { %2110 = vrot.lane.b32.xlu0 %v8971_v1, %s7914_s15  ;;  %2142 = vrot.lane.b32.xlu1 %v8994_v31, %s7914_s15 }
 0x3af   :  { %v9031_v23 = vpop.permute.xlu0 %2350  ;;  %v9033_v51 = vpop.permute.xlu1 %1218 }
 0x3b0   :  { %15819 = vst [vmem:[#allocation97_spill] sm:$0xff] %v9031_v23  ;;  %15820 = vst [vmem:[#allocation98_spill] sm:$0xff] %v9033_v51 }
 0x3b1   :  { %1848 = vrot.lane.b32.xlu0 %v8982_v38, %s7915_s0  ;;  %1238 = vrot.lane.b32.xlu1 %v9013_v21, %s7919_s18 }
 0x3b3   :  { %v9039_v41 = vpop.permute.xlu0 %1400  ;;  %v9041_v16 = vpop.permute.xlu1 %1416 }
 0x3b4   :  { %15821 = vst [vmem:[#allocation99_spill] sm:$0xff] %v9041_v16 }
 0x3b5   :  { %1880 = vrot.lane.b32.xlu0 %v9013_v21, %s7915_s0  ;;  %1832 = vrot.lane.b32.xlu1 %v8971_v1, %s7915_s0 }
 0x3b7   :  { %v9047_v2 = vpop.permute.xlu0 %2122  ;;  %v9049_v23 = vpop.permute.xlu1 %1448 }
 0x3b9   :  { %2570 = vrot.lane.b32.xlu0 %v8994_v31, %s7912_s30  ;;  %2554 = vrot.lane.b32.xlu1 %v8982_v38, %s7912_s30 }
 0x3bb   :  { %v9055_v51 = vpop.permute.xlu0 %2106  ;;  %v9057_v13 = vpop.permute.xlu1 %2138 }
 0x3bc   :  { %15822 = vst [vmem:[#allocation100_spill] sm:$0xff] %v9055_v51  ;;  %15823 = vst [vmem:[#allocation101_spill] sm:$0xff] %v9057_v13 }
 0x3bd   :  { %1634 = vrot.lane.b32.xlu0 %v8982_v38, %s7916_s16  ;;  %2538 = vrot.lane.b32.xlu1 %v8971_v1, %s7912_s30 }
 0x3bf   :  { %v9063_v5 = vpop.permute.xlu0 %1844  ;;  %v9065_v50 = vpop.permute.xlu1 %1234 }
 0x3c0   :  { %15824 = vst [vmem:[#allocation102_spill] sm:$0xff] %v9063_v5  ;;  %15825 = vst [vmem:[#allocation103_spill] sm:$0xff] %v9065_v50  ;;  %v1005_v50 = vmul.f32 %v8665_v17, %v8411_v14 }
 0x3c1   :  { %1666 = vrot.lane.b32.xlu0 %v9013_v21, %s7916_s16  ;;  %1618 = vrot.lane.b32.xlu1 %v8971_v1, %s7916_s16 }
 0x3c3   :  { %v9071_v27 = vpop.permute.xlu0 %1876  ;;  %v9073_v36 = vpop.permute.xlu1 %1828 }
 0x3c4   :  { %15826 = vst [vmem:[#allocation104_spill] sm:$0xff] %v9071_v27  ;;  %15827 = vst [vmem:[#allocation105_spill] sm:$0xff] %v9073_v36  ;;  %v1077_v27 = vadd.f32 %v8685_v22, %v1005_v50 }
 0x3c5   :  { %2356 = vrot.lane.b32.xlu0 %v8994_v31, %s7913_s12  ;;  %2340 = vrot.lane.b32.xlu1 %v8982_v38, %s7913_s12 }
 0x3c6   :  { %v9104_v37 = vmax.f32 %v1077_v27, 0.0 }
 0x3c7   :  { %v9079_v40 = vpop.permute.xlu0 %2566  ;;  %v9081_v5 = vpop.permute.xlu1 %2550 }
 0x3c8   :  { %15828 = vst [vmem:[#allocation106_spill] sm:$0xff] %v9079_v40  ;;  %15829 = vst [vmem:[#allocation107_spill] sm:$0xff] %v9081_v5  ;;  %v1004_v40 = vmul.f32 %v8665_v17, %v8403_v62  ;;  %v1007_v5 = vmul.f32 %v8665_v17, %v8440_v43  ;;  %v1006_v62 = vmul.f32 %v8665_v17, %v8430_v34 }
 0x3c9   :  { %1436 = vrot.lane.b32.xlu0 %v8994_v31, %s7917_s17  ;;  %2324 = vrot.lane.b32.xlu1 %v8971_v1, %s7913_s12  ;;  %15832 = vst [vmem:[#allocation110_spill] sm:$0xff] %v9104_v37 }
 0x3ca   :  { %v1076_v14 = vadd.f32 %v8685_v22, %v1004_v40  ;;  %v1079_v50 = vadd.f32 %v8685_v22, %v1007_v5  ;;  %v1078_v43 = vadd.f32 %v8685_v22, %v1006_v62 }
 0x3cb   :  { %v9090_v36 = vpop.permute.xlu0 %1630  ;;  %v9092_v59 = vpop.permute.xlu1 %2534 }
 0x3cc   :  { %15830 = vst [vmem:[#allocation108_spill] sm:$0xff] %v9090_v36  ;;  %15831 = vst [vmem:[#allocation109_spill] sm:$0xff] %v9092_v59  ;;  %v9117_v40 = vmax.f32 %v1076_v14, 0.0  ;;  %v9119_v5 = vmax.f32 %v1079_v50, 0.0  ;;  %v9129_v34 = vmax.f32 %v1078_v43, 0.0 }
 0x3cd   :  { %2768 = vrot.lane.b32.xlu0 %v8982_v38, %s7911_s28  ;;  %2784 = vrot.lane.b32.xlu1 %v8994_v31, %s7911_s28 }
 0x3ce   :  { %15835 = vst [vmem:[#allocation113_spill] sm:$0xff] %v9117_v40  ;;  %15836 = vst [vmem:[#allocation114_spill] sm:$0xff] %v9119_v5 }
 0x3cf   :  { %v9106_v36 = vpop.permute.xlu0 %1662  ;;  %v9108_v59 = vpop.permute.xlu1 %1614  ;;  %15839 = vst [vmem:[#allocation117_spill] sm:$0xff] %v9129_v34 }
 0x3d0   :  { %15833 = vst [vmem:[#allocation111_spill] sm:$0xff] %v9106_v36  ;;  %15834 = vst [vmem:[#allocation112_spill] sm:$0xff] %v9108_v59 }
 0x3d1   :  { %2752 = vrot.lane.b32.xlu0 %v8971_v1, %s7911_s28  ;;  %1422 = vrot.lane.b32.xlu1 %v9104_v37, %s7917_s17 }
 0x3d3   :  { %v9121_v27 = vpop.permute.xlu0 %2352  ;;  %v9123_v36 = vpop.permute.xlu1 %2336 }
 0x3d4   :  { %15837 = vst [vmem:[#allocation115_spill] sm:$0xff] %v9121_v27  ;;  %15838 = vst [vmem:[#allocation116_spill] sm:$0xff] %v9123_v36 }
 0x3d5   :  { %1192 = vrot.lane.b32.xlu0 %v9117_v40, %s7919_s18  ;;  %1454 = vrot.lane.b32.xlu1 %v9119_v5, %s7917_s17 }
 0x3d7   :  { %v9131_v17 = vpop.permute.xlu0 %1432  ;;  %v9133_v59 = vpop.permute.xlu1 %2320 }
 0x3d8   :  { %15840 = vst [vmem:[#allocation118_spill] sm:$0xff] %v9131_v17  ;;  %15841 = vst [vmem:[#allocation119_spill] sm:$0xff] %v9133_v59 }
 0x3d9   :  { %1208 = vrot.lane.b32.xlu0 %v9104_v37, %s7919_s18  ;;  %2144 = vrot.lane.b32.xlu1 %v9129_v34, %s7914_s15 }
 0x3db   :  { %v9139_v22 = vpop.permute.xlu0 %2764  ;;  %v9141_v14 = vpop.permute.xlu1 %1418 }
 0x3dc   :  { %15842 = vst [vmem:[#allocation120_spill] sm:$0xff] %v9139_v22  ;;  %15843 = vst [vmem:[#allocation121_spill] sm:$0xff] %v9141_v14 }
 0x3dd   :  { %1224 = vrot.lane.b32.xlu0 %v9129_v34, %s7919_s18  ;;  %1834 = vrot.lane.b32.xlu1 %v9117_v40, %s7915_s0 }
 0x3df   :  { %v9147_v50 = vpop.permute.xlu0 %1188  ;;  %v9149_v62 = vpop.permute.xlu1 %1450 }
 0x3e0   :  { %15844 = vst [vmem:[#allocation122_spill] sm:$0xff] %v9147_v50 }
 0x3e1   :  { %1406 = vrot.lane.b32.xlu0 %v9117_v40, %s7917_s17  ;;  %2556 = vrot.lane.b32.xlu1 %v9104_v37, %s7912_s30 }
 0x3e3   :  { %v9155_v43 = vpop.permute.xlu0 %1204  ;;  %v9157_v22 = vpop.permute.xlu1 %2140 }
 0x3e4   :  { %15845 = vst [vmem:[#allocation123_spill] sm:$0xff] %v9155_v43  ;;  %15846 = vst [vmem:[#allocation124_spill] sm:$0xff] %v9157_v22 }
 0x3e5   :  { %2128 = vrot.lane.b32.xlu0 %v9104_v37, %s7914_s15  ;;  %2540 = vrot.lane.b32.xlu1 %v9117_v40, %s7912_s30 }
 0x3e7   :  { %v9163_v17 = vpop.permute.xlu0 %1220  ;;  %v9165_v59 = vpop.permute.xlu1 %1830 }
 0x3e8   :  { %15847 = vst [vmem:[#allocation125_spill] sm:$0xff] %v9163_v17  ;;  %15848 = vst [vmem:[#allocation126_spill] sm:$0xff] %v9165_v59 }
 0x3e9   :  { %2112 = vrot.lane.b32.xlu0 %v9117_v40, %s7914_s15  ;;  %1620 = vrot.lane.b32.xlu1 %v9117_v40, %s7916_s16 }
 0x3eb   :  { %v9171_v36 = vpop.permute.xlu0 %1402  ;;  %v9173_v27 = vpop.permute.xlu1 %2552 }
 0x3ec   :  { %15849 = vst [vmem:[#allocation127_spill] sm:$0xff] %v9173_v27  ;;  %v1008_v27 = vmul.f32 %v8671_v47, %v8423_v0  ;;  %v1010_v0 = vmul.f32 %v8671_v47, %v8446_v53 }
 0x3ed   :  { %1240 = vrot.lane.b32.xlu0 %v9119_v5, %s7919_s18  ;;  %2342 = vrot.lane.b32.xlu1 %v9104_v37, %s7913_s12 }
 0x3ee   :  { %v1080_v43 = vadd.f32 %v8683_v6, %v1008_v27 }
 0x3ef   :  { %v9179_v1 = vpop.permute.xlu0 %2124  ;;  %v9181_v17 = vpop.permute.xlu1 %2536 }
 0x3f0   :  { %15850 = vst [vmem:[#allocation128_spill] sm:$0xff] %v9181_v17 }
 0x3f1   :  { %1850 = vrot.lane.b32.xlu0 %v9104_v37, %s7915_s0  ;;  %2326 = vrot.lane.b32.xlu1 %v9117_v40, %s7913_s12 }
 0x3f3   :  { %v9187_v59 = vpop.permute.xlu0 %2108  ;;  %v9189_v38 = vpop.permute.xlu1 %1616 }
 0x3f4   :  { %15851 = vst [vmem:[#allocation129_spill] sm:$0xff] %v9187_v59  ;;  %15852 = vst [vmem:[#allocation130_spill] sm:$0xff] %v9189_v38  ;;  %v1009_v38 = vmul.f32 %v8671_v47, %v8432_v35 }
 0x3f5   :  { %1882 = vrot.lane.b32.xlu0 %v9119_v5, %s7915_s0  ;;  %1438 = vrot.lane.b32.xlu1 %v9129_v34, %s7917_s17 }
 0x3f7   :  { %v9197_v17 = vpop.permute.xlu0 %1236  ;;  %v9199_v50 = vpop.permute.xlu1 %2338 }
 0x3f8   :  { %15853 = vst [vmem:[#allocation131_spill] sm:$0xff] %v9197_v17  ;;  %15854 = vst [vmem:[#allocation132_spill] sm:$0xff] %v9199_v50  ;;  %v1081_v50 = vadd.f32 %v8683_v6, %v1009_v38  ;;  %v9219_v17 = vmax.f32 %v1080_v43, 0.0  ;;  %v1011_v38 = vmul.f32 %v8671_v47, %v8451_v60 }
 0x3f9   :  { %2572 = vrot.lane.b32.xlu0 %v9129_v34, %s7912_s30  ;;  %2770 = vrot.lane.b32.xlu1 %v9104_v37, %s7911_s28 }
 0x3fa   :  { %15857 = vst [vmem:[#allocation135_spill] sm:$0xff] %v9219_v17 }
 0x3fb   :  { %v9208_v4 = vpop.permute.xlu0 %1846  ;;  %v9210_v26 = vpop.permute.xlu1 %2322 }
 0x3fc   :  { %15855 = vst [vmem:[#allocation133_spill] sm:$0xff] %v9208_v4  ;;  %15856 = vst [vmem:[#allocation134_spill] sm:$0xff] %v9210_v26  ;;  %v1082_v26 = vadd.f32 %v8683_v6, %v1010_v0  ;;  %v9230_v4 = vmax.f32 %v1081_v50, 0.0  ;;  %v1083_v50 = vadd.f32 %v8683_v6, %v1011_v38 }
 0x3fd   :  { %1636 = vrot.lane.b32.xlu0 %v9104_v37, %s7916_s16  ;;  %2754 = vrot.lane.b32.xlu1 %v9117_v40, %s7911_s28  ;;  %v2925_v37 = vld [vmem:[%s15215_s5 + $0x8] sm:$0xff] }
 0x3fe   :  { %15860 = vst [vmem:[#allocation138_spill] sm:$0xff] %v9230_v4  ;;  %v9242_v43 = vmax.f32 %v1082_v26, 0.0  ;;  %v9261_v60 = vmax.f32 %v1083_v50, 0.0  ;;  %3341 = vmatprep.mubr.f32.mxu0 %v2925_v37 }
 0x3ff   :  { %v9221_v35 = vpop.permute.xlu0 %1878  ;;  %v9223_v27 = vpop.permute.xlu1 %1434 }
 0x400   :  { %15858 = vst [vmem:[#allocation136_spill] sm:$0xff] %v9221_v35  ;;  %15859 = vst [vmem:[#allocation137_spill] sm:$0xff] %v9223_v27 }
 0x401   :  { %1668 = vrot.lane.b32.xlu0 %v9119_v5, %s7916_s16  ;;  %1194 = vrot.lane.b32.xlu1 %v9219_v17, %s7919_s18  ;;  %15863 = vst [vmem:[#allocation141_spill] sm:$0xff] %v9242_v43  ;;  %15868 = vst [vmem:[#allocation146_spill] sm:$0xff] %v9261_v60 }
 0x403   :  { %v9232_v40 = vpop.permute.xlu0 %2568  ;;  %v9234_v53 = vpop.permute.xlu1 %2766 }
 0x404   :  { %15861 = vst [vmem:[#allocation139_spill] sm:$0xff] %v9232_v40  ;;  %15862 = vst [vmem:[#allocation140_spill] sm:$0xff] %v9234_v53 }
 0x405   :  { %2358 = vrot.lane.b32.xlu0 %v9129_v34, %s7913_s12  ;;  %1210 = vrot.lane.b32.xlu1 %v9230_v4, %s7919_s18 }
 0x407   :  { %v9244_v27 = vpop.permute.xlu0 %1632  ;;  %v9246_v0 = vpop.permute.xlu1 %2750 }
 0x408   :  { %15864 = vst [vmem:[#allocation142_spill] sm:$0xff] %v9244_v27  ;;  %15865 = vst [vmem:[#allocation143_spill] sm:$0xff] %v9246_v0 }
 0x409   :  { %2786 = vrot.lane.b32.xlu0 %v9129_v34, %s7911_s28  ;;  %1226 = vrot.lane.b32.xlu1 %v9242_v43, %s7919_s18 }
 0x40b   :  { %v9253_v53 = vpop.permute.xlu0 %1664  ;;  %v9255_v40 = vpop.permute.xlu1 %1190 }
 0x40c   :  { %15866 = vst [vmem:[#allocation144_spill] sm:$0xff] %v9253_v53  ;;  %15867 = vst [vmem:[#allocation145_spill] sm:$0xff] %v9255_v40 }
 0x40d   :  { %1424 = vrot.lane.b32.xlu0 %v9230_v4, %s7917_s17  ;;  %1408 = vrot.lane.b32.xlu1 %v9219_v17, %s7917_s17 }
 0x40f   :  { %v9263_v47 = vpop.permute.xlu0 %2354  ;;  %v9265_v26 = vpop.permute.xlu1 %1206 }
 0x410   :  { %15869 = vst [vmem:[#allocation147_spill] sm:$0xff] %v9263_v47  ;;  %15870 = vst [vmem:[#allocation148_spill] sm:$0xff] %v9265_v26 }
 0x411   :  { %2130 = vrot.lane.b32.xlu0 %v9230_v4, %s7914_s15  ;;  %1456 = vrot.lane.b32.xlu1 %v9261_v60, %s7917_s17 }
 0x413   :  { %v9271_v6 = vpop.permute.xlu0 %2782  ;;  %v9273_v38 = vpop.permute.xlu1 %1222 }
 0x414   :  { %15871 = vst [vmem:[#allocation149_spill] sm:$0xff] %v9271_v6  ;;  %15872 = vst [vmem:[#allocation150_spill] sm:$0xff] %v9273_v38 }
 0x415   :  { %2748 = vrot.lane.b32.xlu0 %v8729_v46, %s7911_s28  ;;  %2146 = vrot.lane.b32.xlu1 %v9242_v43, %s7914_s15 }
 0x417   :  { %v9279_v50 = vpop.permute.xlu0 %1404  ;;  %v9281_v0 = vpop.permute.xlu1 %1420 }
 0x418   :  { %15873 = vst [vmem:[#allocation151_spill] sm:$0xff] %v9281_v0 }
 0x419   :  { %2114 = vrot.lane.b32.xlu0 %v9219_v17, %s7914_s15  ;;  %2780 = vrot.lane.b32.xlu1 %v8752_v30, %s7911_s28 }
 0x41b   :  { %v9287_v47 = vpop.permute.xlu0 %2126  ;;  %v9289_v6 = vpop.permute.xlu1 %1452 }
 0x41d   :  { %2778 = vrot.lane.b32.xlu0 %v8663_v42, %s7911_s28  ;;  %2762 = vrot.lane.b32.xlu1 %v8648_v56, %s7911_s28 }
 0x41f   :  { %v9295_v38 = vpop.permute.xlu0 %2110  ;;  %v9297_v53 = vpop.permute.xlu1 %2142 }
 0x420   :  { %15874 = vst [vmem:[#allocation152_spill] sm:$0xff] %v9295_v38  ;;  %15875 = vst [vmem:[#allocation153_spill] sm:$0xff] %v9297_v53 }
 0x421   :  { %2760 = vrot.lane.b32.xlu0 %v8580_v32, %s7911_s28  ;;  %2746 = vrot.lane.b32.xlu1 %v8646_v61, %s7911_s28 }
 0x423   :  { %v9303_v27 = vpop.permute.xlu0 %1848  ;;  %v9305_v35 = vpop.permute.xlu1 %1238 }
 0x424   :  { %15876 = vst [vmem:[#allocation154_spill] sm:$0xff] %v9303_v27  ;;  %15877 = vst [vmem:[#allocation155_spill] sm:$0xff] %v9305_v35 }
 0x425   :  { %2744 = vrot.lane.b32.xlu0 %v8573_v52, %s7911_s28  ;;  %1242 = vrot.lane.b32.xlu1 %v9261_v60, %s7919_s18 }
 0x427   :  { %v9311_v56 = vpop.permute.xlu0 %1880  ;;  %v9313_v46 = vpop.permute.xlu1 %1832 }
 0x428   :  { %15878 = vst [vmem:[#allocation156_spill] sm:$0xff] %v9311_v56  ;;  %15879 = vst [vmem:[#allocation157_spill] sm:$0xff] %v9313_v46 }
 0x429   :  { %1836 = vrot.lane.b32.xlu0 %v9219_v17, %s7915_s0  ;;  %2776 = vrot.lane.b32.xlu1 %v8586_v48, %s7911_s28 }
 0x42b   :  { %v9319_v32 = vpop.permute.xlu0 %2570  ;;  %v9321_v27 = vpop.permute.xlu1 %2554 }
 0x42c   :  { %15880 = vst [vmem:[#allocation158_spill] sm:$0xff] %v9319_v32  ;;  %15881 = vst [vmem:[#allocation159_spill] sm:$0xff] %v9321_v27 }
 0x42d   :  { %1884 = vrot.lane.b32.xlu0 %v9261_v60, %s7915_s0  ;;  %1852 = vrot.lane.b32.xlu1 %v9230_v4, %s7915_s0 }
 0x42f   :  { %v9327_v52 = vpop.permute.xlu0 %1634  ;;  %v9329_v56 = vpop.permute.xlu1 %2538 }
 0x430   :  { %15882 = vst [vmem:[#allocation160_spill] sm:$0xff] %v9327_v52  ;;  %15883 = vst [vmem:[#allocation161_spill] sm:$0xff] %v9329_v56 }
 0x431   :  { %2574 = vrot.lane.b32.xlu0 %v9242_v43, %s7912_s30  ;;  %2558 = vrot.lane.b32.xlu1 %v9230_v4, %s7912_s30 }
 0x433   :  { %v9335_v46 = vpop.permute.xlu0 %1666  ;;  %v9337_v32 = vpop.permute.xlu1 %1618 }
 0x434   :  { %15884 = vst [vmem:[#allocation162_spill] sm:$0xff] %v9335_v46  ;;  %15885 = vst [vmem:[#allocation163_spill] sm:$0xff] %v9337_v32 }
 0x435   :  { %2774 = vrot.lane.b32.xlu0 %v8537_v54, %s7911_s28  ;;  %2542 = vrot.lane.b32.xlu1 %v9219_v17, %s7912_s30 }
 0x437   :  { %v9343_v27 = vpop.permute.xlu0 %2356  ;;  %v9345_v52 = vpop.permute.xlu1 %2340 }
 0x438   :  { %15886 = vst [vmem:[#allocation164_spill] sm:$0xff] %v9343_v27  ;;  %15887 = vst [vmem:[#allocation165_spill] sm:$0xff] %v9345_v52 }
 0x439   :  { %1638 = vrot.lane.b32.xlu0 %v9230_v4, %s7916_s16  ;;  %2758 = vrot.lane.b32.xlu1 %v8524_v18, %s7911_s28 }
 0x43b   :  { %v9351_v56 = vpop.permute.xlu0 %1436  ;;  %v9353_v46 = vpop.permute.xlu1 %2324 }
 0x43c   :  { %15888 = vst [vmem:[#allocation166_spill] sm:$0xff] %v9351_v56  ;;  %15889 = vst [vmem:[#allocation167_spill] sm:$0xff] %v9353_v46 }
 0x43d   :  { %1670 = vrot.lane.b32.xlu0 %v9261_v60, %s7916_s16  ;;  %1622 = vrot.lane.b32.xlu1 %v9219_v17, %s7916_s16 }
 0x43f   :  { %v9359_v32 = vpop.permute.xlu0 %2768  ;;  %v9361_v27 = vpop.permute.xlu1 %2784 }
 0x440   :  { %15890 = vst [vmem:[#allocation168_spill] sm:$0xff] %v9359_v32  ;;  %15891 = vst [vmem:[#allocation169_spill] sm:$0xff] %v9361_v27 }
 0x441   :  { %2360 = vrot.lane.b32.xlu0 %v9242_v43, %s7913_s12  ;;  %2344 = vrot.lane.b32.xlu1 %v9230_v4, %s7913_s12 }
 0x443   :  { %v9367_v52 = vpop.permute.xlu0 %2752  ;;  %v9369_v56 = vpop.permute.xlu1 %1422 }
 0x444   :  { %15892 = vst [vmem:[#allocation170_spill] sm:$0xff] %v9367_v52  ;;  %15893 = vst [vmem:[#allocation171_spill] sm:$0xff] %v9369_v56 }
 0x445   :  { %2160 = vrot.lane.b32.xlu0 %v9119_v5, %s7914_s15  ;;  %2328 = vrot.lane.b32.xlu1 %v9219_v17, %s7913_s12 }
 0x447   :  { %v9375_v46 = vpop.permute.xlu0 %1192  ;;  %v9377_v32 = vpop.permute.xlu1 %1454 }
 0x448   :  { %15894 = vst [vmem:[#allocation172_spill] sm:$0xff] %v9375_v46  ;;  %15895 = vst [vmem:[#allocation173_spill] sm:$0xff] %v9377_v32 }
 0x449   :  { %2158 = vrot.lane.b32.xlu0 %v9013_v21, %s7914_s15  ;;  %2742 = vrot.lane.b32.xlu1 %v8522_v11, %s7911_s28 }
 0x44b   :  { %v9383_v27 = vpop.permute.xlu0 %1208  ;;  %v9385_v52 = vpop.permute.xlu1 %2144 }
 0x44c   :  { %15896 = vst [vmem:[#allocation174_spill] sm:$0xff] %v9383_v27  ;;  %15897 = vst [vmem:[#allocation175_spill] sm:$0xff] %v9385_v52 }
 0x44d   :  { %2156 = vrot.lane.b32.xlu0 %v8871_v55, %s7914_s15  ;;  %1866 = vrot.lane.b32.xlu1 %v9129_v34, %s7915_s0 }
 0x44f   :  { %v9391_v18 = vpop.permute.xlu0 %1224  ;;  %v9393_v61 = vpop.permute.xlu1 %1834 }
 0x450   :  { %15898 = vst [vmem:[#allocation176_spill] sm:$0xff] %v9391_v18  ;;  %15899 = vst [vmem:[#allocation177_spill] sm:$0xff] %v9393_v61  ;;  %v2927_v18 = vld [vmem:[%s15215_s5 + $0x18] sm:$0xff] }
 0x451   :  { %2154 = vrot.lane.b32.xlu0 %v8773_v19, %s7914_s15  ;;  %1864 = vrot.lane.b32.xlu1 %v8994_v31, %s7915_s0 }
 0x452   :  { %3454 = vmatprep.mubr.f32.mxu1 %v2927_v18 }
 0x453   :  { %v9402_v11 = vpop.permute.xlu0 %1406  ;;  %v9404_v35 = vpop.permute.xlu1 %2556 }
 0x454   :  { %15900 = vst [vmem:[#allocation178_spill] sm:$0xff] %v9404_v35 }
 0x455   :  { %1440 = vrot.lane.b32.xlu0 %v9242_v43, %s7917_s17  ;;  %1862 = vrot.lane.b32.xlu1 %v8881_v49, %s7915_s0 }
 0x457   :  { %v9413_v37 = vpop.permute.xlu0 %2128  ;;  %v9415_v61 = vpop.permute.xlu1 %2540 }
 0x458   :  { %15901 = vst [vmem:[#allocation179_spill] sm:$0xff] %v9415_v61 }
 0x459   :  { %2152 = vrot.lane.b32.xlu0 %v8657_v15, %s7914_s15  ;;  %1860 = vrot.lane.b32.xlu1 %v8752_v30, %s7915_s0 }
 0x45b   :  { %v9421_v35 = vpop.permute.xlu0 %2112  ;;  %v9423_v40 = vpop.permute.xlu1 %1620 }
 0x45c   :  { %15902 = vst [vmem:[#allocation180_spill] sm:$0xff] %v9421_v35  ;;  %15903 = vst [vmem:[#allocation181_spill] sm:$0xff] %v9423_v40 }
 0x45d   :  { %2150 = vrot.lane.b32.xlu0 %v8597_v20, %s7914_s15  ;;  %1858 = vrot.lane.b32.xlu1 %v8663_v42, %s7915_s0 }
 0x45f   :  { %v9429_v18 = vpop.permute.xlu0 %1240  ;;  %v9431_v26 = vpop.permute.xlu1 %2342 }
 0x460   :  { %15904 = vst [vmem:[#allocation182_spill] sm:$0xff] %v9429_v18  ;;  %15905 = vst [vmem:[#allocation183_spill] sm:$0xff] %v9431_v26 }
 0x461   :  { %2772 = vrot.lane.b32.xlu0 %v9230_v4, %s7911_s28  ;;  %2788 = vrot.lane.b32.xlu1 %v9242_v43, %s7911_s28 }
 0x463   :  { %v9437_v61 = vpop.permute.xlu0 %1850  ;;  %v9439_v46 = vpop.permute.xlu1 %2326 }
 0x464   :  { %15906 = vst [vmem:[#allocation184_spill] sm:$0xff] %v9437_v61  ;;  %15907 = vst [vmem:[#allocation185_spill] sm:$0xff] %v9439_v46 }
 0x465   :  { %2756 = vrot.lane.b32.xlu0 %v9219_v17, %s7911_s28  ;;  %1856 = vrot.lane.b32.xlu1 %v8586_v48, %s7915_s0  ;;  %v7737_v17 = vld [vmem:[%s15211_s1 + $0x14] sm:$0xf] }
 0x467   :  { %v9445_v40 = vpop.permute.xlu0 %1882  ;;  %v9447_v18 = vpop.permute.xlu1 %1438 }
 0x468   :  { %15908 = vst [vmem:[#allocation186_spill] sm:$0xff] %v9445_v40  ;;  %15909 = vst [vmem:[#allocation187_spill] sm:$0xff] %v9447_v18 }
 0x469   :  { %2148 = vrot.lane.b32.xlu0 %v8531_v3, %s7914_s15  ;;  %1854 = vrot.lane.b32.xlu1 %v8537_v54, %s7915_s0 }
 0x46b   :  { %v9453_v26 = vpop.permute.xlu0 %2572  ;;  %v9455_v61 = vpop.permute.xlu1 %2770 }
 0x46c   :  { %15910 = vst [vmem:[#allocation188_spill] sm:$0xff] %v9453_v26  ;;  %15911 = vst [vmem:[#allocation189_spill] sm:$0xff] %v9455_v61 }
 0x46d   :  { %1650 = vrot.lane.b32.xlu0 %v8994_v31, %s7916_s16  ;;  %1652 = vrot.lane.b32.xlu1 %v9129_v34, %s7916_s16 }
 0x46f   :  { %v9461_v46 = vpop.permute.xlu0 %1636  ;;  %v9463_v40 = vpop.permute.xlu1 %2754 }
 0x470   :  { %15912 = vst [vmem:[#allocation190_spill] sm:$0xff] %v9461_v46  ;;  %15913 = vst [vmem:[#allocation191_spill] sm:$0xff] %v9463_v40  ;;  %v9492_v40 = vld [vmem:[%s15211_s1 + $0x4] sm:$0xf] }
 0x471   :  { %1646 = vrot.lane.b32.xlu0 %v8752_v30, %s7916_s16  ;;  %1648 = vrot.lane.b32.xlu1 %v8881_v49, %s7916_s16  ;;  %15918 = vst [vmem:[#allocation196_spill] sm:$0xff] %v9492_v40 }
 0x473   :  { %v9469_v18 = vpop.permute.xlu0 %1668  ;;  %v9471_v26 = vpop.permute.xlu1 %1194 }
 0x474   :  { %15914 = vst [vmem:[#allocation192_spill] sm:$0xff] %v9469_v18 }
 0x475   :  { %2162 = vrot.lane.b32.xlu0 %v9261_v60, %s7914_s15  ;;  %1868 = vrot.lane.b32.xlu1 %v9242_v43, %s7915_s0 }
 0x477   :  { %v9477_v31 = vpop.permute.xlu0 %2358  ;;  %v9479_v34 = vpop.permute.xlu1 %1210 }
 0x478   :  { %15915 = vst [vmem:[#allocation193_spill] sm:$0xff] %v9477_v31  ;;  %v9517_v31 = vrot.slane %v9492_v40, %v8074_v9 }
 0x479   :  { %1642 = vrot.lane.b32.xlu0 %v8586_v48, %s7916_s16  ;;  %1644 = vrot.lane.b32.xlu1 %v8663_v42, %s7916_s16  ;;  %v9502_v42 = vrot.slane %v9492_v40, %v8072_v8 }
 0x47b   :  { %v9485_v30 = vpop.permute.xlu0 %2786  ;;  %v9487_v49 = vpop.permute.xlu1 %1226 }
 0x47c   :  { %15916 = vst [vmem:[#allocation194_spill] sm:$0xff] %v9485_v30  ;;  %15917 = vst [vmem:[#allocation195_spill] sm:$0xff] %v9487_v49 }
 0x47d   :  { %2586 = vrot.lane.b32.xlu0 %v9013_v21, %s7912_s30  ;;  %1640 = vrot.lane.b32.xlu1 %v8537_v54, %s7916_s16  ;;  %v1276_v54 = vld [vmem:[%s15211_s1] sm:$0xf] }
 0x47e   :  { %v9546_v4 = vrot.slane %v1276_v54, %v8074_v9 }
 0x47f   :  { %v9498_v61 = vpop.permute.xlu0 %1424  ;;  %v1409_v48 = vpop.permute.xlu1 %1408 }
 0x480   :  { %15919 = vst [vmem:[#allocation197_spill] sm:$0xff] %v9498_v61  ;;  %v1481_v49 = vsel %vm113_vm6, %v1409_v48, %v9498_v61  ;;  %v1480_v61 = vsel %vm113_vm6, %v9402_v11, %v9369_v56  ;;  %15922 = vst [vmem:[#allocation200_spill] sm:$0xff] %v9546_v4 }
 0x481   :  { %2582 = vrot.lane.b32.xlu0 %v8773_v19, %s7912_s30  ;;  %2588 = vrot.lane.b32.xlu1 %v9119_v5, %s7912_s30  ;;  %v1541_v30 = vmul.f32 %v9502_v42, %v1481_v49  ;;  %v9528_v49 = vld [vmem:[%s15211_s1 + $0x1c] sm:$0xf]  ;;  %v9582_v19 = vrot.slane %v7737_v17, %v8072_v8 }
 0x482   :  { %15921 = vst [vmem:[#allocation199_spill] sm:$0xff] %v9528_v49 }
 0x483   :  { %v2131_v18 = vpop.permute.xlu0 %2130  ;;  %3277 = vmatprep.subr.mxu0 %v1541_v30  ;;  %v9523_v46 = vpop.permute.xlu1 %1456  ;;  %v1488_v30 = vsel %vm113_vm6, %v9377_v32, %v9402_v11  ;;  %v9554_v11 = vrot.slane %v1276_v54, %v8072_v8  ;;  %v9566_v32 = vld [vmem:[%s15211_s1 + $0xc] sm:$0xf]  ;;  %v1487_v54 = vsel %vm113_vm6, %v9289_v6, %v9279_v50 }
 0x484   :  { %15920 = vst [vmem:[#allocation198_spill] sm:$0xff] %v9523_v46  ;;  %v1489_v40 = vsel %vm113_vm6, %v9523_v46, %v1409_v48  ;;  %v1479_v48 = vsel %vm113_vm6, %v9279_v50, %v9281_v0  ;;  %v1537_v46 = vmul.f32 %v9502_v42, %v1480_v61  ;;  %v9571_v0 = vld [vmem:[%s15211_s1 + $0x18] sm:$0xf]  ;;  %v1536_v4 = vmul.f32 %v9517_v31, %v1488_v30 }
 0x485   :  { %v1540_v56 = vmul.f32 %v9517_v31, %v1489_v40  ;;  %1654 = vrot.lane.b32.xlu0 %v9242_v43, %s7916_s16  ;;  %2584 = vrot.lane.b32.xlu1 %v8871_v55, %s7912_s30  ;;  %v9558_v40 = vrot.slane %v9528_v49, %v8074_v9  ;;  %v9561_v43 = vrot.slane %v7737_v17, %v8074_v9 }
 0x486   :  { %v9586_v55 = vrot.slane %v9566_v32, %v8074_v9  ;;  %v1478_v49 = vsel %vm113_vm6, %v9171_v36, %v9141_v14  ;;  %v1486_v17 = vsel %vm113_vm6, %v9149_v62, %v9171_v36  ;;  %v1533_v50 = vmul.f32 %v9502_v42, %v1479_v48 }
 0x487   :  { %15923 = vst [vmem:[#allocation201_spill] sm:$0xff] %v9558_v40  ;;  %v9577_v61 = vpop.permute.xlu0 %2748  ;;  %3278 = vmatpush1.msra.mxu0 %v1540_v56  ;;  %v9579_v40 = vpop.permute.xlu1 %2146  ;;  %v1477_v36 = vsel %vm113_vm6, %v9039_v41, %v9041_v16  ;;  %v1485_v48 = vsel %vm113_vm6, %v9049_v23, %v9039_v41  ;;  %v1529_v16 = vmul.f32 %v9502_v42, %v1478_v49 }
 0x488   :  { %15924 = vst [vmem:[#allocation202_spill] sm:$0xff] %v9577_v61  ;;  %15925 = vst [vmem:[#allocation203_spill] sm:$0xff] %v9579_v40  ;;  %v2179_v56 = vsel %vm265_vm3, %v2131_v18, %v9579_v40  ;;  %3279 = vmatprep.subr.mxu0 %v1537_v46  ;;  %v1474_v46 = vsel %vm113_vm6, %v8731_v44, %v8693_v28  ;;  %v9612_v40 = vrot.slane %v9571_v0, %v8074_v9 }
 0x489   :  { %2578 = vrot.lane.b32.xlu0 %v8597_v20, %s7912_s30  ;;  %2580 = vrot.lane.b32.xlu1 %v8657_v15, %s7912_s30  ;;  %v2247_v30 = vmul.f32 %v9582_v19, %v2179_v56  ;;  %v1532_v61 = vmul.f32 %v9517_v31, %v1487_v54  ;;  %v2178_v56 = vsel %vm265_vm3, %v9413_v37, %v9385_v52 }
 0x48a   :  { %3280 = vmatpush1.msra.mxu0 %v1536_v4  ;;  %v1475_v4 = vsel %vm113_vm6, %v8815_v58, %v8817_v10  ;;  %v1476_v41 = vsel %vm113_vm6, %v8939_v24, %v8917_v63  ;;  %v1528_v54 = vmul.f32 %v9517_v31, %v1486_v17  ;;  %v1484_v49 = vsel %vm113_vm6, %v8925_v57, %v8939_v24 }
 0x48b   :  { %3281 = vmatprep.subr.mxu0 %v1533_v50  ;;  %v9627_v28 = vpop.permute.xlu0 %2114  ;;  %3390 = vmatprep.subr.mxu1 %v2247_v30  ;;  %v9629_v14 = vpop.permute.xlu1 %2780  ;;  %v1525_v52 = vmul.f32 %v9502_v42, %v1477_v36  ;;  %v1524_v17 = vmul.f32 %v9517_v31, %v1485_v48  ;;  %v2243_v24 = vmul.f32 %v9582_v19, %v2178_v56 }
 0x48c   :  { %15926 = vst [vmem:[#allocation204_spill] sm:$0xff] %v9627_v28  ;;  %15927 = vst [vmem:[#allocation205_spill] sm:$0xff] %v9629_v14  ;;  %v2187_v50 = vsel %vm265_vm3, %v9627_v28, %v2131_v18  ;;  %3282 = vmatpush1.msra.mxu0 %v1532_v61  ;;  %v2186_v18 = vsel %vm265_vm3, %v9421_v35, %v9413_v37  ;;  %v2177_v61 = vsel %vm265_vm3, %v9287_v47, %v9297_v53  ;;  %v15960_v35 = vld [vmem:[#allocation138_spill] sm:$0xff]  ;;  %v16013_v14 = vld [vmem:[#allocation156_spill] sm:$0xff] }
 0x48d   :  { %v2246_v30 = vmul.f32 %v9561_v43, %v2187_v50  ;;  %3283 = vmatprep.subr.mxu0 %v1529_v16  ;;  %2590 = vrot.lane.b32.xlu0 %v9261_v60, %s7912_s30  ;;  %v1483_v16 = vsel %vm113_vm6, %v8825_v12, %v8815_v58  ;;  %v1521_v48 = vmul.f32 %v9502_v42, %v1476_v41 }
 0x48e   :  { %2576 = vrot.lane.b32.xlu1 %v8531_v3, %s7912_s30  ;;  %3284 = vmatpush1.msra.mxu0 %v1528_v54  ;;  %v1482_v56 = vsel %vm113_vm6, %v8701_v45, %v8731_v44  ;;  %v1520_v58 = vmul.f32 %v9517_v31, %v1484_v49  ;;  %v2185_v54 = vsel %vm265_vm3, %v9295_v38, %v9287_v47  ;;  %v15958_v38 = vld [vmem:[#allocation96_spill] sm:$0xff] }
 0x48f   :  { %3285 = vmatprep.subr.mxu0 %v1525_v52  ;;  %v9668_v36 = vpop.permute.xlu0 %2778  ;;  %3391 = vmatpush1.msra.mxu1 %v2246_v30  ;;  %v9670_v37 = vpop.permute.xlu1 %2762  ;;  %v2176_v52 = vsel %vm265_vm3, %v9179_v1, %v9157_v22  ;;  %v2242_v41 = vmul.f32 %v9561_v43, %v2186_v18  ;;  %v1517_v44 = vmul.f32 %v9502_v42, %v1475_v4  ;;  %v15951_v22 = vld [vmem:[#allocation30_spill] sm:$0xff] }
 0x490   :  { %15928 = vst [vmem:[#allocation206_spill] sm:$0xff] %v9668_v36  ;;  %15929 = vst [vmem:[#allocation207_spill] sm:$0xff] %v9670_v37  ;;  %3286 = vmatpush1.msra.mxu0 %v1524_v17  ;;  %3392 = vmatprep.subr.mxu1 %v2243_v24  ;;  %v1516_v50 = vmul.f32 %v9517_v31, %v1483_v16  ;;  %v2239_v47 = vmul.f32 %v9582_v19, %v2177_v61  ;;  %v15984_v37 = vld [vmem:[#allocation59_spill] sm:$0xff]  ;;  %v15985_v36 = vld [vmem:[#allocation58_spill] sm:$0xff] }
 0x491   :  { %3287 = vmatprep.subr.mxu0 %v1521_v48  ;;  %2376 = vrot.lane.b32.xlu0 %v9261_v60, %s7913_s12  ;;  %v1513_v49 = vmul.f32 %v9502_v42, %v1474_v46  ;;  %v2184_v30 = vsel %vm265_vm3, %v9187_v59, %v9179_v1  ;;  %v2238_v17 = vmul.f32 %v9561_v43, %v2185_v54  ;;  %v7735_v42 = vld [vmem:[%s15211_s1 + $0x8] sm:$0xf] }
 0x492   :  { %2374 = vrot.lane.b32.xlu1 %v9119_v5, %s7913_s12  ;;  %3288 = vmatpush1.msra.mxu0 %v1520_v58  ;;  %v1267_v4 = vsel %vm66_vm7, %v9471_v26, %v9479_v34  ;;  %v2175_v1 = vsel %vm265_vm3, %v9047_v2, %v9057_v13  ;;  %v2235_v46 = vmul.f32 %v9582_v19, %v2176_v52  ;;  %v15948_v13 = vld [vmem:[#allocation155_spill] sm:$0xff] }
 0x493   :  { %3393 = vmatpush1.msra.mxu1 %v2242_v41  ;;  %3289 = vmatprep.subr.mxu0 %v1517_v44  ;;  %v9704_v18 = vpop.permute.xlu0 %2760  ;;  %v9706_v24 = vpop.permute.xlu1 %2746  ;;  %v9718_v16 = vrot.slane %v9566_v32, %v8072_v8  ;;  %v1512_v61 = vmul.f32 %v9517_v31, %v1482_v56  ;;  %v9722_v48 = vrot.slane %v7735_v42, %v8074_v9  ;;  %v15932_v56 = vld [vmem:[#allocation79_spill] sm:$0xff] }
 0x494   :  { %15930 = vst [vmem:[#allocation208_spill] sm:$0xff] %v9704_v18  ;;  %15931 = vst [vmem:[#allocation209_spill] sm:$0xff] %v9706_v24  ;;  %3394 = vmatprep.subr.mxu1 %v2239_v47  ;;  %3290 = vmatpush1.msra.mxu0 %v1516_v50  ;;  %v2183_v58 = vsel %vm265_vm3, %v9055_v51, %v9047_v2  ;;  %v2174_v54 = vsel %vm265_vm3, %v8949_v39, %v8933_v25  ;;  %v15950_v51 = vld [vmem:[#allocation122_spill] sm:$0xff]  ;;  %v15976_v24 = vld [vmem:[#allocation84_spill] sm:$0xff] }
 0x495   :  { %3395 = vmatpush1.msra.mxu1 %v2238_v17  ;;  %3291 = vmatprep.subr.mxu0 %v1513_v49  ;;  %v2234_v32 = vmul.f32 %v9561_v43, %v2184_v30  ;;  %v1327_v31 = vmul.f32 %v9554_v11, %v1267_v4  ;;  %v2173_v2 = vsel %vm265_vm3, %v8823_v29, %v8833_v33  ;;  %v15934_v49 = vld [vmem:[#allocation172_spill] sm:$0xff]  ;;  %v15935_v17 = vld [vmem:[#allocation53_spill] sm:$0xff] }
 0x496   :  { %3396 = vmatprep.subr.mxu1 %v2235_v46  ;;  %2804 = vrot.lane.b32.xlu0 %v9261_v60, %s7911_s28  ;;  %v2182_v52 = vsel %vm265_vm3, %v15932_v56, %v8949_v39  ;;  %v2231_v41 = vmul.f32 %v9582_v19, %v2175_v1  ;;  %v2230_v47 = vmul.f32 %v9561_v43, %v2183_v58  ;;  %v15936_v1 = vld [vmem:[#allocation200_spill] sm:$0xff]  ;;  %v15937_v58 = vld [vmem:[#allocation199_spill] sm:$0xff] }
 0x497   :  { %2372 = vrot.lane.b32.xlu1 %v9013_v21, %s7913_s12  ;;  %3292 = vmatpush1.msra.mxu0 %v1512_v61  ;;  %v9747_v44 = vpop.permute.xlu0 %2744  ;;  %v9749_v50 = vpop.permute.xlu1 %1242  ;;  %v1266_v30 = vsel %vm66_vm7, %v15934_v49, %v9383_v27  ;;  %v2181_v4 = vsel %vm265_vm3, %v15935_v17, %v8823_v29  ;;  %v2227_v61 = vmul.f32 %v9582_v19, %v2174_v54  ;;  %v15941_v54 = vld [vmem:[#allocation182_spill] sm:$0xff]  ;;  %v16025_v27 = vld [vmem:[#allocation139_spill] sm:$0xff] }
 0x498   :  { %15933 = vst [vmem:[#allocation210_spill] sm:$0xff] %v9747_v44  ;;  %3397 = vmatpush1.msra.mxu1 %v2234_v32  ;;  %3293 = vmatprep.subr.mxu0 %v1327_v31  ;;  %v1275_v39 = vsel %vm66_vm7, %v9749_v50, %v9471_v26  ;;  %v9768_v60 = vrot.slane %v15937_v58, %v8072_v8  ;;  %v15938_v32 = vld [vmem:[#allocation29_spill] sm:$0xff]  ;;  %v15939_v31 = vld [vmem:[#allocation35_spill] sm:$0xff]  ;;  %v15940_v26 = vld [vmem:[#allocation38_spill] sm:$0xff] }
 0x499   :  { %3398 = vmatprep.subr.mxu1 %v2231_v41  ;;  %v1326_v46 = vmul.f32 %v15936_v1, %v1275_v39  ;;  %v2172_v33 = vsel %vm265_vm3, %v15939_v31, %v15938_v32  ;;  %v2180_v25 = vsel %vm265_vm3, %v15940_v26, %v15939_v31  ;;  %v2226_v29 = vmul.f32 %v9561_v43, %v2182_v52  ;;  %v15942_v39 = vld [vmem:[#allocation61_spill] sm:$0xff]  ;;  %v15964_v44 = vld [vmem:[#allocation135_spill] sm:$0xff] }
 0x49a   :  { %3399 = vmatpush1.msra.mxu1 %v2230_v47  ;;  %2802 = vrot.lane.b32.xlu0 %v9119_v5, %s7911_s28  ;;  %v1274_v41 = vsel %vm66_vm7, %v15941_v54, %v15934_v49  ;;  %v2223_v58 = vmul.f32 %v9582_v19, %v2173_v2  ;;  %v1323_v52 = vmul.f32 %v9554_v11, %v1266_v30  ;;  %v15944_v5 = vld [vmem:[#allocation148_spill] sm:$0xff]  ;;  %v15945_v26 = vld [vmem:[#allocation145_spill] sm:$0xff] }
 0x49b   :  { %3400 = vmatprep.subr.mxu1 %v2227_v61  ;;  %2370 = vrot.lane.b32.xlu1 %v15942_v39, %s7913_s12  ;;  %v9788_v32 = vpop.permute.xlu0 %1836  ;;  %v9790_v31 = vpop.permute.xlu1 %2776  ;;  %v2222_v47 = vmul.f32 %v9561_v43, %v2181_v4  ;;  %v1265_v17 = vsel %vm66_vm7, %v15945_v26, %v15944_v5  ;;  %v9799_v49 = vrot.slane %v7735_v42, %v8072_v8  ;;  %v15946_v61 = vld [vmem:[#allocation27_spill] sm:$0xff]  ;;  %v15947_v2 = vld [vmem:[#allocation25_spill] sm:$0xff] }
 0x49c   :  { %15943 = vst [vmem:[#allocation172_spill] sm:$0xff] %v9790_v31  ;;  %3401 = vmatpush1.msra.mxu1 %v2226_v29  ;;  %3294 = vmatpush1.msra.mxu0 %v1326_v46  ;;  %v1260_v56 = vsel %vm66_vm7, %v15947_v2, %v15946_v61  ;;  %v1273_v30 = vsel %vm66_vm7, %v15948_v13, %v15945_v26  ;;  %v15949_v46 = vld [vmem:[#allocation123_spill] sm:$0xff]  ;;  %v15968_v31 = vld [vmem:[#allocation110_spill] sm:$0xff]  ;;  %v16009_v5 = vld [vmem:[#allocation157_spill] sm:$0xff] }
 0x49d   :  { %3402 = vmatprep.subr.mxu1 %v2223_v58  ;;  %3295 = vmatprep.subr.mxu0 %v1323_v52  ;;  %v2219_v4 = vmul.f32 %v9582_v19, %v2172_v33  ;;  %v2218_v29 = vmul.f32 %v9561_v43, %v2180_v25  ;;  %v1264_v42 = vsel %vm66_vm7, %v15950_v51, %v15949_v46  ;;  %v15952_v33 = vld [vmem:[#allocation42_spill] sm:$0xff]  ;;  %v15955_v58 = vld [vmem:[#allocation131_spill] sm:$0xff]  ;;  %v16016_v13 = vld [vmem:[#allocation188_spill] sm:$0xff] }
 0x49e   :  { %v1322_v59 = vmul.f32 %v15936_v1, %v1274_v41  ;;  %3403 = vmatpush1.msra.mxu1 %v2222_v47  ;;  %2800 = vrot.lane.b32.xlu0 %v9013_v21, %s7911_s28  ;;  %v1268_v26 = vsel %vm66_vm7, %v15951_v22, %v15947_v2  ;;  %v1319_v19 = vmul.f32 %v9554_v11, %v1265_v17  ;;  %v15956_v17 = vld [vmem:[#allocation33_spill] sm:$0xff]  ;;  %v16017_v22 = vld [vmem:[#allocation178_spill] sm:$0xff] }
 0x49f   :  { %3404 = vmatprep.subr.mxu1 %v2219_v4  ;;  %2368 = vrot.lane.b32.xlu1 %v15952_v33, %s7913_s12  ;;  %v9825_v25 = vpop.permute.xlu0 %1884  ;;  %v9827_v43 = vpop.permute.xlu1 %1852  ;;  %v9831_v41 = vrot.slane %v9571_v0, %v8072_v8  ;;  %v1272_v52 = vsel %vm66_vm7, %v15955_v58, %v15950_v51  ;;  %v1318_v47 = vmul.f32 %v15936_v1, %v1273_v30  ;;  %v15957_v4 = vld [vmem:[#allocation36_spill] sm:$0xff]  ;;  %v15959_v0 = vld [vmem:[#allocation94_spill] sm:$0xff]  ;;  %v15962_v30 = vld [vmem:[#allocation31_spill] sm:$0xff] }
 0x4a0   :  { %15953 = vst [vmem:[#allocation200_spill] sm:$0xff] %v9825_v25  ;;  %15954 = vst [vmem:[#allocation199_spill] sm:$0xff] %v9827_v43  ;;  %3296 = vmatpush1.msra.mxu0 %v1322_v59  ;;  %3405 = vmatpush1.msra.mxu1 %v2218_v29  ;;  %v9839_v2 = vmul.f32 %v9554_v11, %v1260_v56  ;;  %v2608_v21 = vsel %vm361_vm1, %v15957_v4, %v15956_v17  ;;  %v15961_v56 = vld [vmem:[#allocation40_spill] sm:$0xff]  ;;  %v15963_v4 = vld [vmem:[#allocation103_spill] sm:$0xff] }
 0x4a1   :  { %v1263_v53 = vsel %vm66_vm7, %v15959_v0, %v15958_v38  ;;  %3297 = vmatprep.subr.mxu0 %v1319_v19  ;;  %3406 = vmatprep.subr.mxu1 %v15960_v35  ;;  %v1315_v51 = vmul.f32 %v9554_v11, %v1264_v42  ;;  %v9852_v59 = vmul.f32 %v15936_v1, %v1268_v26  ;;  %v15965_v19 = vld [vmem:[#allocation43_spill] sm:$0xff]  ;;  %v15966_v26 = vld [vmem:[#allocation74_spill] sm:$0xff]  ;;  %v15967_v35 = vld [vmem:[#allocation73_spill] sm:$0xff] }
 0x4a2   :  { %v1902_v29 = vsel %vm209_vm4, %v15962_v30, %v15961_v56  ;;  %v1271_v28 = vsel %vm66_vm7, %v15963_v4, %v15959_v0  ;;  %3298 = vmatpush1.msra.mxu0 %v1318_v47  ;;  %3407 = vmatpush1.msra.mxu1 %v15964_v44  ;;  %v1910_v42 = vsel %vm209_vm4, %v15965_v19, %v15962_v30  ;;  %v15970_v0 = vld [vmem:[#allocation201_spill] sm:$0xff]  ;;  %v15989_v58 = vld [vmem:[#allocation66_spill] sm:$0xff] }
 0x4a3   :  { %v1262_v18 = vsel %vm66_vm7, %v15967_v35, %v15966_v26  ;;  %v1314_v56 = vmul.f32 %v15936_v1, %v1272_v52  ;;  %3299 = vmatprep.subr.mxu0 %v1315_v51  ;;  %3408 = vmatprep.subr.mxu1 %v15968_v31  ;;  %v9873_v38 = vpop.permute.xlu0 %2574  ;;  %v9875_v47 = vpop.permute.xlu1 %2558  ;;  %v9878_v44 = vmul.f32 %v15970_v0, %v2608_v21  ;;  %v15971_v4 = vld [vmem:[#allocation45_spill] sm:$0xff]  ;;  %v15972_v51 = vld [vmem:[#allocation82_spill] sm:$0xff]  ;;  %v15975_v26 = vld [vmem:[#allocation48_spill] sm:$0xff] }
 0x4a4   :  { %15969 = vst [vmem:[#allocation35_spill] sm:$0xff] %v9873_v38  ;;  %v2600_v30 = vsel %vm361_vm1, %v15956_v17, %v15971_v4  ;;  %2798 = vrot.lane.b32.xlu0 %v15942_v39, %s7911_s28  ;;  %2366 = vrot.lane.b32.xlu1 %v8657_v15, %s7913_s12  ;;  %v1311_v52 = vmul.f32 %v9554_v11, %v1263_v53  ;;  %v15973_v19 = vld [vmem:[#allocation113_spill] sm:$0xff]  ;;  %v15974_v39 = vld [vmem:[#allocation50_spill] sm:$0xff] }
 0x4a5   :  { %v1270_v31 = vsel %vm66_vm7, %v15972_v51, %v15967_v35  ;;  %v1310_v21 = vmul.f32 %v15936_v1, %v1271_v28  ;;  %3300 = vmatpush1.msra.mxu0 %v1314_v56  ;;  %3409 = vmatpush1.msra.mxu1 %v15973_v19  ;;  %v9896_v17 = vmul.f32 %v9718_v16, %v1902_v29  ;;  %v15977_v28 = vld [vmem:[#allocation47_spill] sm:$0xff]  ;;  %v15979_v29 = vld [vmem:[#allocation56_spill] sm:$0xff]  ;;  %v15980_v51 = vld [vmem:[#allocation81_spill] sm:$0xff] }
 0x4a6   :  { %v9899_v4 = vmul.f32 %v9586_v55, %v1910_v42  ;;  %v1261_v53 = vsel %vm66_vm7, %v15975_v26, %v15974_v39  ;;  %3301 = vmatprep.subr.mxu0 %v1311_v52  ;;  %3410 = vmatprep.subr.mxu1 %v15976_v24  ;;  %v1307_v35 = vmul.f32 %v9554_v11, %v1262_v18  ;;  %v15978_v56 = vld [vmem:[#allocation39_spill] sm:$0xff] }
 0x4a7   :  { %v9911_v19 = vsel %vm161_vm5, %v15978_v56, %v15977_v28  ;;  %v1269_v42 = vsel %vm66_vm7, %v15979_v29, %v15975_v26  ;;  %3302 = vmatpush1.msra.mxu0 %v1310_v21  ;;  %3411 = vmatpush1.msra.mxu1 %v15980_v51  ;;  %v9918_v46 = vpop.permute.xlu0 %2774  ;;  %v9920_v52 = vpop.permute.xlu1 %2542  ;;  %v9923_v18 = vmul.f32 %v9768_v60, %v2600_v30  ;;  %v15983_v24 = vld [vmem:[#allocation55_spill] sm:$0xff]  ;;  %v15986_v51 = vld [vmem:[#allocation57_spill] sm:$0xff]  ;;  %v15987_v29 = vld [vmem:[#allocation62_spill] sm:$0xff] }
 0x4a8   :  { %15981 = vst [vmem:[#allocation182_spill] sm:$0xff] %v9918_v46  ;;  %15982 = vst [vmem:[#allocation145_spill] sm:$0xff] %v9920_v52  ;;  %v1903_v28 = vsel %vm209_vm4, %v15984_v37, %v15983_v24  ;;  %v1911_v26 = vsel %vm209_vm4, %v15985_v36, %v15984_v37  ;;  %v1306_v21 = vmul.f32 %v15936_v1, %v1270_v31  ;;  %3303 = vmatprep.subr.mxu0 %v1307_v35  ;;  %v15988_v46 = vld [vmem:[#allocation63_spill] sm:$0xff]  ;;  %v15990_v31 = vld [vmem:[#allocation49_spill] sm:$0xff] }
 0x4a9   :  { %3412 = vmatprep.subr.mxu1 %v15986_v51  ;;  %v2601_v30 = vsel %vm361_vm1, %v15988_v46, %v15987_v29  ;;  %v2609_v24 = vsel %vm361_vm1, %v15989_v58, %v15988_v46  ;;  %2796 = vrot.lane.b32.xlu0 %v15952_v33, %s7911_s28  ;;  %v1303_v37 = vmul.f32 %v9554_v11, %v1261_v53  ;;  %v15991_v29 = vld [vmem:[#allocation85_spill] sm:$0xff]  ;;  %v15993_v58 = vld [vmem:[#allocation60_spill] sm:$0xff]  ;;  %v15994_v53 = vld [vmem:[#allocation34_spill] sm:$0xff] }
 0x4aa   :  { %2364 = vrot.lane.b32.xlu1 %v8597_v20, %s7913_s12  ;;  %v9952_v35 = vsel %vm161_vm5, %v15990_v31, %v15978_v56  ;;  %v1302_v51 = vmul.f32 %v15936_v1, %v1269_v42  ;;  %v15992_v36 = vld [vmem:[#allocation77_spill] sm:$0xff]  ;;  %3304 = vmatpush1.msra.mxu0 %v1306_v21  ;;  %v9961_v33 = vmul.f32 %v9586_v55, %v1911_v26  ;;  %v15998_v31 = vld [vmem:[#allocation80_spill] sm:$0xff] }
 0x4ab   :  { %v1904_v46 = vsel %vm209_vm4, %v15992_v36, %v15991_v29  ;;  %3413 = vmatpush1.msra.mxu1 %v15993_v58  ;;  %v1909_v11 = vsel %vm209_vm4, %v9788_v32, %v9827_v43  ;;  %3305 = vmatprep.subr.mxu0 %v1303_v37  ;;  %v9968_v1 = vpop.permute.xlu0 %1638  ;;  %v9970_v56 = vpop.permute.xlu1 %2758  ;;  %v9973_v42 = vmul.f32 %v9718_v16, %v1903_v28  ;;  %v15996_v58 = vld [vmem:[#allocation32_spill] sm:$0xff] }
 0x4ac   :  { %3414 = vmatprep.subr.mxu1 %v15994_v53  ;;  %15995 = vst [vmem:[#allocation27_spill] sm:$0xff] %v9970_v56  ;;  %v9976_v21 = vmul.f32 %v15970_v0, %v2609_v24  ;;  %v1917_v26 = vsel %vm209_vm4, %v9825_v25, %v9788_v32  ;;  %3306 = vmatpush1.msra.mxu0 %v1302_v51  ;;  %v15997_v53 = vld [vmem:[#allocation78_spill] sm:$0xff]  ;;  %v15999_v29 = vld [vmem:[#allocation184_spill] sm:$0xff]  ;;  %v16000_v24 = vld [vmem:[#allocation177_spill] sm:$0xff] }
 0x4ad   :  { %3415 = vmatpush1.msra.mxu1 %v15996_v58  ;;  %v9984_v37 = vmul.f32 %v9768_v60, %v2601_v30  ;;  %v9990_v28 = vsel %vm361_vm1, %v15998_v31, %v15997_v53  ;;  %v1908_v43 = vsel %vm209_vm4, %v16000_v24, %v15999_v29  ;;  %3307 = vmatprep.subr.mxu0 %v9839_v2  ;;  %v16001_v32 = vld [vmem:[#allocation22_spill] sm:$0xff]  ;;  %v16002_v30 = vld [vmem:[#allocation88_spill] sm:$0xff]  ;;  %v16004_v25 = vld [vmem:[#allocation105_spill] sm:$0xff] }
 0x4ae   :  { %3416 = vmatprep.subr.mxu1 %v16001_v32  ;;  %v9999_v51 = vmul.f32 %v9718_v16, %v1904_v46  ;;  %v10005_v58 = vsel %vm209_vm4, %v16002_v30, %v15992_v36  ;;  %v16003_v31 = vld [vmem:[#allocation102_spill] sm:$0xff]  ;;  %2794 = vrot.lane.b32.xlu0 %v8657_v15, %s7911_s28  ;;  %v1969_v2 = vmul.f32 %v9718_v16, %v1909_v11  ;;  %v16005_v46 = vld [vmem:[#allocation104_spill] sm:$0xff]  ;;  %v16007_v15 = vld [vmem:[#allocation21_spill] sm:$0xff] }
 0x4af   :  { %v1905_v56 = vsel %vm209_vm4, %v16004_v25, %v16003_v31  ;;  %2362 = vrot.lane.b32.xlu1 %v8531_v3, %s7913_s12  ;;  %v1913_v32 = vsel %vm209_vm4, %v16005_v46, %v16004_v25  ;;  %v16006_v36 = vld [vmem:[#allocation186_spill] sm:$0xff]  ;;  %v1968_v31 = vmul.f32 %v9586_v55, %v1917_v26  ;;  %3308 = vmatpush1.msra.mxu0 %v9852_v59  ;;  %v10027_v29 = vpop.permute.xlu0 %1670  ;;  %v10029_v39 = vpop.permute.xlu1 %1622 }
 0x4b0   :  { %v1916_v30 = vsel %vm209_vm4, %v16006_v36, %v16000_v24  ;;  %3417 = vmatpush1.msra.mxu1 %v16007_v15  ;;  %v16008_v11 = vld [vmem:[#allocation154_spill] sm:$0xff]  ;;  %v2607_v24 = vsel %vm361_vm1, %v9875_v47, %v9873_v38  ;;  %3309 = vmatprep.subr.mxu0 %v1969_v2  ;;  %v1965_v59 = vmul.f32 %v9718_v16, %v1908_v43  ;;  %v16011_v15 = vld [vmem:[#allocation133_spill] sm:$0xff]  ;;  %v16015_v43 = vld [vmem:[#allocation136_spill] sm:$0xff] }
 0x4b1   :  { %v1907_v25 = vsel %vm209_vm4, %v16009_v5, %v16008_v11  ;;  %v16010_v26 = vld [vmem:[#allocation18_spill] sm:$0xff]  ;;  %v1915_v11 = vsel %vm209_vm4, %v16013_v14, %v16009_v5  ;;  %v2615_v38 = vsel %vm361_vm1, %v9920_v52, %v9875_v47  ;;  %3310 = vmatpush2.msra.mxu0 %v1968_v31  ;;  %v16014_v2 = vld [vmem:[#allocation17_spill] sm:$0xff]  ;;  %v2606_v5 = vsel %vm361_vm1, %v16017_v22, %v16016_v13  ;;  %v16019_v47 = vld [vmem:[#allocation179_spill] sm:$0xff] }
 0x4b2   :  { %3418 = vmatprep.subr.mxu1 %v16010_v26  ;;  %v16012_v46 = vld [vmem:[#allocation126_spill] sm:$0xff]  ;;  %3311 = vmatprep.subr.mxu0 %v1965_v59  ;;  %v2614_v31 = vsel %vm361_vm1, %v16019_v47, %v16017_v22  ;;  %v16022_v52 = vld [vmem:[#allocation159_spill] sm:$0xff]  ;;  %v2674_v47 = vmul.f32 %v15970_v0, %v2615_v38 }
 0x4b3   :  { %v1906_v36 = vsel %vm209_vm4, %v16012_v46, %v16011_v15  ;;  %3419 = vmatpush1.msra.mxu1 %v16014_v2  ;;  %v1914_v26 = vsel %vm209_vm4, %v16015_v43, %v16012_v46  ;;  %v1964_v15 = vmul.f32 %v9586_v55, %v1916_v30  ;;  %v16018_v14 = vld [vmem:[#allocation14_spill] sm:$0xff]  ;;  %2792 = vrot.lane.b32.xlu0 %v8597_v20, %s7911_s28  ;;  %v10074_v2 = vpop.permute.xlu0 %2360  ;;  %v10076_v59 = vpop.permute.xlu1 %2344  ;;  %v16023_v20 = vld [vmem:[#allocation13_spill] sm:$0xff] }
 0x4b4   :  { %3420 = vmatprep.subr.mxu1 %v16018_v14  ;;  %2790 = vrot.lane.b32.xlu1 %v8531_v3, %s7911_s28  ;;  %v1961_v30 = vmul.f32 %v9718_v16, %v1907_v25  ;;  %v2675_v46 = vmul.f32 %v9768_v60, %v2607_v24  ;;  %16020 = vst [vmem:[#allocation25_spill] sm:$0xff] %v10074_v2  ;;  %v16021_v13 = vld [vmem:[#allocation158_spill] sm:$0xff]  ;;  %v16024_v25 = vld [vmem:[#allocation161_spill] sm:$0xff] }
 0x4b5   :  { %v1960_v14 = vmul.f32 %v9586_v55, %v1915_v11  ;;  %v2605_v22 = vsel %vm361_vm1, %v16022_v52, %v16021_v13  ;;  %3312 = vmatpush2.msra.mxu0 %v1964_v15  ;;  %3421 = vmatpush1.msra.mxu1 %v16023_v20  ;;  %v2613_v24 = vsel %vm361_vm1, %v16024_v25, %v16022_v52  ;;  %v16026_v13 = vld [vmem:[#allocation127_spill] sm:$0xff]  ;;  %v16027_v20 = vld [vmem:[#allocation128_spill] sm:$0xff] }
 0x4b6   :  { %3313 = vmatprep.subr.mxu0 %v1961_v30  ;;  %3422 = vmatprep.subr.mxu1 %v2675_v46  ;;  %v1957_v3 = vmul.f32 %v9718_v16, %v1906_v36  ;;  %v2671_v11 = vmul.f32 %v9768_v60, %v2606_v5  ;;  %v1956_v43 = vmul.f32 %v9586_v55, %v1914_v26 }
 0x4b7   :  { %v2604_v15 = vsel %vm361_vm1, %v16026_v13, %v16025_v27  ;;  %v2670_v38 = vmul.f32 %v15970_v0, %v2614_v31  ;;  %3314 = vmatpush2.msra.mxu0 %v1960_v14  ;;  %3423 = vmatpush2.msra.mxu1 %v2674_v47  ;;  %v2612_v52 = vsel %vm361_vm1, %v16027_v20, %v16026_v13  ;;  %v10103_v5 = vpop.permute.xlu0 %2160  ;;  %v10105_v30 = vpop.permute.xlu1 %2328  ;;  %v16029_v31 = vld [vmem:[#allocation106_spill] sm:$0xff]  ;;  %v16030_v14 = vld [vmem:[#allocation107_spill] sm:$0xff] }
 0x4b8   :  { %3315 = vmatprep.subr.mxu0 %v1957_v3  ;;  %3424 = vmatprep.subr.mxu1 %v2671_v11  ;;  %v1953_v36 = vmul.f32 %v9718_v16, %v1905_v56  ;;  %v2667_v26 = vmul.f32 %v9768_v60, %v2605_v22  ;;  %16028 = vst [vmem:[#allocation122_spill] sm:$0xff] %v10105_v30  ;;  %v16031_v3 = vld [vmem:[#allocation90_spill] sm:$0xff]  ;;  %v16032_v16 = vld [vmem:[#allocation109_spill] sm:$0xff]  ;;  %v16034_v11 = vld [vmem:[#allocation68_spill] sm:$0xff] }
 0x4b9   :  { %v1952_v46 = vmul.f32 %v9586_v55, %v1913_v32  ;;  %v2603_v47 = vsel %vm361_vm1, %v16030_v14, %v16029_v31  ;;  %v2666_v27 = vmul.f32 %v15970_v0, %v2613_v24  ;;  %3316 = vmatpush2.msra.mxu0 %v1956_v43  ;;  %3425 = vmatpush2.msra.mxu1 %v2670_v38  ;;  %v16033_v22 = vld [vmem:[#allocation65_spill] sm:$0xff]  ;;  %v16035_v38 = vld [vmem:[#allocation67_spill] sm:$0xff] }
 0x4ba   :  { %v2602_v13 = vsel %vm361_vm1, %v15997_v53, %v16031_v3  ;;  %v2611_v56 = vsel %vm361_vm1, %v16032_v16, %v16030_v14  ;;  %3317 = vmatprep.subr.mxu0 %v1953_v36  ;;  %3426 = vmatprep.subr.mxu1 %v2667_v26  ;;  %v2663_v32 = vmul.f32 %v9768_v60, %v2604_v15  ;;  %v16046_v16 = vld [vmem:[#allocation192_spill] sm:$0xff] }
 0x4bb   :  { %v10126_v43 = vsel %vm161_vm5, %v16034_v11, %v16033_v22  ;;  %v1948_v24 = vmul.f32 %v9586_v55, %v10005_v58  ;;  %v2662_v53 = vmul.f32 %v15970_v0, %v2612_v52  ;;  %3318 = vmatpush2.msra.mxu0 %v1952_v46  ;;  %3427 = vmatpush2.msra.mxu1 %v2666_v27  ;;  %v10141_v14 = vpop.permute.xlu0 %2158  ;;  %v10143_v55 = vpop.permute.xlu1 %2742  ;;  %v16036_v52 = vld [vmem:[#allocation93_spill] sm:$0xff]  ;;  %v16052_v22 = vld [vmem:[#allocation183_spill] sm:$0xff] }
 0x4bc   :  { %v10135_v36 = vsel %vm161_vm5, %v16035_v38, %v16034_v11  ;;  %v2654_v15 = vmul.f32 %v15970_v0, %v9990_v28  ;;  %3319 = vmatprep.subr.mxu0 %v9999_v51  ;;  %3428 = vmatprep.subr.mxu1 %v2663_v32  ;;  %v2659_v26 = vmul.f32 %v9768_v60, %v2603_v47  ;;  %v16037_v51 = vld [vmem:[#allocation83_spill] sm:$0xff] }
 0x4bd   :  { %v2658_v27 = vmul.f32 %v15970_v0, %v2611_v56  ;;  %v1695_v58 = vsel %vm161_vm5, %v10029_v39, %v9968_v1  ;;  %3320 = vmatpush2.msra.mxu0 %v1948_v24  ;;  %3429 = vmatpush2.msra.mxu1 %v2662_v53  ;;  %v2655_v28 = vmul.f32 %v9768_v60, %v2602_v13  ;;  %v16038_v47 = vld [vmem:[#allocation95_spill] sm:$0xff]  ;;  %v16039_v60 = vld [vmem:[#allocation108_spill] sm:$0xff]  ;;  %v16042_v53 = vld [vmem:[#allocation190_spill] sm:$0xff] }
 0x4be   :  { %v10155_v46 = vsel %vm161_vm5, %v16037_v51, %v16036_v52  ;;  %v10161_v0 = vsel %vm161_vm5, %v16038_v47, %v16037_v51  ;;  %v1703_v56 = vsel %vm161_vm5, %v10027_v29, %v10029_v39  ;;  %3321 = vmatprep.subr.mxu0 %v9973_v42  ;;  %3430 = vmatprep.subr.mxu1 %v2659_v26  ;;  %v16040_v13 = vld [vmem:[#allocation112_spill] sm:$0xff]  ;;  %v16041_v11 = vld [vmem:[#allocation111_spill] sm:$0xff]  ;;  %v16043_v51 = vld [vmem:[#allocation181_spill] sm:$0xff] }
 0x4bf   :  { %v1691_v32 = vsel %vm161_vm5, %v16040_v13, %v16039_v60  ;;  %v1699_v24 = vsel %vm161_vm5, %v16041_v11, %v16040_v13  ;;  %v1694_v3 = vsel %vm161_vm5, %v16043_v51, %v16042_v53  ;;  %3322 = vmatpush2.msra.mxu0 %v9961_v33  ;;  %3431 = vmatpush2.msra.mxu1 %v2658_v27  ;;  %v16044_v39 = vld [vmem:[#allocation142_spill] sm:$0xff]  ;;  %v10191_v31 = vpop.permute.xlu0 %2156  ;;  %v10193_v25 = vpop.permute.xlu1 %1866  ;;  %v16047_v33 = vld [vmem:[#allocation160_spill] sm:$0xff]  ;;  %v16048_v27 = vld [vmem:[#allocation163_spill] sm:$0xff] }
 0x4c0   :  { %v16045_v42 = vld [vmem:[#allocation130_spill] sm:$0xff]  ;;  %v1702_v20 = vsel %vm161_vm5, %v16046_v16, %v16043_v51  ;;  %3323 = vmatprep.subr.mxu0 %v9896_v17  ;;  %3432 = vmatprep.subr.mxu1 %v2655_v28  ;;  %v1755_v13 = vmul.f32 %v9799_v49, %v1695_v58  ;;  %v1693_v52 = vsel %vm161_vm5, %v16048_v27, %v16047_v33  ;;  %v16051_v47 = vld [vmem:[#allocation193_spill] sm:$0xff] }
 0x4c1   :  { %v1692_v26 = vsel %vm161_vm5, %v16045_v42, %v16044_v39  ;;  %v1754_v38 = vmul.f32 %v9722_v48, %v1703_v56  ;;  %v2393_v51 = vsel %vm313_vm2, %v10076_v59, %v10074_v2  ;;  %3324 = vmatpush2.msra.mxu0 %v9899_v4  ;;  %3433 = vmatpush2.msra.mxu1 %v2654_v15  ;;  %v16049_v17 = vld [vmem:[#allocation162_spill] sm:$0xff]  ;;  %v16050_v2 = vld [vmem:[#allocation144_spill] sm:$0xff] }
 0x4c2   :  { %v1701_v58 = vsel %vm161_vm5, %v16049_v17, %v16048_v27  ;;  %v2401_v28 = vsel %vm313_vm2, %v10105_v30, %v10076_v59  ;;  %3325 = vmatprep.subr.mxu0 %v1755_v13  ;;  %3434 = vmatprep.subr.mxu1 %v9984_v37  ;;  %v1751_v56 = vmul.f32 %v9799_v49, %v1694_v3  ;;  %v16053_v59 = vld [vmem:[#allocation185_spill] sm:$0xff] }
 0x4c3   :  { %v1700_v4 = vsel %vm161_vm5, %v16050_v2, %v16045_v42  ;;  %v1750_v15 = vmul.f32 %v9722_v48, %v1702_v20  ;;  %v2392_v27 = vsel %vm313_vm2, %v16052_v22, %v16051_v47  ;;  %3326 = vmatpush2.msra.mxu0 %v1754_v38  ;;  %3435 = vmatpush2.msra.mxu1 %v9976_v21  ;;  %v10232_v42 = vpop.permute.xlu0 %2154  ;;  %v10234_v13 = vpop.permute.xlu1 %1864  ;;  %v16054_v47 = vld [vmem:[#allocation164_spill] sm:$0xff]  ;;  %v16055_v21 = vld [vmem:[#allocation165_spill] sm:$0xff] }
 0x4c4   :  { %v2400_v37 = vsel %vm313_vm2, %v16053_v59, %v16052_v22  ;;  %3327 = vmatprep.subr.mxu0 %v1751_v56  ;;  %3436 = vmatprep.subr.mxu1 %v9923_v18  ;;  %v1747_v3 = vmul.f32 %v9799_v49, %v1693_v52  ;;  %v2461_v20 = vmul.f32 %v9831_v41, %v2393_v51  ;;  %v16056_v18 = vld [vmem:[#allocation167_spill] sm:$0xff] }
 0x4c5   :  { %v1746_v38 = vmul.f32 %v9722_v48, %v1701_v58  ;;  %v2391_v30 = vsel %vm313_vm2, %v16055_v21, %v16054_v47  ;;  %v2460_v22 = vmul.f32 %v9612_v40, %v2401_v28  ;;  %3328 = vmatpush2.msra.mxu0 %v1750_v15  ;;  %3437 = vmatpush2.msra.mxu1 %v9878_v44  ;;  %v16057_v59 = vld [vmem:[#allocation147_spill] sm:$0xff]  ;;  %v16058_v47 = vld [vmem:[#allocation132_spill] sm:$0xff]  ;;  %v16059_v15 = vld [vmem:[#allocation134_spill] sm:$0xff] }
 0x4c6   :  { %v2399_v52 = vsel %vm313_vm2, %v16056_v18, %v16055_v21  ;;  %3329 = vmatprep.subr.mxu0 %v1747_v3  ;;  %3438 = vmatprep.subr.mxu1 %v2461_v20  ;;  %v1743_v51 = vmul.f32 %v9799_v49, %v1692_v26  ;;  %v2457_v58 = vmul.f32 %v9831_v41, %v2392_v27 }
 0x4c7   :  { %v1742_v56 = vmul.f32 %v9722_v48, %v1700_v4  ;;  %v2390_v28 = vsel %vm313_vm2, %v16058_v47, %v16057_v59  ;;  %v2456_v44 = vmul.f32 %v9612_v40, %v2400_v37  ;;  %3330 = vmatpush2.msra.mxu0 %v1746_v38  ;;  %3439 = vmatpush2.msra.mxu1 %v2460_v22  ;;  %v1441_v27 = vpop.permute.xlu0 %1440  ;;  %v10261_v20 = vpop.permute.xlu1 %1862  ;;  %v16060_v59 = vld [vmem:[#allocation115_spill] sm:$0xff]  ;;  %v16061_v37 = vld [vmem:[#allocation116_spill] sm:$0xff] }
 0x4c8   :  { %v2398_v3 = vsel %vm313_vm2, %v16059_v15, %v16058_v47  ;;  %3331 = vmatprep.subr.mxu0 %v1743_v51  ;;  %3440 = vmatprep.subr.mxu1 %v2457_v58  ;;  %v1739_v26 = vmul.f32 %v9799_v49, %v1691_v32  ;;  %v2453_v4 = vmul.f32 %v9831_v41, %v2391_v30  ;;  %v16062_v47 = vld [vmem:[#allocation119_spill] sm:$0xff]  ;;  %v16063_v58 = vld [vmem:[#allocation97_spill] sm:$0xff] }
 0x4c9   :  { %v1738_v21 = vmul.f32 %v9722_v48, %v1699_v24  ;;  %v2389_v38 = vsel %vm313_vm2, %v16061_v37, %v16060_v59  ;;  %v2452_v22 = vmul.f32 %v9612_v40, %v2399_v52  ;;  %3332 = vmatpush2.msra.mxu0 %v1742_v56  ;;  %3441 = vmatpush2.msra.mxu1 %v2456_v44  ;;  %v16064_v59 = vld [vmem:[#allocation86_spill] sm:$0xff]  ;;  %v16065_v44 = vld [vmem:[#allocation89_spill] sm:$0xff] }
 0x4ca   :  { %v2397_v32 = vsel %vm313_vm2, %v16062_v47, %v16061_v37  ;;  %3333 = vmatprep.subr.mxu0 %v1739_v26  ;;  %3442 = vmatprep.subr.mxu1 %v2453_v4  ;;  %v1735_v30 = vmul.f32 %v9799_v49, %v10155_v46  ;;  %v2449_v24 = vmul.f32 %v9831_v41, %v2390_v28  ;;  %v16067_v37 = vld [vmem:[#allocation70_spill] sm:$0xff] }
 0x4cb   :  { %v1734_v51 = vmul.f32 %v9722_v48, %v10161_v0  ;;  %v2388_v52 = vsel %vm313_vm2, %v16064_v59, %v16063_v58  ;;  %v2448_v56 = vmul.f32 %v9612_v40, %v2398_v3  ;;  %3334 = vmatpush2.msra.mxu0 %v1738_v21  ;;  %3443 = vmatpush2.msra.mxu1 %v2452_v22  ;;  %v10290_v28 = vpop.permute.xlu0 %2152  ;;  %v10292_v4 = vpop.permute.xlu1 %1860  ;;  %v16066_v21 = vld [vmem:[#allocation69_spill] sm:$0xff] }
 0x4cc   :  { %v2396_v26 = vsel %vm313_vm2, %v16065_v44, %v16064_v59  ;;  %3335 = vmatprep.subr.mxu0 %v1735_v30  ;;  %3444 = vmatprep.subr.mxu1 %v2449_v24  ;;  %v1731_v46 = vmul.f32 %v9799_v49, %v10126_v43  ;;  %v2445_v0 = vmul.f32 %v9831_v41, %v2389_v38  ;;  %v16068_v43 = vld [vmem:[#allocation72_spill] sm:$0xff]  ;;  %v16070_v58 = vld [vmem:[#allocation41_spill] sm:$0xff]  ;;  %v16086_v44 = vld [vmem:[#allocation166_spill] sm:$0xff] }
 0x4cd   :  { %v1730_v3 = vmul.f32 %v9722_v48, %v10135_v36  ;;  %v2387_v22 = vsel %vm313_vm2, %v16067_v37, %v16066_v21  ;;  %v2444_v59 = vmul.f32 %v9612_v40, %v2397_v32  ;;  %3336 = vmatpush2.msra.mxu0 %v1734_v51  ;;  %3445 = vmatpush2.msra.mxu1 %v2448_v56  ;;  %v16069_v21 = vld [vmem:[#allocation51_spill] sm:$0xff]  ;;  %v10318_v56 = vld [vmem:[%s15215_s5] sm:$0xff] }
 0x4ce   :  { %v2395_v38 = vsel %vm313_vm2, %v16068_v43, %v16067_v37  ;;  %3337 = vmatprep.subr.mxu0 %v1731_v46  ;;  %3446 = vmatprep.subr.mxu1 %v2445_v0  ;;  %v1727_v30 = vmul.f32 %v9799_v49, %v9911_v19  ;;  %v2441_v36 = vmul.f32 %v9831_v41, %v2388_v52  ;;  %v16072_v49 = vld [vmem:[#allocation44_spill] sm:$0xff]  ;;  %v16074_v0 = vld [vmem:[#allocation198_spill] sm:$0xff] }
 0x4cf   :  { %v1726_v24 = vmul.f32 %v9722_v48, %v9952_v35  ;;  %v2386_v32 = vsel %vm313_vm2, %v16070_v58, %v16069_v21  ;;  %v2440_v51 = vmul.f32 %v9612_v40, %v2396_v26  ;;  %3338 = vmatpush2.msra.mxu0 %v1730_v3  ;;  %3447 = vmatpush2.msra.mxu1 %v2444_v59  ;;  %v10328_v35 = vld [vmem:[%s15215_s5 + $0x30] sm:$0xff]  ;;  %v10330_v52 = vpop.permute.xlu0 %2150  ;;  %v10332_v26 = vpop.permute.xlu1 %1858  ;;  %v16076_v59 = vld [vmem:[#allocation197_spill] sm:$0xff] }
 0x4d0   :  { %16071 = vst [vmem:[#allocation33_spill] sm:$0xff] %v10318_v56  ;;  %v2394_v19 = vsel %vm313_vm2, %v16072_v49, %v16070_v58  ;;  %3339 = vmatprep.subr.mxu0 %v1727_v30  ;;  %3448 = vmatprep.subr.mxu1 %v2441_v36  ;;  %v2437_v48 = vmul.f32 %v9831_v41, %v2387_v22  ;;  %16073 = vst [vmem:[#allocation94_spill] sm:$0xff] %v10328_v35  ;;  %v10344_v22 = vld [vmem:[%s15211_s1 + $0x20] sm:$0xf]  ;;  %v10353_v30 = vld [vmem:[%s15215_s5 + $0x28] sm:$0xff] }
 0x4d1   :  { %v2436_v46 = vmul.f32 %v9612_v40, %v2395_v38  ;;  %3340 = vmatpush2.msra.mxu0 %v1726_v24  ;;  %3449 = vmatpush2.msra.mxu1 %v2440_v51  ;;  %v1465_v58 = vsel %vm113_vm6, %v1441_v27, %v16074_v0  ;;  %v2433_v3 = vmul.f32 %v9831_v41, %v2386_v32  ;;  %v16078_v41 = vld [vmem:[#allocation11_spill] sm:$0xff]  ;;  %v16079_v36 = vld [vmem:[#allocation196_spill] sm:$0xff] }
 0x4d2   :  { %3342 = vmatmul.mubr.f32.vlgmr.msra.gmra.mxu0 %v10318_v56  ;;  %3450 = vmatprep.subr.mxu1 %v2437_v48  ;;  %v2432_v37 = vmul.f32 %v9612_v40, %v2394_v19  ;;  %16075 = vst [vmem:[#allocation31_spill] sm:$0xff] %v10344_v22  ;;  %v1473_v38 = vsel %vm113_vm6, %v16076_v59, %v1441_v27  ;;  %16077 = vst [vmem:[#allocation73_spill] sm:$0xff] %v10353_v30  ;;  %v2926_v40 = vld [vmem:[%s15215_s5 + $0x10] sm:$0xff]  ;;  %v16080_v32 = vld [vmem:[#allocation12_spill] sm:$0xff] }
 0x4d3   :  { %3451 = vmatpush2.msra.mxu1 %v2436_v46  ;;  %3347 = vmatprep.mubr.f32.mxu0 %v10328_v35  ;;  %v10360_v24 = vrot.slane %v16079_v36, %v16078_v41  ;;  %v10364_v51 = vrot.slane %v16079_v36, %v16080_v32  ;;  %v16081_v27 = vld [vmem:[#allocation173_spill] sm:$0xff]  ;;  %v16082_v19 = vld [vmem:[#allocation187_spill] sm:$0xff]  ;;  %v2773_v0 = vpop.permute.xlu0 %2772  ;;  %v10375_v59 = vpop.permute.xlu1 %2788  ;;  %v10379_v21 = vrot.slane %v10344_v22, %v8072_v8  ;;  %v16113_v35 = vld [vmem:[#allocation140_spill] sm:$0xff] }
 0x4d4   :  { %v1464_v48 = vsel %vm113_vm6, %v16082_v19, %v16081_v27  ;;  %3452 = vmatprep.subr.mxu1 %v2433_v3  ;;  %v10373_v46 = vld [vmem:[%s15215_s5 + $0x58] sm:$0xff]  ;;  %16084 = vst [vmem:[#allocation48_spill] sm:$0xff] %v10375_v59  ;;  %v2932_v27 = vld [vmem:[%s15215_s5 + $0x40] sm:$0xff]  ;;  %v2821_v43 = vsel %vm409_vm0, %v2773_v0, %v10375_v59  ;;  %v1463_v8 = vsel %vm113_vm6, %v16086_v44, %v9289_v6  ;;  %v10408_v6 = vld [vmem:[%s15215_s5 + $0x50] sm:$0xff] }
 0x4d5   :  { %16083 = vst [vmem:[#allocation201_spill] sm:$0xff] %v10373_v46  ;;  %v16085_v36 = vld [vmem:[#allocation171_spill] sm:$0xff]  ;;  %3453 = vmatpush2.msra.mxu1 %v2432_v37  ;;  %v1543_v3 = vmul.f32 %v10360_v24, %v1465_v58  ;;  %v1542_v47 = vmul.f32 %v10364_v51, %v1473_v38  ;;  %v2889_v58 = vmul.f32 %v10379_v21, %v2821_v43  ;;  %16088 = vst [vmem:[#allocation39_spill] sm:$0xff] %v10408_v6  ;;  %v16089_v38 = vld [vmem:[#allocation137_spill] sm:$0xff] }
 0x4d6   :  { %v1472_v49 = vsel %vm113_vm6, %v16085_v36, %v16082_v19  ;;  %3348 = vmatmul.mubr.f32.gmra.mxu0 %v10353_v30  ;;  %3455 = vmatmul.mubr.f32.vlgmr.msra.gmra.mxu1 %v2926_v40  ;;  %v16087_v37 = vld [vmem:[#allocation151_spill] sm:$0xff]  ;;  %v1539_v36 = vmul.f32 %v10360_v24, %v1464_v48  ;;  %v1462_v43 = vsel %vm113_vm6, %v16089_v38, %v9149_v62 }
 0x4d7   :  { %v1471_v19 = vsel %vm113_vm6, %v16087_v37, %v16086_v44  ;;  %3616 = vmatprep.subr.mxu1 %v1543_v3  ;;  %3353 = vmatprep.mubr.f32.mxu0 %v10373_v46  ;;  %v1538_v40 = vmul.f32 %v10364_v51, %v1472_v49  ;;  %v2931_v44 = vld [vmem:[%s15215_s5 + $0x38] sm:$0xff]  ;;  %v10418_v48 = vpop.permute.xlu0 %2756  ;;  %v10420_v3 = vpop.permute.xlu1 %1856  ;;  %v16091_v37 = vld [vmem:[#allocation121_spill] sm:$0xff]  ;;  %v1535_v62 = vmul.f32 %v10360_v24, %v1463_v8  ;;  %v16093_v49 = vld [vmem:[#allocation118_spill] sm:$0xff] }
 0x4d8   :  { %3617 = vmatpush1.msra.mxu1 %v1542_v47  ;;  %3460 = vmatprep.mubr.f32.mxu1 %v2932_v27  ;;  %16090 = vst [vmem:[#allocation59_spill] sm:$0xff] %v10418_v48  ;;  %v1470_v15 = vsel %vm113_vm6, %v16091_v37, %v16089_v38  ;;  %v10430_v47 = vld [vmem:[%s15215_s5 + $0x80] sm:$0xff]  ;;  %v1461_v27 = vsel %vm113_vm6, %v16093_v49, %v9049_v23  ;;  %v2937_v8 = vld [vmem:[%s15215_s5 + $0x68] sm:$0xff]  ;;  %v10449_v23 = vld [vmem:[%s15215_s5 + $0x78] sm:$0xff] }
 0x4d9   :  { %3618 = vmatprep.subr.mxu1 %v1539_v36  ;;  %16092 = vst [vmem:[#allocation63_spill] sm:$0xff] %v10430_v47  ;;  %3519 = vmatprep.subr.mxu0 %v2889_v58  ;;  %v1534_v18 = vmul.f32 %v10364_v51, %v1471_v19  ;;  %v16094_v36 = vld [vmem:[#allocation99_spill] sm:$0xff]  ;;  %v1531_v58 = vmul.f32 %v10360_v24, %v1462_v43  ;;  %16095 = vst [vmem:[#allocation77_spill] sm:$0xff] %v10449_v23 }
 0x4da   :  { %3619 = vmatpush1.msra.mxu1 %v1538_v40  ;;  %3354 = vmatmul.mubr.f32.gmra.mxu0 %v10408_v6  ;;  %v1469_v38 = vsel %vm113_vm6, %v16094_v36, %v16093_v49  ;;  %v16096_v19 = vld [vmem:[#allocation91_spill] sm:$0xff]  ;;  %v1530_v37 = vmul.f32 %v10364_v51, %v1470_v15  ;;  %v10475_v15 = vld [vmem:[%s15215_s5 + $0xa8] sm:$0xff] }
 0x4db   :  { %3461 = vmatmul.mubr.f32.gmra.mxu1 %v2931_v44  ;;  %3620 = vmatprep.subr.mxu1 %v1535_v62  ;;  %v1460_v40 = vsel %vm113_vm6, %v16096_v19, %v8925_v57  ;;  %v2936_v44 = vld [vmem:[%s15215_s5 + $0x60] sm:$0xff]  ;;  %v10460_v43 = vpop.permute.xlu0 %2148  ;;  %v10462_v62 = vpop.permute.xlu1 %1854  ;;  %v1468_v49 = vsel %vm113_vm6, %v8917_v63, %v16096_v19  ;;  %v1527_v57 = vmul.f32 %v10360_v24, %v1461_v27  ;;  %v16098_v36 = vld [vmem:[#allocation71_spill] sm:$0xff]  ;;  %v16099_v27 = vld [vmem:[#allocation46_spill] sm:$0xff] }
 0x4dc   :  { %3621 = vmatpush1.msra.mxu1 %v1534_v18  ;;  %3359 = vmatprep.mubr.f32.mxu0 %v10430_v47  ;;  %v2829_v18 = vsel %vm409_vm0, %v10418_v48, %v2773_v0  ;;  %16097 = vst [vmem:[#allocation78_spill] sm:$0xff] %v10475_v15  ;;  %v1459_v47 = vsel %vm113_vm6, %v16098_v36, %v8825_v12  ;;  %v2942_v0 = vld [vmem:[%s15215_s5 + $0x90] sm:$0xff]  ;;  %v10502_v19 = vld [vmem:[%s15215_s5 + $0xa0] sm:$0xff]  ;;  %v16104_v46 = vld [vmem:[#allocation191_spill] sm:$0xff] }
 0x4dd   :  { %3622 = vmatprep.subr.mxu1 %v1531_v58  ;;  %3466 = vmatprep.mubr.f32.mxu1 %v2937_v8  ;;  %v1526_v63 = vmul.f32 %v10364_v51, %v1469_v38  ;;  %v10484_v8 = vrot.slane %v10344_v22, %v8074_v9  ;;  %v1458_v58 = vsel %vm113_vm6, %v16099_v27, %v8701_v45  ;;  %v16101_v9 = vld [vmem:[#allocation194_spill] sm:$0xff] }
 0x4de   :  { %3623 = vmatpush1.msra.mxu1 %v1530_v37  ;;  %3360 = vmatmul.mubr.f32.gmra.mxu0 %v10449_v23  ;;  %v1467_v12 = vsel %vm113_vm6, %v8817_v10, %v16098_v36  ;;  %v1523_v38 = vmul.f32 %v10360_v24, %v1460_v40  ;;  %16100 = vst [vmem:[#allocation177_spill] sm:$0xff] %v10502_v19  ;;  %v16102_v23 = vld [vmem:[#allocation189_spill] sm:$0xff]  ;;  %v7859_v36 = vld [vmem:[%s15211_s1] sm:$0xf] }
 0x4df   :  { %3467 = vmatmul.mubr.f32.gmra.mxu1 %v2936_v44  ;;  %3624 = vmatprep.subr.mxu1 %v1527_v57  ;;  %v1522_v37 = vmul.f32 %v10364_v51, %v1468_v49  ;;  %v2820_v45 = vsel %vm409_vm0, %v16102_v23, %v16101_v9  ;;  %v2888_v6 = vmul.f32 %v10484_v8, %v2829_v18  ;;  %v2941_v10 = vld [vmem:[%s15215_s5 + $0x88] sm:$0xff]  ;;  %v10514_v40 = vpop.permute.xlu0 %1650  ;;  %v10516_v44 = vpop.permute.xlu1 %1652  ;;  %v16103_v49 = vld [vmem:[#allocation26_spill] sm:$0xff] }
 0x4e0   :  { %3625 = vmatpush1.msra.mxu1 %v1526_v63  ;;  %3365 = vmatprep.mubr.f32.mxu0 %v10475_v15  ;;  %v1466_v57 = vsel %vm113_vm6, %v16103_v49, %v16099_v27  ;;  %v1519_v18 = vmul.f32 %v10360_v24, %v1459_v47  ;;  %v10527_v63 = vrot.slane %v7859_v36, %v16080_v32  ;;  %v10540_v27 = vld [vmem:[%s15215_s5 + $0xd0] sm:$0xff] }
 0x4e1   :  { %3626 = vmatprep.subr.mxu1 %v1523_v38  ;;  %3472 = vmatprep.mubr.f32.mxu1 %v2942_v0  ;;  %v1518_v15 = vmul.f32 %v10364_v51, %v1467_v12  ;;  %v2828_v30 = vsel %vm409_vm0, %v16104_v46, %v16102_v23  ;;  %v2885_v47 = vmul.f32 %v10379_v21, %v2820_v45  ;;  %v2947_v12 = vld [vmem:[%s15215_s5 + $0xb8] sm:$0xff] }
 0x4e2   :  { %3627 = vmatpush1.msra.mxu1 %v1522_v37  ;;  %3366 = vmatmul.mubr.f32.gmra.mxu0 %v10502_v19  ;;  %v1515_v0 = vmul.f32 %v10360_v24, %v1458_v58  ;;  %16105 = vst [vmem:[#allocation105_spill] sm:$0xff] %v10540_v27  ;;  %v10546_v23 = vrot.slane %v7859_v36, %v16078_v41  ;;  %v16106_v37 = vld [vmem:[#allocation169_spill] sm:$0xff]  ;;  %v16108_v24 = vld [vmem:[#allocation195_spill] sm:$0xff]  ;;  %v16109_v36 = vld [vmem:[#allocation170_spill] sm:$0xff] }
 0x4e3   :  { %3473 = vmatmul.mubr.f32.gmra.mxu1 %v2941_v10  ;;  %3628 = vmatprep.subr.mxu1 %v1519_v18  ;;  %v1514_v38 = vmul.f32 %v10364_v51, %v1466_v57  ;;  %v16107_v10 = vld [vmem:[#allocation168_spill] sm:$0xff]  ;;  %v1251_v58 = vsel %vm66_vm7, %v16108_v24, %v9749_v50  ;;  %v10557_v49 = vpop.permute.xlu0 %1646  ;;  %v10559_v18 = vpop.permute.xlu1 %1648  ;;  %v2884_v57 = vmul.f32 %v10484_v8, %v2828_v30  ;;  %v10573_v50 = vld [vmem:[%s15215_s5 + $0xc8] sm:$0xff] }
 0x4e4   :  { %v2819_v45 = vsel %vm409_vm0, %v16107_v10, %v16106_v37  ;;  %3520 = vmatpush1.msra.mxu0 %v2888_v6  ;;  %3629 = vmatpush1.msra.mxu1 %v1518_v15  ;;  %v2827_v51 = vsel %vm409_vm0, %v16109_v36, %v16107_v10  ;;  %v1259_v19 = vsel %vm66_vm7, %v9479_v34, %v16108_v24  ;;  %v2946_v6 = vld [vmem:[%s15215_s5 + $0xb0] sm:$0xff]  ;;  %v16111_v15 = vld [vmem:[#allocation28_spill] sm:$0xff]  ;;  %v16112_v10 = vld [vmem:[#allocation149_spill] sm:$0xff] }
 0x4e5   :  { %3521 = vmatprep.subr.mxu0 %v2885_v47  ;;  %3630 = vmatprep.subr.mxu1 %v1515_v0  ;;  %16110 = vst [vmem:[#allocation157_spill] sm:$0xff] %v10573_v50  ;;  %v10582_v30 = vsel %vm66_vm7, %v15946_v61, %v16111_v15  ;;  %v2818_v34 = vsel %vm409_vm0, %v16113_v35, %v16112_v10  ;;  %v16114_v47 = vld [vmem:[#allocation176_spill] sm:$0xff]  ;;  %v16115_v24 = vld [vmem:[#allocation143_spill] sm:$0xff]  ;;  %v16116_v36 = vld [vmem:[#allocation174_spill] sm:$0xff] }
 0x4e6   :  { %v1250_v0 = vsel %vm66_vm7, %v16114_v47, %v15941_v54  ;;  %3371 = vmatprep.mubr.f32.mxu0 %v10540_v27  ;;  %3478 = vmatprep.mubr.f32.mxu1 %v2947_v12  ;;  %v2826_v37 = vsel %vm409_vm0, %v16115_v24, %v16113_v35  ;;  %v2881_v61 = vmul.f32 %v10379_v21, %v2819_v45 }
 0x4e7   :  { %3522 = vmatpush1.msra.mxu0 %v2884_v57  ;;  %3631 = vmatpush1.msra.mxu1 %v1514_v38  ;;  %v1329_v56 = vmul.f32 %v10546_v23, %v1251_v58  ;;  %v2880_v10 = vmul.f32 %v10484_v8, %v2827_v51  ;;  %v1258_v54 = vsel %vm66_vm7, %v16116_v36, %v16114_v47  ;;  %v10606_v27 = vpop.permute.xlu0 %2162  ;;  %v10608_v35 = vpop.permute.xlu1 %1868  ;;  %v16117_v38 = vld [vmem:[#allocation30_spill] sm:$0xff]  ;;  %v10626_v51 = vld [vmem:[%s15215_s5 + $0xe0] sm:$0xff] }
 0x4e8   :  { %v1328_v12 = vmul.f32 %v10527_v63, %v1259_v19  ;;  %3372 = vmatmul.mubr.f32.gmra.mxu0 %v10573_v50  ;;  %3479 = vmatmul.mubr.f32.gmra.mxu1 %v2946_v6  ;;  %v10614_v45 = vsel %vm66_vm7, %v16111_v15, %v16117_v38  ;;  %v2877_v58 = vmul.f32 %v10379_v21, %v2818_v34  ;;  %v10621_v19 = vld [vmem:[%s15215_s5 + $0xf8] sm:$0xff]  ;;  %v16121_v15 = vld [vmem:[#allocation150_spill] sm:$0xff]  ;;  %v16122_v34 = vld [vmem:[#allocation205_spill] sm:$0xff] }
 0x4e9   :  { %3523 = vmatprep.subr.mxu0 %v2881_v61  ;;  %3632 = vmatprep.subr.mxu1 %v1329_v56  ;;  %v1325_v36 = vmul.f32 %v10546_v23, %v1250_v0  ;;  %16118 = vst [vmem:[#allocation126_spill] sm:$0xff] %v10621_v19  ;;  %16119 = vst [vmem:[#allocation178_spill] sm:$0xff] %v10626_v51  ;;  %v2876_v57 = vmul.f32 %v10484_v8, %v2826_v37  ;;  %v16120_v6 = vld [vmem:[#allocation155_spill] sm:$0xff]  ;;  %v16123_v47 = vld [vmem:[#allocation120_spill] sm:$0xff] }
 0x4ea   :  { %v1249_v56 = vsel %vm66_vm7, %v16121_v15, %v16120_v6  ;;  %v2817_v0 = vsel %vm409_vm0, %v16123_v47, %v16122_v34  ;;  %3524 = vmatpush1.msra.mxu0 %v2880_v10  ;;  %3633 = vmatpush1.msra.mxu1 %v1328_v12  ;;  %v16124_v61 = vld [vmem:[#allocation148_spill] sm:$0xff]  ;;  %v1324_v50 = vmul.f32 %v10527_v63, %v1258_v54  ;;  %v16125_v37 = vld [vmem:[#allocation202_spill] sm:$0xff]  ;;  %v10654_v10 = vld [vmem:[%s15215_s5 + $0xd8] sm:$0xff] }
 0x4eb   :  { %v1257_v38 = vsel %vm66_vm7, %v16124_v61, %v16121_v15  ;;  %v2825_v24 = vsel %vm409_vm0, %v16125_v37, %v16123_v47  ;;  %3525 = vmatprep.subr.mxu0 %v2877_v58  ;;  %3634 = vmatprep.subr.mxu1 %v1325_v36  ;;  %v10649_v6 = vld [vmem:[%s15215_s5 + $0xf0] sm:$0xff]  ;;  %16127 = vst [vmem:[#allocation127_spill] sm:$0xff] %v10654_v10  ;;  %v16128_v12 = vld [vmem:[#allocation52_spill] sm:$0xff]  ;;  %v16130_v61 = vld [vmem:[#allocation131_spill] sm:$0xff]  ;;  %v10672_v9 = vpop.permute.xlu0 %1642  ;;  %v10674_v59 = vpop.permute.xlu1 %1644 }
 0x4ec   :  { %16126 = vst [vmem:[#allocation159_spill] sm:$0xff] %v10649_v6  ;;  %v16129_v15 = vld [vmem:[#allocation50_spill] sm:$0xff]  ;;  %v16131_v47 = vld [vmem:[#allocation125_spill] sm:$0xff]  ;;  %v16133_v34 = vld [vmem:[#allocation207_spill] sm:$0xff]  ;;  %3377 = vmatprep.mubr.f32.mxu0 %v10621_v19  ;;  %3484 = vmatprep.mubr.f32.mxu1 %v10626_v51  ;;  %v1321_v48 = vmul.f32 %v10546_v23, %v1249_v56  ;;  %v2872_v19 = vmul.f32 %v10484_v8, %v2825_v24 }
 0x4ed   :  { %v10660_v54 = vsel %vm66_vm7, %v16129_v15, %v16128_v12  ;;  %v1248_v58 = vsel %vm66_vm7, %v16131_v47, %v16130_v61  ;;  %v16132_v36 = vld [vmem:[#allocation206_spill] sm:$0xff]  ;;  %16134 = vst [vmem:[#allocation107_spill] sm:$0xff] %v10672_v9  ;;  %16135 = vst [vmem:[#allocation68_spill] sm:$0xff] %v10674_v59  ;;  %v16136_v15 = vld [vmem:[#allocation123_spill] sm:$0xff]  ;;  %3526 = vmatpush1.msra.mxu0 %v2876_v57  ;;  %3635 = vmatpush1.msra.mxu1 %v1324_v50 }
 0x4ee   :  { %v2816_v37 = vsel %vm409_vm0, %v16133_v34, %v16132_v36  ;;  %v1256_v46 = vsel %vm66_vm7, %v16136_v15, %v16131_v47  ;;  %v2873_v61 = vmul.f32 %v10379_v21, %v2817_v0  ;;  %v1320_v36 = vmul.f32 %v10527_v63, %v1257_v38  ;;  %v16137_v51 = vld [vmem:[#allocation209_spill] sm:$0xff]  ;;  %3378 = vmatmul.mubr.f32.gmra.mxu0 %v10649_v6  ;;  %v16138_v47 = vld [vmem:[#allocation82_spill] sm:$0xff]  ;;  %v16139_v57 = vld [vmem:[#allocation75_spill] sm:$0xff] }
 0x4ef   :  { %v2824_v59 = vsel %vm409_vm0, %v16137_v51, %v16133_v34  ;;  %3485 = vmatmul.mubr.f32.gmra.mxu1 %v10654_v10  ;;  %v1246_v50 = vsel %vm66_vm7, %v16139_v57, %v16138_v47  ;;  %3636 = vmatprep.subr.mxu1 %v1321_v48  ;;  %v2869_v56 = vmul.f32 %v10379_v21, %v2816_v37  ;;  %v10699_v0 = vld [vmem:[%s15215_s5 + $0x120] sm:$0xff]  ;;  %v10704_v34 = vld [vmem:[%s15215_s5 + $0x108] sm:$0xff]  ;;  %v16141_v38 = vld [vmem:[#allocation98_spill] sm:$0xff]  ;;  %v10718_v6 = vpop.permute.xlu0 %2586  ;;  %v10720_v51 = vpop.permute.xlu1 %1640 }
 0x4f0   :  { %3527 = vmatprep.subr.mxu0 %v2873_v61  ;;  %v1317_v24 = vmul.f32 %v10546_v23, %v1248_v58  ;;  %16140 = vst [vmem:[#allocation83_spill] sm:$0xff] %v10704_v34  ;;  %v16142_v15 = vld [vmem:[#allocation96_spill] sm:$0xff]  ;;  %v16143_v48 = vld [vmem:[#allocation103_spill] sm:$0xff]  ;;  %3637 = vmatpush1.msra.mxu1 %v1320_v36  ;;  %v1316_v22 = vmul.f32 %v10527_v63, %v1256_v46  ;;  %v16146_v9 = vld [vmem:[#allocation210_spill] sm:$0xff] }
 0x4f1   :  { %v1255_v61 = vsel %vm66_vm7, %v16142_v15, %v16141_v38  ;;  %v1247_v37 = vsel %vm66_vm7, %v16141_v38, %v16143_v48  ;;  %v16144_v58 = vld [vmem:[#allocation172_spill] sm:$0xff]  ;;  %3528 = vmatpush1.msra.mxu0 %v2872_v19  ;;  %v2868_v15 = vmul.f32 %v10484_v8, %v2824_v59  ;;  %v10731_v19 = vld [vmem:[%s15215_s5 + $0x118] sm:$0xff]  ;;  %v16148_v46 = vld [vmem:[#allocation74_spill] sm:$0xff]  ;;  %3383 = vmatprep.mubr.f32.mxu0 %v10699_v0 }
 0x4f2   :  { %v16145_v47 = vld [vmem:[#allocation208_spill] sm:$0xff]  ;;  %3529 = vmatprep.subr.mxu0 %v2869_v56  ;;  %3638 = vmatprep.subr.mxu1 %v1317_v24  ;;  %v1254_v59 = vsel %vm66_vm7, %v16148_v46, %v16139_v57  ;;  %v16149_v48 = vld [vmem:[#allocation182_spill] sm:$0xff]  ;;  %v1309_v24 = vmul.f32 %v10546_v23, %v1246_v50  ;;  %v1313_v46 = vmul.f32 %v10546_v23, %v1247_v37 }
 0x4f3   :  { %v2815_v10 = vsel %vm409_vm0, %v16145_v47, %v16144_v58  ;;  %v2823_v38 = vsel %vm409_vm0, %v16146_v9, %v16145_v47  ;;  %v10736_v36 = vld [vmem:[%s15215_s5 + $0x100] sm:$0xff]  ;;  %v16150_v58 = vld [vmem:[#allocation27_spill] sm:$0xff]  ;;  %3490 = vmatprep.mubr.f32.mxu1 %v10704_v34  ;;  %3530 = vmatpush1.msra.mxu0 %v2868_v15  ;;  %v1312_v9 = vmul.f32 %v10527_v63, %v1255_v61  ;;  %v10773_v37 = vld [vmem:[%s15215_s5 + $0x130] sm:$0xff] }
 0x4f4   :  { %16147 = vst [vmem:[#allocation108_spill] sm:$0xff] %v10736_v36  ;;  %v2814_v56 = vsel %vm409_vm0, %v16150_v58, %v16149_v48  ;;  %v2822_v47 = vsel %vm409_vm0, %v10143_v55, %v16150_v58  ;;  %3639 = vmatpush1.msra.mxu1 %v1316_v22  ;;  %v2865_v57 = vmul.f32 %v10379_v21, %v2815_v10  ;;  %v16151_v50 = vld [vmem:[#allocation204_spill] sm:$0xff]  ;;  %v10763_v58 = vpop.permute.xlu0 %2582  ;;  %v16152_v22 = vld [vmem:[#allocation203_spill] sm:$0xff]  ;;  %v7860_v15 = vld [vmem:[%s15211_s1 + $0x14] sm:$0xf] }
 0x4f5   :  { %v2864_v48 = vmul.f32 %v10484_v8, %v2823_v38  ;;  %3384 = vmatmul.mubr.f32.gmra.mxu0 %v10731_v19  ;;  %3491 = vmatmul.mubr.f32.gmra.mxu1 %v10736_v36  ;;  %v2195_v34 = vsel %vm265_vm3, %v10606_v27, %v16151_v50  ;;  %v2171_v10 = vsel %vm265_vm3, %v16152_v22, %v10606_v27  ;;  %v10797_v36 = vld [vmem:[%s15215_s5 + $0x128] sm:$0xff] }
 0x4f6   :  { %3531 = vmatprep.subr.mxu0 %v2865_v57  ;;  %3640 = vmatprep.subr.mxu1 %v1313_v46  ;;  %v2861_v61 = vmul.f32 %v10379_v21, %v2814_v56  ;;  %v10779_v38 = vrot.slane %v7860_v15, %v16078_v41  ;;  %v10781_v57 = vpop.permute.xlu1 %2588  ;;  %v16153_v46 = vld [vmem:[#allocation56_spill] sm:$0xff]  ;;  %v10788_v21 = vrot.slane %v7860_v15, %v16080_v32  ;;  %v16157_v15 = vmov 0.0  }
 0x4f7   :  { %v1245_v27 = vsel %vm66_vm7, %v16128_v12, %v16153_v46  ;;  %v2860_v56 = vmul.f32 %v10484_v8, %v2822_v47  ;;  %3532 = vmatpush1.msra.mxu0 %v2864_v48  ;;  %3641 = vmatpush1.msra.mxu1 %v1312_v9  ;;  %v1300_v50 = vmul.f32 %v10527_v63, %v10582_v30  ;;  %v10802_v12 = vld [vmem:[%s15215_s5 + $0x20] sm:$0xff]  ;;  %v16155_v8 = vld [vmem:[#allocation175_spill] sm:$0xff]  ;;  %v16158_v46 = vld [vmem:[#allocation153_spill] sm:$0xff] }
 0x4f8   :  { %v1308_v22 = vmul.f32 %v10527_v63, %v1254_v59  ;;  %3533 = vmatprep.subr.mxu0 %v2861_v61  ;;  %3642 = vmatprep.subr.mxu1 %v1309_v24  ;;  %16154 = vst [vmem:[#allocation112_spill] sm:$0xff] %v10797_v36  ;;  %v2249_v9 = vmul.f32 %v10779_v38, %v2195_v34  ;;  %v10813_v24 = vpop.permute.xlu0 %1654  ;;  %v16156_v61 = vld [vmem:[#allocation180_spill] sm:$0xff] }
 0x4f9   :  { %v2170_v30 = vsel %vm265_vm3, %v16155_v8, %v10103_v5  ;;  %v2248_v59 = vmul.f32 %v10788_v21, %v2171_v10  ;;  %3496 = vmatprep.mubr.f32.mxu1 %v10773_v37  ;;  %3534 = vmatpush1.msra.mxu0 %v2860_v56  ;;  %v1301_v48 = vmul.f32 %v10546_v23, %v10614_v45  ;;  %v7861_v56 = vld [vmem:[%s15211_s1 + $0xc] sm:$0xf] }
 0x4fa   :  { %v1304_v47 = vmul.f32 %v10527_v63, %v10660_v54  ;;  %v2194_v34 = vsel %vm265_vm3, %v10103_v5, %v16156_v61  ;;  %3567 = vmatprep.mubr.f32.mxu0 %v16157_v15  ;;  %3643 = vmatpush1.msra.mxu1 %v1308_v22  ;;  %v1305_v10 = vmul.f32 %v10546_v23, %v1245_v27  ;;  %v16159_v54 = vld [vmem:[#allocation200_spill] sm:$0xff]  ;;  %v16160_v27 = vld [vmem:[#allocation199_spill] sm:$0xff]  ;;  %v10848_v61 = vpop.permute.xlu1 %2584 }
 0x4fb   :  { %v2169_v45 = vsel %vm265_vm3, %v16158_v46, %v10141_v14  ;;  %v10831_v63 = vrot.slane %v7861_v56, %v16080_v32  ;;  %v1893_v5 = vsel %vm209_vm4, %v10608_v35, %v16159_v54  ;;  %3497 = vmatmul.mubr.f32.gmra.mxu1 %v10797_v36  ;;  %7741 = vmatmul.mubr.msk.f32.vlgmr.msra.gmra.mxu0 %vm3252_vm9, %v10802_v12  ;;  %v16161_v46 = vld [vmem:[#allocation152_spill] sm:$0xff]  ;;  %v16162_v36 = vld [vmem:[#allocation186_spill] sm:$0xff] }
 0x4fc   :  { %v2244_v23 = vmul.f32 %v10788_v21, %v2170_v30  ;;  %v1901_v22 = vsel %vm209_vm4, %v16160_v27, %v10608_v35  ;;  %3644 = vmatprep.subr.mxu1 %v1305_v10  ;;  %3729 = vmatprep.subr.mxu0 %v2249_v9  ;;  %v10846_v8 = vrot.slane %v7861_v56, %v16078_v41  ;;  %v10862_v9 = vld [vmem:[%s15215_s5 + $0x48] sm:$0xff]  ;;  %v10864_v10 = vpop.permute.xlu0 %2578 }
 0x4fd   :  { %v2193_v54 = vsel %vm265_vm3, %v10141_v14, %v16161_v46  ;;  %v1892_v30 = vsel %vm209_vm4, %v10193_v25, %v16162_v36  ;;  %3645 = vmatpush1.msra.mxu1 %v1304_v47  ;;  %3730 = vmatpush1.msra.mxu0 %v2248_v59  ;;  %v2245_v35 = vmul.f32 %v10779_v38, %v2194_v34  ;;  %v16163_v14 = vld [vmem:[#allocation124_spill] sm:$0xff]  ;;  %v16164_v59 = vld [vmem:[#allocation129_spill] sm:$0xff] }
 0x4fe   :  { %v2240_v56 = vmul.f32 %v10788_v21, %v2169_v45  ;;  %v2168_v27 = vsel %vm265_vm3, %v16163_v14, %v10191_v31  ;;  %3646 = vmatprep.subr.mxu1 %v1301_v48  ;;  %3573 = vmatprep.mubr.f32.mxu0 %v16157_v15  ;;  %v1971_v36 = vmul.f32 %v10846_v8, %v1893_v5  ;;  %v16165_v34 = vld [vmem:[#allocation184_spill] sm:$0xff] }
 0x4ff   :  { %v2192_v47 = vsel %vm265_vm3, %v10191_v31, %v16164_v59  ;;  %v1900_v45 = vsel %vm209_vm4, %v16165_v34, %v10193_v25  ;;  %v1970_v46 = vmul.f32 %v10831_v63, %v1901_v22  ;;  %3647 = vmatpush1.msra.mxu1 %v1300_v50  ;;  %3731 = vmatprep.subr.mxu0 %v2245_v35  ;;  %v16166_v14 = vld [vmem:[#allocation156_spill] sm:$0xff]  ;;  %v16168_v22 = vld [vmem:[#allocation154_spill] sm:$0xff] }
 0x500   :  { %v1891_v48 = vsel %vm209_vm4, %v10234_v13, %v16166_v14  ;;  %7742 = vmatmul.mubr.msk.f32.gmra.mxu0 %vm3252_vm9, %v10862_v9  ;;  %3648 = vmatprep.subr.mxu1 %v1971_v36  ;;  %v2241_v31 = vmul.f32 %v10779_v38, %v2193_v54  ;;  %v1967_v5 = vmul.f32 %v10846_v8, %v1892_v30  ;;  %v16167_v25 = vld [vmem:[#allocation100_spill] sm:$0xff]  ;;  %v10910_v14 = vpop.permute.xlu1 %2580 }
 0x501   :  { %v2236_v59 = vmul.f32 %v10788_v21, %v2168_v27  ;;  %v2191_v50 = vsel %vm265_vm3, %v10232_v42, %v16167_v25  ;;  %v1899_v35 = vsel %vm209_vm4, %v16168_v22, %v10234_v13  ;;  %3732 = vmatpush1.msra.mxu0 %v2244_v23  ;;  %3649 = vmatpush2.msra.mxu1 %v1970_v46  ;;  %v16169_v34 = vld [vmem:[#allocation136_spill] sm:$0xff]  ;;  %v10908_v27 = vld [vmem:[%s15215_s5 + $0x70] sm:$0xff]  ;;  %v16170_v13 = vld [vmem:[#allocation101_spill] sm:$0xff] }
 0x502   :  { %v1966_v36 = vmul.f32 %v10831_v63, %v1900_v45  ;;  %v1890_v54 = vsel %vm209_vm4, %v10261_v20, %v16169_v34  ;;  %3733 = vmatprep.subr.mxu0 %v2241_v31  ;;  %3650 = vmatprep.subr.mxu1 %v1967_v5  ;;  %v2237_v30 = vmul.f32 %v10779_v38, %v2192_v47  ;;  %v16171_v45 = vld [vmem:[#allocation133_spill] sm:$0xff]  ;;  %v10922_v31 = vpop.permute.xlu0 %2590  ;;  %v16172_v25 = vld [vmem:[#allocation79_spill] sm:$0xff]  ;;  %v16174_v34 = vld [vmem:[#allocation104_spill] sm:$0xff] }
 0x503   :  { %v2167_v23 = vsel %vm265_vm3, %v16170_v13, %v10232_v42  ;;  %v1898_v46 = vsel %vm209_vm4, %v16171_v45, %v10261_v20  ;;  %3734 = vmatpush1.msra.mxu0 %v2240_v56  ;;  %3579 = vmatprep.mubr.f32.mxu0 %v16157_v15  ;;  %v1963_v47 = vmul.f32 %v10846_v8, %v1891_v48  ;;  %v16173_v20 = vld [vmem:[#allocation76_spill] sm:$0xff]  ;;  %v16176_v13 = vld [vmem:[#allocation53_spill] sm:$0xff] }
 0x504   :  { %v1962_v5 = vmul.f32 %v10831_v63, %v1899_v35  ;;  %v2190_v22 = vsel %vm265_vm3, %v10290_v28, %v16172_v25  ;;  %3651 = vmatpush2.msra.mxu1 %v1966_v36  ;;  %3735 = vmatprep.subr.mxu0 %v2237_v30  ;;  %v2233_v42 = vmul.f32 %v10779_v38, %v2191_v50  ;;  %v16175_v30 = vld [vmem:[#allocation102_spill] sm:$0xff]  ;;  %v16177_v25 = vld [vmem:[#allocation88_spill] sm:$0xff] }
 0x505   :  { %v2166_v56 = vsel %vm265_vm3, %v16173_v20, %v10290_v28  ;;  %v1889_v48 = vsel %vm209_vm4, %v10292_v4, %v16174_v34  ;;  %7743 = vmatmul.mubr.msk.f32.gmra.mxu0 %vm3252_vm9, %v10908_v27  ;;  %3652 = vmatprep.subr.mxu1 %v1963_v47  ;;  %v1959_v35 = vmul.f32 %v10846_v8, %v1890_v54  ;;  %v16179_v20 = vld [vmem:[#allocation85_spill] sm:$0xff] }
 0x506   :  { %v2232_v36 = vmul.f32 %v10788_v21, %v2167_v23  ;;  %v1958_v50 = vmul.f32 %v10831_v63, %v1898_v46  ;;  %v1897_v28 = vsel %vm209_vm4, %v16175_v30, %v10292_v4  ;;  %3736 = vmatpush1.msra.mxu0 %v2236_v59  ;;  %3653 = vmatpush2.msra.mxu1 %v1962_v5  ;;  %v10959_v4 = vld [vmem:[%s15215_s5 + $0x98] sm:$0xff]  ;;  %v16178_v46 = vld [vmem:[#allocation54_spill] sm:$0xff] }
 0x507   :  { %v2189_v45 = vsel %vm265_vm3, %v10330_v52, %v16176_v13  ;;  %v1888_v54 = vsel %vm209_vm4, %v10332_v26, %v16177_v25  ;;  %3737 = vmatprep.subr.mxu0 %v2233_v42  ;;  %3654 = vmatprep.subr.mxu1 %v1959_v35  ;;  %v2229_v23 = vmul.f32 %v10779_v38, %v2190_v22  ;;  %v10968_v42 = vpop.permute.xlu1 %2576  ;;  %v16183_v25 = vld [vmem:[#allocation29_spill] sm:$0xff] }
 0x508   :  { %v2228_v59 = vmul.f32 %v10788_v21, %v2166_v56  ;;  %v2165_v47 = vsel %vm265_vm3, %v16178_v46, %v10330_v52  ;;  %3738 = vmatpush1.msra.mxu0 %v2232_v36  ;;  %3585 = vmatprep.mubr.f32.mxu0 %v16157_v15  ;;  %v1955_v5 = vmul.f32 %v10846_v8, %v1889_v48  ;;  %v16180_v56 = vld [vmem:[#allocation38_spill] sm:$0xff]  ;;  %v10979_v52 = vpop.permute.xlu0 %2376 }
 0x509   :  { %v1954_v22 = vmul.f32 %v10831_v63, %v1897_v28  ;;  %v1896_v34 = vsel %vm209_vm4, %v16179_v20, %v10332_v26  ;;  %v2188_v35 = vsel %vm265_vm3, %v10460_v43, %v16180_v56  ;;  %3655 = vmatpush2.msra.mxu1 %v1958_v50  ;;  %3739 = vmatprep.subr.mxu0 %v2229_v23  ;;  %v16181_v36 = vld [vmem:[#allocation58_spill] sm:$0xff]  ;;  %v16182_v50 = vld [vmem:[#allocation55_spill] sm:$0xff] }
 0x50a   :  { %v1887_v48 = vsel %vm209_vm4, %v10420_v3, %v16181_v36  ;;  %7744 = vmatmul.mubr.msk.f32.gmra.mxu0 %vm3252_vm9, %v10959_v4  ;;  %3656 = vmatprep.subr.mxu1 %v1955_v5  ;;  %v2225_v26 = vmul.f32 %v10779_v38, %v2189_v45  ;;  %v1951_v30 = vmul.f32 %v10846_v8, %v1888_v54  ;;  %v16184_v5 = vld [vmem:[#allocation43_spill] sm:$0xff] }
 0x50b   :  { %v2224_v28 = vmul.f32 %v10788_v21, %v2165_v47  ;;  %v1895_v13 = vsel %vm209_vm4, %v16182_v50, %v10420_v3  ;;  %v2164_v23 = vsel %vm265_vm3, %v16183_v25, %v10460_v43  ;;  %3740 = vmatpush1.msra.mxu0 %v2228_v59  ;;  %3657 = vmatpush2.msra.mxu1 %v1954_v22  ;;  %v11007_v3 = vld [vmem:[%s15215_s5 + $0xc0] sm:$0xff] }
 0x50c   :  { %v1950_v46 = vmul.f32 %v10831_v63, %v1896_v34  ;;  %v1886_v45 = vsel %vm209_vm4, %v10462_v62, %v16184_v5  ;;  %3741 = vmatprep.subr.mxu0 %v2225_v26  ;;  %3658 = vmatprep.subr.mxu1 %v1951_v30  ;;  %v2221_v54 = vmul.f32 %v10779_v38, %v2188_v35  ;;  %v16185_v22 = vld [vmem:[#allocation40_spill] sm:$0xff]  ;;  %v11017_v38 = vpop.permute.xlu1 %2374  ;;  %v11026_v56 = vpop.permute.xlu0 %2804  ;;  %v7862_v35 = vld [vmem:[%s15211_s1 + $0x8] sm:$0xf] }
 0x50d   :  { %3742 = vmatpush1.msra.mxu0 %v2224_v28  ;;  %3591 = vmatprep.mubr.f32.mxu0 %v16157_v15  ;;  %v1947_v43 = vmul.f32 %v10846_v8, %v1887_v48  ;;  %v1946_v59 = vmul.f32 %v10831_v63, %v1895_v13  ;;  %v2220_v47 = vmul.f32 %v10788_v21, %v2164_v23  ;;  %v16187_v26 = vld [vmem:[#allocation141_spill] sm:$0xff]  ;;  %v16188_v28 = vld [vmem:[#allocation114_spill] sm:$0xff]  ;;  %v16190_v5 = vld [vmem:[#allocation92_spill] sm:$0xff] }
 0x50e   :  { %v1894_v20 = vsel %vm209_vm4, %v16185_v22, %v10462_v62  ;;  %3659 = vmatpush2.msra.mxu1 %v1950_v46  ;;  %3743 = vmatprep.subr.mxu0 %v2221_v54  ;;  %v1679_v34 = vsel %vm161_vm5, %v10813_v24, %v10027_v29  ;;  %v1943_v21 = vmul.f32 %v10846_v8, %v1886_v45  ;;  %v11086_v45 = vld [vmem:[%s15215_s5 + $0x110] sm:$0xff]  ;;  %v16191_v54 = vld [vmem:[#allocation87_spill] sm:$0xff]  ;;  %v16192_v22 = vld [vmem:[#allocation61_spill] sm:$0xff] }
 0x50f   :  { %7745 = vmatmul.mubr.msk.f32.gmra.mxu0 %vm3252_vm9, %v11007_v3  ;;  %3660 = vmatprep.subr.mxu1 %v1947_v43  ;;  %v1687_v62 = vsel %vm161_vm5, %v9968_v1, %v10813_v24  ;;  %v11036_v29 = vrot.slane %v7862_v35, %v16078_v41  ;;  %v1942_v36 = vmul.f32 %v10831_v63, %v1894_v20  ;;  %v16186_v1 = vld [vmem:[#allocation146_spill] sm:$0xff]  ;;  %v11050_v24 = vld [vmem:[%s15215_s5 + $0xe8] sm:$0xff]  ;;  %v7864_v20 = vld [vmem:[%s15211_s1 + $0x18] sm:$0xf] }
 0x510   :  { %3744 = vmatpush1.msra.mxu0 %v2220_v47  ;;  %3661 = vmatpush2.msra.mxu1 %v1946_v59  ;;  %v11040_v8 = vrot.slane %v7862_v35, %v16080_v32  ;;  %v1678_v48 = vsel %vm161_vm5, %v10516_v44, %v16046_v16  ;;  %v1686_v30 = vsel %vm161_vm5, %v16042_v53, %v10516_v44  ;;  %v11068_v25 = vpop.permute.xlu1 %2372  ;;  %v16189_v44 = vld [vmem:[#allocation117_spill] sm:$0xff]  ;;  %v11075_v23 = vpop.permute.xlu0 %2802  ;;  %v16193_v35 = vld [vmem:[#allocation107_spill] sm:$0xff] }
 0x511   :  { %3745 = vmatprep.subr.mxu0 %v16186_v1  ;;  %3662 = vmatprep.subr.mxu1 %v1943_v21  ;;  %v1757_v63 = vmul.f32 %v11036_v29, %v1679_v34  ;;  %v1677_v50 = vsel %vm161_vm5, %v10514_v40, %v16049_v17  ;;  %v1753_v13 = vmul.f32 %v11036_v29, %v1678_v48  ;;  %v16203_v1 = vld [vmem:[#allocation158_spill] sm:$0xff] }
 0x512   :  { %3746 = vmatpush1.msra.mxu0 %v16187_v26  ;;  %3597 = vmatprep.mubr.f32.mxu0 %v16157_v15  ;;  %v1756_v16 = vmul.f32 %v11040_v8, %v1687_v62  ;;  %v1685_v53 = vsel %vm161_vm5, %v16047_v33, %v10514_v40  ;;  %v1752_v17 = vmul.f32 %v11040_v8, %v1686_v30  ;;  %v7863_v33 = vld [vmem:[%s15211_s1 + $0x1c] sm:$0xf]  ;;  %v16205_v26 = vld [vmem:[#allocation49_spill] sm:$0xff] }
 0x513   :  { %3663 = vmatpush2.msra.mxu1 %v1942_v36  ;;  %3747 = vmatprep.subr.mxu0 %v16188_v28  ;;  %v1676_v46 = vsel %vm161_vm5, %v10559_v18, %v16050_v2  ;;  %v11092_v40 = vrot.slane %v7863_v33, %v16080_v32  ;;  %v1749_v2 = vmul.f32 %v11036_v29, %v1677_v50  ;;  %v16194_v36 = vld [vmem:[#allocation65_spill] sm:$0xff]  ;;  %v16208_v28 = vld [vmem:[#allocation24_spill] sm:$0xff] }
 0x514   :  { %7746 = vmatmul.mubr.msk.f32.gmra.mxu0 %vm3252_vm9, %v11050_v24  ;;  %3664 = vmatprep.subr.mxu1 %v1757_v63  ;;  %v11098_v43 = vrot.slane %v7863_v33, %v16078_v41  ;;  %v1748_v59 = vmul.f32 %v11040_v8, %v1685_v53  ;;  %v1684_v47 = vsel %vm161_vm5, %v16044_v39, %v10559_v18  ;;  %v16196_v63 = vld [vmem:[#allocation31_spill] sm:$0xff]  ;;  %v16198_v53 = vld [vmem:[#allocation68_spill] sm:$0xff]  ;;  %v11152_v33 = vpop.permute.xlu0 %2800 }
 0x515   :  { %3748 = vmatpush1.msra.mxu0 %v16189_v44  ;;  %3665 = vmatpush2.msra.mxu1 %v1756_v16  ;;  %v11110_v34 = vrot.slane %v7864_v20, %v16080_v32  ;;  %v1675_v21 = vsel %vm161_vm5, %v10557_v49, %v16041_v11  ;;  %v1745_v39 = vmul.f32 %v11036_v29, %v1676_v46  ;;  %v16195_v11 = vld [vmem:[#allocation64_spill] sm:$0xff]  ;;  %v11135_v16 = vpop.permute.xlu1 %2370  ;;  %v16209_v44 = vld [vmem:[#allocation161_spill] sm:$0xff] }
 0x516   :  { %3749 = vmatprep.subr.mxu0 %v16190_v5  ;;  %3666 = vmatprep.subr.mxu1 %v1753_v13  ;;  %v11120_v18 = vrot.slane %v7864_v20, %v16078_v41  ;;  %v1683_v62 = vsel %vm161_vm5, %v16039_v60, %v10557_v49  ;;  %v1681_v48 = vsel %vm161_vm5, %v16194_v36, %v16193_v35  ;;  %v16197_v13 = vld [vmem:[#allocation95_spill] sm:$0xff]  ;;  %v16199_v49 = vld [vmem:[#allocation42_spill] sm:$0xff] }
 0x517   :  { %3750 = vmatpush1.msra.mxu0 %v16191_v54  ;;  %3603 = vmatprep.mubr.f32.mxu0 %v16157_v15  ;;  %v11133_v30 = vrot.slane %v16196_v63, %v16080_v32  ;;  %v1744_v50 = vmul.f32 %v11040_v8, %v1684_v47  ;;  %v1674_v60 = vsel %vm161_vm5, %v16198_v53, %v16197_v13  ;;  %v16201_v47 = vld [vmem:[#allocation93_spill] sm:$0xff]  ;;  %v16217_v54 = vld [vmem:[#allocation16_spill] sm:$0xff] }
 0x518   :  { %3667 = vmatpush2.msra.mxu1 %v1752_v17  ;;  %3751 = vmatprep.subr.mxu0 %v16192_v22  ;;  %v11146_v17 = vld [vmem:[%s15215_s5 + $0x138] sm:$0xff]  ;;  %v11150_v46 = vrot.slane %v16196_v63, %v16078_v41  ;;  %v1682_v20 = vsel %vm161_vm5, %v16201_v47, %v16198_v53  ;;  %v1741_v36 = vmul.f32 %v11036_v29, %v1675_v21 }
 0x519   :  { %7747 = vmatmul.mubr.msk.f32.gmra.mxu0 %vm3252_vm9, %v11086_v45  ;;  %3668 = vmatprep.subr.mxu1 %v1749_v2  ;;  %v16200_v2 = vld [vmem:[#allocation67_spill] sm:$0xff]  ;;  %v1740_v63 = vmul.f32 %v11040_v8, %v1683_v62  ;;  %v1732_v13 = vmul.f32 %v11040_v8, %v1681_v48  ;;  %v1672_v53 = vsel %vm161_vm5, %v10720_v51, %v16205_v26  ;;  %v16207_v48 = vld [vmem:[#allocation145_spill] sm:$0xff] }
 0x51a   :  { %3752 = vmatpush1.msra.mxu0 %v16195_v11  ;;  %3669 = vmatpush2.msra.mxu1 %v1748_v59  ;;  %v1673_v59 = vsel %vm161_vm5, %v16193_v35, %v16200_v2  ;;  %v2597_v35 = vsel %vm361_vm1, %v16203_v1, %v10718_v6  ;;  %v16204_v2 = vld [vmem:[#allocation23_spill] sm:$0xff]  ;;  %v1737_v62 = vmul.f32 %v11036_v29, %v1674_v60 }
 0x51b   :  { %3753 = vmatprep.subr.mxu0 %v16199_v49  ;;  %3670 = vmatprep.subr.mxu1 %v1745_v39  ;;  %v16202_v39 = vld [vmem:[#allocation37_spill] sm:$0xff]  ;;  %v16206_v47 = vld [vmem:[#allocation47_spill] sm:$0xff]  ;;  %v1736_v1 = vmul.f32 %v11040_v8, %v1682_v20  ;;  %v1733_v26 = vmul.f32 %v11036_v29, %v1673_v59 }
 0x51c   :  { %3754 = vmatpush1.msra.mxu0 %v16202_v39  ;;  %3609 = vmatprep.mubr.f32.mxu0 %v16157_v15  ;;  %v1680_v21 = vsel %vm161_vm5, %v16206_v47, %v10720_v51  ;;  %v2621_v51 = vsel %vm361_vm1, %v10718_v6, %v16209_v44  ;;  %v16210_v60 = vld [vmem:[#allocation35_spill] sm:$0xff]  ;;  %v16211_v47 = vld [vmem:[#allocation20_spill] sm:$0xff]  ;;  %v1729_v44 = vmul.f32 %v11036_v29, %v1672_v53 }
 0x51d   :  { %3671 = vmatpush2.msra.mxu1 %v1744_v50  ;;  %3755 = vmatprep.subr.mxu0 %v16204_v2  ;;  %v2623_v50 = vsel %vm361_vm1, %v10922_v31, %v16207_v48  ;;  %v2599_v20 = vsel %vm361_vm1, %v16210_v60, %v10922_v31  ;;  %v11200_v48 = vpop.permute.xlu1 %2368  ;;  %v16212_v59 = vld [vmem:[#allocation179_spill] sm:$0xff]  ;;  %v16214_v31 = vld [vmem:[#allocation188_spill] sm:$0xff] }
 0x51e   :  { %7748 = vmatmul.mubr.msk.f32.gmra.mxu0 %vm3252_vm9, %v11146_v17  ;;  %3672 = vmatprep.subr.mxu1 %v1741_v36  ;;  %v2668_v36 = vmul.f32 %v11092_v40, %v2597_v35  ;;  %v2622_v5 = vsel %vm361_vm1, %v10781_v57, %v16212_v59  ;;  %v16213_v6 = vld [vmem:[#allocation19_spill] sm:$0xff]  ;;  %v2799_v35 = vpop.permute.xlu0 %2798  ;;  %v2677_v59 = vmul.f32 %v11098_v43, %v2623_v50 }
 0x51f   :  { %3756 = vmatpush1.msra.mxu0 %v16208_v28  ;;  %3673 = vmatpush2.msra.mxu1 %v1740_v63  ;;  %v1728_v63 = vmul.f32 %v11040_v8, %v1680_v21  ;;  %v16215_v60 = vld [vmem:[#allocation59_spill] sm:$0xff] }
 0x520   :  { %3757 = vmatprep.subr.mxu0 %v16211_v47  ;;  %3674 = vmatprep.subr.mxu1 %v1737_v62  ;;  %v2598_v62 = vsel %vm361_vm1, %v16214_v31, %v10781_v57  ;;  %v2837_v8 = vsel %vm409_vm0, %v11026_v56, %v16215_v60  ;;  %v16216_v21 = vld [vmem:[#allocation15_spill] sm:$0xff]  ;;  %v2669_v57 = vmul.f32 %v11098_v43, %v2621_v51  ;;  %v16219_v31 = vld [vmem:[#allocation106_spill] sm:$0xff] }
 0x521   :  { %3758 = vmatpush1.msra.mxu0 %v16213_v6  ;;  %3675 = vmatpush2.msra.mxu1 %v1736_v1  ;;  %v2676_v1 = vmul.f32 %v11092_v40, %v2599_v20  ;;  %v16218_v29 = vld [vmem:[#allocation191_spill] sm:$0xff]  ;;  %v2595_v60 = vsel %vm361_vm1, %v16219_v31, %v10763_v58  ;;  %v2673_v20 = vmul.f32 %v11098_v43, %v2622_v5  ;;  %v16222_v31 = vld [vmem:[#allocation194_spill] sm:$0xff]  ;;  %v7865_v5 = vld [vmem:[%s15215_s5 + $0x8] sm:$0xff] }
 0x522   :  { %3759 = vmatprep.subr.mxu0 %v16216_v21  ;;  %3676 = vmatprep.subr.mxu1 %v1733_v26  ;;  %v2836_v53 = vsel %vm409_vm0, %v11075_v23, %v16218_v29  ;;  %v16220_v26 = vld [vmem:[#allocation48_spill] sm:$0xff]  ;;  %v2672_v22 = vmul.f32 %v11092_v40, %v2598_v62  ;;  %v2891_v51 = vmul.f32 %v11150_v46, %v2837_v8  ;;  %v16224_v8 = vld [vmem:[#allocation139_spill] sm:$0xff] }
 0x523   :  { %3760 = vmatpush1.msra.mxu0 %v16217_v54  ;;  %3677 = vmatpush2.msra.mxu1 %v1732_v13  ;;  %v2813_v50 = vsel %vm409_vm0, %v16220_v26, %v11026_v56  ;;  %v16221_v29 = vld [vmem:[#allocation128_spill] sm:$0xff]  ;;  %v2812_v56 = vsel %vm409_vm0, %v16222_v31, %v11075_v23  ;;  %v2596_v23 = vsel %vm361_vm1, %v16224_v8, %v10848_v61  ;;  %v16225_v26 = vld [vmem:[#allocation33_spill] sm:$0xff]  ;;  %v2797_v31 = vpop.permute.xlu0 %2796 }
 0x524   :  { %3761 = vmatprep.subr.mxu0 %v2677_v59  ;;  %3678 = vmatprep.subr.mxu1 %v1729_v44  ;;  %v2620_v13 = vsel %vm361_vm1, %v10848_v61, %v16221_v29  ;;  %v16223_v44 = vld [vmem:[#allocation170_spill] sm:$0xff]  ;;  %v11253_v59 = vpop.permute.xlu1 %2366  ;;  %v2886_v8 = vmul.f32 %v11133_v30, %v2812_v56 }
 0x525   :  { %3762 = vmatpush2.msra.mxu0 %v2676_v1  ;;  %3679 = vmatpush2.msra.mxu1 %v1728_v63  ;;  %v2835_v62 = vsel %vm409_vm0, %v11152_v33, %v16223_v44  ;;  %v2887_v63 = vmul.f32 %v11150_v46, %v2836_v53  ;;  %v2890_v1 = vmul.f32 %v11133_v30, %v2813_v50  ;;  %v16228_v50 = vld [vmem:[#allocation80_spill] sm:$0xff] }
 0x526   :  { %3680 = vmatprep.mubr.f32.mxu1 %v7865_v5  ;;  %3763 = vmatprep.subr.mxu0 %v2673_v20  ;;  %v16226_v20 = vld [vmem:[#allocation169_spill] sm:$0xff]  ;;  %v2660_v44 = vmul.f32 %v11092_v40, %v2595_v60  ;;  %v2665_v61 = vmul.f32 %v11098_v43, %v2620_v13  ;;  %v16229_v60 = vld [vmem:[#allocation94_spill] sm:$0xff] }
 0x527   :  { %3681 = vmatmul.mubr.f32.vlgmr.msra.gmra.mxu1 %v16225_v26  ;;  %3764 = vmatpush2.msra.mxu0 %v2672_v22  ;;  %v2811_v29 = vsel %vm409_vm0, %v16226_v20, %v11152_v33  ;;  %v16227_v5 = vld [vmem:[#allocation109_spill] sm:$0xff]  ;;  %v2618_v22 = vsel %vm361_vm1, %v10910_v14, %v16228_v50  ;;  %v2883_v33 = vmul.f32 %v11150_v46, %v2835_v62  ;;  %v16234_v20 = vld [vmem:[#allocation66_spill] sm:$0xff]  ;;  %v16237_v50 = vld [vmem:[#allocation36_spill] sm:$0xff] }
 0x528   :  { %v2619_v53 = vsel %vm361_vm1, %v10763_v58, %v16227_v5  ;;  %3858 = vmatprep.subr.mxu1 %v2891_v51  ;;  %3765 = vmatprep.subr.mxu0 %v2669_v57  ;;  %v2664_v26 = vmul.f32 %v11092_v40, %v2596_v23  ;;  %v2882_v58 = vmul.f32 %v11133_v30, %v2811_v29  ;;  %v16230_v57 = vld [vmem:[#allocation143_spill] sm:$0xff]  ;;  %v16231_v51 = vld [vmem:[#allocation90_spill] sm:$0xff]  ;;  %v16235_v5 = vld [vmem:[#allocation73_spill] sm:$0xff] }
 0x529   :  { %3859 = vmatpush1.msra.mxu1 %v2890_v1  ;;  %3766 = vmatpush2.msra.mxu0 %v2668_v36  ;;  %v2834_v13 = vsel %vm409_vm0, %v2799_v35, %v16230_v57  ;;  %v2594_v56 = vsel %vm361_vm1, %v16231_v51, %v10910_v14  ;;  %v16232_v36 = vld [vmem:[#allocation149_spill] sm:$0xff]  ;;  %v2661_v23 = vmul.f32 %v11098_v43, %v2619_v53  ;;  %v16238_v57 = vld [vmem:[#allocation202_spill] sm:$0xff] }
 0x52a   :  { %3860 = vmatprep.subr.mxu1 %v2887_v63  ;;  %3686 = vmatprep.mubr.f32.mxu1 %v16229_v60  ;;  %v2810_v62 = vsel %vm409_vm0, %v16232_v36, %v2799_v35  ;;  %v16233_v63 = vld [vmem:[#allocation62_spill] sm:$0xff]  ;;  %v2617_v29 = vsel %vm361_vm1, %v10864_v10, %v16234_v20  ;;  %v2657_v14 = vmul.f32 %v11098_v43, %v2618_v22  ;;  %v16236_v35 = vld [vmem:[#allocation45_spill] sm:$0xff]  ;;  %v2795_v60 = vpop.permute.xlu0 %2794 }
 0x52b   :  { %3767 = vmatprep.subr.mxu0 %v2665_v61  ;;  %3861 = vmatpush1.msra.mxu1 %v2886_v8  ;;  %v2593_v1 = vsel %vm361_vm1, %v16233_v63, %v10864_v10  ;;  %v11301_v61 = vpop.permute.xlu1 %2364  ;;  %v2592_v53 = vsel %vm361_vm1, %v16236_v35, %v10968_v42  ;;  %v2616_v8 = vsel %vm361_vm1, %v10968_v42, %v16237_v50  ;;  %v16239_v63 = vld [vmem:[#allocation201_spill] sm:$0xff]  ;;  %v16247_v50 = vld [vmem:[#allocation63_spill] sm:$0xff] }
 0x52c   :  { %3687 = vmatmul.mubr.f32.gmra.mxu1 %v16235_v5  ;;  %3768 = vmatpush2.msra.mxu0 %v2664_v26  ;;  %v2879_v10 = vmul.f32 %v11150_v46, %v2834_v13  ;;  %v2656_v26 = vmul.f32 %v11092_v40, %v2594_v56  ;;  %v2878_v22 = vmul.f32 %v11133_v30, %v2810_v62  ;;  %v16240_v42 = vld [vmem:[#allocation205_spill] sm:$0xff]  ;;  %v16241_v62 = vld [vmem:[#allocation122_spill] sm:$0xff] }
 0x52d   :  { %3769 = vmatprep.subr.mxu0 %v2661_v23  ;;  %3862 = vmatprep.subr.mxu1 %v2883_v33  ;;  %v2833_v51 = vsel %vm409_vm0, %v2797_v31, %v16238_v57  ;;  %v2652_v36 = vmul.f32 %v11092_v40, %v2593_v1  ;;  %v2809_v33 = vsel %vm409_vm0, %v16240_v42, %v2797_v31  ;;  %v16243_v1 = vld [vmem:[#allocation25_spill] sm:$0xff]  ;;  %v16251_v42 = vld [vmem:[#allocation164_spill] sm:$0xff] }
 0x52e   :  { %3770 = vmatpush2.msra.mxu0 %v2660_v44  ;;  %3863 = vmatpush1.msra.mxu1 %v2882_v58  ;;  %v2653_v13 = vmul.f32 %v11098_v43, %v2617_v29  ;;  %v2648_v56 = vmul.f32 %v11092_v40, %v2592_v53  ;;  %v2409_v44 = vsel %vm313_vm2, %v10979_v52, %v16241_v62  ;;  %v16242_v58 = vld [vmem:[#allocation39_spill] sm:$0xff]  ;;  %v16244_v31 = vld [vmem:[#allocation193_spill] sm:$0xff]  ;;  %v16252_v62 = vld [vmem:[#allocation134_spill] sm:$0xff] }
 0x52f   :  { %3692 = vmatprep.mubr.f32.mxu1 %v16239_v63  ;;  %3771 = vmatprep.subr.mxu0 %v2657_v14  ;;  %v2649_v23 = vmul.f32 %v11098_v43, %v2616_v8  ;;  %v2385_v20 = vsel %vm313_vm2, %v16243_v1, %v10979_v52  ;;  %v2384_v40 = vsel %vm313_vm2, %v16244_v31, %v11017_v38  ;;  %v16245_v5 = vld [vmem:[#allocation185_spill] sm:$0xff]  ;;  %v11347_v53 = vpop.permute.xlu1 %2362  ;;  %v16248_v8 = vld [vmem:[#allocation206_spill] sm:$0xff]  ;;  %v16256_v31 = vld [vmem:[#allocation172_spill] sm:$0xff] }
 0x530   :  { %3693 = vmatmul.mubr.f32.gmra.mxu1 %v16242_v58  ;;  %3772 = vmatpush2.msra.mxu0 %v2656_v26  ;;  %v2875_v29 = vmul.f32 %v11150_v46, %v2833_v51  ;;  %v2408_v14 = vsel %vm313_vm2, %v11017_v38, %v16245_v5  ;;  %v2874_v43 = vmul.f32 %v11133_v30, %v2809_v33  ;;  %v16246_v35 = vld [vmem:[#allocation209_spill] sm:$0xff]  ;;  %v2793_v38 = vpop.permute.xlu0 %2792  ;;  %v16249_v51 = vld [vmem:[#allocation167_spill] sm:$0xff] }
 0x531   :  { %3773 = vmatprep.subr.mxu0 %v2653_v13  ;;  %3864 = vmatprep.subr.mxu1 %v2879_v10  ;;  %v2832_v52 = vsel %vm409_vm0, %v2795_v60, %v16246_v35  ;;  %v2808_v10 = vsel %vm409_vm0, %v16248_v8, %v2795_v60  ;;  %v2463_v26 = vmul.f32 %v11120_v18, %v2409_v44  ;;  %v16250_v63 = vld [vmem:[#allocation77_spill] sm:$0xff] }
 0x532   :  { %3774 = vmatpush2.msra.mxu0 %v2652_v36  ;;  %3865 = vmatpush1.msra.mxu1 %v2878_v22  ;;  %v2462_v57 = vmul.f32 %v11110_v34, %v2385_v20  ;;  %v2458_v22 = vmul.f32 %v11110_v34, %v2384_v40  ;;  %v2407_v36 = vsel %vm313_vm2, %v11068_v25, %v16249_v51  ;;  %v16255_v20 = vld [vmem:[#allocation78_spill] sm:$0xff]  ;;  %v16258_v35 = vld [vmem:[#allocation177_spill] sm:$0xff] }
 0x533   :  { %3698 = vmatprep.mubr.f32.mxu1 %v16247_v50  ;;  %3775 = vmatprep.subr.mxu0 %v2649_v23  ;;  %v2383_v60 = vsel %vm313_vm2, %v16251_v42, %v11068_v25  ;;  %v2459_v33 = vmul.f32 %v11120_v18, %v2408_v14  ;;  %v2871_v13 = vmul.f32 %v11150_v46, %v2832_v52  ;;  %v16254_v25 = vld [vmem:[#allocation147_spill] sm:$0xff]  ;;  %v16261_v51 = vld [vmem:[#allocation105_spill] sm:$0xff] }
 0x534   :  { %3699 = vmatmul.mubr.f32.gmra.mxu1 %v16250_v63  ;;  %3776 = vmatpush2.msra.mxu0 %v2648_v56  ;;  %v2406_v44 = vsel %vm313_vm2, %v11135_v16, %v16252_v62  ;;  %v2870_v58 = vmul.f32 %v11133_v30, %v2808_v10  ;;  %v16253_v56 = vld [vmem:[#allocation210_spill] sm:$0xff]  ;;  %v2382_v1 = vsel %vm313_vm2, %v16254_v25, %v11135_v16  ;;  %v16257_v14 = vld [vmem:[#allocation119_spill] sm:$0xff]  ;;  %v2791_v16 = vpop.permute.xlu1 %2790  ;;  %v16262_v42 = vld [vmem:[#allocation97_spill] sm:$0xff] }
 0x535   :  { %3777 = vmatprep.subr.mxu0 %v2463_v26  ;;  %3866 = vmatprep.subr.mxu1 %v2875_v29  ;;  %v2831_v23 = vsel %vm409_vm0, %v2793_v38, %v16253_v56  ;;  %v2807_v40 = vsel %vm409_vm0, %v16256_v31, %v2793_v38  ;;  %v2455_v29 = vmul.f32 %v11120_v18, %v2407_v36  ;;  %v16259_v52 = vld [vmem:[#allocation115_spill] sm:$0xff]  ;;  %v16260_v38 = vld [vmem:[#allocation89_spill] sm:$0xff] }
 0x536   :  { %3778 = vmatpush2.msra.mxu0 %v2462_v57  ;;  %3867 = vmatpush1.msra.mxu1 %v2874_v43  ;;  %v2454_v5 = vmul.f32 %v11110_v34, %v2383_v60  ;;  %v2405_v43 = vsel %vm313_vm2, %v11200_v48, %v16257_v14  ;;  %v2381_v50 = vsel %vm313_vm2, %v16259_v52, %v11200_v48  ;;  %v16264_v62 = vld [vmem:[#allocation157_spill] sm:$0xff]  ;;  %v16271_v52 = vld [vmem:[#allocation178_spill] sm:$0xff] }
 0x537   :  { %3704 = vmatprep.mubr.f32.mxu1 %v16255_v20  ;;  %3779 = vmatprep.subr.mxu0 %v2459_v33  ;;  %v2451_v8 = vmul.f32 %v11120_v18, %v2406_v44  ;;  %v2867_v10 = vmul.f32 %v11150_v46, %v2831_v23  ;;  %v2450_v26 = vmul.f32 %v11110_v34, %v2382_v1  ;;  %v16263_v33 = vld [vmem:[#allocation182_spill] sm:$0xff]  ;;  %v16266_v56 = vld [vmem:[#allocation69_spill] sm:$0xff]  ;;  %v16267_v1 = vld [vmem:[#allocation44_spill] sm:$0xff] }
 0x538   :  { %3705 = vmatmul.mubr.f32.gmra.mxu1 %v16258_v35  ;;  %3780 = vmatpush2.msra.mxu0 %v2458_v22  ;;  %v2404_v57 = vsel %vm313_vm2, %v11253_v59, %v16260_v38  ;;  %v2866_v22 = vmul.f32 %v11133_v30, %v2807_v40  ;;  %v2830_v48 = vsel %vm409_vm0, %v2791_v16, %v10143_v55  ;;  %v16265_v55 = vld [vmem:[#allocation72_spill] sm:$0xff]  ;;  %v16268_v40 = vld [vmem:[#allocation126_spill] sm:$0xff] }
 0x539   :  { %3781 = vmatprep.subr.mxu0 %v2455_v29  ;;  %3868 = vmatprep.subr.mxu1 %v2871_v13  ;;  %v2447_v36 = vmul.f32 %v11120_v18, %v2405_v43  ;;  %v2446_v63 = vmul.f32 %v11110_v34, %v2381_v50  ;;  %v2380_v60 = vsel %vm313_vm2, %v16262_v42, %v11253_v59  ;;  %v16269_v29 = vld [vmem:[#allocation51_spill] sm:$0xff]  ;;  %v7872_v35 = vld [vmem:[%s15215_s5 + $0x90] sm:$0xff] }
 0x53a   :  { %3782 = vmatpush2.msra.mxu0 %v2454_v5  ;;  %3869 = vmatpush1.msra.mxu1 %v2870_v58  ;;  %v2806_v13 = vsel %vm409_vm0, %v16263_v33, %v2791_v16  ;;  %v2403_v44 = vsel %vm313_vm2, %v11301_v61, %v16265_v55  ;;  %v2443_v58 = vmul.f32 %v11120_v18, %v2404_v57  ;;  %v16270_v5 = vld [vmem:[#allocation159_spill] sm:$0xff] }
 0x53b   :  { %3710 = vmatprep.mubr.f32.mxu1 %v16261_v51  ;;  %3783 = vmatprep.subr.mxu0 %v2451_v8  ;;  %v2379_v59 = vsel %vm313_vm2, %v16266_v56, %v11301_v61  ;;  %v2863_v23 = vmul.f32 %v11150_v46, %v2830_v48  ;;  %v2442_v25 = vmul.f32 %v11110_v34, %v2380_v60  ;;  %v7874_v16 = vld [vmem:[%s15215_s5 + $0xb8] sm:$0xff] }
 0x53c   :  { %3711 = vmatmul.mubr.f32.gmra.mxu1 %v16264_v62  ;;  %3784 = vmatpush2.msra.mxu0 %v2450_v26  ;;  %v2402_v20 = vsel %vm313_vm2, %v11347_v53, %v16267_v1  ;;  %v2862_v31 = vmul.f32 %v11133_v30, %v2806_v13  ;;  %v2378_v61 = vsel %vm313_vm2, %v16269_v29, %v11347_v53  ;;  %v7866_v53 = vld [vmem:[%s15215_s5 + $0x18] sm:$0xff] }
 0x53d   :  { %3785 = vmatprep.subr.mxu0 %v2447_v36  ;;  %3870 = vmatprep.subr.mxu1 %v2867_v10  ;;  %v2439_v46 = vmul.f32 %v11120_v18, %v2403_v44  ;;  %v2438_v14 = vmul.f32 %v11110_v34, %v2379_v59  ;;  %v2435_v30 = vmul.f32 %v11120_v18, %v2402_v20  ;;  %v7870_v18 = vld [vmem:[%s15215_s5 + $0x68] sm:$0xff]  ;;  %v16272_v50 = vld [vmem:[#allocation127_spill] sm:$0xff] }
 0x53e   :  { %3786 = vmatpush2.msra.mxu0 %v2446_v63  ;;  %3871 = vmatpush1.msra.mxu1 %v2866_v22  ;;  %v2434_v43 = vmul.f32 %v11110_v34, %v2378_v61  ;;  %v7868_v34 = vld [vmem:[%s15215_s5 + $0x40] sm:$0xff]  ;;  %v16273_v8 = vld [vmem:[#allocation83_spill] sm:$0xff] }
 0x53f   :  { %3716 = vmatprep.mubr.f32.mxu1 %v16268_v40  ;;  %3787 = vmatprep.subr.mxu0 %v2443_v58 }
 0x540   :  { %3872 = vmatprep.subr.mxu1 %v2863_v23  ;;  %3717 = vmatmul.mubr.f32.gmra.mxu1 %v16270_v5 }
 0x541   :  { %3788 = vmatpush2.msra.mxu0 %v2442_v25  ;;  %3873 = vmatpush1.msra.mxu1 %v2862_v31 }
 0x542   :  { %3789 = vmatprep.subr.mxu0 %v2439_v46  ;;  %3722 = vmatprep.mubr.f32.mxu1 %v10699_v0  ;;  %v7867_v0 = vld [vmem:[%s15215_s5 + $0x10] sm:$0xff] }
 0x543   :  { %3790 = vmatpush2.msra.mxu0 %v2438_v14  ;;  %3793 = vmatprep.mubr.f32.mxu0 %v7866_v53 }
 0x544   :  { %3791 = vmatprep.subr.mxu0 %v2435_v30  ;;  %3723 = vmatmul.mubr.f32.gmra.mxu1 %v10731_v19  ;;  %v7869_v19 = vld [vmem:[%s15215_s5 + $0x38] sm:$0xff] }
 0x545   :  { %3792 = vmatpush2.msra.mxu0 %v2434_v43  ;;  %3906 = vmatprep.mubr.f32.mxu1 %v16157_v15 }
 0x546   :  { %3794 = vmatmul.mubr.f32.vlgmr.msra.gmra.mxu0 %v7867_v0 }
 0x547   :  { %3799 = vmatprep.mubr.f32.mxu0 %v7868_v34 }
 0x548   :  { %7749 = vmatmul.mubr.msk.f32.vlgmr.msra.gmra.mxu1 %vm3252_vm9, %v10802_v12  ;;  %v7871_v12 = vld [vmem:[%s15215_s5 + $0x60] sm:$0xff] }
 0x549   :  { %3912 = vmatprep.mubr.f32.mxu1 %v16157_v15 }
 0x54a   :  { %3800 = vmatmul.mubr.f32.gmra.mxu0 %v7869_v19 }
 0x54b   :  { %3805 = vmatprep.mubr.f32.mxu0 %v7870_v18 }
 0x54c   :  { %7750 = vmatmul.mubr.msk.f32.gmra.mxu1 %vm3252_vm9, %v10862_v9  ;;  %v7873_v9 = vld [vmem:[%s15215_s5 + $0x88] sm:$0xff] }
 0x54d   :  { %3918 = vmatprep.mubr.f32.mxu1 %v16157_v15 }
 0x54e   :  { %3806 = vmatmul.mubr.f32.gmra.mxu0 %v7871_v12 }
 0x54f   :  { %3811 = vmatprep.mubr.f32.mxu0 %v7872_v35 }
 0x550   :  { %7751 = vmatmul.mubr.msk.f32.gmra.mxu1 %vm3252_vm9, %v10908_v27  ;;  %v7875_v27 = vld [vmem:[%s15215_s5 + $0xb0] sm:$0xff] }
 0x551   :  { %3924 = vmatprep.mubr.f32.mxu1 %v16157_v15 }
 0x552   :  { %3812 = vmatmul.mubr.f32.gmra.mxu0 %v7873_v9 }
 0x553   :  { %3817 = vmatprep.mubr.f32.mxu0 %v7874_v16 }
 0x554   :  { %7752 = vmatmul.mubr.msk.f32.gmra.mxu1 %vm3252_vm9, %v10959_v4  ;;  %v16274_v4 = vld [vmem:[#allocation108_spill] sm:$0xff] }
 0x555   :  { %3930 = vmatprep.mubr.f32.mxu1 %v16157_v15 }
 0x556   :  { %3818 = vmatmul.mubr.f32.gmra.mxu0 %v7875_v27 }
 0x557   :  { %3823 = vmatprep.mubr.f32.mxu0 %v16271_v52 }
 0x558   :  { %7753 = vmatmul.mubr.msk.f32.gmra.mxu1 %vm3252_vm9, %v11007_v3  ;;  %v16275_v3 = vld [vmem:[#allocation112_spill] sm:$0xff] }
 0x559   :  { %3936 = vmatprep.mubr.f32.mxu1 %v16157_v15 }
 0x55a   :  { %3824 = vmatmul.mubr.f32.gmra.mxu0 %v16272_v50 }
 0x55b   :  { %3829 = vmatprep.mubr.f32.mxu0 %v16273_v8 }
 0x55c   :  { %7754 = vmatmul.mubr.msk.f32.gmra.mxu1 %vm3252_vm9, %v11050_v24 }
 0x55d   :  { %3942 = vmatprep.mubr.f32.mxu1 %v16157_v15 }
 0x55e   :  { %3830 = vmatmul.mubr.f32.gmra.mxu0 %v16274_v4 }
 0x55f   :  { %3835 = vmatprep.mubr.f32.mxu0 %v10773_v37 }
 0x560   :  { %7755 = vmatmul.mubr.msk.f32.gmra.mxu1 %vm3252_vm9, %v11086_v45 }
 0x561   :  { %3948 = vmatprep.mubr.f32.mxu1 %v16157_v15 }
 0x562   :  { %3836 = vmatmul.mubr.f32.gmra.mxu0 %v16275_v3 }
 0x564   :  { %7756 = vmatmul.mubr.msk.f32.gmra.mxu1 %vm3252_vm9, %v11146_v17 }
 0x592   :  { %v3343_v10 = vpop.f32.mrf.mxu0 }
 0x594   :  { %v3345_v26 = vpop.f32.mrf.mxu0 }
 0x596   :  { %v11504_v38 = vpop.f32.mrf.mxu0  ;;  %v3456_v51 = vpop.f32.mrf.mxu1 }
 0x597   :  { %v3457_v41 = vadd.f32 %v3456_v51, %v3343_v10 }
 0x598   :  { %v3351_v24 = vpop.f32.mrf.mxu0  ;;  %v3458_v63 = vpop.f32.mrf.mxu1 }
 0x599   :  { %v3459_v15 = vadd.f32 %v3458_v63, %v3345_v26 }
 0x59a   :  { %v11506_v57 = vpop.f32.mrf.mxu0 }
 0x59b   :  { %v3462_v42 = vpop.f32.mrf.mxu1 }
 0x59c   :  { %v11508_v22 = vpop.f32.mrf.mxu0 }
 0x59d   :  { %v3464_v33 = vpop.f32.mrf.mxu1 }
 0x59e   :  { %v11510_v37 = vpop.f32.mrf.mxu0  ;;  %v3465_v7 = vadd.f32 %v3464_v33, %v3351_v24 }
 0x59f   :  { %v3468_v62 = vpop.f32.mrf.mxu1 }
 0x5a0   :  { %v11512_v48 = vpop.f32.mrf.mxu0 }
 0x5a1   :  { %v3470_v44 = vpop.f32.mrf.mxu1 }
 0x5a2   :  { %v11514_v45 = vpop.f32.mrf.mxu0 }
 0x5a3   :  { %v3474_v56 = vpop.f32.mrf.mxu1 }
 0x5a4   :  { %v11516_v36 = vpop.f32.mrf.mxu0 }
 0x5a5   :  { %v3476_v23 = vpop.f32.mrf.mxu1 }
 0x5a8   :  { %v11518_v17 = vpop.f32.mrf.mxu0  ;;  %v3480_v1 = vpop.f32.mrf.mxu1 }
 0x5a9   :  { %v11592_v51 = vadd.f32 %v3480_v1, %v11514_v45 }
 0x5aa   :  { %v11520_v60 = vpop.f32.mrf.mxu0  ;;  %v3482_v31 = vpop.f32.mrf.mxu1 }
 0x5ae   :  { %v11522_v13 = vpop.f32.mrf.mxu0 }
 0x5af   :  { %v3486_v29 = vpop.f32.mrf.mxu1 }
 0x5b0   :  { %v11524_v55 = vpop.f32.mrf.mxu0 }
 0x5b1   :  { %v3488_v5 = vpop.f32.mrf.mxu1 }
 0x5b5   :  { %v11526_v58 = vpop.f32.mrf.mxu0  ;;  %v3492_v14 = vpop.f32.mrf.mxu1 }
 0x5b7   :  { %v11528_v59 = vpop.f32.mrf.mxu0  ;;  %v3494_v43 = vpop.f32.mrf.mxu1 }
 0x5b8   :  { %16276 = vst [vmem:[#allocation111_spill] sm:$0xff] %v11528_v59 }
 0x5bb   :  { %v3569_v25 = vpop.f32.mrf.mxu0  ;;  %v11534_v0 = vpop.f32.mrf.mxu1 }
 0x5bd   :  { %v3571_v20 = vpop.f32.mrf.mxu0  ;;  %v11538_v19 = vpop.f32.mrf.mxu1 }
 0x5be   :  { %16277 = vst [vmem:[#allocation190_spill] sm:$0xff] %v11538_v19 }
 0x5c0   :  { %v3575_v40 = vpop.f32.mrf.mxu0 }
 0x5c2   :  { %v3577_v61 = vpop.f32.mrf.mxu0 }
 0x5c3   :  { %v11586_v26 = vadd.f32 %v3577_v61, %v3465_v7 }
 0x5c5   :  { %v11530_v46 = vpop.f32.mrf.mxu0 }
 0x5c7   :  { %v3583_v30 = vpop.f32.mrf.mxu0 }
 0x5ca   :  { %v11532_v53 = vpop.f32.mrf.mxu0 }
 0x5cc   :  { %v11536_v34 = vpop.f32.mrf.mxu0 }
 0x5cf   :  { %v11540_v12 = vpop.f32.mrf.mxu0 }
 0x5d1   :  { %v11542_v9 = vpop.f32.mrf.mxu0 }
 0x5d4   :  { %v11544_v52 = vpop.f32.mrf.mxu0 }
 0x5d6   :  { %v11550_v4 = vpop.f32.mrf.mxu0 }
 0x5d9   :  { %v11556_v49 = vpop.f32.mrf.mxu0 }
 0x5da   :  { %16278 = vst [vmem:[#allocation181_spill] sm:$0xff] %v11556_v49  ;;  %v11574_v49 = vadd.f32 %v3571_v20, %v3459_v15  ;;  %v3477_v15 = vadd.f32 %v3476_v23, %v11512_v48  ;;  %v11606_v48 = vadd.f32 %v3492_v14, %v11522_v13 }
 0x5db   :  { %v11562_v28 = vpop.f32.mrf.mxu0 }
 0x5dc   :  { %16279 = vst [vmem:[#allocation142_spill] sm:$0xff] %v11562_v28  ;;  %v3463_v28 = vadd.f32 %v3462_v42, %v11504_v38  ;;  %v3483_v38 = vadd.f32 %v3482_v31, %v11516_v36  ;;  %v4004_v7 = vmul.f32 %v11574_v49, %v11574_v49 }
 0x5de   :  { %v11568_v21 = vpop.f32.mrf.mxu0 }
 0x5df   :  { %16282 = vst [vmem:[#allocation160_spill] sm:$0xff] %v11568_v21  ;;  %v3475_v21 = vadd.f32 %v3474_v56, %v11510_v37 }
 0x5e0   :  { %v11576_v19 = vpop.f32.mrf.mxu0 }
 0x5e7   :  { %v3682_v18 = vpop.f32.mrf.mxu1 }
 0x5e9   :  { %v3684_v35 = vpop.f32.mrf.mxu1 }
 0x5ec   :  { %v3688_v16 = vpop.f32.mrf.mxu1 }
 0x5ee   :  { %v3690_v27 = vpop.f32.mrf.mxu1 }
 0x5f0   :  { %v11546_v50 = vpop.f32.mrf.mxu1 }
 0x5f2   :  { %v11548_v8 = vpop.f32.mrf.mxu1 }
 0x5f4   :  { %v11552_v3 = vpop.f32.mrf.mxu1 }
 0x5f6   :  { %v11554_v11 = vpop.f32.mrf.mxu1 }
 0x5f8   :  { %v11558_v39 = vpop.f32.mrf.mxu1 }
 0x5fa   :  { %v11560_v2 = vpop.f32.mrf.mxu1 }
 0x5fc   :  { %v11564_v47 = vpop.f32.mrf.mxu1 }
 0x5fd   :  { %16280 = vst [vmem:[#allocation130_spill] sm:$0xff] %v11564_v47  ;;  %v3469_v47 = vadd.f32 %v3468_v62, %v11506_v57  ;;  %v11596_v57 = vadd.f32 %v3486_v29, %v11518_v17  ;;  %v11613_v17 = vadd.f32 %v3494_v43, %v11524_v55 }
 0x5fe   :  { %v11566_v6 = vpop.f32.mrf.mxu1 }
 0x5ff   :  { %16281 = vst [vmem:[#allocation192_spill] sm:$0xff] %v11566_v6  ;;  %v3471_v6 = vadd.f32 %v3470_v44, %v11508_v22  ;;  %v11599_v22 = vadd.f32 %v3488_v5, %v11520_v60 }
 0x600   :  { %v11570_v54 = vpop.f32.mrf.mxu1 }
 0x601   :  { %16283 = vst [vmem:[#allocation163_spill] sm:$0xff] %v11570_v54  ;;  %v11584_v54 = vadd.f32 %v3569_v25, %v3457_v41  ;;  %v11603_v41 = vadd.f32 %v3575_v40, %v3463_v28  ;;  %v4008_v28 = vmul.f32 %v11586_v26, %v11586_v26  ;;  %v11619_v62 = vadd.f32 %v3583_v30, %v3471_v6 }
 0x602   :  { %v11572_v32 = vpop.f32.mrf.mxu1  ;;  %v11631_v6 = vadd.f32 %v11530_v46, %v3469_v47 }
 0x603   :  { %v3955_v45 = vadd.f32 %v11574_v49, %v11584_v54  ;;  %v4003_v60 = vmul.f32 %v11584_v54, %v11584_v54  ;;  %v4007_v20 = vmul.f32 %v11603_v41, %v11603_v41  ;;  %v3960_v31 = vadd.f32 %v11586_v26, %v11603_v41 }
 0x604   :  { %v11578_v59 = vpop.f32.mrf.mxu1 }
 0x605   :  { %v4035_v55 = vadd.f32 %v4004_v7, %v4003_v60  ;;  %v4040_v43 = vadd.f32 %v4008_v28, %v4007_v20  ;;  %v11679_v20 = vadd.f32 %v11540_v12, %v11592_v51 }
 0x606   :  { %v3795_v10 = vpop.f32.mrf.mxu0  ;;  %v11588_v24 = vpop.f32.mrf.mxu1 }
 0x607   :  { %v3796_v63 = vadd.f32 %v3795_v10, %v3682_v18  ;;  %v4012_v18 = vmul.f32 %v11619_v62, %v11619_v62  ;;  %v11644_v10 = vadd.f32 %v11532_v53, %v3475_v21 }
 0x608   :  { %v3797_v37 = vpop.f32.mrf.mxu0  ;;  %v3908_v42 = vpop.f32.mrf.mxu1 }
 0x609   :  { %v3798_v36 = vadd.f32 %v3797_v37, %v3684_v35  ;;  %v11610_v33 = vadd.f32 %v3908_v42, %v3796_v63  ;;  %v11641_v35 = vadd.f32 %v11536_v34, %v3477_v15  ;;  %v11653_v37 = vadd.f32 %v11534_v0, %v11526_v58 }
 0x60a   :  { %v3801_v44 = vpop.f32.mrf.mxu0  ;;  %v3910_v13 = vpop.f32.mrf.mxu1  ;;  %v4011_v34 = vmul.f32 %v11631_v6, %v11631_v6  ;;  %v3965_v58 = vadd.f32 %v11619_v62, %v11631_v6 }
 0x60b   :  { %v3956_v56 = vadd.f32 %v3955_v45, %v11610_v33  ;;  %v4005_v23 = vmul.f32 %v11610_v33, %v11610_v33  ;;  %v3802_v25 = vadd.f32 %v3801_v44, %v3688_v16  ;;  %v11624_v1 = vadd.f32 %v3910_v13, %v3798_v36 }
 0x60c   :  { %v3803_v40 = vpop.f32.mrf.mxu0  ;;  %v3914_v29 = vpop.f32.mrf.mxu1  ;;  %v4045_v0 = vadd.f32 %v4012_v18, %v4011_v34  ;;  %v4016_v28 = vmul.f32 %v11641_v35, %v11641_v35  ;;  %v11668_v44 = vadd.f32 %v11542_v9, %v3483_v38  ;;  %v11694_v18 = vadd.f32 %v11550_v4, %v11599_v22 }
 0x60d   :  { %v4006_v61 = vmul.f32 %v11624_v1, %v11624_v1  ;;  %v3804_v5 = vadd.f32 %v3803_v40, %v3690_v27  ;;  %v11635_v14 = vadd.f32 %v3914_v29, %v3802_v25  ;;  %v3957_v30 = vadd.f32 %v3956_v56, %v11624_v1 }
 0x60e   :  { %v3807_v16 = vpop.f32.mrf.mxu0  ;;  %v3916_v47 = vpop.f32.mrf.mxu1  ;;  %v4036_v46 = vadd.f32 %v4035_v55, %v4005_v23  ;;  %v4015_v23 = vmul.f32 %v11644_v10, %v11644_v10  ;;  %v4020_v51 = vmul.f32 %v11668_v44, %v11668_v44  ;;  %v4019_v34 = vmul.f32 %v11679_v20, %v11679_v20 }
 0x60f   :  { %v4009_v27 = vmul.f32 %v11635_v14, %v11635_v14  ;;  %v3808_v63 = vadd.f32 %v3807_v16, %v11546_v50  ;;  %v11649_v7 = vadd.f32 %v3916_v47, %v3804_v5  ;;  %3958 = vadd.xlane.f32.xlu0 %v3957_v30  ;;  %v3961_v15 = vadd.f32 %v3960_v31, %v11635_v14 }
 0x610   :  { %v3809_v42 = vpop.f32.mrf.mxu0  ;;  %v3920_v21 = vpop.f32.mrf.mxu1  ;;  %v4037_v53 = vadd.f32 %v4036_v46, %v4006_v61  ;;  %v4050_v12 = vadd.f32 %v4016_v28, %v4015_v23  ;;  %v4024_v28 = vmul.f32 %v11694_v18, %v11694_v18 }
 0x611   :  { %v4010_v45 = vmul.f32 %v11649_v7, %v11649_v7  ;;  %v3810_v50 = vadd.f32 %v3809_v42, %v11548_v8  ;;  %v11661_v36 = vadd.f32 %v3920_v21, %v3808_v63  ;;  %v4041_v60 = vadd.f32 %v4040_v43, %v4009_v27 }
 0x612   :  { %v3813_v13 = vpop.f32.mrf.mxu0  ;;  %v3922_v56 = vpop.f32.mrf.mxu1  ;;  %v3962_v29 = vadd.f32 %v3961_v15, %v11649_v7  ;;  %v3970_v43 = vadd.f32 %v11641_v35, %v11644_v10 }
 0x613   :  { %v4013_v8 = vmul.f32 %v11661_v36, %v11661_v36  ;;  %v3814_v25 = vadd.f32 %v3813_v13, %v11552_v3  ;;  %v11675_v55 = vadd.f32 %v3922_v56, %v3810_v50  ;;  %4038 = vadd.xlane.f32.xlu0 %v4037_v53  ;;  %v3966_v9 = vadd.f32 %v3965_v58, %v11661_v36  ;;  %v16285_v50 = vld [vmem:[#allocation190_spill] sm:$0xff] }
 0x614   :  { %v3815_v38 = vpop.f32.mrf.mxu0  ;;  %v3926_v31 = vpop.f32.mrf.mxu1  ;;  %v4042_v40 = vadd.f32 %v4041_v60, %v4010_v45  ;;  %v16284_v45 = vld [vmem:[#allocation111_spill] sm:$0xff]  ;;  %v3975_v58 = vadd.f32 %v11668_v44, %v11679_v20 }
 0x615   :  { %v4014_v61 = vmul.f32 %v11675_v55, %v11675_v55  ;;  %v3816_v5 = vadd.f32 %v3815_v38, %v11554_v11  ;;  %v11686_v3 = vadd.f32 %v3926_v31, %v3814_v25  ;;  %v4046_v30 = vadd.f32 %v4045_v0, %v4013_v8  ;;  %v16286_v8 = vld [vmem:[#allocation130_spill] sm:$0xff] }
 0x616   :  { %v3819_v16 = vpop.f32.mrf.mxu0  ;;  %4043 = vadd.xlane.f32.xlu1 %v4042_v40  ;;  %v3928_v47 = vpop.f32.mrf.mxu1  ;;  %v11698_v11 = vadd.f32 %v11544_v52, %v11596_v57  ;;  %v3967_v21 = vadd.f32 %v3966_v9, %v11675_v55  ;;  %v3501_v60 = vadd.f32 %v16285_v50, %v16284_v45  ;;  %v4055_v0 = vadd.f32 %v4020_v51, %v4019_v34  ;;  %v16289_v34 = vld [vmem:[#allocation142_spill] sm:$0xff] }
 0x617   :  { %v4017_v46 = vmul.f32 %v11686_v3, %v11686_v3  ;;  %v3820_v27 = vadd.f32 %v3819_v16, %v11558_v39  ;;  %v11703_v63 = vadd.f32 %v3928_v47, %v3816_v5  ;;  %3963 = vadd.xlane.f32.xlu0 %v3962_v29  ;;  %v3971_v4 = vadd.f32 %v3970_v43, %v11686_v3  ;;  %v16287_v43 = vld [vmem:[#allocation192_spill] sm:$0xff] }
 0x618   :  { %v3821_v22 = vpop.f32.mrf.mxu0  ;;  %v3932_v15 = vpop.f32.mrf.mxu1  ;;  %v4047_v42 = vadd.f32 %v4046_v30, %v4014_v61  ;;  %v4023_v23 = vmul.f32 %v11698_v11, %v11698_v11  ;;  %v3980_v38 = vadd.f32 %v11694_v18, %v11698_v11 }
 0x619   :  { %v4018_v52 = vmul.f32 %v11703_v63, %v11703_v63  ;;  %v3822_v57 = vadd.f32 %v3821_v22, %v11560_v2  ;;  %v11712_v53 = vadd.f32 %v3932_v15, %v3820_v27  ;;  %v4051_v39 = vadd.f32 %v4050_v12, %v4017_v46  ;;  %v16288_v46 = vld [vmem:[#allocation181_spill] sm:$0xff]  ;;  %v16290_v15 = vld [vmem:[#allocation160_spill] sm:$0xff] }
 0x61a   :  { %v3825_v13 = vpop.f32.mrf.mxu0  ;;  %4048 = vadd.xlane.f32.xlu1 %v4047_v42  ;;  %v3934_v56 = vpop.f32.mrf.mxu1  ;;  %v3972_v5 = vadd.f32 %v3971_v4, %v11703_v63  ;;  %v4060_v47 = vadd.f32 %v4024_v28, %v4023_v23  ;;  %v11738_v27 = vadd.f32 %v16288_v46, %v11606_v48  ;;  %v11742_v22 = vadd.f32 %v16289_v34, %v11613_v17 }
 0x61b   :  { %v4021_v2 = vmul.f32 %v11712_v53, %v11712_v53  ;;  %v3826_v25 = vadd.f32 %v3825_v13, %v16286_v8  ;;  %v11725_v9 = vadd.f32 %v3934_v56, %v3822_v57  ;;  %3968 = vadd.xlane.f32.xlu0 %v3967_v21  ;;  %v3976_v31 = vadd.f32 %v3975_v58, %v11712_v53 }
 0x61c   :  { %v3827_v40 = vpop.f32.mrf.mxu0  ;;  %v3938_v29 = vpop.f32.mrf.mxu1  ;;  %v4052_v61 = vadd.f32 %v4051_v39, %v4018_v52  ;;  %v11746_v4 = vadd.f32 %v16290_v15, %v11653_v37  ;;  %v11749_v52 = vadd.f32 %v11576_v19, %v3501_v60  ;;  %v16291_v39 = vld [vmem:[#allocation163_spill] sm:$0xff]  ;;  %v3985_v56 = vadd.f32 %v11742_v22, %v11738_v27 }
 0x61d   :  { %v4022_v30 = vmul.f32 %v11725_v9, %v11725_v9  ;;  %v3828_v12 = vadd.f32 %v3827_v40, %v16287_v43  ;;  %v11734_v51 = vadd.f32 %v3938_v29, %v3826_v25  ;;  %v4056_v16 = vadd.f32 %v4055_v0, %v4021_v2 }
 0x61e   :  { %v3831_v42 = vpop.f32.mrf.mxu0  ;;  %4053 = vadd.xlane.f32.xlu1 %v4052_v61  ;;  %v3940_v21 = vpop.f32.mrf.mxu1  ;;  %v3977_v0 = vadd.f32 %v3976_v31, %v11725_v9  ;;  %v4028_v23 = vmul.f32 %v11742_v22, %v11742_v22  ;;  %v4027_v25 = vmul.f32 %v11738_v27, %v11738_v27 }
 0x61f   :  { %v4025_v57 = vmul.f32 %v11734_v51, %v11734_v51  ;;  %v3832_v48 = vadd.f32 %v3831_v42, %v16291_v39  ;;  %v11754_v45 = vadd.f32 %v3940_v21, %v3828_v12  ;;  %3973 = vadd.xlane.f32.xlu0 %v3972_v5  ;;  %v3981_v17 = vadd.f32 %v3980_v38, %v11734_v51 }
 0x620   :  { %v3833_v50 = vpop.f32.mrf.mxu0  ;;  %v3944_v58 = vpop.f32.mrf.mxu1  ;;  %v4057_v37 = vadd.f32 %v4056_v16, %v4022_v30  ;;  %v4031_v38 = vmul.f32 %v11746_v4, %v11746_v4  ;;  %v3990_v12 = vadd.f32 %v11749_v52, %v11746_v4  ;;  %v4065_v46 = vadd.f32 %v4028_v23, %v4027_v25 }
 0x621   :  { %v4026_v28 = vmul.f32 %v11754_v45, %v11754_v45  ;;  %v3834_v19 = vadd.f32 %v3833_v50, %v11572_v32  ;;  %v11761_v60 = vadd.f32 %v3944_v58, %v3832_v48  ;;  %v4061_v13 = vadd.f32 %v4060_v47, %v4025_v57 }
 0x622   :  { %v3837_v2 = vpop.f32.mrf.mxu0  ;;  %4058 = vadd.xlane.f32.xlu1 %v4057_v37  ;;  %v3946_v8 = vpop.f32.mrf.mxu1  ;;  %v4032_v32 = vmul.f32 %v11749_v52, %v11749_v52 }
 0x623   :  { %v3838_v31 = vadd.f32 %v3837_v2, %v11578_v59  ;;  %3978 = vadd.xlane.f32.xlu0 %v3977_v0  ;;  %v3986_v40 = vadd.f32 %v3985_v56, %v11761_v60  ;;  %v4029_v29 = vmul.f32 %v11761_v60, %v11761_v60  ;;  %v11777_v61 = vadd.f32 %v3946_v8, %v3834_v19 }
 0x624   :  { %v3839_v5 = vpop.f32.mrf.mxu0  ;;  %v3950_v30 = vpop.f32.mrf.mxu1  ;;  %v4062_v43 = vadd.f32 %v4061_v13, %v4026_v28  ;;  %v3982_v59 = vadd.f32 %v3981_v17, %v11754_v45  ;;  %v4070_v15 = vadd.f32 %v4032_v32, %v4031_v38 }
 0x625   :  { %v3840_v16 = vadd.f32 %v3839_v5, %v11588_v24  ;;  %v11782_v47 = vadd.f32 %v3950_v30, %v3838_v31  ;;  %v4030_v39 = vmul.f32 %v11777_v61, %v11777_v61  ;;  %v3987_v24 = vadd.f32 %v3986_v40, %v11777_v61 }
 0x626   :  { %4063 = vadd.xlane.f32.xlu1 %v4062_v43  ;;  %v3952_v34 = vpop.f32.mrf.mxu1  ;;  %v4066_v48 = vadd.f32 %v4065_v46, %v4029_v29 }
 0x627   :  { %v3991_v42 = vadd.f32 %v3990_v12, %v11782_v47  ;;  %v4033_v21 = vmul.f32 %v11782_v47, %v11782_v47  ;;  %v11788_v57 = vadd.f32 %v3952_v34, %v3840_v16  ;;  %3983 = vadd.xlane.f32.xlu0 %v3982_v59 }
 0x628   :  { %v4067_v37 = vadd.f32 %v4066_v48, %v4030_v39 }
 0x629   :  { %v4034_v17 = vmul.f32 %v11788_v57, %v11788_v57  ;;  %v3992_v50 = vadd.f32 %v3991_v42, %v11788_v57  ;;  %v4071_v58 = vadd.f32 %v4070_v15, %v4033_v21 }
 0x62a   :  { %3988 = vadd.xlane.f32.xlu1 %v3987_v24 }
 0x62b   :  { %3993 = vadd.xlane.f32.xlu0 %v3992_v50  ;;  %v4072_v0 = vadd.f32 %v4071_v58, %v4034_v17 }
 0x62e   :  { %4068 = vadd.xlane.f32.xlu1 %v4067_v37  ;;  %v4099_v37 = vld [vmem:[%s15216_s6] sm:$0xff] }
 0x62f   :  { %4073 = vadd.xlane.f32.xlu0 %v4072_v0 }
 0x698   :  { %v3959_v28 = vpop.xlane.xlu0 %3958 }
 0x699   :  { %v3995_v19 = vmul.f32 0.001953125, %v3959_v28 }
 0x69b   :  { %v4083_v56 = vmul.f32 %v3995_v19, %v3995_v19 }
 0x69c   :  { %v4039_v13 = vpop.xlane.xlu0 %4038 }
 0x69d   :  { %v4075_v23 = vmul.f32 0.001953125, %v4039_v13 }
 0x69f   :  { %v4091_v2 = vsub.f32 %v4075_v23, %v4083_v56  ;;  %v4044_v8 = vpop.xlane.xlu1 %4043 }
 0x6a0   :  { %v3964_v25 = vpop.xlane.xlu0 %3963  ;;  %v4076_v31 = vmul.f32 0.001953125, %v4044_v8 }
 0x6a1   :  { %v4107_v38 = vadd.f32 1e-05, %v4091_v2  ;;  %v3996_v32 = vmul.f32 0.001953125, %v3964_v25 }
 0x6a3   :  { %7827 = vrsqrt.f32 %v4107_v38  ;;  %v4084_v40 = vmul.f32 %v3996_v32, %v3996_v32  ;;  %v4049_v29 = vpop.xlane.xlu1 %4048 }
 0x6a4   :  { %v3969_v5 = vpop.xlane.xlu0 %3968  ;;  %v4077_v16 = vmul.f32 0.001953125, %v4049_v29 }
 0x6a5   :  { %v4092_v30 = vsub.f32 %v4076_v31, %v4084_v40  ;;  %v11796_v43 = vmul.f32 0.001953125, %v3969_v5  ;;  %v4131_v31 = vld [vmem:[%s15217_s7] sm:$0xff] }
 0x6a7   :  { %v4108_v12 = vadd.f32 1e-05, %v4092_v30  ;;  %v4085_v59 = vmul.f32 %v11796_v43, %v11796_v43  ;;  %v4054_v46 = vpop.xlane.xlu1 %4053 }
 0x6a8   :  { %v3974_v34 = vpop.xlane.xlu0 %3973  ;;  %v4078_v39 = vmul.f32 0.001953125, %v4054_v46 }
 0x6a9   :  { %7829 = vrsqrt.f32 %v4108_v12  ;;  %v4093_v15 = vsub.f32 %v4077_v16, %v4085_v59  ;;  %v11800_v42 = vmul.f32 0.001953125, %v3974_v34  ;;  %v4100_v16 = vld [vmem:[%s15216_s6 + $0x8] sm:$0xff] }
 0x6ab   :  { %v4109_v21 = vadd.f32 1e-05, %v4093_v15  ;;  %v4086_v24 = vmul.f32 %v11800_v42, %v11800_v42  ;;  %v4059_v48 = vpop.xlane.xlu1 %4058 }
 0x6ac   :  { %v3979_v17 = vpop.xlane.xlu0 %3978  ;;  %v4079_v28 = vmul.f32 0.001953125, %v4059_v48 }
 0x6ad   :  { %7831 = vrsqrt.f32 %v4109_v21  ;;  %v4094_v50 = vsub.f32 %v4078_v39, %v4086_v24  ;;  %v11804_v58 = vmul.f32 0.001953125, %v3979_v17 }
 0x6af   :  { %v4110_v0 = vadd.f32 1e-05, %v4094_v50  ;;  %v4087_v13 = vmul.f32 %v11804_v58, %v11804_v58  ;;  %v4064_v56 = vpop.xlane.xlu1 %4063  ;;  %v4101_v50 = vld [vmem:[%s15216_s6 + $0x10] sm:$0xff] }
 0x6b0   :  { %v7828_v23 = vpop.eup %7827  ;;  %v3984_v2 = vpop.xlane.xlu0 %3983  ;;  %v4080_v29 = vmul.f32 0.001953125, %v4064_v56 }
 0x6b1   :  { %7833 = vrsqrt.f32 %v4110_v0  ;;  %v4095_v8 = vsub.f32 %v4079_v28, %v4087_v13  ;;  %v11811_v25 = vmul.f32 0.001953125, %v3984_v2  ;;  %v4123_v38 = vmul.f32 %v7828_v23, %v4099_v37 }
 0x6b3   :  { %v4111_v40 = vadd.f32 1e-05, %v4095_v8  ;;  %v4088_v5 = vmul.f32 %v11811_v25, %v11811_v25  ;;  %v3989_v30 = vpop.xlane.xlu1 %3988  ;;  %4157 = vperm.xlu1 %7809, %v4123_v38   ;;  %v4139_v12 = vmul.f32 %v4123_v38, %v3995_v19  ;;  %v4132_v19 = vld [vmem:[%s15217_s7 + $0x8] sm:$0xff] }
 0x6b4   :  { %v11821_v59 = vmul.f32 0.001953125, %v3989_v30  ;;  %v3994_v46 = vpop.xlane.xlu0 %3993 }
 0x6b5   :  { %7835 = vrsqrt.f32 %v4111_v40  ;;  %v4096_v34 = vsub.f32 %v4080_v29, %v4088_v5  ;;  %v11823_v15 = vmul.f32 0.001953125, %v3994_v46  ;;  %v4147_v21 = vsub.f32 %v4131_v31, %v4139_v12  ;;  %v4102_v29 = vld [vmem:[%s15216_s6 + $0x18] sm:$0xff]  ;;  %v4133_v46 = vld [vmem:[%s15217_s7 + $0x10] sm:$0xff] }
 0x6b6   :  { %v7830_v39 = vpop.eup %7829  ;;  %v4089_v37 = vmul.f32 %v11821_v59, %v11821_v59 }
 0x6b7   :  { %v4124_v24 = vmul.f32 %v7830_v39, %v4100_v16  ;;  %v4112_v48 = vadd.f32 1e-05, %v4096_v34  ;;  %v4069_v17 = vpop.xlane.xlu1 %4068  ;;  %4229 = vperm.xlu1 %7809, %v4147_v21   ;;  %v4090_v56 = vmul.f32 %v11823_v15, %v11823_v15  ;;  %v4103_v34 = vld [vmem:[%s15216_s6 + $0x20] sm:$0xff] }
 0x6b8   :  { %v4081_v0 = vmul.f32 0.001953125, %v4069_v17  ;;  %v4074_v28 = vpop.xlane.xlu0 %4073  ;;  %v4135_v17 = vld [vmem:[%s15217_s7 + $0x20] sm:$0xff] }
 0x6b9   :  { %v4140_v13 = vmul.f32 %v4124_v24, %v3996_v32  ;;  %v4082_v23 = vmul.f32 0.001953125, %v4074_v28  ;;  %4162 = vperm.xlu0 %7810, %v4124_v24   ;;  %7837 = vrsqrt.f32 %v4112_v48  ;;  %v4105_v28 = vld [vmem:[%s15216_s6 + $0x30] sm:$0xff] }
 0x6ba   :  { %v7832_v2 = vpop.eup %7831  ;;  %v4097_v8 = vsub.f32 %v4081_v0, %v4089_v37 }
 0x6bb   :  { %v4148_v38 = vsub.f32 %v4132_v19, %v4140_v13  ;;  %v4125_v31 = vmul.f32 %v7832_v2, %v4101_v50  ;;  %v4098_v40 = vsub.f32 %v4082_v23, %v4090_v56  ;;  %v4106_v13 = vld [vmem:[%s15216_s6 + $0x38] sm:$0xff] }
 0x6bc   :  { %v4113_v5 = vadd.f32 1e-05, %v4097_v8 }
 0x6bd   :  { %v4114_v30 = vadd.f32 1e-05, %v4098_v40  ;;  %4234 = vperm.xlu0 %7810, %v4148_v38   ;;  %4167 = vperm.xlu1 %7809, %v4125_v31   ;;  %v4141_v12 = vmul.f32 %v4125_v31, %v11796_v43  ;;  %v4134_v43 = vld [vmem:[%s15217_s7 + $0x18] sm:$0xff]  ;;  %v4137_v38 = vld [vmem:[%s15217_s7 + $0x30] sm:$0xff] }
 0x6be   :  { %v7834_v32 = vpop.eup %7833  ;;  %7839 = vrsqrt.f32 %v4113_v5 }
 0x6bf   :  { %v4126_v16 = vmul.f32 %v7834_v32, %v4102_v29  ;;  %7841 = vrsqrt.f32 %v4114_v30  ;;  %v4149_v39 = vsub.f32 %v4133_v46, %v4141_v12  ;;  %v4136_v29 = vld [vmem:[%s15217_s7 + $0x28] sm:$0xff]  ;;  %v4138_v32 = vld [vmem:[%s15217_s7 + $0x38] sm:$0xff] }
 0x6c1   :  { %4172 = vperm.xlu1 %7809, %v4126_v16   ;;  %v4142_v24 = vmul.f32 %v4126_v16, %v11800_v42  ;;  %v4104_v42 = vld [vmem:[%s15216_s6 + $0x28] sm:$0xff] }
 0x6c2   :  { %v7836_v21 = vpop.eup %7835 }
 0x6c3   :  { %v4127_v48 = vmul.f32 %v7836_v21, %v4103_v34  ;;  %v4150_v50 = vsub.f32 %v4134_v43, %v4142_v24 }
 0x6c5   :  { %v4143_v19 = vmul.f32 %v4127_v48, %v11804_v58  ;;  %4239 = vperm.xlu1 %7809, %v4149_v39   ;;  %4177 = vperm.xlu0 %7810, %v4127_v48  }
 0x6c6   :  { %v7838_v0 = vpop.eup %7837 }
 0x6c7   :  { %v4151_v37 = vsub.f32 %v4135_v17, %v4143_v19  ;;  %v4128_v56 = vmul.f32 %v7838_v0, %v4104_v42 }
 0x6c9   :  { %4244 = vperm.xlu0 %7810, %v4150_v50   ;;  %4249 = vperm.xlu1 %7809, %v4151_v37   ;;  %v4144_v40 = vmul.f32 %v4128_v56, %v11811_v25 }
 0x6cb   :  { %v7840_v58 = vpop.eup %7839  ;;  %v4152_v12 = vsub.f32 %v4136_v29, %v4144_v40 }
 0x6cc   :  { %v7842_v23 = vpop.eup %7841  ;;  %v4129_v2 = vmul.f32 %v7840_v58, %v4105_v28 }
 0x6cd   :  { %4182 = vperm.xlu0 %7810, %v4128_v56   ;;  %v4130_v8 = vmul.f32 %v7842_v23, %v4106_v13 }
 0x6ce   :  { %v4145_v31 = vmul.f32 %v4129_v2, %v11821_v59 }
 0x6cf   :  { %4192 = vperm.xlu1 %7809, %v4130_v8   ;;  %v4146_v30 = vmul.f32 %v4130_v8, %v11823_v15 }
 0x6d0   :  { %v4153_v5 = vsub.f32 %v4137_v38, %v4145_v31 }
 0x6d1   :  { %4187 = vperm.xlu0 %7810, %v4129_v2   ;;  %v4154_v16 = vsub.f32 %v4138_v32, %v4146_v30 }
 0x6d3   :  { %4259 = vperm.xlu1 %7809, %v4153_v5  }
 0x6d5   :  { %4254 = vperm.xlu0 %7810, %v4152_v12  }
 0x6d7   :  { %4264 = vperm.xlu1 %7809, %v4154_v16  }
 0x72e   :  { %v4158_v59 = vpop.permute.xlu1 %4157 }
 0x72f   :  { %v4195_v25 = vmul.f32 %v4158_v59, %v11584_v54  ;;  %v4196_v34 = vmul.f32 %v4158_v59, %v11574_v49  ;;  %v4198_v15 = vmul.f32 %v4158_v59, %v11624_v1  ;;  %v4197_v49 = vmul.f32 %v4158_v59, %v11610_v33 }
 0x732   :  { %v4230_v46 = vpop.permute.xlu1 %4229 }
 0x733   :  { %v4267_v21 = vadd.f32 %v4230_v46, %v4195_v25  ;;  %v4268_v39 = vadd.f32 %v4230_v46, %v4196_v34  ;;  %v4270_v48 = vadd.f32 %v4230_v46, %v4198_v15  ;;  %v4269_v1 = vadd.f32 %v4230_v46, %v4197_v49 }
 0x734   :  { %v4163_v33 = vpop.permute.xlu0 %4162 }
 0x735   :  { %v11876_v24 = vmax.f32 %v4267_v21, 0.0  ;;  %v11883_v43 = vmax.f32 %v4268_v39, 0.0  ;;  %v11889_v54 = vmax.f32 %v4270_v48, 0.0  ;;  %v11900_v17 = vmax.f32 %v4269_v1, 0.0 }
 0x736   :  { %v4199_v50 = vmul.f32 %v4163_v33, %v11603_v41  ;;  %v4200_v0 = vmul.f32 %v4163_v33, %v11586_v26  ;;  %v4202_v13 = vmul.f32 %v4163_v33, %v11649_v7  ;;  %v4201_v58 = vmul.f32 %v4163_v33, %v11635_v14 }
 0x737   :  { %16292 = vst [vmem:[#allocation162_spill] sm:$0xff] %v11876_v24  ;;  %4395 = vrot.lane.b32.xlu0 %v11876_v24, %s7919_s18  ;;  %4609 = vrot.lane.b32.xlu1 %v11876_v24, %s7917_s17  ;;  %16293 = vst [vmem:[#allocation144_spill] sm:$0xff] %v11883_v43 }
 0x738   :  { %16294 = vst [vmem:[#allocation183_spill] sm:$0xff] %v11889_v54  ;;  %16295 = vst [vmem:[#allocation165_spill] sm:$0xff] %v11900_v17  ;;  %v4235_v19 = vpop.permute.xlu0 %4234  ;;  %v4168_v14 = vpop.permute.xlu1 %4167 }
 0x739   :  { %v4271_v37 = vadd.f32 %v4235_v19, %v4199_v50  ;;  %v4272_v42 = vadd.f32 %v4235_v19, %v4200_v0  ;;  %v4274_v26 = vadd.f32 %v4235_v19, %v4202_v13  ;;  %v4273_v56 = vadd.f32 %v4235_v19, %v4201_v58 }
 0x73a   :  { %v4203_v38 = vmul.f32 %v4168_v14, %v11631_v6  ;;  %v4204_v40 = vmul.f32 %v4168_v14, %v11619_v62  ;;  %v4206_v62 = vmul.f32 %v4168_v14, %v11675_v55  ;;  %v4205_v46 = vmul.f32 %v4168_v14, %v11661_v36 }
 0x73b   :  { %4411 = vrot.lane.b32.xlu0 %v11883_v43, %s7919_s18  ;;  %5331 = vrot.lane.b32.xlu1 %v11883_v43, %s7914_s15  ;;  %v11928_v28 = vmax.f32 %v4271_v37, 0.0  ;;  %v11934_v41 = vmax.f32 %v4272_v42, 0.0  ;;  %v11946_v23 = vmax.f32 %v4274_v26, 0.0  ;;  %v11952_v7 = vmax.f32 %v4273_v56, 0.0 }
 0x73c   :  { %v11970_v2 = vpop.permute.xlu1 %4172 }
 0x73d   :  { %16296 = vst [vmem:[#allocation132_spill] sm:$0xff] %v11928_v28  ;;  %16297 = vst [vmem:[#allocation116_spill] sm:$0xff] %v11934_v41  ;;  %v4207_v50 = vmul.f32 %v11970_v2, %v11644_v10  ;;  %v4208_v13 = vmul.f32 %v11970_v2, %v11641_v35 }
 0x73e   :  { %16298 = vst [vmem:[#allocation86_spill] sm:$0xff] %v11946_v23  ;;  %16299 = vst [vmem:[#allocation70_spill] sm:$0xff] %v11952_v7 }
 0x73f   :  { %4625 = vrot.lane.b32.xlu0 %v11883_v43, %s7917_s17  ;;  %4443 = vrot.lane.b32.xlu1 %v11889_v54, %s7919_s18 }
 0x740   :  { %v4240_v8 = vpop.permute.xlu1 %4239  ;;  %v11992_v6 = vpop.permute.xlu0 %4177 }
 0x741   :  { %v4275_v31 = vadd.f32 %v4240_v8, %v4203_v38  ;;  %v4276_v29 = vadd.f32 %v4240_v8, %v4204_v40  ;;  %v4278_v32 = vadd.f32 %v4240_v8, %v4206_v62  ;;  %v4277_v34 = vadd.f32 %v4240_v8, %v4205_v46 }
 0x742   :  { %v4210_v38 = vmul.f32 %v11970_v2, %v11703_v63  ;;  %v4209_v62 = vmul.f32 %v11970_v2, %v11686_v3 }
 0x743   :  { %4657 = vrot.lane.b32.xlu0 %v11889_v54, %s7917_s17  ;;  %5037 = vrot.lane.b32.xlu1 %v11876_v24, %s7915_s0  ;;  %v11986_v5 = vmax.f32 %v4275_v31, 0.0  ;;  %v11994_v30 = vmax.f32 %v4276_v29, 0.0  ;;  %v12007_v59 = vmax.f32 %v4278_v32, 0.0  ;;  %v12030_v15 = vmax.f32 %v4277_v34, 0.0 }
 0x744   :  { %v4245_v12 = vpop.permute.xlu0 %4244  ;;  %v12005_v16 = vpop.permute.xlu1 %4249 }
 0x745   :  { %16300 = vst [vmem:[#allocation41_spill] sm:$0xff] %v11986_v5  ;;  %16301 = vst [vmem:[#allocation198_spill] sm:$0xff] %v11994_v30  ;;  %v4279_v42 = vadd.f32 %v4245_v12, %v4207_v50  ;;  %v4280_v58 = vadd.f32 %v4245_v12, %v4208_v13  ;;  %v4282_v31 = vadd.f32 %v4245_v12, %v4210_v38 }
 0x746   :  { %16302 = vst [vmem:[#allocation197_spill] sm:$0xff] %v12007_v59  ;;  %16303 = vst [vmem:[#allocation196_spill] sm:$0xff] %v12030_v15  ;;  %v4281_v63 = vadd.f32 %v4245_v12, %v4209_v62 }
 0x747   :  { %5347 = vrot.lane.b32.xlu0 %v11900_v17, %s7914_s15  ;;  %5759 = vrot.lane.b32.xlu1 %v11883_v43, %s7912_s30  ;;  %v12076_v56 = vmax.f32 %v4279_v42, 0.0  ;;  %v12086_v35 = vmax.f32 %v4280_v58, 0.0  ;;  %v12104_v32 = vmax.f32 %v4282_v31, 0.0 }
 0x748   :  { %v12013_v55 = vpop.permute.xlu0 %4182  ;;  %v12114_v3 = vmax.f32 %v4281_v63, 0.0 }
 0x749   :  { %16311 = vst [vmem:[#allocation118_spill] sm:$0xff] %v12076_v56  ;;  %16314 = vst [vmem:[#allocation71_spill] sm:$0xff] %v12086_v35 }
 0x74a   :  { %v12015_v25 = vpop.permute.xlu1 %4192  ;;  %16317 = vst [vmem:[#allocation26_spill] sm:$0xff] %v12104_v32  ;;  %16320 = vst [vmem:[#allocation28_spill] sm:$0xff] %v12114_v3 }
 0x74b   :  { %5315 = vrot.lane.b32.xlu0 %v11876_v24, %s7914_s15  ;;  %5743 = vrot.lane.b32.xlu1 %v11876_v24, %s7912_s30 }
 0x74c   :  { %v12022_v21 = vpop.permute.xlu0 %4187 }
 0x74e   :  { %v12024_v39 = vpop.permute.xlu1 %4259 }
 0x74f   :  { %5053 = vrot.lane.b32.xlu0 %v11883_v43, %s7915_s0  ;;  %4823 = vrot.lane.b32.xlu1 %v11876_v24, %s7916_s16 }
 0x750   :  { %v12036_v36 = vpop.permute.xlu0 %4254 }
 0x752   :  { %v12038_v48 = vpop.permute.xlu1 %4264 }
 0x753   :  { %5085 = vrot.lane.b32.xlu0 %v11889_v54, %s7915_s0  ;;  %5545 = vrot.lane.b32.xlu1 %v11883_v43, %s7913_s12 }
 0x757   :  { %5775 = vrot.lane.b32.xlu0 %v11900_v17, %s7912_s30  ;;  %5529 = vrot.lane.b32.xlu1 %v11876_v24, %s7913_s12 }
 0x75b   :  { %4839 = vrot.lane.b32.xlu0 %v11883_v43, %s7916_s16  ;;  %4641 = vrot.lane.b32.xlu1 %v11900_v17, %s7917_s17 }
 0x75f   :  { %4871 = vrot.lane.b32.xlu0 %v11889_v54, %s7916_s16  ;;  %4397 = vrot.lane.b32.xlu1 %v11928_v28, %s7919_s18 }
 0x763   :  { %5561 = vrot.lane.b32.xlu0 %v11900_v17, %s7913_s12  ;;  %4413 = vrot.lane.b32.xlu1 %v11934_v41, %s7919_s18 }
 0x767   :  { %4627 = vrot.lane.b32.xlu0 %v11934_v41, %s7917_s17  ;;  %4611 = vrot.lane.b32.xlu1 %v11928_v28, %s7917_s17 }
 0x76b   :  { %4659 = vrot.lane.b32.xlu0 %v11946_v23, %s7917_s17  ;;  %5333 = vrot.lane.b32.xlu1 %v11934_v41, %s7914_s15 }
 0x76f   :  { %5349 = vrot.lane.b32.xlu0 %v11952_v7, %s7914_s15  ;;  %5317 = vrot.lane.b32.xlu1 %v11928_v28, %s7914_s15 }
 0x773   :  { %4445 = vrot.lane.b32.xlu0 %v11946_v23, %s7919_s18  ;;  %5039 = vrot.lane.b32.xlu1 %v11928_v28, %s7915_s0 }
 0x777   :  { %5055 = vrot.lane.b32.xlu0 %v11934_v41, %s7915_s0  ;;  %5761 = vrot.lane.b32.xlu1 %v11934_v41, %s7912_s30 }
 0x77b   :  { %5087 = vrot.lane.b32.xlu0 %v11946_v23, %s7915_s0  ;;  %5745 = vrot.lane.b32.xlu1 %v11928_v28, %s7912_s30 }
 0x77f   :  { %5777 = vrot.lane.b32.xlu0 %v11952_v7, %s7912_s30  ;;  %4825 = vrot.lane.b32.xlu1 %v11928_v28, %s7916_s16 }
 0x783   :  { %4841 = vrot.lane.b32.xlu0 %v11934_v41, %s7916_s16  ;;  %5547 = vrot.lane.b32.xlu1 %v11934_v41, %s7913_s12 }
 0x787   :  { %4873 = vrot.lane.b32.xlu0 %v11946_v23, %s7916_s16  ;;  %5531 = vrot.lane.b32.xlu1 %v11928_v28, %s7913_s12 }
 0x78b   :  { %5563 = vrot.lane.b32.xlu0 %v11952_v7, %s7913_s12  ;;  %4613 = vrot.lane.b32.xlu1 %v11986_v5, %s7917_s17 }
 0x78f   :  { %4643 = vrot.lane.b32.xlu0 %v11952_v7, %s7917_s17  ;;  %5335 = vrot.lane.b32.xlu1 %v11994_v30, %s7914_s15 }
 0x793   :  { %4399 = vrot.lane.b32.xlu0 %v11986_v5, %s7919_s18  ;;  %5319 = vrot.lane.b32.xlu1 %v11986_v5, %s7914_s15 }
 0x797   :  { %4415 = vrot.lane.b32.xlu0 %v11994_v30, %s7919_s18  ;;  %4447 = vrot.lane.b32.xlu1 %v12007_v59, %s7919_s18 }
 0x79b   :  { %4629 = vrot.lane.b32.xlu0 %v11994_v30, %s7917_s17  ;;  %5041 = vrot.lane.b32.xlu1 %v11986_v5, %s7915_s0 }
 0x79f   :  { %4661 = vrot.lane.b32.xlu0 %v12007_v59, %s7917_s17  ;;  %5763 = vrot.lane.b32.xlu1 %v11994_v30, %s7912_s30 }
 0x7a3   :  { %5351 = vrot.lane.b32.xlu0 %v12030_v15, %s7914_s15  ;;  %5747 = vrot.lane.b32.xlu1 %v11986_v5, %s7912_s30 }
 0x7a7   :  { %5057 = vrot.lane.b32.xlu0 %v11994_v30, %s7915_s0  ;;  %4827 = vrot.lane.b32.xlu1 %v11986_v5, %s7916_s16 }
 0x7a9   :  { %v12044_v49 = vpop.permute.xlu1 %4609  ;;  %v12046_v1 = vpop.permute.xlu0 %4395 }
 0x7aa   :  { %16304 = vst [vmem:[#allocation173_spill] sm:$0xff] %v12046_v1 }
 0x7ab   :  { %5089 = vrot.lane.b32.xlu0 %v12007_v59, %s7915_s0  ;;  %5549 = vrot.lane.b32.xlu1 %v11994_v30, %s7913_s12 }
 0x7ad   :  { %v12052_v33 = vpop.permute.xlu1 %5331  ;;  %v12054_v19 = vpop.permute.xlu0 %4411 }
 0x7ae   :  { %16305 = vst [vmem:[#allocation187_spill] sm:$0xff] %v12052_v33  ;;  %16306 = vst [vmem:[#allocation171_spill] sm:$0xff] %v12054_v19 }
 0x7af   :  { %5779 = vrot.lane.b32.xlu0 %v12030_v15, %s7912_s30  ;;  %5533 = vrot.lane.b32.xlu1 %v11986_v5, %s7913_s12 }
 0x7b1   :  { %v12062_v37 = vpop.permute.xlu1 %4443  ;;  %v12064_v0 = vpop.permute.xlu0 %4625 }
 0x7b2   :  { %16307 = vst [vmem:[#allocation166_spill] sm:$0xff] %v12062_v37  ;;  %16308 = vst [vmem:[#allocation151_spill] sm:$0xff] %v12064_v0 }
 0x7b3   :  { %4843 = vrot.lane.b32.xlu0 %v11994_v30, %s7916_s16  ;;  %4645 = vrot.lane.b32.xlu1 %v12030_v15, %s7917_s17 }
 0x7b5   :  { %v12072_v26 = vpop.permute.xlu1 %5037  ;;  %v12074_v10 = vpop.permute.xlu0 %4657 }
 0x7b6   :  { %16309 = vst [vmem:[#allocation137_spill] sm:$0xff] %v12072_v26  ;;  %16310 = vst [vmem:[#allocation121_spill] sm:$0xff] %v12074_v10 }
 0x7b7   :  { %4875 = vrot.lane.b32.xlu0 %v12007_v59, %s7916_s16  ;;  %4401 = vrot.lane.b32.xlu1 %v12076_v56, %s7919_s18 }
 0x7b9   :  { %v12082_v14 = vpop.permute.xlu1 %5759  ;;  %v12084_v8 = vpop.permute.xlu0 %5347 }
 0x7ba   :  { %16312 = vst [vmem:[#allocation99_spill] sm:$0xff] %v12082_v14  ;;  %16313 = vst [vmem:[#allocation91_spill] sm:$0xff] %v12084_v8 }
 0x7bb   :  { %5565 = vrot.lane.b32.xlu0 %v12030_v15, %s7913_s12  ;;  %4417 = vrot.lane.b32.xlu1 %v12086_v35, %s7919_s18 }
 0x7bd   :  { %v12094_v40 = vpop.permute.xlu0 %5315  ;;  %v12096_v29 = vpop.permute.xlu1 %5743 }
 0x7be   :  { %16315 = vst [vmem:[#allocation46_spill] sm:$0xff] %v12094_v40  ;;  %16316 = vst [vmem:[#allocation189_spill] sm:$0xff] %v12096_v29 }
 0x7bf   :  { %4631 = vrot.lane.b32.xlu0 %v12086_v35, %s7917_s17  ;;  %4615 = vrot.lane.b32.xlu1 %v12076_v56, %s7917_s17 }
 0x7c1   :  { %v12106_v46 = vpop.permute.xlu0 %5053  ;;  %v12108_v34 = vpop.permute.xlu1 %4823 }
 0x7c2   :  { %16318 = vst [vmem:[#allocation168_spill] sm:$0xff] %v12106_v46  ;;  %16319 = vst [vmem:[#allocation195_spill] sm:$0xff] %v12108_v34  ;;  %v4212_v46 = vmul.f32 %v11992_v6, %v11668_v44 }
 0x7c3   :  { %4663 = vrot.lane.b32.xlu0 %v12104_v32, %s7917_s17  ;;  %5337 = vrot.lane.b32.xlu1 %v12086_v35, %s7914_s15 }
 0x7c5   :  { %v12116_v2 = vpop.permute.xlu0 %5085  ;;  %v12118_v50 = vpop.permute.xlu1 %5545 }
 0x7c6   :  { %16321 = vst [vmem:[#allocation140_spill] sm:$0xff] %v12116_v2  ;;  %16322 = vst [vmem:[#allocation176_spill] sm:$0xff] %v12118_v50 }
 0x7c7   :  { %5353 = vrot.lane.b32.xlu0 %v12114_v3, %s7914_s15  ;;  %5321 = vrot.lane.b32.xlu1 %v12076_v56, %s7914_s15 }
 0x7c9   :  { %v12124_v12 = vpop.permute.xlu0 %5775  ;;  %v12126_v42 = vpop.permute.xlu1 %5529 }
 0x7ca   :  { %16323 = vst [vmem:[#allocation174_spill] sm:$0xff] %v12124_v12  ;;  %16324 = vst [vmem:[#allocation30_spill] sm:$0xff] %v12126_v42 }
 0x7cb   :  { %4449 = vrot.lane.b32.xlu0 %v12104_v32, %s7919_s18  ;;  %5043 = vrot.lane.b32.xlu1 %v12076_v56, %s7915_s0 }
 0x7cd   :  { %v12132_v13 = vpop.permute.xlu0 %4839  ;;  %v12134_v58 = vpop.permute.xlu1 %4641 }
 0x7ce   :  { %16325 = vst [vmem:[#allocation155_spill] sm:$0xff] %v12132_v13  ;;  %16326 = vst [vmem:[#allocation150_spill] sm:$0xff] %v12134_v58  ;;  %v4211_v13 = vmul.f32 %v11992_v6, %v11679_v20  ;;  %v4284_v20 = vadd.f32 %v12005_v16, %v4212_v46  ;;  %v4214_v46 = vmul.f32 %v11992_v6, %v11725_v9 }
 0x7cf   :  { %5059 = vrot.lane.b32.xlu0 %v12086_v35, %s7915_s0  ;;  %5765 = vrot.lane.b32.xlu1 %v12086_v35, %s7912_s30 }
 0x7d0   :  { %v4283_v2 = vadd.f32 %v12005_v16, %v4211_v13  ;;  %v12206_v44 = vmax.f32 %v4284_v20, 0.0 }
 0x7d1   :  { %v12140_v38 = vpop.permute.xlu0 %4871  ;;  %v12142_v31 = vpop.permute.xlu1 %4397 }
 0x7d2   :  { %16327 = vst [vmem:[#allocation120_spill] sm:$0xff] %v12140_v38  ;;  %16328 = vst [vmem:[#allocation148_spill] sm:$0xff] %v12142_v31 }
 0x7d3   :  { %5091 = vrot.lane.b32.xlu0 %v12104_v32, %s7915_s0  ;;  %5749 = vrot.lane.b32.xlu1 %v12076_v56, %s7912_s30  ;;  %16340 = vst [vmem:[#allocation208_spill] sm:$0xff] %v12206_v44 }
 0x7d5   :  { %v12148_v62 = vpop.permute.xlu0 %5561  ;;  %v12150_v63 = vpop.permute.xlu1 %4413 }
 0x7d6   :  { %16329 = vst [vmem:[#allocation52_spill] sm:$0xff] %v12148_v62  ;;  %16330 = vst [vmem:[#allocation50_spill] sm:$0xff] %v12150_v63  ;;  %v12196_v63 = vmax.f32 %v4283_v2, 0.0 }
 0x7d7   :  { %5781 = vrot.lane.b32.xlu0 %v12114_v3, %s7912_s30  ;;  %4829 = vrot.lane.b32.xlu1 %v12076_v56, %s7916_s16 }
 0x7d8   :  { %16337 = vst [vmem:[#allocation98_spill] sm:$0xff] %v12196_v63 }
 0x7d9   :  { %v12156_v58 = vpop.permute.xlu0 %4627  ;;  %v12158_v42 = vpop.permute.xlu1 %4611 }
 0x7da   :  { %16331 = vst [vmem:[#allocation131_spill] sm:$0xff] %v12156_v58 }
 0x7db   :  { %4845 = vrot.lane.b32.xlu0 %v12086_v35, %s7916_s16  ;;  %5551 = vrot.lane.b32.xlu1 %v12086_v35, %s7913_s12 }
 0x7dd   :  { %v12164_v50 = vpop.permute.xlu0 %4659  ;;  %v12166_v62 = vpop.permute.xlu1 %5333 }
 0x7df   :  { %4877 = vrot.lane.b32.xlu0 %v12104_v32, %s7916_s16  ;;  %5535 = vrot.lane.b32.xlu1 %v12076_v56, %s7913_s12 }
 0x7e1   :  { %v12172_v38 = vpop.permute.xlu0 %5349  ;;  %v12174_v34 = vpop.permute.xlu1 %5317 }
 0x7e2   :  { %16332 = vst [vmem:[#allocation125_spill] sm:$0xff] %v12172_v38  ;;  %16333 = vst [vmem:[#allocation207_spill] sm:$0xff] %v12174_v34 }
 0x7e3   :  { %5567 = vrot.lane.b32.xlu0 %v12114_v3, %s7913_s12  ;;  %5995 = vrot.lane.b32.xlu1 %v12114_v3, %s7911_s28 }
 0x7e5   :  { %v12182_v12 = vpop.permute.xlu0 %4445  ;;  %v12185_v26 = vpop.permute.xlu1 %5039 }
 0x7e6   :  { %16334 = vst [vmem:[#allocation123_spill] sm:$0xff] %v12182_v12  ;;  %16335 = vst [vmem:[#allocation82_spill] sm:$0xff] %v12185_v26 }
 0x7e7   :  { %4647 = vrot.lane.b32.xlu0 %v12114_v3, %s7917_s17  ;;  %4433 = vrot.lane.b32.xlu1 %v12114_v3, %s7919_s18 }
 0x7e9   :  { %v12193_v31 = vpop.permute.xlu0 %5055  ;;  %v12198_v12 = vpop.permute.xlu1 %5761 }
 0x7ea   :  { %16336 = vst [vmem:[#allocation75_spill] sm:$0xff] %v12193_v31  ;;  %16338 = vst [vmem:[#allocation96_spill] sm:$0xff] %v12198_v12  ;;  %v4286_v12 = vadd.f32 %v12005_v16, %v4214_v46 }
 0x7eb   :  { %5979 = vrot.lane.b32.xlu0 %v12086_v35, %s7911_s28  ;;  %4617 = vrot.lane.b32.xlu1 %v12196_v63, %s7917_s17 }
 0x7ed   :  { %v12204_v13 = vpop.permute.xlu0 %5087  ;;  %v12208_v26 = vpop.permute.xlu1 %5745 }
 0x7ee   :  { %16339 = vst [vmem:[#allocation103_spill] sm:$0xff] %v12204_v13  ;;  %16341 = vst [vmem:[#allocation74_spill] sm:$0xff] %v12208_v26  ;;  %v4213_v26 = vmul.f32 %v11992_v6, %v11712_v53 }
 0x7ef   :  { %5963 = vrot.lane.b32.xlu0 %v12076_v56, %s7911_s28  ;;  %5339 = vrot.lane.b32.xlu1 %v12206_v44, %s7914_s15  ;;  %v12227_v56 = vmax.f32 %v4286_v12, 0.0 }
 0x7f0   :  { %v4285_v46 = vadd.f32 %v12005_v16, %v4213_v26 }
 0x7f1   :  { %v12216_v2 = vpop.permute.xlu0 %5777  ;;  %v12219_v35 = vpop.permute.xlu1 %4825  ;;  %16345 = vst [vmem:[#allocation56_spill] sm:$0xff] %v12227_v56 }
 0x7f2   :  { %16342 = vst [vmem:[#allocation27_spill] sm:$0xff] %v12216_v2  ;;  %16343 = vst [vmem:[#allocation204_spill] sm:$0xff] %v12219_v35  ;;  %v12246_v12 = vmax.f32 %v4285_v46, 0.0 }
 0x7f3   :  { %4403 = vrot.lane.b32.xlu0 %v12196_v63, %s7919_s18  ;;  %5323 = vrot.lane.b32.xlu1 %v12196_v63, %s7914_s15 }
 0x7f4   :  { %16349 = vst [vmem:[#allocation200_spill] sm:$0xff] %v12246_v12 }
 0x7f5   :  { %v12225_v20 = vpop.permute.xlu0 %4841  ;;  %v12229_v9 = vpop.permute.xlu1 %5547 }
 0x7f6   :  { %16344 = vst [vmem:[#allocation203_spill] sm:$0xff] %v12225_v20  ;;  %16346 = vst [vmem:[#allocation175_spill] sm:$0xff] %v12229_v9 }
 0x7f7   :  { %4633 = vrot.lane.b32.xlu0 %v12206_v44, %s7917_s17  ;;  %4451 = vrot.lane.b32.xlu1 %v12227_v56, %s7919_s18 }
 0x7f9   :  { %v12238_v35 = vpop.permute.xlu0 %4873  ;;  %v12240_v2 = vpop.permute.xlu1 %5531 }
 0x7fa   :  { %16347 = vst [vmem:[#allocation180_spill] sm:$0xff] %v12238_v35  ;;  %16348 = vst [vmem:[#allocation153_spill] sm:$0xff] %v12240_v2 }
 0x7fb   :  { %4665 = vrot.lane.b32.xlu0 %v12227_v56, %s7917_s17  ;;  %5045 = vrot.lane.b32.xlu1 %v12196_v63, %s7915_s0 }
 0x7fd   :  { %v12248_v53 = vpop.permute.xlu0 %5563  ;;  %v12250_v6 = vpop.permute.xlu1 %4613 }
 0x7fe   :  { %16350 = vst [vmem:[#allocation199_spill] sm:$0xff] %v12248_v53 }
 0x7ff   :  { %5355 = vrot.lane.b32.xlu0 %v12246_v12, %s7914_s15  ;;  %5767 = vrot.lane.b32.xlu1 %v12206_v44, %s7912_s30 }
 0x801   :  { %v12256_v16 = vpop.permute.xlu0 %4643  ;;  %v12258_v26 = vpop.permute.xlu1 %5335 }
 0x802   :  { %16351 = vst [vmem:[#allocation152_spill] sm:$0xff] %v12256_v16 }
 0x803   :  { %4419 = vrot.lane.b32.xlu0 %v12206_v44, %s7919_s18  ;;  %5751 = vrot.lane.b32.xlu1 %v12196_v63, %s7912_s30 }
 0x805   :  { %v12264_v46 = vpop.permute.xlu0 %4399  ;;  %v12266_v2 = vpop.permute.xlu1 %5319 }
 0x806   :  { %16352 = vst [vmem:[#allocation186_spill] sm:$0xff] %v12264_v46  ;;  %16353 = vst [vmem:[#allocation124_spill] sm:$0xff] %v12266_v2  ;;  %v4216_v46 = vmul.f32 %v12013_v55, %v11694_v18 }
 0x807   :  { %5061 = vrot.lane.b32.xlu0 %v12206_v44, %s7915_s0  ;;  %4831 = vrot.lane.b32.xlu1 %v12196_v63, %s7916_s16 }
 0x809   :  { %v12272_v9 = vpop.permute.xlu0 %4415  ;;  %v12274_v16 = vpop.permute.xlu1 %4447 }
 0x80a   :  { %16354 = vst [vmem:[#allocation129_spill] sm:$0xff] %v12272_v9  ;;  %16355 = vst [vmem:[#allocation184_spill] sm:$0xff] %v12274_v16 }
 0x80b   :  { %5093 = vrot.lane.b32.xlu0 %v12227_v56, %s7915_s0  ;;  %5553 = vrot.lane.b32.xlu1 %v12206_v44, %s7913_s12 }
 0x80d   :  { %v12280_v53 = vpop.permute.xlu0 %4629  ;;  %v12282_v35 = vpop.permute.xlu1 %5041 }
 0x80e   :  { %16356 = vst [vmem:[#allocation156_spill] sm:$0xff] %v12282_v35  ;;  %v4215_v35 = vmul.f32 %v12013_v55, %v11698_v11 }
 0x80f   :  { %5783 = vrot.lane.b32.xlu0 %v12246_v12, %s7912_s30  ;;  %5537 = vrot.lane.b32.xlu1 %v12196_v63, %s7913_s12 }
 0x810   :  { %v4287_v14 = vadd.f32 %v12036_v36, %v4215_v35  ;;  %v4288_v35 = vadd.f32 %v12036_v36, %v4216_v46 }
 0x811   :  { %v12288_v20 = vpop.permute.xlu0 %4661  ;;  %v12290_v13 = vpop.permute.xlu1 %5763 }
 0x812   :  { %16357 = vst [vmem:[#allocation100_spill] sm:$0xff] %v12290_v13  ;;  %v12317_v37 = vmax.f32 %v4287_v14, 0.0  ;;  %v4218_v14 = vmul.f32 %v12013_v55, %v11754_v45 }
 0x813   :  { %4847 = vrot.lane.b32.xlu0 %v12206_v44, %s7916_s16  ;;  %4649 = vrot.lane.b32.xlu1 %v12246_v12, %s7917_s17 }
 0x814   :  { %16363 = vst [vmem:[#allocation76_spill] sm:$0xff] %v12317_v37  ;;  %v4290_v18 = vadd.f32 %v12036_v36, %v4218_v14 }
 0x815   :  { %v12296_v31 = vpop.permute.xlu0 %5351  ;;  %v12298_v29 = vpop.permute.xlu1 %5747 }
 0x816   :  { %16358 = vst [vmem:[#allocation154_spill] sm:$0xff] %v12296_v31  ;;  %16359 = vst [vmem:[#allocation136_spill] sm:$0xff] %v12298_v29 }
 0x817   :  { %4879 = vrot.lane.b32.xlu0 %v12227_v56, %s7916_s16  ;;  %5997 = vrot.lane.b32.xlu1 %v12246_v12, %s7911_s28 }
 0x819   :  { %v12306_v13 = vpop.permute.xlu0 %5057  ;;  %v12309_v16 = vpop.permute.xlu1 %4827 }
 0x81a   :  { %16360 = vst [vmem:[#allocation101_spill] sm:$0xff] %v12306_v13  ;;  %16361 = vst [vmem:[#allocation133_spill] sm:$0xff] %v12309_v16 }
 0x81b   :  { %5569 = vrot.lane.b32.xlu0 %v12246_v12, %s7913_s12  ;;  %4435 = vrot.lane.b32.xlu1 %v12246_v12, %s7919_s18 }
 0x81d   :  { %v12315_v29 = vpop.permute.xlu0 %5089  ;;  %v12319_v11 = vpop.permute.xlu1 %5549 }
 0x81e   :  { %16362 = vst [vmem:[#allocation79_spill] sm:$0xff] %v12315_v29  ;;  %16364 = vst [vmem:[#allocation104_spill] sm:$0xff] %v12319_v11  ;;  %v12339_v11 = vmax.f32 %v4288_v35, 0.0 }
 0x81f   :  { %5981 = vrot.lane.b32.xlu0 %v12206_v44, %s7911_s28  ;;  %4405 = vrot.lane.b32.xlu1 %v12317_v37, %s7919_s18 }
 0x820   :  { %16367 = vst [vmem:[#allocation88_spill] sm:$0xff] %v12339_v11 }
 0x821   :  { %v12328_v16 = vpop.permute.xlu0 %5779  ;;  %v12330_v13 = vpop.permute.xlu1 %5533 }
 0x822   :  { %16365 = vst [vmem:[#allocation102_spill] sm:$0xff] %v12328_v16  ;;  %16366 = vst [vmem:[#allocation53_spill] sm:$0xff] %v12330_v13  ;;  %v4217_v13 = vmul.f32 %v12013_v55, %v11734_v51  ;;  %v12352_v16 = vmax.f32 %v4290_v18, 0.0 }
 0x823   :  { %5965 = vrot.lane.b32.xlu0 %v12196_v63, %s7911_s28  ;;  %4619 = vrot.lane.b32.xlu1 %v12317_v37, %s7917_s17 }
 0x824   :  { %v4289_v45 = vadd.f32 %v12036_v36, %v4217_v13  ;;  %16370 = vst [vmem:[#allocation38_spill] sm:$0xff] %v12352_v16 }
 0x825   :  { %v12341_v29 = vpop.permute.xlu0 %4843  ;;  %v12343_v46 = vpop.permute.xlu1 %4645 }
 0x826   :  { %16368 = vst [vmem:[#allocation54_spill] sm:$0xff] %v12341_v29  ;;  %16369 = vst [vmem:[#allocation85_spill] sm:$0xff] %v12343_v46  ;;  %v12362_v51 = vmax.f32 %v4289_v45, 0.0 }
 0x827   :  { %4635 = vrot.lane.b32.xlu0 %v12339_v11, %s7917_s17  ;;  %5341 = vrot.lane.b32.xlu1 %v12339_v11, %s7914_s15 }
 0x828   :  { %16373 = vst [vmem:[#allocation29_spill] sm:$0xff] %v12362_v51 }
 0x829   :  { %v12354_v14 = vpop.permute.xlu0 %4875  ;;  %v12356_v35 = vpop.permute.xlu1 %4401 }
 0x82a   :  { %16371 = vst [vmem:[#allocation58_spill] sm:$0xff] %v12354_v14  ;;  %16372 = vst [vmem:[#allocation55_spill] sm:$0xff] %v12356_v35 }
 0x82b   :  { %4667 = vrot.lane.b32.xlu0 %v12352_v16, %s7917_s17  ;;  %5325 = vrot.lane.b32.xlu1 %v12317_v37, %s7914_s15 }
 0x82d   :  { %v12364_v55 = vpop.permute.xlu0 %5565  ;;  %v12366_v46 = vpop.permute.xlu1 %4417 }
 0x82e   :  { %16374 = vst [vmem:[#allocation43_spill] sm:$0xff] %v12364_v55  ;;  %16375 = vst [vmem:[#allocation40_spill] sm:$0xff] %v12366_v46 }
 0x82f   :  { %5357 = vrot.lane.b32.xlu0 %v12362_v51, %s7914_s15  ;;  %4453 = vrot.lane.b32.xlu1 %v12352_v16, %s7919_s18 }
 0x831   :  { %v12372_v36 = vpop.permute.xlu0 %4631  ;;  %v12374_v13 = vpop.permute.xlu1 %4615 }
 0x832   :  { %16376 = vst [vmem:[#allocation107_spill] sm:$0xff] %v12372_v36 }
 0x833   :  { %4421 = vrot.lane.b32.xlu0 %v12339_v11, %s7919_s18  ;;  %5047 = vrot.lane.b32.xlu1 %v12317_v37, %s7915_s0 }
 0x835   :  { %v12380_v18 = vpop.permute.xlu0 %4663  ;;  %v12382_v45 = vpop.permute.xlu1 %5337 }
 0x837   :  { %5063 = vrot.lane.b32.xlu0 %v12339_v11, %s7915_s0  ;;  %5769 = vrot.lane.b32.xlu1 %v12339_v11, %s7912_s30 }
 0x839   :  { %v12388_v55 = vpop.permute.xlu0 %5353  ;;  %v12390_v14 = vpop.permute.xlu1 %5321 }
 0x83a   :  { %16377 = vst [vmem:[#allocation65_spill] sm:$0xff] %v12388_v55  ;;  %16378 = vst [vmem:[#allocation31_spill] sm:$0xff] %v12390_v14 }
 0x83b   :  { %5095 = vrot.lane.b32.xlu0 %v12352_v16, %s7915_s0  ;;  %5753 = vrot.lane.b32.xlu1 %v12317_v37, %s7912_s30 }
 0x83d   :  { %v12396_v29 = vpop.permute.xlu0 %4449  ;;  %v12398_v63 = vpop.permute.xlu1 %5043 }
 0x83e   :  { %16379 = vst [vmem:[#allocation95_spill] sm:$0xff] %v12396_v29  ;;  %16380 = vst [vmem:[#allocation68_spill] sm:$0xff] %v12398_v63 }
 0x83f   :  { %5785 = vrot.lane.b32.xlu0 %v12362_v51, %s7912_s30  ;;  %4833 = vrot.lane.b32.xlu1 %v12317_v37, %s7916_s16 }
 0x841   :  { %v12404_v44 = vpop.permute.xlu0 %5059  ;;  %v12406_v9 = vpop.permute.xlu1 %5765 }
 0x842   :  { %16381 = vst [vmem:[#allocation67_spill] sm:$0xff] %v12404_v44  ;;  %16382 = vst [vmem:[#allocation93_spill] sm:$0xff] %v12406_v9  ;;  %v4219_v9 = vmul.f32 %v12022_v21, %v11738_v27 }
 0x843   :  { %4849 = vrot.lane.b32.xlu0 %v12339_v11, %s7916_s16  ;;  %5555 = vrot.lane.b32.xlu1 %v12339_v11, %s7913_s12 }
 0x844   :  { %v4291_v46 = vadd.f32 %v12024_v39, %v4219_v9  ;;  %v4222_v9 = vmul.f32 %v12022_v21, %v11777_v61  ;;  %v4221_v61 = vmul.f32 %v12022_v21, %v11761_v60 }
 0x845   :  { %v12412_v35 = vpop.permute.xlu0 %5091  ;;  %v12414_v29 = vpop.permute.xlu1 %5749 }
 0x846   :  { %16383 = vst [vmem:[#allocation158_spill] sm:$0xff] %v12412_v35  ;;  %16384 = vst [vmem:[#allocation49_spill] sm:$0xff] %v12414_v29  ;;  %v4220_v35 = vmul.f32 %v12022_v21, %v11742_v22 }
 0x847   :  { %4881 = vrot.lane.b32.xlu0 %v12352_v16, %s7916_s16  ;;  %5539 = vrot.lane.b32.xlu1 %v12317_v37, %s7913_s12 }
 0x849   :  { %v12420_v63 = vpop.permute.xlu0 %5781  ;;  %v12424_v44 = vpop.permute.xlu1 %4829 }
 0x84a   :  { %16385 = vst [vmem:[#allocation47_spill] sm:$0xff] %v12420_v63  ;;  %16386 = vst [vmem:[#allocation145_spill] sm:$0xff] %v12424_v44  ;;  %v4292_v44 = vadd.f32 %v12024_v39, %v4220_v35  ;;  %v12444_v63 = vmax.f32 %v4291_v46, 0.0  ;;  %v4294_v35 = vadd.f32 %v12024_v39, %v4222_v9  ;;  %v4293_v9 = vadd.f32 %v12024_v39, %v4221_v61 }
 0x84b   :  { %5571 = vrot.lane.b32.xlu0 %v12362_v51, %s7913_s12  ;;  %5999 = vrot.lane.b32.xlu1 %v12362_v51, %s7911_s28 }
 0x84c   :  { %16390 = vst [vmem:[#allocation188_spill] sm:$0xff] %v12444_v63  ;;  %v12494_v60 = vmax.f32 %v4293_v9, 0.0 }
 0x84d   :  { %v12430_v29 = vpop.permute.xlu0 %4845  ;;  %v12435_v1 = vpop.permute.xlu1 %5551 }
 0x84e   :  { %16387 = vst [vmem:[#allocation161_spill] sm:$0xff] %v12430_v29  ;;  %16388 = vst [vmem:[#allocation35_spill] sm:$0xff] %v12435_v1  ;;  %v12456_v1 = vmax.f32 %v4292_v44, 0.0 }
 0x84f   :  { %4651 = vrot.lane.b32.xlu0 %v12362_v51, %s7917_s17  ;;  %4437 = vrot.lane.b32.xlu1 %v12362_v51, %s7919_s18  ;;  %16400 = vst [vmem:[#allocation169_spill] sm:$0xff] %v12494_v60 }
 0x850   :  { %16393 = vst [vmem:[#allocation106_spill] sm:$0xff] %v12456_v1 }
 0x851   :  { %v12441_v27 = vpop.permute.xlu0 %4877  ;;  %v12446_v29 = vpop.permute.xlu1 %5535 }
 0x852   :  { %16389 = vst [vmem:[#allocation179_spill] sm:$0xff] %v12441_v27  ;;  %16391 = vst [vmem:[#allocation59_spill] sm:$0xff] %v12446_v29 }
 0x853   :  { %5983 = vrot.lane.b32.xlu0 %v12339_v11, %s7911_s28  ;;  %4621 = vrot.lane.b32.xlu1 %v12444_v63, %s7917_s17 }
 0x855   :  { %v12452_v22 = vpop.permute.xlu0 %5567  ;;  %v12458_v27 = vpop.permute.xlu1 %5995 }
 0x856   :  { %16392 = vst [vmem:[#allocation191_spill] sm:$0xff] %v12452_v22  ;;  %16394 = vst [vmem:[#allocation48_spill] sm:$0xff] %v12458_v27  ;;  %v12477_v27 = vmax.f32 %v4294_v35, 0.0 }
 0x857   :  { %5967 = vrot.lane.b32.xlu0 %v12317_v37, %s7911_s28  ;;  %5343 = vrot.lane.b32.xlu1 %v12456_v1, %s7914_s15 }
 0x858   :  { %16398 = vst [vmem:[#allocation139_spill] sm:$0xff] %v12477_v27 }
 0x859   :  { %v12464_v46 = vpop.permute.xlu0 %4647  ;;  %v12467_v29 = vpop.permute.xlu1 %4433 }
 0x85a   :  { %16395 = vst [vmem:[#allocation128_spill] sm:$0xff] %v12464_v46  ;;  %16396 = vst [vmem:[#allocation194_spill] sm:$0xff] %v12467_v29 }
 0x85b   :  { %4407 = vrot.lane.b32.xlu0 %v12444_v63, %s7919_s18  ;;  %5327 = vrot.lane.b32.xlu1 %v12444_v63, %s7914_s15 }
 0x85d   :  { %v12475_v44 = vpop.permute.xlu0 %5979  ;;  %v12479_v22 = vpop.permute.xlu1 %4617 }
 0x85e   :  { %16397 = vst [vmem:[#allocation170_spill] sm:$0xff] %v12475_v44 }
 0x85f   :  { %4637 = vrot.lane.b32.xlu0 %v12456_v1, %s7917_s17  ;;  %4455 = vrot.lane.b32.xlu1 %v12477_v27, %s7919_s18 }
 0x861   :  { %v12486_v29 = vpop.permute.xlu0 %5963  ;;  %v12488_v46 = vpop.permute.xlu1 %5339 }
 0x862   :  { %16399 = vst [vmem:[#allocation33_spill] sm:$0xff] %v12486_v29 }
 0x863   :  { %4669 = vrot.lane.b32.xlu0 %v12477_v27, %s7917_s17  ;;  %5049 = vrot.lane.b32.xlu1 %v12444_v63, %s7915_s0 }
 0x865   :  { %v12496_v21 = vpop.permute.xlu0 %4403  ;;  %v12498_v35 = vpop.permute.xlu1 %5323 }
 0x866   :  { %16401 = vst [vmem:[#allocation109_spill] sm:$0xff] %v12496_v21  ;;  %16402 = vst [vmem:[#allocation80_spill] sm:$0xff] %v12498_v35 }
 0x867   :  { %5359 = vrot.lane.b32.xlu0 %v12494_v60, %s7914_s15  ;;  %5771 = vrot.lane.b32.xlu1 %v12456_v1, %s7912_s30 }
 0x869   :  { %v12504_v39 = vpop.permute.xlu0 %4633  ;;  %v12506_v61 = vpop.permute.xlu1 %4451 }
 0x86a   :  { %16403 = vst [vmem:[#allocation94_spill] sm:$0xff] %v12504_v39  ;;  %16404 = vst [vmem:[#allocation143_spill] sm:$0xff] %v12506_v61 }
 0x86b   :  { %4423 = vrot.lane.b32.xlu0 %v12456_v1, %s7919_s18  ;;  %5755 = vrot.lane.b32.xlu1 %v12444_v63, %s7912_s30 }
 0x86d   :  { %v12512_v9 = vpop.permute.xlu0 %4665  ;;  %v12514_v29 = vpop.permute.xlu1 %5045 }
 0x86e   :  { %16405 = vst [vmem:[#allocation90_spill] sm:$0xff] %v12514_v29 }
 0x86f   :  { %5065 = vrot.lane.b32.xlu0 %v12456_v1, %s7915_s0  ;;  %4835 = vrot.lane.b32.xlu1 %v12444_v63, %s7916_s16 }
 0x871   :  { %v12520_v44 = vpop.permute.xlu0 %5355  ;;  %v12522_v37 = vpop.permute.xlu1 %5767 }
 0x872   :  { %16406 = vst [vmem:[#allocation149_spill] sm:$0xff] %v12520_v44  ;;  %16407 = vst [vmem:[#allocation62_spill] sm:$0xff] %v12522_v37 }
 0x873   :  { %5097 = vrot.lane.b32.xlu0 %v12477_v27, %s7915_s0  ;;  %5557 = vrot.lane.b32.xlu1 %v12456_v1, %s7913_s12 }
 0x875   :  { %v12528_v11 = vpop.permute.xlu0 %4419  ;;  %v12530_v19 = vpop.permute.xlu1 %5751 }
 0x876   :  { %16408 = vst [vmem:[#allocation66_spill] sm:$0xff] %v12528_v11  ;;  %16409 = vst [vmem:[#allocation73_spill] sm:$0xff] %v12530_v19  ;;  %v4223_v19 = vmul.f32 %v12015_v25, %v11746_v4 }
 0x877   :  { %5787 = vrot.lane.b32.xlu0 %v12494_v60, %s7912_s30  ;;  %5541 = vrot.lane.b32.xlu1 %v12444_v63, %s7913_s12 }
 0x879   :  { %v12536_v29 = vpop.permute.xlu0 %5061  ;;  %v12538_v61 = vpop.permute.xlu1 %4831 }
 0x87a   :  { %16410 = vst [vmem:[#allocation45_spill] sm:$0xff] %v12536_v29  ;;  %16411 = vst [vmem:[#allocation36_spill] sm:$0xff] %v12538_v61  ;;  %v4295_v29 = vadd.f32 %v12038_v48, %v4223_v19 }
 0x87b   :  { %4851 = vrot.lane.b32.xlu0 %v12456_v1, %s7916_s16  ;;  %4653 = vrot.lane.b32.xlu1 %v12494_v60, %s7917_s17 }
 0x87c   :  { %v12568_v40 = vmax.f32 %v4295_v29, 0.0 }
 0x87d   :  { %v12544_v37 = vpop.permute.xlu0 %5093  ;;  %v12546_v21 = vpop.permute.xlu1 %5553 }
 0x87e   :  { %16412 = vst [vmem:[#allocation202_spill] sm:$0xff] %v12544_v37  ;;  %16413 = vst [vmem:[#allocation201_spill] sm:$0xff] %v12546_v21  ;;  %v4224_v21 = vmul.f32 %v12015_v25, %v11749_v52 }
 0x87f   :  { %4883 = vrot.lane.b32.xlu0 %v12477_v27, %s7916_s16  ;;  %6001 = vrot.lane.b32.xlu1 %v12494_v60, %s7911_s28  ;;  %16417 = vst [vmem:[#allocation25_spill] sm:$0xff] %v12568_v40 }
 0x880   :  { %v4296_v4 = vadd.f32 %v12038_v48, %v4224_v21 }
 0x881   :  { %v12554_v61 = vpop.permute.xlu0 %5783  ;;  %v12557_v11 = vpop.permute.xlu1 %5537 }
 0x882   :  { %16414 = vst [vmem:[#allocation205_spill] sm:$0xff] %v12554_v61  ;;  %16415 = vst [vmem:[#allocation122_spill] sm:$0xff] %v12557_v11  ;;  %v12578_v52 = vmax.f32 %v4296_v4, 0.0  ;;  %v4225_v4 = vmul.f32 %v12015_v25, %v11782_v47 }
 0x883   :  { %5573 = vrot.lane.b32.xlu0 %v12494_v60, %s7913_s12  ;;  %4439 = vrot.lane.b32.xlu1 %v12494_v60, %s7919_s18 }
 0x884   :  { %16420 = vst [vmem:[#allocation209_spill] sm:$0xff] %v12578_v52 }
 0x885   :  { %v12565_v37 = vpop.permute.xlu0 %4847  ;;  %v12570_v61 = vpop.permute.xlu1 %4649 }
 0x886   :  { %16416 = vst [vmem:[#allocation39_spill] sm:$0xff] %v12565_v37  ;;  %16418 = vst [vmem:[#allocation193_spill] sm:$0xff] %v12570_v61  ;;  %v4226_v37 = vmul.f32 %v12015_v25, %v11788_v57  ;;  %v4297_v57 = vadd.f32 %v12038_v48, %v4225_v4 }
 0x887   :  { %5985 = vrot.lane.b32.xlu0 %v12456_v1, %s7911_s28  ;;  %4409 = vrot.lane.b32.xlu1 %v12568_v40, %s7919_s18 }
 0x888   :  { %v4298_v29 = vadd.f32 %v12038_v48, %v4226_v37  ;;  %v12610_v47 = vmax.f32 %v4297_v57, 0.0 }
 0x889   :  { %v12576_v19 = vpop.permute.xlu0 %4879  ;;  %v12580_v11 = vpop.permute.xlu1 %5997 }
 0x88a   :  { %16419 = vst [vmem:[#allocation185_spill] sm:$0xff] %v12576_v19  ;;  %16421 = vst [vmem:[#allocation63_spill] sm:$0xff] %v12580_v11  ;;  %v12600_v11 = vmax.f32 %v4298_v29, 0.0 }
 0x88b   :  { %5969 = vrot.lane.b32.xlu0 %v12444_v63, %s7911_s28  ;;  %4639 = vrot.lane.b32.xlu1 %v12578_v52, %s7917_s17  ;;  %16427 = vst [vmem:[#allocation210_spill] sm:$0xff] %v12610_v47 }
 0x88c   :  { %16424 = vst [vmem:[#allocation77_spill] sm:$0xff] %v12600_v11 }
 0x88d   :  { %v12589_v21 = vpop.permute.xlu0 %5569  ;;  %v12591_v61 = vpop.permute.xlu1 %4435 }
 0x88e   :  { %16422 = vst [vmem:[#allocation206_spill] sm:$0xff] %v12589_v21  ;;  %16423 = vst [vmem:[#allocation167_spill] sm:$0xff] %v12591_v61 }
 0x88f   :  { %4623 = vrot.lane.b32.xlu0 %v12568_v40, %s7917_s17  ;;  %5345 = vrot.lane.b32.xlu1 %v12578_v52, %s7914_s15 }
 0x891   :  { %v12602_v19 = vpop.permute.xlu0 %5981  ;;  %v12604_v37 = vpop.permute.xlu1 %4405 }
 0x892   :  { %16425 = vst [vmem:[#allocation164_spill] sm:$0xff] %v12602_v19  ;;  %16426 = vst [vmem:[#allocation134_spill] sm:$0xff] %v12604_v37 }
 0x893   :  { %4671 = vrot.lane.b32.xlu0 %v12600_v11, %s7917_s17  ;;  %5329 = vrot.lane.b32.xlu1 %v12568_v40, %s7914_s15 }
 0x895   :  { %v12612_v25 = vpop.permute.xlu0 %5965  ;;  %v12614_v61 = vpop.permute.xlu1 %4619 }
 0x896   :  { %16428 = vst [vmem:[#allocation147_spill] sm:$0xff] %v12612_v25 }
 0x897   :  { %5361 = vrot.lane.b32.xlu0 %v12610_v47, %s7914_s15  ;;  %5993 = vrot.lane.b32.xlu1 %v12030_v15, %s7911_s28 }
 0x899   :  { %v12620_v48 = vpop.permute.xlu0 %4635  ;;  %v12622_v29 = vpop.permute.xlu1 %5341 }
 0x89b   :  { %5977 = vrot.lane.b32.xlu0 %v11994_v30, %s7911_s28  ;;  %4431 = vrot.lane.b32.xlu1 %v12030_v15, %s7919_s18 }
 0x89d   :  { %v12628_v4 = vpop.permute.xlu0 %4667  ;;  %v12630_v57 = vpop.permute.xlu1 %5325 }
 0x89e   :  { %16429 = vst [vmem:[#allocation78_spill] sm:$0xff] %v12630_v57 }
 0x89f   :  { %5961 = vrot.lane.b32.xlu0 %v11986_v5, %s7911_s28  ;;  %4425 = vrot.lane.b32.xlu1 %v12578_v52, %s7919_s18 }
 0x8a1   :  { %v12636_v25 = vpop.permute.xlu0 %5357  ;;  %v12638_v19 = vpop.permute.xlu1 %4453 }
 0x8a2   :  { %16430 = vst [vmem:[#allocation172_spill] sm:$0xff] %v12636_v25  ;;  %16431 = vst [vmem:[#allocation119_spill] sm:$0xff] %v12638_v19  ;;  %v6142_v19 = vld [vmem:[#allocation5 + $0x18] sm:$0xff] }
 0x8a3   :  { %5975 = vrot.lane.b32.xlu0 %v11934_v41, %s7911_s28  ;;  %4457 = vrot.lane.b32.xlu1 %v12600_v11, %s7919_s18 }
 0x8a4   :  { %6668 = vmatprep.mubr.f32.mxu1 %v6142_v19 }
 0x8a5   :  { %v12644_v21 = vpop.permute.xlu0 %4421  ;;  %v12646_v30 = vpop.permute.xlu1 %5047 }
 0x8a6   :  { %16432 = vst [vmem:[#allocation177_spill] sm:$0xff] %v12644_v21  ;;  %16433 = vst [vmem:[#allocation115_spill] sm:$0xff] %v12646_v30 }
 0x8a7   :  { %5959 = vrot.lane.b32.xlu0 %v11928_v28, %s7911_s28  ;;  %5991 = vrot.lane.b32.xlu1 %v11952_v7, %s7911_s28 }
 0x8a9   :  { %v12652_v5 = vpop.permute.xlu0 %5063  ;;  %v12654_v63 = vpop.permute.xlu1 %5769 }
 0x8aa   :  { %16434 = vst [vmem:[#allocation89_spill] sm:$0xff] %v12652_v5  ;;  %16435 = vst [vmem:[#allocation105_spill] sm:$0xff] %v12654_v63 }
 0x8ab   :  { %5051 = vrot.lane.b32.xlu0 %v12568_v40, %s7915_s0  ;;  %5067 = vrot.lane.b32.xlu1 %v12578_v52, %s7915_s0 }
 0x8ad   :  { %v12660_v41 = vpop.permute.xlu0 %5095  ;;  %v12662_v1 = vpop.permute.xlu1 %5753 }
 0x8ae   :  { %16436 = vst [vmem:[#allocation97_spill] sm:$0xff] %v12660_v41  ;;  %16437 = vst [vmem:[#allocation182_spill] sm:$0xff] %v12662_v1 }
 0x8af   :  { %5099 = vrot.lane.b32.xlu0 %v12600_v11, %s7915_s0  ;;  %5773 = vrot.lane.b32.xlu1 %v12578_v52, %s7912_s30 }
 0x8b1   :  { %v12668_v28 = vpop.permute.xlu0 %5785  ;;  %v12670_v30 = vpop.permute.xlu1 %4833 }
 0x8b2   :  { %16438 = vst [vmem:[#allocation157_spill] sm:$0xff] %v12668_v28  ;;  %16439 = vst [vmem:[#allocation72_spill] sm:$0xff] %v12670_v30 }
 0x8b3   :  { %5789 = vrot.lane.b32.xlu0 %v12610_v47, %s7912_s30  ;;  %5757 = vrot.lane.b32.xlu1 %v12568_v40, %s7912_s30 }
 0x8b5   :  { %v12676_v63 = vpop.permute.xlu0 %4849  ;;  %v12678_v41 = vpop.permute.xlu1 %5555 }
 0x8b6   :  { %16440 = vst [vmem:[#allocation69_spill] sm:$0xff] %v12676_v63  ;;  %16441 = vst [vmem:[#allocation44_spill] sm:$0xff] %v12678_v41 }
 0x8b7   :  { %5973 = vrot.lane.b32.xlu0 %v11883_v43, %s7911_s28  ;;  %4429 = vrot.lane.b32.xlu1 %v11952_v7, %s7919_s18 }
 0x8b9   :  { %v12684_v1 = vpop.permute.xlu0 %4881  ;;  %v12686_v28 = vpop.permute.xlu1 %5539 }
 0x8ba   :  { %16442 = vst [vmem:[#allocation126_spill] sm:$0xff] %v12684_v1  ;;  %16443 = vst [vmem:[#allocation51_spill] sm:$0xff] %v12686_v28 }
 0x8bb   :  { %4853 = vrot.lane.b32.xlu0 %v12578_v52, %s7916_s16  ;;  %4837 = vrot.lane.b32.xlu1 %v12568_v40, %s7916_s16 }
 0x8bd   :  { %v12692_v30 = vpop.permute.xlu0 %5571  ;;  %v12694_v63 = vpop.permute.xlu1 %5999 }
 0x8be   :  { %16444 = vst [vmem:[#allocation159_spill] sm:$0xff] %v12692_v30  ;;  %16445 = vst [vmem:[#allocation178_spill] sm:$0xff] %v12694_v63 }
 0x8bf   :  { %4885 = vrot.lane.b32.xlu0 %v12600_v11, %s7916_s16  ;;  %5559 = vrot.lane.b32.xlu1 %v12578_v52, %s7913_s12 }
 0x8c1   :  { %v12700_v41 = vpop.permute.xlu0 %4651  ;;  %v12702_v1 = vpop.permute.xlu1 %4437 }
 0x8c2   :  { %16446 = vst [vmem:[#allocation127_spill] sm:$0xff] %v12700_v41  ;;  %16447 = vst [vmem:[#allocation83_spill] sm:$0xff] %v12702_v1 }
 0x8c3   :  { %5575 = vrot.lane.b32.xlu0 %v12610_v47, %s7913_s12  ;;  %5543 = vrot.lane.b32.xlu1 %v12568_v40, %s7913_s12 }
 0x8c5   :  { %v12708_v28 = vpop.permute.xlu0 %5983  ;;  %v12710_v30 = vpop.permute.xlu1 %4621 }
 0x8c6   :  { %16448 = vst [vmem:[#allocation108_spill] sm:$0xff] %v12708_v28 }
 0x8c7   :  { %5957 = vrot.lane.b32.xlu0 %v11876_v24, %s7911_s28  ;;  %5989 = vrot.lane.b32.xlu1 %v11900_v17, %s7911_s28  ;;  %v6140_v24 = vld [vmem:[#allocation5 + $0x8] sm:$0xff] }
 0x8c8   :  { %6555 = vmatprep.mubr.f32.mxu0 %v6140_v24 }
 0x8c9   :  { %v12716_v63 = vpop.permute.xlu0 %5967  ;;  %v12718_v41 = vpop.permute.xlu1 %5343 }
 0x8ca   :  { %16449 = vst [vmem:[#allocation112_spill] sm:$0xff] %v12716_v63 }
 0x8cb   :  { %5375 = vrot.lane.b32.xlu0 %v12477_v27, %s7914_s15  ;;  %4427 = vrot.lane.b32.xlu1 %v11900_v17, %s7919_s18 }
 0x8cd   :  { %v12724_v1 = vpop.permute.xlu0 %4407  ;;  %v12726_v28 = vpop.permute.xlu1 %5327 }
 0x8ce   :  { %16450 = vst [vmem:[#allocation111_spill] sm:$0xff] %v12724_v1  ;;  %16451 = vst [vmem:[#allocation190_spill] sm:$0xff] %v12726_v28 }
 0x8cf   :  { %5373 = vrot.lane.b32.xlu0 %v12352_v16, %s7914_s15  ;;  %5081 = vrot.lane.b32.xlu1 %v12494_v60, %s7915_s0 }
 0x8d1   :  { %v12732_v63 = vpop.permute.xlu0 %4637  ;;  %v12734_v43 = vpop.permute.xlu1 %4455 }
 0x8d2   :  { %16452 = vst [vmem:[#allocation130_spill] sm:$0xff] %v12732_v63  ;;  %16453 = vst [vmem:[#allocation192_spill] sm:$0xff] %v12734_v43 }
 0x8d3   :  { %5371 = vrot.lane.b32.xlu0 %v12227_v56, %s7914_s15  ;;  %5079 = vrot.lane.b32.xlu1 %v12362_v51, %s7915_s0 }
 0x8d5   :  { %v12740_v5 = vpop.permute.xlu0 %4669  ;;  %v12742_v37 = vpop.permute.xlu1 %5049 }
 0x8d6   :  { %16454 = vst [vmem:[#allocation181_spill] sm:$0xff] %v12742_v37 }
 0x8d7   :  { %4655 = vrot.lane.b32.xlu0 %v12610_v47, %s7917_s17  ;;  %5077 = vrot.lane.b32.xlu1 %v12246_v12, %s7915_s0 }
 0x8d9   :  { %v12748_v24 = vpop.permute.xlu0 %5359  ;;  %v12750_v21 = vpop.permute.xlu1 %5771 }
 0x8da   :  { %16455 = vst [vmem:[#allocation142_spill] sm:$0xff] %v12748_v24  ;;  %16456 = vst [vmem:[#allocation160_spill] sm:$0xff] %v12750_v21 }
 0x8db   :  { %5369 = vrot.lane.b32.xlu0 %v12104_v32, %s7914_s15  ;;  %5075 = vrot.lane.b32.xlu1 %v12114_v3, %s7915_s0 }
 0x8dd   :  { %v12756_v43 = vpop.permute.xlu0 %4423  ;;  %v12758_v37 = vpop.permute.xlu1 %5755 }
 0x8de   :  { %16457 = vst [vmem:[#allocation163_spill] sm:$0xff] %v12756_v43  ;;  %16458 = vst [vmem:[#allocation211_spill] sm:$0xff] %v12758_v37 }
 0x8df   :  { %5987 = vrot.lane.b32.xlu0 %v12578_v52, %s7911_s28  ;;  %6003 = vrot.lane.b32.xlu1 %v12610_v47, %s7911_s28  ;;  %v16477_v52 = vld [vmem:[#allocation10_spill] sm:$0xff] }
 0x8e1   :  { %v12764_v19 = vpop.permute.xlu0 %5065  ;;  %v12766_v33 = vpop.permute.xlu1 %4835 }
 0x8e2   :  { %16459 = vst [vmem:[#allocation212_spill] sm:$0xff] %v12764_v19  ;;  %16460 = vst [vmem:[#allocation213_spill] sm:$0xff] %v12766_v33 }
 0x8e3   :  { %5971 = vrot.lane.b32.xlu0 %v12568_v40, %s7911_s28  ;;  %4441 = vrot.lane.b32.xlu1 %v12610_v47, %s7919_s18  ;;  %v4491_v40 = vld [vmem:[%s15211_s1] sm:$0xf] }
 0x8e5   :  { %v12772_v21 = vpop.permute.xlu0 %5097  ;;  %v12774_v8 = vpop.permute.xlu1 %5557 }
 0x8e6   :  { %16461 = vst [vmem:[#allocation214_spill] sm:$0xff] %v12772_v21  ;;  %16462 = vst [vmem:[#allocation215_spill] sm:$0xff] %v12774_v8 }
 0x8e7   :  { %5367 = vrot.lane.b32.xlu0 %v12007_v59, %s7914_s15  ;;  %5073 = vrot.lane.b32.xlu1 %v12030_v15, %s7915_s0 }
 0x8e9   :  { %v12780_v37 = vpop.permute.xlu0 %5787  ;;  %v12782_v19 = vpop.permute.xlu1 %5541 }
 0x8ea   :  { %16463 = vst [vmem:[#allocation216_spill] sm:$0xff] %v12780_v37  ;;  %16464 = vst [vmem:[#allocation217_spill] sm:$0xff] %v12782_v19 }
 0x8eb   :  { %5365 = vrot.lane.b32.xlu0 %v11946_v23, %s7914_s15  ;;  %5071 = vrot.lane.b32.xlu1 %v11952_v7, %s7915_s0 }
 0x8ed   :  { %v12788_v33 = vpop.permute.xlu0 %4851  ;;  %v12790_v21 = vpop.permute.xlu1 %4653 }
 0x8ee   :  { %16465 = vst [vmem:[#allocation218_spill] sm:$0xff] %v12788_v33  ;;  %16466 = vst [vmem:[#allocation219_spill] sm:$0xff] %v12790_v21 }
 0x8ef   :  { %5363 = vrot.lane.b32.xlu0 %v11889_v54, %s7914_s15  ;;  %5069 = vrot.lane.b32.xlu1 %v11900_v17, %s7915_s0 }
 0x8f1   :  { %v12796_v8 = vpop.permute.xlu0 %4883  ;;  %v12798_v37 = vpop.permute.xlu1 %6001 }
 0x8f2   :  { %16467 = vst [vmem:[#allocation220_spill] sm:$0xff] %v12796_v8  ;;  %16468 = vst [vmem:[#allocation221_spill] sm:$0xff] %v12798_v37 }
 0x8f3   :  { %5377 = vrot.lane.b32.xlu0 %v12600_v11, %s7914_s15  ;;  %5083 = vrot.lane.b32.xlu1 %v12610_v47, %s7915_s0 }
 0x8f5   :  { %v12804_v19 = vpop.permute.xlu0 %5573  ;;  %v12806_v33 = vpop.permute.xlu1 %4439 }
 0x8f6   :  { %16469 = vst [vmem:[#allocation222_spill] sm:$0xff] %v12804_v19  ;;  %16470 = vst [vmem:[#allocation223_spill] sm:$0xff] %v12806_v33  ;;  %v12825_v33 = vld [vmem:[%s15211_s1 + $0x4] sm:$0xf] }
 0x8f7   :  { %4865 = vrot.lane.b32.xlu0 %v12362_v51, %s7916_s16  ;;  %4867 = vrot.lane.b32.xlu1 %v12494_v60, %s7916_s16  ;;  %16473 = vst [vmem:[#allocation226_spill] sm:$0xff] %v12825_v33  ;;  %v12853_v1 = vrot.slane %v12825_v33, %v16477_v52 }
 0x8f9   :  { %v12812_v21 = vpop.permute.xlu0 %5985  ;;  %v12814_v8 = vpop.permute.xlu1 %4409 }
 0x8fa   :  { %16471 = vst [vmem:[#allocation224_spill] sm:$0xff] %v12812_v21 }
 0x8fb   :  { %4861 = vrot.lane.b32.xlu0 %v12114_v3, %s7916_s16  ;;  %4863 = vrot.lane.b32.xlu1 %v12246_v12, %s7916_s16  ;;  %v16475_v3 = vld [vmem:[#allocation9_spill] sm:$0xff] }
 0x8fc   :  { %v12835_v21 = vrot.slane %v12825_v33, %v16475_v3  ;;  %v12874_v38 = vrot.slane %v4491_v40, %v16475_v3 }
 0x8fd   :  { %v12820_v37 = vpop.permute.xlu0 %5969  ;;  %v12827_v51 = vpop.permute.xlu1 %4639 }
 0x8fe   :  { %16472 = vst [vmem:[#allocation225_spill] sm:$0xff] %v12820_v37  ;;  %16474 = vst [vmem:[#allocation227_spill] sm:$0xff] %v12827_v51 }
 0x8ff   :  { %4857 = vrot.lane.b32.xlu0 %v11952_v7, %s7916_s16  ;;  %4859 = vrot.lane.b32.xlu1 %v12030_v15, %s7916_s16  ;;  %v7760_v15 = vld [vmem:[%s15211_s1 + $0x14] sm:$0xf] }
 0x901   :  { %v4624_v60 = vpop.permute.xlu0 %4623  ;;  %v5346_v12 = vpop.permute.xlu1 %5345 }
 0x902   :  { %v4696_v19 = vsel %vm113_vm6, %v4624_v60, %v12827_v51  ;;  %v4695_v51 = vsel %vm113_vm6, %v12710_v30, %v12732_v63  ;;  %v4694_v63 = vsel %vm113_vm6, %v12614_v61, %v12620_v48 }
 0x903   :  { %5801 = vrot.lane.b32.xlu0 %v12352_v16, %s7912_s30  ;;  %v4756_v7 = vmul.f32 %v12835_v21, %v4696_v19  ;;  %4855 = vrot.lane.b32.xlu1 %v11900_v17, %s7916_s16  ;;  %v12862_v19 = vrot.slane %v4491_v40, %v16477_v52  ;;  %v4703_v17 = vsel %vm113_vm6, %v12740_v5, %v12710_v30 }
 0x904   :  { %v12887_v30 = vrot.slane %v7760_v15, %v16475_v3  ;;  %v4689_v40 = vsel %vm113_vm6, %v12044_v49, %v12064_v0  ;;  %v4751_v0 = vmul.f32 %v12853_v1, %v4703_v17 }
 0x905   :  { %6491 = vmatprep.subr.mxu0 %v4756_v7  ;;  %v12859_v16 = vpop.permute.xlu0 %4671  ;;  %16478 = vst [vmem:[#allocation9_spill] sm:$0xff] %v12862_v19  ;;  %v12868_v43 = vpop.permute.xlu1 %5329  ;;  %v12877_v7 = vrot.slane %v7760_v15, %v16477_v52  ;;  %v4752_v15 = vmul.f32 %v12835_v21, %v4695_v51  ;;  %v4692_v51 = vsel %vm113_vm6, %v12374_v13, %v12372_v36 }
 0x906   :  { %16479 = vst [vmem:[#allocation8_spill] sm:$0xff] %v12868_v43  ;;  %v4704_v33 = vsel %vm113_vm6, %v12859_v16, %v4624_v60  ;;  %v12897_v60 = vsel %vm113_vm6, %v12074_v10, %v12044_v49  ;;  %v4693_v49 = vsel %vm113_vm6, %v12479_v22, %v12504_v39  ;;  %v5393_v36 = vsel %vm265_vm3, %v12718_v41, %v12748_v24 }
 0x907   :  { %v4755_v19 = vmul.f32 %v12853_v1, %v4704_v33  ;;  %4869 = vrot.lane.b32.xlu0 %v12610_v47, %s7916_s16  ;;  %v4702_v33 = vsel %vm113_vm6, %v12628_v4, %v12614_v61  ;;  %5803 = vrot.lane.b32.xlu1 %v12477_v27, %s7912_s30  ;;  %v12910_v47 = vsel %vm113_vm6, %v12158_v42, %v12156_v58 }
 0x908   :  { %v5402_v61 = vsel %vm265_vm3, %v12868_v43, %v5346_v12  ;;  %v4701_v58 = vsel %vm113_vm6, %v12512_v9, %v12479_v22  ;;  %v4747_v43 = vmul.f32 %v12853_v1, %v4702_v33  ;;  %v4744_v33 = vmul.f32 %v12835_v21, %v4693_v49 }
 0x909   :  { %6492 = vmatpush1.msra.mxu0 %v4755_v19  ;;  %v12920_v10 = vpop.permute.xlu0 %5361  ;;  %v12930_v39 = vpop.permute.xlu1 %5993  ;;  %v4748_v19 = vmul.f32 %v12835_v21, %v4694_v63  ;;  %v5461_v63 = vmul.f32 %v12877_v7, %v5402_v61  ;;  %v4691_v49 = vsel %vm113_vm6, %v12250_v6, %v12280_v53 }
 0x90a   :  { %16480 = vst [vmem:[#allocation10_spill] sm:$0xff] %v12920_v10  ;;  %16481 = vst [vmem:[#allocation228_spill] sm:$0xff] %v12930_v39  ;;  %v5394_v17 = vsel %vm265_vm3, %v5346_v12, %v12920_v10  ;;  %6493 = vmatprep.subr.mxu0 %v4752_v15  ;;  %v5401_v12 = vsel %vm265_vm3, %v12726_v28, %v12718_v41  ;;  %v4743_v15 = vmul.f32 %v12853_v1, %v4701_v58  ;;  %v16513_v28 = vld [vmem:[#allocation25_spill] sm:$0xff] }
 0x90b   :  { %5797 = vrot.lane.b32.xlu0 %v12104_v32, %s7912_s30  ;;  %6494 = vmatpush1.msra.mxu0 %v4751_v0  ;;  %v5462_v22 = vmul.f32 %v12887_v30, %v5394_v17  ;;  %v4700_v0 = vsel %vm113_vm6, %v12380_v18, %v12374_v13  ;;  %v5392_v41 = vsel %vm265_vm3, %v12622_v29, %v12636_v25  ;;  %v16570_v39 = vld [vmem:[#allocation105_spill] sm:$0xff] }
 0x90c   :  { %5799 = vrot.lane.b32.xlu1 %v12227_v56, %s7912_s30  ;;  %6495 = vmatprep.subr.mxu0 %v4748_v19  ;;  %v5400_v13 = vsel %vm265_vm3, %v12630_v57, %v12622_v29  ;;  %v5458_v17 = vmul.f32 %v12887_v30, %v5393_v36  ;;  %v5457_v19 = vmul.f32 %v12877_v7, %v5401_v12 }
 0x90d   :  { %6496 = vmatpush1.msra.mxu0 %v4747_v43  ;;  %6604 = vmatprep.subr.mxu1 %v5462_v22  ;;  %v12961_v61 = vpop.permute.xlu0 %5977  ;;  %v12971_v58 = vpop.permute.xlu1 %4431  ;;  %v4699_v43 = vsel %vm113_vm6, %v12288_v20, %v12250_v6  ;;  %v4740_v22 = vmul.f32 %v12835_v21, %v4692_v51  ;;  %v4739_v29 = vmul.f32 %v12853_v1, %v4700_v0 }
 0x90e   :  { %16482 = vst [vmem:[#allocation229_spill] sm:$0xff] %v12961_v61  ;;  %16483 = vst [vmem:[#allocation230_spill] sm:$0xff] %v12971_v58  ;;  %6497 = vmatprep.subr.mxu0 %v4744_v33  ;;  %6605 = vmatpush1.msra.mxu1 %v5461_v63  ;;  %v5391_v36 = vsel %vm265_vm3, %v12488_v46, %v12520_v44  ;;  %v5454_v6 = vmul.f32 %v12887_v30, %v5392_v41  ;;  %v16519_v58 = vld [vmem:[#allocation50_spill] sm:$0xff]  ;;  %v16567_v61 = vld [vmem:[#allocation156_spill] sm:$0xff] }
 0x90f   :  { %5793 = vrot.lane.b32.xlu0 %v11946_v23, %s7912_s30  ;;  %6498 = vmatpush1.msra.mxu0 %v4743_v15  ;;  %v5399_v12 = vsel %vm265_vm3, %v12498_v35, %v12488_v46  ;;  %v5453_v51 = vmul.f32 %v12877_v7, %v5400_v13  ;;  %v4736_v33 = vmul.f32 %v12835_v21, %v4691_v49  ;;  %v16507_v35 = vld [vmem:[#allocation55_spill] sm:$0xff] }
 0x910   :  { %5795 = vrot.lane.b32.xlu1 %v12007_v59, %s7912_s30  ;;  %6606 = vmatprep.subr.mxu1 %v5458_v17  ;;  %v4698_v0 = vsel %vm113_vm6, %v12164_v50, %v12158_v42  ;;  %v5390_v15 = vsel %vm265_vm3, %v12382_v45, %v12388_v55  ;;  %v4728_v46 = vmul.f32 %v12835_v21, %v4689_v40 }
 0x911   :  { %6499 = vmatprep.subr.mxu0 %v4740_v22  ;;  %6607 = vmatpush1.msra.mxu1 %v5457_v19  ;;  %v12995_v63 = vpop.permute.xlu0 %5961  ;;  %v13006_v41 = vpop.permute.xlu1 %4425  ;;  %v4735_v13 = vmul.f32 %v12853_v1, %v4699_v43  ;;  %v5398_v49 = vsel %vm265_vm3, %v12390_v14, %v12382_v45  ;;  %v5450_v42 = vmul.f32 %v12887_v30, %v5391_v36 }
 0x912   :  { %16484 = vst [vmem:[#allocation231_spill] sm:$0xff] %v12995_v63  ;;  %6500 = vmatpush1.msra.mxu0 %v4739_v29  ;;  %6608 = vmatprep.subr.mxu1 %v5454_v6  ;;  %v4727_v17 = vmul.f32 %v12853_v1, %v12897_v60  ;;  %v5449_v19 = vmul.f32 %v12877_v7, %v5399_v12  ;;  %v16486_v6 = vld [vmem:[#allocation125_spill] sm:$0xff]  ;;  %v16565_v63 = vld [vmem:[#allocation162_spill] sm:$0xff] }
 0x913   :  { %6501 = vmatprep.subr.mxu0 %v4736_v33  ;;  %6609 = vmatpush1.msra.mxu1 %v5453_v51  ;;  %v4732_v40 = vmul.f32 %v12835_v21, %v12910_v47  ;;  %v4731_v45 = vmul.f32 %v12853_v1, %v4698_v0  ;;  %v5389_v43 = vsel %vm265_vm3, %v12258_v26, %v12296_v31  ;;  %v16487_v51 = vld [vmem:[#allocation163_spill] sm:$0xff]  ;;  %v16499_v31 = vld [vmem:[#allocation66_spill] sm:$0xff] }
 0x914   :  { %5791 = vrot.lane.b32.xlu1 %v11889_v54, %s7912_s30  ;;  %5805 = vrot.lane.b32.xlu0 %v12600_v11, %s7912_s30  ;;  %v5446_v60 = vmul.f32 %v12887_v30, %v5390_v15  ;;  %v5397_v29 = vsel %vm265_vm3, %v12266_v2, %v12258_v26  ;;  %v5445_v21 = vmul.f32 %v12877_v7, %v5398_v49  ;;  %v16488_v33 = vld [vmem:[#allocation111_spill] sm:$0xff]  ;;  %v16489_v15 = vld [vmem:[#allocation9_spill] sm:$0xff] }
 0x915   :  { %6502 = vmatpush1.msra.mxu0 %v4735_v13  ;;  %6610 = vmatprep.subr.mxu1 %v5450_v42  ;;  %v13030_v22 = vpop.permute.xlu0 %5975  ;;  %v4482_v1 = vsel %vm66_vm7, %v12814_v8, %v13006_v41  ;;  %v13041_v47 = vpop.permute.xlu1 %4457  ;;  %v5396_v36 = vsel %vm265_vm3, %v12174_v34, %v12166_v62  ;;  %v5388_v26 = vsel %vm265_vm3, %v12166_v62, %v16486_v6  ;;  %v16490_v42 = vld [vmem:[#allocation91_spill] sm:$0xff]  ;;  %v16497_v6 = vld [vmem:[#allocation134_spill] sm:$0xff]  ;;  %v16500_v2 = vld [vmem:[#allocation109_spill] sm:$0xff] }
 0x916   :  { %16485 = vst [vmem:[#allocation232_spill] sm:$0xff] %v13030_v22  ;;  %6503 = vmatprep.subr.mxu0 %v4732_v40  ;;  %6611 = vmatpush1.msra.mxu1 %v5449_v19  ;;  %v4490_v12 = vsel %vm66_vm7, %v13041_v47, %v12814_v8  ;;  %v4481_v0 = vsel %vm66_vm7, %v16488_v33, %v16487_v51  ;;  %v16491_v62 = vld [vmem:[#allocation187_spill] sm:$0xff] }
 0x917   :  { %6504 = vmatpush1.msra.mxu0 %v4731_v45  ;;  %6612 = vmatprep.subr.mxu1 %v5446_v60  ;;  %v4541_v13 = vmul.f32 %v16489_v15, %v4490_v12  ;;  %v5442_v49 = vmul.f32 %v12887_v30, %v5389_v43  ;;  %v5387_v19 = vsel %vm265_vm3, %v16491_v62, %v16490_v42  ;;  %v7762_v8 = vld [vmem:[%s15211_s1 + $0x1c] sm:$0xf]  ;;  %v16493_v43 = vld [vmem:[#allocation46_spill] sm:$0xff]  ;;  %v7761_v42 = vld [vmem:[%s15211_s1 + $0x18] sm:$0xf] }
 0x918   :  { %6505 = vmatprep.subr.mxu0 %v4728_v46  ;;  %6613 = vmatpush1.msra.mxu1 %v5445_v21  ;;  %v5441_v40 = vmul.f32 %v12877_v7, %v5397_v29  ;;  %v4542_v46 = vmul.f32 %v12874_v38, %v4482_v1  ;;  %v5395_v60 = vsel %vm265_vm3, %v16493_v43, %v16491_v62  ;;  %v16494_v21 = vld [vmem:[#allocation192_spill] sm:$0xff]  ;;  %v7759_v1 = vld [vmem:[%s15211_s1 + $0xc] sm:$0xf]  ;;  %v16498_v34 = vld [vmem:[#allocation119_spill] sm:$0xff] }
 0x919   :  { %5589 = vrot.lane.b32.xlu1 %v12477_v27, %s7913_s12  ;;  %6017 = vrot.lane.b32.xlu0 %v12477_v27, %s7911_s28  ;;  %v13074_v45 = vpop.permute.xlu0 %5959  ;;  %v4489_v29 = vsel %vm66_vm7, %v16494_v21, %v16488_v33  ;;  %v13084_v12 = vpop.permute.xlu1 %5991  ;;  %v5438_v27 = vmul.f32 %v12887_v30, %v5388_v26  ;;  %v5437_v62 = vmul.f32 %v12877_v7, %v5396_v36  ;;  %v16496_v43 = vld [vmem:[#allocation177_spill] sm:$0xff]  ;;  %v16526_v22 = vld [vmem:[#allocation123_spill] sm:$0xff] }
 0x91a   :  { %16492 = vst [vmem:[#allocation163_spill] sm:$0xff] %v13074_v45  ;;  %6506 = vmatpush1.msra.mxu0 %v4727_v17  ;;  %6614 = vmatprep.subr.mxu1 %v5442_v49  ;;  %16495 = vst [vmem:[#allocation111_spill] sm:$0xff] %v13084_v12  ;;  %v4480_v17 = vsel %vm66_vm7, %v16497_v6, %v16496_v43  ;;  %v4538_v33 = vmul.f32 %v12874_v38, %v4481_v0  ;;  %v16520_v45 = vld [vmem:[#allocation148_spill] sm:$0xff]  ;;  %v16529_v12 = vld [vmem:[#allocation174_spill] sm:$0xff] }
 0x91b   :  { %6507 = vmatprep.subr.mxu0 %v4542_v46  ;;  %6615 = vmatpush1.msra.mxu1 %v5441_v40  ;;  %v13100_v26 = vrot.slane %v7762_v8, %v16477_v52  ;;  %v13103_v49 = vrot.slane %v7759_v1, %v16477_v52  ;;  %v4488_v36 = vsel %vm66_vm7, %v16498_v34, %v16497_v6  ;;  %v16566_v43 = vld [vmem:[#allocation101_spill] sm:$0xff] }
 0x91c   :  { %6508 = vmatpush1.msra.mxu0 %v4541_v13  ;;  %6616 = vmatprep.subr.mxu1 %v5438_v27  ;;  %v4479_v40 = vsel %vm66_vm7, %v16500_v2, %v16499_v31  ;;  %v4537_v0 = vmul.f32 %v16489_v15, %v4489_v29  ;;  %v5434_v46 = vmul.f32 %v12887_v30, %v5387_v19  ;;  %v16501_v27 = vld [vmem:[#allocation38_spill] sm:$0xff]  ;;  %v7758_v30 = vld [vmem:[%s15211_s1 + $0x8] sm:$0xf]  ;;  %v16503_v19 = vld [vmem:[#allocation143_spill] sm:$0xff] }
 0x91d   :  { %6509 = vmatprep.subr.mxu0 %v4538_v33  ;;  %6617 = vmatpush1.msra.mxu1 %v5437_v62  ;;  %v13115_v55 = vpop.permute.xlu0 %5051  ;;  %v5433_v14 = vmul.f32 %v12877_v7, %v5395_v60  ;;  %v13119_v44 = vrot.slane %v7761_v42, %v16477_v52  ;;  %v4534_v6 = vmul.f32 %v12874_v38, %v4480_v17  ;;  %v13126_v13 = vpop.permute.xlu1 %5067  ;;  %v16504_v62 = vld [vmem:[#allocation171_spill] sm:$0xff]  ;;  %v16505_v17 = vld [vmem:[#allocation173_spill] sm:$0xff] }
 0x91e   :  { %5587 = vrot.lane.b32.xlu1 %v16501_v27, %s7913_s12  ;;  %6015 = vrot.lane.b32.xlu0 %v16501_v27, %s7911_s28  ;;  %16502 = vst [vmem:[#allocation9_spill] sm:$0xff] %v13126_v13  ;;  %v4487_v7 = vsel %vm66_vm7, %v16503_v19, %v16500_v2  ;;  %v4533_v60 = vmul.f32 %v16489_v15, %v4488_v36  ;;  %v16506_v27 = vld [vmem:[#allocation40_spill] sm:$0xff]  ;;  %v16560_v19 = vld [vmem:[#allocation202_spill] sm:$0xff] }
 0x91f   :  { %6510 = vmatpush1.msra.mxu0 %v4537_v0  ;;  %6618 = vmatprep.subr.mxu1 %v5434_v46  ;;  %v13137_v29 = vrot.slane %v7759_v1, %v16475_v3  ;;  %v4475_v33 = vsel %vm66_vm7, %v16505_v17, %v16504_v62  ;;  %v4478_v25 = vsel %vm66_vm7, %v16507_v35, %v16506_v27  ;;  %v16508_v1 = vld [vmem:[#allocation95_spill] sm:$0xff]  ;;  %v16509_v46 = vld [vmem:[#allocation209_spill] sm:$0xff] }
 0x920   :  { %6511 = vmatprep.subr.mxu0 %v4534_v6  ;;  %6619 = vmatpush1.msra.mxu1 %v5433_v14  ;;  %v4530_v2 = vmul.f32 %v12874_v38, %v4479_v40  ;;  %v13149_v36 = vrot.slane %v7758_v30, %v16477_v52  ;;  %v4486_v0 = vsel %vm66_vm7, %v16508_v1, %v16507_v35  ;;  %v16511_v6 = vld [vmem:[#allocation129_spill] sm:$0xff]  ;;  %v16512_v14 = vld [vmem:[#allocation186_spill] sm:$0xff]  ;;  %v16525_v1 = vld [vmem:[#allocation140_spill] sm:$0xff] }
 0x921   :  { %6512 = vmatpush1.msra.mxu0 %v4533_v60  ;;  %6620 = vmatprep.subr.mxu1 %v16509_v46  ;;  %v13156_v57 = vpop.permute.xlu0 %5099  ;;  %v13159_v24 = vrot.slane %v7762_v8, %v16475_v3  ;;  %v4477_v40 = vsel %vm66_vm7, %v16512_v14, %v16511_v6  ;;  %v4529_v62 = vmul.f32 %v16489_v15, %v4487_v7  ;;  %v13167_v10 = vpop.permute.xlu1 %5773 }
 0x922   :  { %16510 = vst [vmem:[#allocation187_spill] sm:$0xff] %v13156_v57  ;;  %6513 = vmatprep.subr.mxu0 %v4530_v2  ;;  %6621 = vmatpush1.msra.mxu1 %v16513_v28  ;;  %v13170_v35 = vrot.slane %v7758_v30, %v16475_v3  ;;  %v4526_v8 = vmul.f32 %v12874_v38, %v4478_v25  ;;  %v16514_v28 = vld [vmem:[#allocation166_spill] sm:$0xff]  ;;  %v16515_v30 = vld [vmem:[#allocation184_spill] sm:$0xff]  ;;  %v16517_v25 = vld [vmem:[#allocation99_spill] sm:$0xff] }
 0x923   :  { %5585 = vrot.lane.b32.xlu1 %v12227_v56, %s7913_s12  ;;  %6013 = vrot.lane.b32.xlu0 %v12227_v56, %s7911_s28  ;;  %v4514_v60 = vmul.f32 %v12874_v38, %v4475_v33  ;;  %v13179_v7 = vrot.slane %v7761_v42, %v16475_v3  ;;  %v4483_v2 = vsel %vm66_vm7, %v16514_v28, %v16505_v17  ;;  %v16516_v56 = vld [vmem:[#allocation106_spill] sm:$0xff]  ;;  %v16518_v33 = vld [vmem:[#allocation189_spill] sm:$0xff]  ;;  %v16521_v28 = vld [vmem:[#allocation188_spill] sm:$0xff] }
 0x924   :  { %v4485_v46 = vsel %vm66_vm7, %v16515_v30, %v16512_v14  ;;  %v4525_v6 = vmul.f32 %v16489_v15, %v4486_v0  ;;  %6514 = vmatpush1.msra.mxu0 %v4529_v62  ;;  %6622 = vmatprep.subr.mxu1 %v16516_v56  ;;  %v5823_v42 = vsel %vm361_vm1, %v16518_v33, %v16517_v25  ;;  %v16523_v62 = vld [vmem:[#allocation168_spill] sm:$0xff]  ;;  %v16524_v0 = vld [vmem:[#allocation137_spill] sm:$0xff] }
 0x925   :  { %v4476_v17 = vsel %vm66_vm7, %v16520_v45, %v16519_v58  ;;  %6515 = vmatprep.subr.mxu0 %v4526_v8  ;;  %6623 = vmatpush1.msra.mxu1 %v16521_v28  ;;  %v4522_v14 = vmul.f32 %v12874_v38, %v4477_v40  ;;  %v13201_v30 = vpop.permute.xlu0 %5789  ;;  %v5117_v56 = vsel %vm209_vm4, %v16524_v0, %v16523_v62  ;;  %v16527_v28 = vld [vmem:[#allocation88_spill] sm:$0xff]  ;;  %v13216_v40 = vpop.permute.xlu1 %5757 }
 0x926   :  { %16522 = vst [vmem:[#allocation192_spill] sm:$0xff] %v13201_v30  ;;  %v5125_v33 = vsel %vm209_vm4, %v16525_v1, %v16524_v0  ;;  %v4484_v8 = vsel %vm66_vm7, %v16526_v22, %v16520_v45  ;;  %6516 = vmatpush1.msra.mxu0 %v4525_v6  ;;  %6624 = vmatprep.subr.mxu1 %v16527_v28  ;;  %16528 = vst [vmem:[#allocation134_spill] sm:$0xff] %v13216_v40  ;;  %v16530_v0 = vld [vmem:[#allocation76_spill] sm:$0xff]  ;;  %v16531_v45 = vld [vmem:[#allocation155_spill] sm:$0xff] }
 0x927   :  { %v4513_v58 = vmul.f32 %v16489_v15, %v4483_v2  ;;  %v5815_v62 = vsel %vm361_vm1, %v16517_v25, %v16529_v12  ;;  %v4521_v31 = vmul.f32 %v16489_v15, %v4485_v46  ;;  %6517 = vmatprep.subr.mxu0 %v4522_v14  ;;  %6625 = vmatpush1.msra.mxu1 %v16530_v0  ;;  %v16532_v6 = vld [vmem:[#allocation195_spill] sm:$0xff] }
 0x928   :  { %v13226_v1 = vmul.f32 %v13100_v26, %v5823_v42  ;;  %v4903_v28 = vsel %vm161_vm5, %v16532_v6, %v16531_v45  ;;  %5583 = vrot.lane.b32.xlu1 %v12104_v32, %s7913_s12  ;;  %5591 = vrot.lane.b32.xlu0 %v12600_v11, %s7913_s12  ;;  %v4518_v2 = vmul.f32 %v12874_v38, %v4476_v17  ;;  %v16533_v42 = vld [vmem:[#allocation208_spill] sm:$0xff]  ;;  %v16535_v12 = vld [vmem:[#allocation75_spill] sm:$0xff]  ;;  %v16536_v45 = vld [vmem:[#allocation82_spill] sm:$0xff] }
 0x929   :  { %v13238_v46 = vmul.f32 %v13103_v49, %v5125_v33  ;;  %v4517_v25 = vmul.f32 %v16489_v15, %v4484_v8  ;;  %6518 = vmatpush1.msra.mxu0 %v4521_v31  ;;  %6626 = vmatprep.subr.mxu1 %v16533_v42  ;;  %v13242_v14 = vpop.permute.xlu0 %5973  ;;  %v13245_v0 = vmul.f32 %v13137_v29, %v5117_v56  ;;  %v16537_v15 = vld [vmem:[#allocation98_spill] sm:$0xff]  ;;  %v13256_v31 = vpop.permute.xlu1 %4429  ;;  %v16539_v17 = vld [vmem:[#allocation103_spill] sm:$0xff] }
 0x92a   :  { %16534 = vst [vmem:[#allocation119_spill] sm:$0xff] %v13242_v14  ;;  %v5118_v22 = vsel %vm209_vm4, %v16536_v45, %v16535_v12  ;;  %v5124_v38 = vsel %vm209_vm4, %v13115_v55, %v13126_v13  ;;  %6519 = vmatprep.subr.mxu0 %v4518_v2  ;;  %6627 = vmatpush1.msra.mxu1 %v16537_v15  ;;  %16538 = vst [vmem:[#allocation109_spill] sm:$0xff] %v13256_v31  ;;  %v16540_v42 = vld [vmem:[#allocation71_spill] sm:$0xff]  ;;  %v16541_v15 = vld [vmem:[#allocation120_spill] sm:$0xff] }
 0x92b   :  { %v13259_v33 = vmul.f32 %v13159_v24, %v5815_v62  ;;  %v5126_v56 = vsel %vm209_vm4, %v16539_v17, %v16536_v45  ;;  %v5132_v8 = vsel %vm209_vm4, %v13156_v57, %v13115_v55  ;;  %6520 = vmatpush1.msra.mxu0 %v4517_v25  ;;  %6628 = vmatprep.subr.mxu1 %v16540_v42  ;;  %v16542_v12 = vld [vmem:[#allocation96_spill] sm:$0xff]  ;;  %v16543_v13 = vld [vmem:[#allocation74_spill] sm:$0xff]  ;;  %v16545_v31 = vld [vmem:[#allocation181_spill] sm:$0xff] }
 0x92c   :  { %v13271_v2 = vmul.f32 %v13170_v35, %v4903_v28  ;;  %v13277_v62 = vsel %vm161_vm5, %v16541_v15, %v16532_v6  ;;  %v5824_v45 = vsel %vm361_vm1, %v16543_v13, %v16542_v12  ;;  %v16544_v17 = vld [vmem:[#allocation212_spill] sm:$0xff]  ;;  %6521 = vmatprep.subr.mxu0 %v4514_v60  ;;  %v16546_v25 = vld [vmem:[#allocation118_spill] sm:$0xff]  ;;  %v16547_v28 = vld [vmem:[#allocation27_spill] sm:$0xff]  ;;  %5581 = vrot.lane.b32.xlu1 %v12007_v59, %s7913_s12 }
 0x92d   :  { %v5123_v55 = vsel %vm209_vm4, %v16545_v31, %v16544_v17  ;;  %6629 = vmatpush1.msra.mxu1 %v16546_v25  ;;  %v5816_v42 = vsel %vm361_vm1, %v16542_v12, %v16547_v28  ;;  %6019 = vrot.lane.b32.xlu0 %v12600_v11, %s7911_s28  ;;  %v5184_v6 = vmul.f32 %v13137_v29, %v5124_v38  ;;  %v13297_v13 = vpop.permute.xlu0 %4853  ;;  %v16548_v25 = vld [vmem:[#allocation214_spill] sm:$0xff]  ;;  %v13311_v11 = vpop.permute.xlu1 %4837  ;;  %v16551_v57 = vld [vmem:[#allocation115_spill] sm:$0xff]  ;;  %v16552_v14 = vld [vmem:[#allocation41_spill] sm:$0xff] }
 0x92e   :  { %v13300_v15 = vmul.f32 %v13137_v29, %v5118_v22  ;;  %v13303_v60 = vmul.f32 %v13103_v49, %v5126_v56  ;;  %v5131_v12 = vsel %vm209_vm4, %v16548_v25, %v16545_v31  ;;  %v5183_v28 = vmul.f32 %v13103_v49, %v5132_v8  ;;  %6522 = vmatpush1.msra.mxu0 %v4513_v58  ;;  %v16549_v17 = vld [vmem:[#allocation198_spill] sm:$0xff]  ;;  %v16550_v22 = vld [vmem:[#allocation89_spill] sm:$0xff] }
 0x92f   :  { %6630 = vmatprep.subr.mxu1 %v16549_v17  ;;  %v13314_v38 = vmul.f32 %v13100_v26, %v5824_v45  ;;  %v5122_v56 = vsel %vm209_vm4, %v16551_v57, %v16550_v22  ;;  %6523 = vmatprep.subr.mxu0 %v5184_v6  ;;  %v5180_v31 = vmul.f32 %v13137_v29, %v5123_v55  ;;  %v16553_v8 = vld [vmem:[#allocation97_spill] sm:$0xff]  ;;  %v16554_v45 = vld [vmem:[#allocation116_spill] sm:$0xff] }
 0x930   :  { %6631 = vmatpush1.msra.mxu1 %v16552_v14  ;;  %v5130_v58 = vsel %vm209_vm4, %v16553_v8, %v16551_v57  ;;  %v5822_v17 = vsel %vm361_vm1, %v13167_v10, %v13201_v30  ;;  %6524 = vmatpush2.msra.mxu0 %v5183_v28  ;;  %v13332_v22 = vmul.f32 %v13159_v24, %v5816_v42  ;;  %v16555_v6 = vld [vmem:[#allocation45_spill] sm:$0xff]  ;;  %v16556_v14 = vld [vmem:[#allocation90_spill] sm:$0xff]  ;;  %v16557_v30 = vld [vmem:[#allocation132_spill] sm:$0xff] }
 0x931   :  { %6632 = vmatprep.subr.mxu1 %v16554_v45  ;;  %v5121_v55 = vsel %vm209_vm4, %v16556_v14, %v16555_v6  ;;  %v5179_v25 = vmul.f32 %v13103_v49, %v5131_v12  ;;  %v5830_v57 = vsel %vm361_vm1, %v13216_v40, %v13167_v10  ;;  %6525 = vmatprep.subr.mxu0 %v5180_v31  ;;  %v13344_v28 = vpop.permute.xlu0 %4885  ;;  %v16558_v45 = vld [vmem:[#allocation67_spill] sm:$0xff]  ;;  %v16559_v42 = vld [vmem:[#allocation68_spill] sm:$0xff] }
 0x932   :  { %6633 = vmatpush1.msra.mxu1 %v16557_v30  ;;  %v5120_v8 = vsel %vm209_vm4, %v16559_v42, %v16558_v45  ;;  %v5129_v12 = vsel %vm209_vm4, %v16560_v19, %v16556_v14  ;;  %5579 = vrot.lane.b32.xlu1 %v11946_v23, %s7913_s12  ;;  %v5176_v10 = vmul.f32 %v13137_v29, %v5122_v56  ;;  %v13359_v30 = vpop.permute.xlu1 %5559  ;;  %v16561_v40 = vld [vmem:[#allocation216_spill] sm:$0xff]  ;;  %v16564_v19 = vld [vmem:[#allocation211_spill] sm:$0xff] }
 0x933   :  { %6011 = vrot.lane.b32.xlu0 %v12104_v32, %s7911_s28  ;;  %v5175_v31 = vmul.f32 %v13103_v49, %v5130_v58  ;;  %v16562_v6 = vld [vmem:[#allocation160_spill] sm:$0xff]  ;;  %v5890_v27 = vmul.f32 %v13159_v24, %v5822_v17  ;;  %6526 = vmatpush2.msra.mxu0 %v5179_v25  ;;  %v5889_v56 = vmul.f32 %v13100_v26, %v5830_v57  ;;  %v16568_v25 = vld [vmem:[#allocation158_spill] sm:$0xff] }
 0x934   :  { %v5821_v45 = vsel %vm361_vm1, %v16562_v6, %v16561_v40  ;;  %v16563_v14 = vld [vmem:[#allocation144_spill] sm:$0xff]  ;;  %v5829_v32 = vsel %vm361_vm1, %v16564_v19, %v16562_v6  ;;  %6527 = vmatprep.subr.mxu0 %v5176_v10  ;;  %v5172_v58 = vmul.f32 %v13137_v29, %v5121_v55  ;;  %v5119_v17 = vsel %vm209_vm4, %v16567_v61, %v16566_v43  ;;  %v16569_v40 = vld [vmem:[#allocation157_spill] sm:$0xff]  ;;  %v16572_v57 = vld [vmem:[#allocation182_spill] sm:$0xff] }
 0x935   :  { %6634 = vmatprep.subr.mxu1 %v16563_v14  ;;  %v5128_v14 = vsel %vm209_vm4, %v16568_v25, %v16559_v42  ;;  %v5820_v6 = vsel %vm361_vm1, %v16570_v39, %v16569_v40  ;;  %6528 = vmatpush2.msra.mxu0 %v5175_v31  ;;  %v5171_v55 = vmul.f32 %v13103_v49, %v5129_v12  ;;  %v16574_v43 = vld [vmem:[#allocation79_spill] sm:$0xff] }
 0x936   :  { %6635 = vmatpush1.msra.mxu1 %v16565_v63  ;;  %v13387_v63 = vpop.permute.xlu0 %5575  ;;  %v5828_v10 = vsel %vm361_vm1, %v16572_v57, %v16570_v39  ;;  %6529 = vmatprep.subr.mxu0 %v5172_v58  ;;  %v5886_v42 = vmul.f32 %v13159_v24, %v5821_v45  ;;  %v13395_v19 = vpop.permute.xlu1 %5543  ;;  %v5885_v31 = vmul.f32 %v13100_v26, %v5829_v32  ;;  %v16575_v45 = vld [vmem:[#allocation205_spill] sm:$0xff] }
 0x937   :  { %6636 = vmatprep.subr.mxu1 %v5890_v27  ;;  %16571 = vst [vmem:[#allocation173_spill] sm:$0xff] %v13387_v63  ;;  %16573 = vst [vmem:[#allocation55_spill] sm:$0xff] %v13395_v19  ;;  %v5127_v27 = vsel %vm209_vm4, %v16574_v43, %v16567_v61  ;;  %5577 = vrot.lane.b32.xlu1 %v11889_v54, %s7913_s12  ;;  %v5168_v39 = vmul.f32 %v13137_v29, %v5120_v8  ;;  %v16577_v32 = vld [vmem:[#allocation73_spill] sm:$0xff]  ;;  %v16580_v43 = vld [vmem:[#allocation136_spill] sm:$0xff] }
 0x938   :  { %6637 = vmatpush2.msra.mxu1 %v5889_v56  ;;  %6009 = vrot.lane.b32.xlu0 %v12007_v59, %s7911_s28  ;;  %v5167_v12 = vmul.f32 %v13103_v49, %v5128_v14  ;;  %v16576_v56 = vld [vmem:[#allocation62_spill] sm:$0xff]  ;;  %v5882_v61 = vmul.f32 %v13159_v24, %v5820_v6  ;;  %v5881_v57 = vmul.f32 %v13100_v26, %v5828_v10  ;;  %v16579_v59 = vld [vmem:[#allocation100_spill] sm:$0xff] }
 0x939   :  { %v5819_v58 = vsel %vm361_vm1, %v16576_v56, %v16575_v45  ;;  %6530 = vmatpush2.msra.mxu0 %v5171_v55  ;;  %6638 = vmatprep.subr.mxu1 %v5886_v42  ;;  %v5827_v40 = vsel %vm361_vm1, %v16577_v32, %v16576_v56  ;;  %v5164_v8 = vmul.f32 %v13137_v29, %v5119_v17  ;;  %v16581_v42 = vld [vmem:[#allocation47_spill] sm:$0xff]  ;;  %v16582_v45 = vld [vmem:[#allocation93_spill] sm:$0xff]  ;;  %v16596_v32 = vld [vmem:[#allocation220_spill] sm:$0xff] }
 0x93a   :  { %6531 = vmatprep.subr.mxu0 %v5168_v39  ;;  %6639 = vmatpush2.msra.mxu1 %v5885_v31  ;;  %v13419_v14 = vpop.permute.xlu0 %5957  ;;  %v5825_v55 = vsel %vm361_vm1, %v16580_v43, %v16579_v59  ;;  %v5163_v6 = vmul.f32 %v13103_v49, %v5127_v27  ;;  %v5818_v56 = vsel %vm361_vm1, %v16582_v45, %v16581_v42  ;;  %v13430_v10 = vpop.permute.xlu1 %5989  ;;  %v16584_v31 = vld [vmem:[#allocation102_spill] sm:$0xff]  ;;  %v16585_v17 = vld [vmem:[#allocation49_spill] sm:$0xff]  ;;  %v16586_v27 = vld [vmem:[#allocation203_spill] sm:$0xff] }
 0x93b   :  { %16578 = vst [vmem:[#allocation209_spill] sm:$0xff] %v13419_v14  ;;  %6532 = vmatpush2.msra.mxu0 %v5167_v12  ;;  %6640 = vmatprep.subr.mxu1 %v5882_v61  ;;  %16583 = vst [vmem:[#allocation186_spill] sm:$0xff] %v13430_v10  ;;  %v5817_v29 = vsel %vm361_vm1, %v16579_v59, %v16584_v31  ;;  %v5826_v39 = vsel %vm361_vm1, %v16585_v17, %v16582_v45  ;;  %v16587_v43 = vld [vmem:[#allocation204_spill] sm:$0xff]  ;;  %v16593_v42 = vld [vmem:[#allocation213_spill] sm:$0xff] }
 0x93c   :  { %6533 = vmatprep.subr.mxu0 %v5164_v8  ;;  %6641 = vmatpush2.msra.mxu1 %v5881_v57  ;;  %v5878_v49 = vmul.f32 %v13159_v24, %v5819_v58  ;;  %v13445_v12 = vsel %vm161_vm5, %v16587_v43, %v16586_v27  ;;  %v16588_v61 = vld [vmem:[#allocation180_spill] sm:$0xff]  ;;  %v5877_v31 = vmul.f32 %v13100_v26, %v5827_v40 }
 0x93d   :  { %v13451_v59 = vsel %vm161_vm5, %v16588_v61, %v16587_v43  ;;  %6005 = vrot.lane.b32.xlu1 %v11889_v54, %s7911_s28  ;;  %6007 = vrot.lane.b32.xlu0 %v11946_v23, %s7911_s28  ;;  %v5869_v57 = vmul.f32 %v13100_v26, %v5825_v55  ;;  %v4910_v45 = vsel %vm161_vm5, %v13311_v11, %v13297_v13  ;;  %v16597_v23 = vld [vmem:[#allocation179_spill] sm:$0xff]  ;;  %v16599_v27 = vld [vmem:[#allocation72_spill] sm:$0xff] }
 0x93e   :  { %6534 = vmatpush2.msra.mxu0 %v5163_v6  ;;  %6642 = vmatprep.subr.mxu1 %v5878_v49  ;;  %v5874_v43 = vmul.f32 %v13159_v24, %v5818_v56  ;;  %v13464_v58 = vpop.permute.xlu0 %5375  ;;  %v5873_v40 = vmul.f32 %v13100_v26, %v5826_v39  ;;  %v4918_v8 = vsel %vm161_vm5, %v13344_v28, %v13311_v11  ;;  %v13473_v17 = vpop.permute.xlu1 %4427  ;;  %v16589_v6 = vld [vmem:[#allocation54_spill] sm:$0xff]  ;;  %v16590_v49 = vld [vmem:[#allocation133_spill] sm:$0xff] }
 0x93f   :  { %6535 = vmatprep.subr.mxu0 %v13300_v15  ;;  %6643 = vmatpush2.msra.mxu1 %v5877_v31  ;;  %v5870_v55 = vmul.f32 %v13159_v24, %v5817_v29  ;;  %v13479_v56 = vsel %vm161_vm5, %v16590_v49, %v16589_v6  ;;  %v16591_v26 = vld [vmem:[#allocation58_spill] sm:$0xff]  ;;  %v16594_v24 = vld [vmem:[#allocation161_spill] sm:$0xff]  ;;  %v4917_v54 = vsel %vm161_vm5, %v16596_v32, %v16593_v42 }
 0x940   :  { %v13485_v39 = vsel %vm161_vm5, %v16591_v26, %v16590_v49  ;;  %v16592_v11 = vld [vmem:[#allocation218_spill] sm:$0xff]  ;;  %6536 = vmatpush2.msra.mxu0 %v13303_v60  ;;  %6644 = vmatprep.subr.mxu1 %v5874_v43  ;;  %v16595_v31 = vld [vmem:[#allocation145_spill] sm:$0xff]  ;;  %v4970_v49 = vmul.f32 %v13170_v35, %v4910_v45  ;;  %v4969_v6 = vmul.f32 %v13149_v36, %v4918_v8 }
 0x941   :  { %v4909_v15 = vsel %vm161_vm5, %v16593_v42, %v16592_v11  ;;  %v4906_v29 = vsel %vm161_vm5, %v16595_v31, %v16594_v24  ;;  %6537 = vmatprep.subr.mxu0 %v13245_v0  ;;  %6645 = vmatpush2.msra.mxu1 %v5873_v40  ;;  %v4914_v60 = vsel %vm161_vm5, %v16597_v23, %v16595_v31  ;;  %v16598_v43 = vld [vmem:[#allocation69_spill] sm:$0xff]  ;;  %v16600_v0 = vld [vmem:[#allocation126_spill] sm:$0xff] }
 0x942   :  { %v4908_v61 = vsel %vm161_vm5, %v16599_v27, %v16598_v43  ;;  %6538 = vmatpush2.msra.mxu0 %v13238_v46  ;;  %6646 = vmatprep.subr.mxu1 %v5870_v55  ;;  %v13512_v42 = vpop.permute.xlu0 %5373  ;;  %v4916_v45 = vsel %vm161_vm5, %v16600_v0, %v16599_v27  ;;  %v5608_v40 = vsel %vm313_vm2, %v13359_v30, %v13387_v63  ;;  %v13523_v8 = vpop.permute.xlu1 %5081  ;;  %v16601_v46 = vld [vmem:[#allocation39_spill] sm:$0xff]  ;;  %v16602_v55 = vld [vmem:[#allocation36_spill] sm:$0xff] }
 0x943   :  { %6539 = vmatprep.subr.mxu0 %v4970_v49  ;;  %6647 = vmatpush2.msra.mxu1 %v5869_v57  ;;  %v4966_v31 = vmul.f32 %v13170_v35, %v4909_v15  ;;  %v4907_v26 = vsel %vm161_vm5, %v16602_v55, %v16601_v46  ;;  %v4965_v24 = vmul.f32 %v13149_v36, %v4917_v54  ;;  %v16603_v57 = vld [vmem:[#allocation185_spill] sm:$0xff]  ;;  %v16604_v49 = vld [vmem:[#allocation222_spill] sm:$0xff]  ;;  %v16605_v63 = vld [vmem:[#allocation215_spill] sm:$0xff] }
 0x944   :  { %v5616_v27 = vsel %vm313_vm2, %v13395_v19, %v13359_v30  ;;  %6540 = vmatpush2.msra.mxu0 %v4969_v6  ;;  %6648 = vmatprep.subr.mxu1 %v13332_v22  ;;  %v4915_v15 = vsel %vm161_vm5, %v16603_v57, %v16602_v55  ;;  %v5607_v23 = vsel %vm313_vm2, %v16605_v63, %v16604_v49  ;;  %v16606_v6 = vld [vmem:[#allocation217_spill] sm:$0xff]  ;;  %v16607_v49 = vld [vmem:[#allocation159_spill] sm:$0xff]  ;;  %v16612_v46 = vld [vmem:[#allocation122_spill] sm:$0xff] }
 0x945   :  { %6541 = vmatprep.subr.mxu0 %v4966_v31  ;;  %6649 = vmatpush2.msra.mxu1 %v13314_v38  ;;  %v4962_v54 = vmul.f32 %v13170_v35, %v4908_v61  ;;  %v4961_v30 = vmul.f32 %v13149_v36, %v4916_v45  ;;  %v5615_v22 = vsel %vm313_vm2, %v16606_v6, %v16605_v63  ;;  %v16608_v31 = vld [vmem:[#allocation44_spill] sm:$0xff]  ;;  %v16610_v6 = vld [vmem:[#allocation206_spill] sm:$0xff] }
 0x946   :  { %v5676_v19 = vmul.f32 %v13179_v7, %v5608_v40  ;;  %6542 = vmatpush2.msra.mxu0 %v4965_v24  ;;  %6650 = vmatprep.subr.mxu1 %v13259_v33  ;;  %v13552_v55 = vpop.permute.xlu0 %5371  ;;  %v5606_v38 = vsel %vm313_vm2, %v16608_v31, %v16607_v49  ;;  %v5675_v61 = vmul.f32 %v13119_v44, %v5616_v27  ;;  %v13561_v63 = vpop.permute.xlu1 %5079  ;;  %v16609_v33 = vld [vmem:[#allocation51_spill] sm:$0xff]  ;;  %v16611_v27 = vld [vmem:[#allocation201_spill] sm:$0xff] }
 0x947   :  { %6543 = vmatprep.subr.mxu0 %v4962_v54  ;;  %6651 = vmatpush2.msra.mxu1 %v13226_v1  ;;  %v4958_v45 = vmul.f32 %v13170_v35, %v4907_v26  ;;  %v4957_v24 = vmul.f32 %v13149_v36, %v4915_v15  ;;  %v5614_v40 = vsel %vm313_vm2, %v16609_v33, %v16608_v31  ;;  %v16613_v31 = vld [vmem:[#allocation191_spill] sm:$0xff] }
 0x948   :  { %6544 = vmatpush2.msra.mxu0 %v4961_v30  ;;  %6652 = vmatprep.subr.mxu1 %v5676_v19  ;;  %v5672_v49 = vmul.f32 %v13179_v7, %v5607_v23  ;;  %v5605_v1 = vsel %vm313_vm2, %v16611_v27, %v16610_v6  ;;  %v5671_v26 = vmul.f32 %v13119_v44, %v5615_v22  ;;  %v16614_v6 = vld [vmem:[#allocation35_spill] sm:$0xff] }
 0x949   :  { %6545 = vmatprep.subr.mxu0 %v4958_v45  ;;  %6653 = vmatpush2.msra.mxu1 %v5675_v61  ;;  %v4954_v15 = vmul.f32 %v13170_v35, %v4906_v29  ;;  %v4953_v54 = vmul.f32 %v13149_v36, %v4914_v60  ;;  %v5613_v19 = vsel %vm313_vm2, %v16612_v46, %v16611_v27  ;;  %v16617_v27 = vld [vmem:[#allocation104_spill] sm:$0xff]  ;;  %v16641_v33 = vld [vmem:[#allocation107_spill] sm:$0xff] }
 0x94a   :  { %6546 = vmatpush2.msra.mxu0 %v4957_v24  ;;  %6654 = vmatprep.subr.mxu1 %v5672_v49  ;;  %v5668_v23 = vmul.f32 %v13179_v7, %v5606_v38  ;;  %v4656_v30 = vpop.permute.xlu0 %4655  ;;  %v5604_v22 = vsel %vm313_vm2, %v16614_v6, %v16613_v31  ;;  %v5667_v61 = vmul.f32 %v13119_v44, %v5614_v40  ;;  %v13588_v60 = vpop.permute.xlu1 %5077  ;;  %v16615_v38 = vld [vmem:[#allocation59_spill] sm:$0xff] }
 0x94b   :  { %6547 = vmatprep.subr.mxu0 %v4954_v15  ;;  %6655 = vmatpush2.msra.mxu1 %v5671_v26  ;;  %v4950_v29 = vmul.f32 %v13170_v35, %v13479_v56  ;;  %v4949_v49 = vmul.f32 %v13149_v36, %v13485_v39  ;;  %v5612_v45 = vsel %vm313_vm2, %v16615_v38, %v16614_v6  ;;  %v16616_v40 = vld [vmem:[#allocation43_spill] sm:$0xff]  ;;  %v16618_v6 = vld [vmem:[#allocation53_spill] sm:$0xff] }
 0x94c   :  { %6548 = vmatpush2.msra.mxu0 %v4953_v54  ;;  %6656 = vmatprep.subr.mxu1 %v5668_v23  ;;  %v5664_v24 = vmul.f32 %v13179_v7, %v5605_v1  ;;  %v5603_v26 = vsel %vm313_vm2, %v16617_v27, %v16616_v40  ;;  %v5663_v56 = vmul.f32 %v13119_v44, %v5613_v19  ;;  %v16636_v38 = vld [vmem:[#allocation221_spill] sm:$0xff] }
 0x94d   :  { %6549 = vmatprep.subr.mxu0 %v4950_v29  ;;  %6657 = vmatpush2.msra.mxu1 %v5667_v61  ;;  %v4946_v39 = vmul.f32 %v13170_v35, %v13445_v12  ;;  %v4945_v15 = vmul.f32 %v13149_v36, %v13451_v59  ;;  %v5611_v1 = vsel %vm313_vm2, %v16618_v6, %v16617_v27  ;;  %v16619_v61 = vld [vmem:[#allocation199_spill] sm:$0xff]  ;;  %v16623_v27 = vld [vmem:[#allocation153_spill] sm:$0xff]  ;;  %v16628_v6 = vld [vmem:[#allocation12_spill] sm:$0xff] }
 0x94e   :  { %6550 = vmatpush2.msra.mxu0 %v4949_v49  ;;  %6658 = vmatprep.subr.mxu1 %v5664_v24  ;;  %v5660_v54 = vmul.f32 %v13179_v7, %v5604_v22  ;;  %v13611_v23 = vpop.permute.xlu0 %5369  ;;  %v4941_v19 = vmul.f32 %v13149_v36, %v13277_v62  ;;  %v16620_v29 = vld [vmem:[#allocation175_spill] sm:$0xff]  ;;  %v5659_v12 = vmul.f32 %v13119_v44, %v5612_v45  ;;  %v13620_v59 = vpop.permute.xlu1 %5075  ;;  %v16621_v49 = vld [vmem:[#allocation52_spill] sm:$0xff] }
 0x94f   :  { %v5602_v35 = vsel %vm313_vm2, %v16620_v29, %v16619_v61  ;;  %6551 = vmatprep.subr.mxu0 %v4946_v39  ;;  %6659 = vmatpush2.msra.mxu1 %v5663_v56  ;;  %v16622_v24 = vld [vmem:[#allocation176_spill] sm:$0xff]  ;;  %v5610_v36 = vsel %vm313_vm2, %v16623_v27, %v16620_v29  ;;  %v5656_v62 = vmul.f32 %v13179_v7, %v5603_v26  ;;  %v16624_v39 = vld [vmem:[#allocation11_spill] sm:$0xff] }
 0x950   :  { %v5601_v22 = vsel %vm313_vm2, %v16622_v24, %v16621_v49  ;;  %6552 = vmatpush2.msra.mxu0 %v4945_v15  ;;  %6660 = vmatprep.subr.mxu1 %v5660_v54  ;;  %v13631_v61 = vld [vmem:[#allocation5] sm:$0xff]  ;;  %v5655_v45 = vmul.f32 %v13119_v44, %v5611_v1  ;;  %v16625_v49 = vld [vmem:[#allocation226_spill] sm:$0xff]  ;;  %v4680_v26 = vsel %vm113_vm6, %v4656_v30, %v12859_v16  ;;  %v16627_v29 = vld [vmem:[#allocation227_spill] sm:$0xff] }
 0x951   :  { %v13637_v56 = vld [vmem:[%s15211_s1 + $0x20] sm:$0xf]  ;;  %6553 = vmatprep.subr.mxu0 %v13271_v2  ;;  %6661 = vmatpush2.msra.mxu1 %v5659_v12  ;;  %v13642_v40 = vrot.slane %v16625_v49, %v16624_v39  ;;  %v13647_v15 = vld [vmem:[#allocation5 + $0x30] sm:$0xff]  ;;  %v5652_v2 = vmul.f32 %v13179_v7, %v5602_v35  ;;  %v4688_v12 = vsel %vm113_vm6, %v16627_v29, %v4656_v30  ;;  %v13687_v29 = vld [vmem:[#allocation5 + $0x58] sm:$0xff] }
 0x952   :  { %v16626_v1 = vld [vmem:[#allocation30_spill] sm:$0xff]  ;;  %6554 = vmatpush2.msra.mxu0 %v4941_v19  ;;  %6662 = vmatprep.subr.mxu1 %v5656_v62  ;;  %v5988_v27 = vpop.permute.xlu0 %5987  ;;  %v13659_v31 = vrot.slane %v16625_v49, %v16628_v6  ;;  %v5651_v16 = vmul.f32 %v13119_v44, %v5610_v36  ;;  %v13664_v19 = vpop.permute.xlu1 %6003  ;;  %v13668_v35 = vrot.slane %v13637_v56, %v16475_v3  ;;  %v13672_v49 = vld [vmem:[#allocation5 + $0x28] sm:$0xff] }
 0x953   :  { %v5609_v54 = vsel %vm313_vm2, %v16626_v1, %v16622_v24  ;;  %6556 = vmatmul.mubr.f32.vlgmr.msra.gmra.mxu0 %v13631_v61  ;;  %6663 = vmatpush2.msra.mxu1 %v5655_v45  ;;  %v5648_v24 = vmul.f32 %v13179_v7, %v5601_v22  ;;  %v4758_v30 = vmul.f32 %v13642_v40, %v4680_v26  ;;  %v16630_v7 = vld [vmem:[#allocation219_spill] sm:$0xff]  ;;  %v6141_v45 = vld [vmem:[#allocation5 + $0x10] sm:$0xff] }
 0x954   :  { %6664 = vmatprep.subr.mxu1 %v5652_v2  ;;  %6561 = vmatprep.mubr.f32.mxu0 %v13647_v15  ;;  %16629 = vst [vmem:[#allocation25_spill] sm:$0xff] %v13672_v49  ;;  %v6036_v36 = vsel %vm409_vm0, %v5988_v27, %v13664_v19  ;;  %v5647_v62 = vmul.f32 %v13119_v44, %v5609_v54  ;;  %v16631_v26 = vld [vmem:[#allocation130_spill] sm:$0xff]  ;;  %16632 = vst [vmem:[#allocation106_spill] sm:$0xff] %v13687_v29 }
 0x955   :  { %v4679_v22 = vsel %vm113_vm6, %v16630_v7, %v12740_v5  ;;  %v4757_v3 = vmul.f32 %v13659_v31, %v4688_v12  ;;  %6665 = vmatpush2.msra.mxu1 %v5651_v16  ;;  %v4687_v2 = vsel %vm113_vm6, %v16631_v26, %v16630_v7  ;;  %v6104_v1 = vmul.f32 %v13668_v35, %v6036_v36  ;;  %v16633_v5 = vld [vmem:[#allocation127_spill] sm:$0xff]  ;;  %v16634_v36 = vld [vmem:[#allocation193_spill] sm:$0xff] }
 0x956   :  { %6666 = vmatprep.subr.mxu1 %v5648_v24  ;;  %v13690_v44 = vpop.permute.xlu0 %5971  ;;  %v13694_v54 = vrot.slane %v13637_v56, %v16477_v52  ;;  %v4678_v12 = vsel %vm113_vm6, %v16633_v5, %v12628_v4  ;;  %v13701_v16 = vpop.permute.xlu1 %4441  ;;  %v4677_v52 = vsel %vm113_vm6, %v16634_v36, %v12512_v9  ;;  %v4686_v7 = vsel %vm113_vm6, %v12620_v48, %v16633_v5  ;;  %v13723_v9 = vld [vmem:[#allocation5 + $0x80] sm:$0xff] }
 0x957   :  { %6562 = vmatmul.mubr.f32.gmra.mxu0 %v13672_v49  ;;  %6667 = vmatpush2.msra.mxu1 %v5647_v62  ;;  %v6044_v24 = vsel %vm409_vm0, %v13690_v44, %v5988_v27  ;;  %v4754_v4 = vmul.f32 %v13642_v40, %v4679_v22  ;;  %v13715_v62 = vld [vmem:[#allocation5 + $0x50] sm:$0xff]  ;;  %v4753_v26 = vmul.f32 %v13659_v31, %v4687_v2  ;;  %v16637_v27 = vld [vmem:[#allocation224_spill] sm:$0xff] }
 0x958   :  { %6830 = vmatprep.subr.mxu1 %v4758_v30  ;;  %6669 = vmatmul.mubr.f32.vlgmr.msra.gmra.mxu1 %v6141_v45  ;;  %16635 = vst [vmem:[#allocation99_spill] sm:$0xff] %v13715_v62  ;;  %v6035_v46 = vsel %vm409_vm0, %v16637_v27, %v16636_v38  ;;  %16638 = vst [vmem:[#allocation148_spill] sm:$0xff] %v13723_v9  ;;  %v6103_v48 = vmul.f32 %v13694_v54, %v6044_v24  ;;  %v16639_v30 = vld [vmem:[#allocation94_spill] sm:$0xff]  ;;  %v16640_v5 = vld [vmem:[#allocation128_spill] sm:$0xff] }
 0x959   :  { %6831 = vmatpush1.msra.mxu1 %v4757_v3  ;;  %6567 = vmatprep.mubr.f32.mxu0 %v13687_v29  ;;  %v4685_v22 = vsel %vm113_vm6, %v16639_v30, %v16634_v36  ;;  %v4750_v45 = vmul.f32 %v13642_v40, %v4678_v12  ;;  %v4676_v3 = vsel %vm113_vm6, %v16640_v5, %v12380_v18 }
 0x95a   :  { %6832 = vmatprep.subr.mxu1 %v4754_v4  ;;  %6733 = vmatprep.subr.mxu0 %v6104_v1  ;;  %v13731_v2 = vpop.permute.xlu0 %5367  ;;  %v4684_v24 = vsel %vm113_vm6, %v16641_v33, %v16640_v5  ;;  %v4749_v29 = vmul.f32 %v13659_v31, %v4686_v7  ;;  %v13743_v36 = vpop.permute.xlu1 %5073  ;;  %v16642_v1 = vld [vmem:[#allocation225_spill] sm:$0xff]  ;;  %v4746_v18 = vmul.f32 %v13642_v40, %v4677_v52  ;;  %v13751_v4 = vld [vmem:[#allocation5 + $0x78] sm:$0xff]  ;;  %v16645_v5 = vld [vmem:[#allocation178_spill] sm:$0xff] }
 0x95b   :  { %6568 = vmatmul.mubr.f32.gmra.mxu0 %v13715_v62  ;;  %6833 = vmatpush1.msra.mxu1 %v4753_v26  ;;  %v6043_v12 = vsel %vm409_vm0, %v16642_v1, %v16637_v27  ;;  %16643 = vst [vmem:[#allocation188_spill] sm:$0xff] %v13751_v4  ;;  %v6100_v33 = vmul.f32 %v13668_v35, %v6035_v46  ;;  %v16644_v7 = vld [vmem:[#allocation85_spill] sm:$0xff]  ;;  %v16646_v62 = vld [vmem:[#allocation108_spill] sm:$0xff] }
 0x95c   :  { %6834 = vmatprep.subr.mxu1 %v4750_v45  ;;  %6573 = vmatprep.mubr.f32.mxu0 %v13723_v9  ;;  %v4675_v26 = vsel %vm113_vm6, %v16644_v7, %v12288_v20  ;;  %v4745_v30 = vmul.f32 %v13659_v31, %v4685_v22  ;;  %v6034_v27 = vsel %vm409_vm0, %v16646_v62, %v16645_v5  ;;  %v13763_v45 = vld [vmem:[#allocation5 + $0xa8] sm:$0xff]  ;;  %v16648_v52 = vld [vmem:[#allocation152_spill] sm:$0xff] }
 0x95d   :  { %6835 = vmatpush1.msra.mxu1 %v4749_v29  ;;  %16647 = vst [vmem:[#allocation137_spill] sm:$0xff] %v13763_v45  ;;  %6734 = vmatpush1.msra.mxu0 %v6103_v48  ;;  %v4674_v46 = vsel %vm113_vm6, %v16648_v52, %v12164_v50  ;;  %v4683_v20 = vsel %vm113_vm6, %v12280_v53, %v16644_v7  ;;  %v16649_v29 = vld [vmem:[#allocation131_spill] sm:$0xff]  ;;  %v16650_v53 = vld [vmem:[#allocation112_spill] sm:$0xff]  ;;  %v16653_v7 = vld [vmem:[#allocation150_spill] sm:$0xff] }
 0x95e   :  { %6836 = vmatprep.subr.mxu1 %v4746_v18  ;;  %v4742_v22 = vmul.f32 %v13642_v40, %v4676_v3  ;;  %6735 = vmatprep.subr.mxu0 %v6100_v33  ;;  %v13774_v9 = vpop.permute.xlu0 %5365  ;;  %v4682_v48 = vsel %vm113_vm6, %v16649_v29, %v16648_v52  ;;  %v4741_v5 = vmul.f32 %v13659_v31, %v4684_v24  ;;  %v13783_v49 = vpop.permute.xlu1 %5071  ;;  %v13791_v33 = vld [vmem:[#allocation5 + $0xa0] sm:$0xff]  ;;  %v13799_v29 = vld [vmem:[#allocation5 + $0xd0] sm:$0xff] }
 0x95f   :  { %v6099_v50 = vmul.f32 %v13694_v54, %v6043_v12  ;;  %6574 = vmatmul.mubr.f32.gmra.mxu0 %v13751_v4  ;;  %6837 = vmatpush1.msra.mxu1 %v4745_v30  ;;  %v6042_v3 = vsel %vm409_vm0, %v16650_v53, %v16646_v62  ;;  %v4738_v18 = vmul.f32 %v13642_v40, %v4675_v26  ;;  %v16652_v12 = vld [vmem:[#allocation121_spill] sm:$0xff]  ;;  %v16655_v62 = vld [vmem:[#allocation151_spill] sm:$0xff]  ;;  %v16657_v4 = vld [vmem:[#allocation164_spill] sm:$0xff] }
 0x960   :  { %6838 = vmatprep.subr.mxu1 %v4742_v22  ;;  %6579 = vmatprep.mubr.f32.mxu0 %v13763_v45  ;;  %16651 = vst [vmem:[#allocation88_spill] sm:$0xff] %v13791_v33  ;;  %v6096_v24 = vmul.f32 %v13668_v35, %v6034_v27  ;;  %v4673_v30 = vsel %vm113_vm6, %v16653_v7, %v16652_v12  ;;  %16654 = vst [vmem:[#allocation76_spill] sm:$0xff] %v13799_v29  ;;  %v16656_v12 = vld [vmem:[#allocation63_spill] sm:$0xff] }
 0x961   :  { %v4737_v52 = vmul.f32 %v13659_v31, %v4683_v20  ;;  %6839 = vmatpush1.msra.mxu1 %v4741_v5  ;;  %6736 = vmatpush1.msra.mxu0 %v6099_v50  ;;  %v4681_v26 = vsel %vm113_vm6, %v16655_v62, %v16653_v7  ;;  %v4733_v22 = vmul.f32 %v13659_v31, %v4682_v48  ;;  %v6147_v48 = vld [vmem:[#allocation5 + $0x40] sm:$0xff]  ;;  %v13833_v7 = vld [vmem:[#allocation5 + $0xc8] sm:$0xff] }
 0x962   :  { %6840 = vmatprep.subr.mxu1 %v4738_v18  ;;  %v4734_v27 = vmul.f32 %v13642_v40, %v4674_v46  ;;  %6737 = vmatprep.subr.mxu0 %v6096_v24  ;;  %v13807_v45 = vpop.permute.xlu0 %5363  ;;  %v6033_v5 = vsel %vm409_vm0, %v16657_v4, %v16656_v12  ;;  %v6095_v20 = vmul.f32 %v13694_v54, %v6042_v3  ;;  %v13819_v46 = vpop.permute.xlu1 %5069  ;;  %v7876_v18 = vld [vmem:[%s15211_s1] sm:$0xf] }
 0x963   :  { %v4466_v50 = vsel %vm66_vm7, %v13701_v16, %v13041_v47  ;;  %6580 = vmatmul.mubr.f32.gmra.mxu0 %v13791_v33  ;;  %6841 = vmatpush1.msra.mxu1 %v4737_v52  ;;  %v13825_v24 = vrot.slane %v7876_v18, %v16624_v39  ;;  %v4474_v3 = vsel %vm66_vm7, %v13006_v41, %v13701_v16  ;;  %v16659_v33 = vld [vmem:[#allocation147_spill] sm:$0xff] }
 0x964   :  { %6842 = vmatprep.subr.mxu1 %v4734_v27  ;;  %6585 = vmatprep.mubr.f32.mxu0 %v13799_v29  ;;  %v4730_v47 = vmul.f32 %v13642_v40, %v4673_v30  ;;  %16658 = vst [vmem:[#allocation195_spill] sm:$0xff] %v13833_v7  ;;  %v4729_v52 = vmul.f32 %v13659_v31, %v4681_v26  ;;  %v16660_v41 = vld [vmem:[#allocation223_spill] sm:$0xff]  ;;  %v16662_v27 = vld [vmem:[#allocation48_spill] sm:$0xff] }
 0x965   :  { %v13837_v62 = vrot.slane %v7876_v18, %v16628_v6  ;;  %v6041_v12 = vsel %vm409_vm0, %v16659_v33, %v16657_v4  ;;  %6843 = vmatpush1.msra.mxu1 %v4733_v22  ;;  %6738 = vmatpush1.msra.mxu0 %v6095_v20  ;;  %v4465_v16 = vsel %vm66_vm7, %v16660_v41, %v16494_v21  ;;  %v13849_v30 = vld [vmem:[#allocation5 + $0xf8] sm:$0xff]  ;;  %v16663_v18 = vld [vmem:[#allocation170_spill] sm:$0xff] }
 0x966   :  { %v4544_v40 = vmul.f32 %v13825_v24, %v4466_v50  ;;  %6844 = vmatprep.subr.mxu1 %v4730_v47  ;;  %6674 = vmatprep.mubr.f32.mxu1 %v6147_v48  ;;  %v6092_v31 = vmul.f32 %v13668_v35, %v6033_v5  ;;  %16661 = vst [vmem:[#allocation208_spill] sm:$0xff] %v13849_v30  ;;  %v13851_v26 = vpop.permute.xlu0 %5377  ;;  %v13863_v5 = vld [vmem:[#allocation5 + $0x38] sm:$0xff]  ;;  %v13865_v20 = vpop.permute.xlu1 %5083  ;;  %v16665_v50 = vld [vmem:[#allocation33_spill] sm:$0xff] }
 0x967   :  { %v6032_v4 = vsel %vm409_vm0, %v16663_v18, %v16662_v27  ;;  %v4473_v21 = vsel %vm66_vm7, %v16487_v51, %v16660_v41  ;;  %v4543_v22 = vmul.f32 %v13837_v62, %v4474_v3  ;;  %6586 = vmatmul.mubr.f32.gmra.mxu0 %v13833_v7  ;;  %6845 = vmatpush1.msra.mxu1 %v4729_v52  ;;  %v16666_v29 = vld [vmem:[#allocation83_spill] sm:$0xff]  ;;  %v13876_v3 = vld [vmem:[#allocation5 + $0xf0] sm:$0xff]  ;;  %v16668_v52 = vld [vmem:[#allocation228_spill] sm:$0xff] }
 0x968   :  { %16664 = vst [vmem:[#allocation82_spill] sm:$0xff] %v13863_v5  ;;  %v6040_v48 = vsel %vm409_vm0, %v16665_v50, %v16663_v18  ;;  %v6091_v47 = vmul.f32 %v13694_v54, %v6041_v12  ;;  %v4464_v51 = vsel %vm66_vm7, %v16666_v29, %v16498_v34  ;;  %6846 = vmatprep.subr.mxu1 %v4544_v40  ;;  %16667 = vst [vmem:[#allocation98_spill] sm:$0xff] %v13876_v3  ;;  %v16669_v41 = vld [vmem:[#allocation229_spill] sm:$0xff]  ;;  %v16679_v33 = vld [vmem:[#allocation111_spill] sm:$0xff] }
 0x969   :  { %6739 = vmatprep.subr.mxu0 %v6092_v31  ;;  %v6031_v7 = vsel %vm409_vm0, %v16669_v41, %v16668_v52  ;;  %6847 = vmatpush1.msra.mxu1 %v4543_v22  ;;  %v4540_v18 = vmul.f32 %v13825_v24, %v4465_v16  ;;  %v16670_v12 = vld [vmem:[#allocation177_spill] sm:$0xff]  ;;  %v4539_v34 = vmul.f32 %v13837_v62, %v4473_v21  ;;  %v16676_v52 = vld [vmem:[#allocation167_spill] sm:$0xff] }
 0x96a   :  { %6591 = vmatprep.mubr.f32.mxu0 %v13849_v30  ;;  %v4472_v27 = vsel %vm66_vm7, %v16670_v12, %v16666_v29  ;;  %6675 = vmatmul.mubr.f32.gmra.mxu1 %v13863_v5  ;;  %v6088_v40 = vmul.f32 %v13668_v35, %v6032_v4  ;;  %v13891_v31 = vpop.permute.xlu0 %4865  ;;  %v6087_v22 = vmul.f32 %v13694_v54, %v6040_v48  ;;  %v16671_v30 = vld [vmem:[#allocation231_spill] sm:$0xff]  ;;  %v13900_v21 = vld [vmem:[#allocation5 + $0x68] sm:$0xff]  ;;  %v13902_v12 = vpop.permute.xlu1 %4867  ;;  %v16674_v4 = vld [vmem:[#allocation40_spill] sm:$0xff] }
 0x96b   :  { %6740 = vmatpush1.msra.mxu0 %v6091_v47  ;;  %v6039_v16 = vsel %vm409_vm0, %v16671_v30, %v16669_v41  ;;  %6848 = vmatprep.subr.mxu1 %v4540_v18  ;;  %v4536_v29 = vmul.f32 %v13825_v24, %v4464_v51  ;;  %16672 = vst [vmem:[#allocation71_spill] sm:$0xff] %v13900_v21  ;;  %v16673_v47 = vld [vmem:[#allocation194_spill] sm:$0xff]  ;;  %v16675_v48 = vld [vmem:[#allocation143_spill] sm:$0xff]  ;;  %v13913_v18 = vld [vmem:[#allocation5 + $0x120] sm:$0xff] }
 0x96c   :  { %6592 = vmatmul.mubr.f32.gmra.mxu0 %v13876_v3  ;;  %v4470_v5 = vsel %vm66_vm7, %v16674_v4, %v16673_v47  ;;  %v4463_v50 = vsel %vm66_vm7, %v16676_v52, %v16675_v48  ;;  %6741 = vmatprep.subr.mxu0 %v6088_v40  ;;  %v6084_v41 = vmul.f32 %v13668_v35, %v6031_v7  ;;  %v16678_v51 = vld [vmem:[#allocation66_spill] sm:$0xff]  ;;  %v16680_v4 = vld [vmem:[#allocation232_spill] sm:$0xff] }
 0x96d   :  { %6849 = vmatpush1.msra.mxu1 %v4539_v34  ;;  %16677 = vst [vmem:[#allocation96_spill] sm:$0xff] %v13913_v18  ;;  %v4471_v3 = vsel %vm66_vm7, %v16678_v51, %v16676_v52  ;;  %v4535_v30 = vmul.f32 %v13837_v62, %v4472_v27  ;;  %v6030_v53 = vsel %vm409_vm0, %v16680_v4, %v16679_v33  ;;  %v13924_v40 = vld [vmem:[#allocation5 + $0x60] sm:$0xff]  ;;  %v16682_v34 = vld [vmem:[#allocation95_spill] sm:$0xff] }
 0x96e   :  { %6742 = vmatpush1.msra.mxu0 %v6087_v22  ;;  %6850 = vmatprep.subr.mxu1 %v4536_v29  ;;  %16681 = vst [vmem:[#allocation181_spill] sm:$0xff] %v13924_v40  ;;  %v4462_v7 = vsel %vm66_vm7, %v16673_v47, %v16682_v34  ;;  %v6083_v48 = vmul.f32 %v13694_v54, %v6039_v16  ;;  %v16683_v52 = vld [vmem:[#allocation163_spill] sm:$0xff]  ;;  %v13938_v22 = vpop.permute.xlu0 %4861 }
 0x96f   :  { %v6038_v27 = vsel %vm409_vm0, %v16683_v52, %v16680_v4  ;;  %6680 = vmatprep.mubr.f32.mxu1 %v13900_v21  ;;  %6743 = vmatprep.subr.mxu0 %v6084_v41  ;;  %v13936_v51 = vld [vmem:[#allocation5 + $0x118] sm:$0xff]  ;;  %v4527_v29 = vmul.f32 %v13837_v62, %v4470_v5  ;;  %v4532_v16 = vmul.f32 %v13825_v24, %v4463_v50  ;;  %v13947_v4 = vpop.permute.xlu1 %4863  ;;  %v16686_v21 = vld [vmem:[#allocation8_spill] sm:$0xff]  ;;  %v16813_v37 = vld [vmem:[#allocation82_spill] sm:$0xff] }
 0x970   :  { %16684 = vst [vmem:[#allocation118_spill] sm:$0xff] %v13936_v51  ;;  %v16685_v33 = vld [vmem:[#allocation119_spill] sm:$0xff]  ;;  %6851 = vmatpush1.msra.mxu1 %v4535_v30  ;;  %6597 = vmatprep.mubr.f32.mxu0 %v13913_v18  ;;  %v4531_v41 = vmul.f32 %v13837_v62, %v4471_v3  ;;  %v6080_v5 = vmul.f32 %v13668_v35, %v6030_v53  ;;  %v16689_v18 = vld [vmem:[#allocation230_spill] sm:$0xff] }
 0x971   :  { %v6029_v47 = vsel %vm409_vm0, %v16685_v33, %v13430_v10  ;;  %v6037_v34 = vsel %vm409_vm0, %v13419_v14, %v16685_v33  ;;  %6681 = vmatmul.mubr.f32.gmra.mxu1 %v13924_v40  ;;  %6744 = vmatpush1.msra.mxu0 %v6083_v48  ;;  %v6079_v30 = vmul.f32 %v13694_v54, %v6038_v27  ;;  %v13963_v10 = vld [vmem:[#allocation5 + $0x90] sm:$0xff]  ;;  %v16688_v33 = vld [vmem:[#allocation184_spill] sm:$0xff]  ;;  %v16694_v14 = vld [vmem:[#allocation109_spill] sm:$0xff] }
 0x972   :  { %6852 = vmatprep.subr.mxu1 %v4532_v16  ;;  %6598 = vmatmul.mubr.f32.gmra.mxu0 %v13936_v51  ;;  %v4528_v50 = vmul.f32 %v13825_v24, %v4462_v7  ;;  %v5410_v3 = vsel %vm265_vm3, %v13851_v26, %v16686_v21  ;;  %16687 = vst [vmem:[#allocation198_spill] sm:$0xff] %v13963_v10  ;;  %v7877_v27 = vld [vmem:[%s15211_s1 + $0x14] sm:$0xf]  ;;  %v13976_v16 = vpop.permute.xlu0 %4857  ;;  %v16690_v21 = vld [vmem:[#allocation129_spill] sm:$0xff] }
 0x973   :  { %v4461_v48 = vsel %vm66_vm7, %v16689_v18, %v16688_v33  ;;  %v6076_v53 = vmul.f32 %v13668_v35, %v6029_v47  ;;  %v13974_v7 = vrot.slane %v7877_v27, %v16624_v39  ;;  %6745 = vmatprep.subr.mxu0 %v6080_v5  ;;  %6853 = vmatpush1.msra.mxu1 %v4531_v41  ;;  %v16691_v35 = vld [vmem:[#allocation10_spill] sm:$0xff]  ;;  %v13987_v51 = vld [vmem:[#allocation5 + $0x88] sm:$0xff]  ;;  %v13989_v5 = vpop.permute.xlu1 %4859  ;;  %v16693_v41 = vld [vmem:[#allocation123_spill] sm:$0xff] }
 0x974   :  { %v4469_v40 = vsel %vm66_vm7, %v16690_v21, %v16689_v18  ;;  %v6075_v33 = vmul.f32 %v13694_v54, %v6037_v34  ;;  %6746 = vmatpush1.msra.mxu0 %v6079_v30  ;;  %6854 = vmatprep.subr.mxu1 %v4528_v50  ;;  %v5386_v47 = vsel %vm265_vm3, %v16691_v35, %v13851_v26  ;;  %v14000_v34 = vld [vmem:[#allocation5 + $0x20] sm:$0xff]  ;;  %v16696_v26 = vld [vmem:[#allocation50_spill] sm:$0xff] }
 0x975   :  { %16692 = vst [vmem:[#allocation115_spill] sm:$0xff] %v13987_v51  ;;  %v4460_v52 = vsel %vm66_vm7, %v16694_v14, %v16693_v41  ;;  %v13996_v18 = vrot.slane %v7877_v27, %v16628_v6  ;;  %v5464_v54 = vmul.f32 %v13974_v7, %v5410_v3  ;;  %6686 = vmatprep.mubr.f32.mxu1 %v13963_v10  ;;  %16695 = vst [vmem:[#allocation41_spill] sm:$0xff] %v14000_v34  ;;  %v16697_v3 = vmov 0.0   ;;  %v16698_v10 = vld [vmem:[#allocation166_spill] sm:$0xff] }
 0x976   :  { %6747 = vmatprep.subr.mxu0 %v6076_v53  ;;  %v4468_v30 = vsel %vm66_vm7, %v16696_v26, %v16694_v14  ;;  %6855 = vmatpush1.msra.mxu1 %v4527_v29  ;;  %v4524_v50 = vmul.f32 %v13825_v24, %v4461_v48  ;;  %v4523_v21 = vmul.f32 %v13837_v62, %v4469_v40  ;;  %v14011_v53 = vld [vmem:[#allocation5 + $0xb8] sm:$0xff]  ;;  %v14013_v35 = vpop.permute.xlu0 %5801  ;;  %v16699_v29 = vld [vmem:[#allocation190_spill] sm:$0xff] }
 0x977   :  { %6748 = vmatpush1.msra.mxu0 %v6075_v33  ;;  %v5463_v27 = vmul.f32 %v13996_v18, %v5386_v47  ;;  %6687 = vmatmul.mubr.f32.gmra.mxu1 %v13987_v51  ;;  %v4520_v41 = vmul.f32 %v13825_v24, %v4460_v52  ;;  %v4459_v14 = vsel %vm66_vm7, %v13473_v17, %v16698_v10  ;;  %v14026_v48 = vpop.permute.xlu1 %4855  ;;  %v16700_v52 = vld [vmem:[#allocation171_spill] sm:$0xff]  ;;  %v14033_v10 = vld [vmem:[#allocation5 + $0xb0] sm:$0xff] }
 0x978   :  { %6781 = vmatprep.mubr.f32.mxu0 %v16697_v3  ;;  %v5409_v40 = vsel %vm265_vm3, %v13464_v58, %v16699_v29  ;;  %6856 = vmatprep.subr.mxu1 %v4524_v50  ;;  %v4519_v33 = vmul.f32 %v13837_v62, %v4468_v30  ;;  %v4467_v47 = vsel %vm66_vm7, %v16700_v52, %v13473_v17  ;;  %v16702_v26 = vld [vmem:[#allocation142_spill] sm:$0xff]  ;;  %v7878_v29 = vld [vmem:[%s15211_s1 + $0xc] sm:$0xf]  ;;  %v16703_v51 = vld [vmem:[#allocation187_spill] sm:$0xff] }
 0x979   :  { %7764 = vmatmul.mubr.msk.f32.vlgmr.msra.gmra.mxu0 %vm3252_vm9, %v14000_v34  ;;  %6857 = vmatpush1.msra.mxu1 %v4523_v21  ;;  %16701 = vst [vmem:[#allocation116_spill] sm:$0xff] %v14033_v10  ;;  %v5385_v50 = vsel %vm265_vm3, %v16702_v26, %v13464_v58  ;;  %v14043_v30 = vrot.slane %v7878_v29, %v16624_v39  ;;  %v16704_v58 = vld [vmem:[#allocation78_spill] sm:$0xff]  ;;  %v14056_v26 = vld [vmem:[#allocation5 + $0x48] sm:$0xff] }
 0x97a   :  { %6943 = vmatprep.subr.mxu0 %v5464_v54  ;;  %v5108_v17 = vsel %vm209_vm4, %v13865_v20, %v16703_v51  ;;  %6858 = vmatprep.subr.mxu1 %v4520_v41  ;;  %v4516_v54 = vmul.f32 %v13825_v24, %v4459_v14  ;;  %v5460_v21 = vmul.f32 %v13974_v7, %v5409_v40  ;;  %v14058_v34 = vpop.permute.xlu0 %4869  ;;  %v16705_v41 = vld [vmem:[#allocation172_spill] sm:$0xff]  ;;  %v16706_v14 = vld [vmem:[#allocation9_spill] sm:$0xff] }
 0x97b   :  { %6692 = vmatprep.mubr.f32.mxu1 %v14011_v53  ;;  %v5408_v52 = vsel %vm265_vm3, %v13512_v42, %v16704_v58  ;;  %6859 = vmatpush1.msra.mxu1 %v4519_v33  ;;  %v4515_v51 = vmul.f32 %v13837_v62, %v4467_v47  ;;  %v5384_v24 = vsel %vm265_vm3, %v16705_v41, %v13512_v42  ;;  %v14076_v47 = vld [vmem:[#allocation5 + $0xe0] sm:$0xff]  ;;  %v14078_v42 = vpop.permute.xlu1 %5803  ;;  %v16707_v58 = vld [vmem:[#allocation214_spill] sm:$0xff] }
 0x97c   :  { %6944 = vmatpush1.msra.mxu0 %v5463_v27  ;;  %v5116_v40 = vsel %vm209_vm4, %v16706_v14, %v13865_v20  ;;  %6693 = vmatmul.mubr.f32.gmra.mxu1 %v14033_v10  ;;  %v5459_v27 = vmul.f32 %v13996_v18, %v5385_v50  ;;  %v14073_v33 = vrot.slane %v7878_v29, %v16628_v6  ;;  %v16708_v14 = vld [vmem:[#allocation80_spill] sm:$0xff]  ;;  %v16712_v10 = vld [vmem:[#allocation149_spill] sm:$0xff] }
 0x97d   :  { %6787 = vmatprep.mubr.f32.mxu0 %v16697_v3  ;;  %v5186_v62 = vmul.f32 %v14043_v30, %v5108_v17  ;;  %6860 = vmatprep.subr.mxu1 %v4516_v54  ;;  %v5107_v20 = vsel %vm209_vm4, %v13523_v8, %v16707_v58  ;;  %v5456_v41 = vmul.f32 %v13974_v7, %v5408_v52  ;;  %v16709_v29 = vld [vmem:[#allocation212_spill] sm:$0xff]  ;;  %v14097_v52 = vld [vmem:[#allocation5 + $0xd8] sm:$0xff] }
 0x97e   :  { %6945 = vmatprep.subr.mxu0 %v5460_v21  ;;  %v5407_v50 = vsel %vm265_vm3, %v13552_v55, %v16708_v14  ;;  %7765 = vmatmul.mubr.msk.f32.gmra.mxu0 %vm3252_vm9, %v14056_v26  ;;  %v5115_v17 = vsel %vm209_vm4, %v16709_v29, %v13523_v8  ;;  %v5455_v54 = vmul.f32 %v13996_v18, %v5384_v24  ;;  %v14099_v58 = vpop.permute.xlu0 %5797  ;;  %v16711_v14 = vld [vmem:[#allocation97_spill] sm:$0xff]  ;;  %v14116_v29 = vld [vmem:[#allocation5 + $0x70] sm:$0xff] }
 0x97f   :  { %6861 = vmatpush1.msra.mxu1 %v4515_v51  ;;  %v5185_v21 = vmul.f32 %v14073_v33, %v5116_v40  ;;  %6946 = vmatpush1.msra.mxu0 %v5459_v27  ;;  %16710 = vst [vmem:[#allocation90_spill] sm:$0xff] %v14097_v52  ;;  %v5106_v51 = vsel %vm209_vm4, %v13561_v63, %v16711_v14  ;;  %v16713_v27 = vld [vmem:[#allocation31_spill] sm:$0xff] }
 0x980   :  { %6862 = vmatprep.subr.mxu1 %v5186_v62  ;;  %v5383_v8 = vsel %vm265_vm3, %v16712_v10, %v13552_v55  ;;  %6947 = vmatprep.subr.mxu0 %v5456_v41  ;;  %v5182_v24 = vmul.f32 %v14043_v30, %v5107_v20  ;;  %v5452_v40 = vmul.f32 %v13974_v7, %v5407_v50  ;;  %v16714_v55 = vld [vmem:[#allocation89_spill] sm:$0xff] }
 0x981   :  { %6698 = vmatprep.mubr.f32.mxu1 %v14076_v47  ;;  %v5406_v62 = vsel %vm265_vm3, %v13611_v23, %v16713_v27  ;;  %6863 = vmatpush2.msra.mxu1 %v5185_v21  ;;  %v5181_v14 = vmul.f32 %v14073_v33, %v5115_v17  ;;  %v5114_v10 = vsel %vm209_vm4, %v16714_v55, %v13561_v63  ;;  %v16715_v20 = vld [vmem:[#allocation65_spill] sm:$0xff]  ;;  %v14133_v21 = vpop.permute.xlu1 %5799  ;;  %v16716_v27 = vld [vmem:[#allocation202_spill] sm:$0xff] }
 0x982   :  { %6948 = vmatpush1.msra.mxu0 %v5455_v54  ;;  %v5382_v41 = vsel %vm265_vm3, %v16715_v20, %v13611_v23  ;;  %6699 = vmatmul.mubr.f32.gmra.mxu1 %v14097_v52  ;;  %v5178_v50 = vmul.f32 %v14043_v30, %v5106_v51  ;;  %v5451_v54 = vmul.f32 %v13996_v18, %v5383_v8  ;;  %v14131_v17 = vld [vmem:[#allocation5 + $0x108] sm:$0xff]  ;;  %v14135_v63 = vpop.permute.xlu0 %5793  ;;  %v16717_v20 = vld [vmem:[#allocation124_spill] sm:$0xff]  ;;  %v16720_v52 = vld [vmem:[#allocation154_spill] sm:$0xff] }
 0x983   :  { %6793 = vmatprep.mubr.f32.mxu0 %v16697_v3  ;;  %6864 = vmatprep.subr.mxu1 %v5182_v24  ;;  %v5105_v23 = vsel %vm209_vm4, %v13588_v60, %v16716_v27  ;;  %v5448_v55 = vmul.f32 %v13974_v7, %v5406_v62  ;;  %v5405_v51 = vsel %vm265_vm3, %v13731_v2, %v16717_v20  ;;  %v16718_v24 = vld [vmem:[#allocation45_spill] sm:$0xff]  ;;  %v14154_v62 = vld [vmem:[#allocation5 + $0x100] sm:$0xff] }
 0x984   :  { %6949 = vmatprep.subr.mxu0 %v5452_v40  ;;  %7766 = vmatmul.mubr.msk.f32.gmra.mxu0 %vm3252_vm9, %v14116_v29  ;;  %v5177_v8 = vmul.f32 %v14073_v33, %v5114_v10  ;;  %v5113_v40 = vsel %vm209_vm4, %v16718_v24, %v13588_v60  ;;  %v5447_v27 = vmul.f32 %v13996_v18, %v5382_v41 }
 0x985   :  { %6865 = vmatpush2.msra.mxu1 %v5181_v14  ;;  %6950 = vmatpush1.msra.mxu0 %v5451_v54  ;;  %v5104_v20 = vsel %vm209_vm4, %v13620_v59, %v16568_v25  ;;  %v16719_v14 = vld [vmem:[#allocation67_spill] sm:$0xff]  ;;  %v5381_v60 = vsel %vm265_vm3, %v16720_v52, %v13731_v2  ;;  %v5174_v41 = vmul.f32 %v14043_v30, %v5105_v23  ;;  %v16722_v2 = vld [vmem:[#allocation125_spill] sm:$0xff] }
 0x986   :  { %6866 = vmatprep.subr.mxu1 %v5178_v50  ;;  %v5112_v10 = vsel %vm209_vm4, %v16719_v14, %v13620_v59  ;;  %6951 = vmatprep.subr.mxu0 %v5448_v55  ;;  %v5444_v50 = vmul.f32 %v13974_v7, %v5405_v51  ;;  %v16721_v54 = vld [vmem:[#allocation207_spill] sm:$0xff]  ;;  %v5173_v24 = vmul.f32 %v14073_v33, %v5113_v40  ;;  %v14184_v23 = vpop.permute.xlu0 %5805  ;;  %v14189_v40 = vld [vmem:[#allocation5 + $0x130] sm:$0xff] }
 0x987   :  { %6704 = vmatprep.mubr.f32.mxu1 %v14131_v17  ;;  %v5404_v25 = vsel %vm265_vm3, %v13774_v9, %v16721_v54  ;;  %6867 = vmatpush2.msra.mxu1 %v5177_v8  ;;  %v14175_v59 = vld [vmem:[#allocation5 + $0x98] sm:$0xff]  ;;  %v5380_v52 = vsel %vm265_vm3, %v16722_v2, %v13774_v9  ;;  %v5169_v55 = vmul.f32 %v14073_v33, %v5112_v10  ;;  %v16724_v2 = vld [vmem:[#allocation46_spill] sm:$0xff]  ;;  %v16725_v10 = vld [vmem:[#allocation101_spill] sm:$0xff] }
 0x988   :  { %6952 = vmatpush1.msra.mxu0 %v5447_v27  ;;  %6705 = vmatmul.mubr.f32.gmra.mxu1 %v14154_v62  ;;  %v5170_v51 = vmul.f32 %v14043_v30, %v5104_v20  ;;  %v5443_v8 = vmul.f32 %v13996_v18, %v5381_v60  ;;  %v14191_v27 = vpop.permute.xlu1 %5795  ;;  %v16723_v14 = vld [vmem:[#allocation79_spill] sm:$0xff]  ;;  %v5440_v54 = vmul.f32 %v13974_v7, %v5404_v25 }
 0x989   :  { %6799 = vmatprep.mubr.f32.mxu0 %v16697_v3  ;;  %6868 = vmatprep.subr.mxu1 %v5174_v41  ;;  %v5103_v9 = vsel %vm209_vm4, %v13743_v36, %v16723_v14  ;;  %v5403_v20 = vsel %vm265_vm3, %v13807_v45, %v16724_v2  ;;  %v5111_v60 = vsel %vm209_vm4, %v16725_v10, %v13743_v36  ;;  %v16726_v41 = vld [vmem:[#allocation103_spill] sm:$0xff]  ;;  %v14213_v14 = vld [vmem:[#allocation5 + $0x128] sm:$0xff] }
 0x98a   :  { %6953 = vmatprep.subr.mxu0 %v5444_v50  ;;  %7767 = vmatmul.mubr.msk.f32.gmra.mxu0 %vm3252_vm9, %v14175_v59  ;;  %v5102_v50 = vsel %vm209_vm4, %v13783_v49, %v16726_v41  ;;  %v5439_v25 = vmul.f32 %v13996_v18, %v5380_v52  ;;  %v16727_v2 = vld [vmem:[#allocation91_spill] sm:$0xff]  ;;  %v5166_v36 = vmul.f32 %v14043_v30, %v5103_v9  ;;  %v7879_v9 = vld [vmem:[%s15211_s1 + $0x8] sm:$0xf] }
 0x98b   :  { %6869 = vmatpush2.msra.mxu1 %v5173_v24  ;;  %6954 = vmatpush1.msra.mxu0 %v5443_v8  ;;  %v5379_v24 = vsel %vm265_vm3, %v16727_v2, %v13807_v45  ;;  %v16728_v10 = vld [vmem:[#allocation75_spill] sm:$0xff]  ;;  %v5436_v52 = vmul.f32 %v13974_v7, %v5403_v20  ;;  %v14228_v8 = vpop.permute.xlu0 %6017  ;;  %v5165_v45 = vmul.f32 %v14073_v33, %v5111_v60 }
 0x98c   :  { %6870 = vmatprep.subr.mxu1 %v5170_v51  ;;  %6955 = vmatprep.subr.mxu0 %v5440_v54  ;;  %v5110_v41 = vsel %vm209_vm4, %v16728_v10, %v13783_v49  ;;  %v14226_v51 = vld [vmem:[#allocation5 + $0xc0] sm:$0xff]  ;;  %v5162_v54 = vmul.f32 %v14043_v30, %v5102_v50  ;;  %v14236_v2 = vrot.slane %v7879_v9, %v16624_v39  ;;  %v14249_v60 = vpop.permute.xlu1 %5791 }
 0x98d   :  { %6710 = vmatprep.mubr.f32.mxu1 %v14189_v40  ;;  %6871 = vmatpush2.msra.mxu1 %v5169_v55  ;;  %v16729_v49 = vld [vmem:[#allocation140_spill] sm:$0xff]  ;;  %v5435_v55 = vmul.f32 %v13996_v18, %v5379_v24  ;;  %v4894_v20 = vsel %vm161_vm5, %v14058_v34, %v13344_v28  ;;  %v5161_v50 = vmul.f32 %v14073_v33, %v5110_v41  ;;  %v14268_v41 = vld [vmem:[#allocation5 + $0xe8] sm:$0xff] }
 0x98e   :  { %6956 = vmatpush1.msra.mxu0 %v5439_v25  ;;  %6711 = vmatmul.mubr.f32.gmra.mxu1 %v14213_v14  ;;  %v5101_v7 = vsel %vm209_vm4, %v13819_v46, %v16729_v49  ;;  %v16730_v25 = vld [vmem:[#allocation168_spill] sm:$0xff]  ;;  %v4902_v18 = vsel %vm161_vm5, %v13297_v13, %v14058_v34  ;;  %v14263_v28 = vrot.slane %v7879_v9, %v16628_v6  ;;  %v16732_v34 = vld [vmem:[#allocation210_spill] sm:$0xff] }
 0x98f   :  { %6805 = vmatprep.mubr.f32.mxu0 %v16697_v3  ;;  %6872 = vmatprep.subr.mxu1 %v5166_v36  ;;  %v5109_v10 = vsel %vm209_vm4, %v16730_v25, %v13819_v46  ;;  %v5158_v24 = vmul.f32 %v14043_v30, %v5101_v7  ;;  %v16731_v36 = vld [vmem:[#allocation77_spill] sm:$0xff]  ;;  %v4972_v46 = vmul.f32 %v14236_v2, %v4894_v20 }
 0x990   :  { %6957 = vmatprep.subr.mxu0 %v5436_v52  ;;  %7768 = vmatmul.mubr.msk.f32.gmra.mxu0 %vm3252_vm9, %v14226_v51  ;;  %v14270_v52 = vpop.permute.xlu0 %6015  ;;  %v4971_v13 = vmul.f32 %v14263_v28, %v4902_v18  ;;  %v4893_v30 = vsel %vm161_vm5, %v13902_v12, %v16596_v32  ;;  %v4901_v9 = vsel %vm161_vm5, %v16592_v11, %v13902_v12  ;;  %v16734_v32 = vld [vmem:[#allocation169_spill] sm:$0xff]  ;;  %v16735_v12 = vld [vmem:[#allocation38_spill] sm:$0xff]  ;;  %v16737_v18 = vld [vmem:[#allocation56_spill] sm:$0xff] }
 0x991   :  { %6873 = vmatpush2.msra.mxu1 %v5165_v45  ;;  %6958 = vmatpush1.msra.mxu0 %v5435_v55  ;;  %v5157_v45 = vmul.f32 %v14073_v33, %v5109_v10  ;;  %v14287_v33 = vpop.permute.xlu1 %5589  ;;  %v4892_v49 = vsel %vm161_vm5, %v13891_v31, %v16600_v0  ;;  %v4968_v7 = vmul.f32 %v14236_v2, %v4893_v30  ;;  %v14300_v55 = vld [vmem:[#allocation5 + $0x110] sm:$0xff]  ;;  %v16736_v0 = vld [vmem:[#allocation29_spill] sm:$0xff]  ;;  %v7881_v30 = vld [vmem:[%s15211_s1 + $0x18] sm:$0xf] }
 0x992   :  { %6874 = vmatprep.subr.mxu1 %v5162_v54  ;;  %6959 = vmatprep.subr.mxu0 %v16731_v36  ;;  %v16733_v54 = vld [vmem:[#allocation139_spill] sm:$0xff]  ;;  %v4900_v11 = vsel %vm161_vm5, %v16598_v43, %v13891_v31  ;;  %v4964_v25 = vmul.f32 %v14236_v2, %v4892_v49  ;;  %v4891_v43 = vsel %vm161_vm5, %v13947_v4, %v16603_v57 }
 0x993   :  { %6875 = vmatpush2.msra.mxu1 %v5161_v50  ;;  %6960 = vmatpush1.msra.mxu0 %v16732_v34  ;;  %v4967_v50 = vmul.f32 %v14263_v28, %v4901_v9  ;;  %v7880_v31 = vld [vmem:[%s15211_s1 + $0x1c] sm:$0xf]  ;;  %v16740_v34 = vld [vmem:[#allocation200_spill] sm:$0xff]  ;;  %v4960_v49 = vmul.f32 %v14236_v2, %v4891_v43 }
 0x994   :  { %6811 = vmatprep.mubr.f32.mxu0 %v16697_v3  ;;  %6876 = vmatprep.subr.mxu1 %v5158_v24  ;;  %v14316_v10 = vrot.slane %v7880_v31, %v16628_v6  ;;  %v4963_v24 = vmul.f32 %v14263_v28, %v4900_v11  ;;  %v16738_v36 = vld [vmem:[#allocation39_spill] sm:$0xff]  ;;  %v16742_v11 = vld [vmem:[#allocation26_spill] sm:$0xff] }
 0x995   :  { %6961 = vmatprep.subr.mxu0 %v16733_v54  ;;  %7769 = vmatmul.mubr.msk.f32.gmra.mxu0 %vm3252_vm9, %v14268_v41  ;;  %v14302_v20 = vpop.permute.xlu0 %6013  ;;  %v16739_v57 = vld [vmem:[#allocation179_spill] sm:$0xff]  ;;  %v14341_v54 = vrot.slane %v7881_v30, %v16624_v39  ;;  %v14343_v9 = vpop.permute.xlu1 %5587 }
 0x996   :  { %6877 = vmatpush2.msra.mxu1 %v5157_v45  ;;  %6962 = vmatpush1.msra.mxu0 %v16734_v32  ;;  %v14325_v45 = vrot.slane %v7880_v31, %v16624_v39  ;;  %v16741_v32 = vld [vmem:[#allocation161_spill] sm:$0xff]  ;;  %v16743_v31 = vld [vmem:[#allocation58_spill] sm:$0xff] }
 0x997   :  { %6878 = vmatprep.subr.mxu1 %v4972_v46  ;;  %6963 = vmatprep.subr.mxu0 %v16735_v12  ;;  %v4899_v46 = vsel %vm161_vm5, %v16738_v36, %v13947_v4  ;;  %v14338_v4 = vrot.slane %v7881_v30, %v16628_v6  ;;  %v14351_v12 = vld [vmem:[#allocation5 + $0x138] sm:$0xff]  ;;  %v4889_v43 = vsel %vm161_vm5, %v13989_v5, %v16743_v31  ;;  %v16746_v36 = vld [vmem:[#allocation180_spill] sm:$0xff] }
 0x998   :  { %6879 = vmatpush2.msra.mxu1 %v4971_v13  ;;  %6964 = vmatpush1.msra.mxu0 %v16736_v0  ;;  %v4890_v13 = vsel %vm161_vm5, %v13938_v22, %v16739_v57  ;;  %v16747_v57 = vld [vmem:[#allocation197_spill] sm:$0xff]  ;;  %v4952_v31 = vmul.f32 %v14236_v2, %v4889_v43 }
 0x999   :  { %6817 = vmatprep.mubr.f32.mxu0 %v16697_v3  ;;  %6880 = vmatprep.subr.mxu1 %v4968_v7  ;;  %v4898_v7 = vsel %vm161_vm5, %v16741_v32, %v13938_v22  ;;  %v16744_v22 = vld [vmem:[#allocation54_spill] sm:$0xff]  ;;  %v14405_v43 = vpop.permute.xlu1 %5585 }
 0x99a   :  { %6965 = vmatprep.subr.mxu0 %v16737_v18  ;;  %7770 = vmatmul.mubr.msk.f32.gmra.mxu0 %vm3252_vm9, %v14300_v55  ;;  %v14357_v0 = vpop.permute.xlu0 %5591  ;;  %v4897_v18 = vsel %vm161_vm5, %v16744_v22, %v13989_v5  ;;  %v4955_v5 = vmul.f32 %v14263_v28, %v4898_v7  ;;  %v16750_v22 = vld [vmem:[#allocation203_spill] sm:$0xff] }
 0x99b   :  { %6881 = vmatpush2.msra.mxu1 %v4967_v50  ;;  %6966 = vmatpush1.msra.mxu0 %v16740_v34  ;;  %v14355_v50 = vrot.slane %v13637_v56, %v16628_v6  ;;  %v4956_v6 = vmul.f32 %v14236_v2, %v4890_v13  ;;  %v16748_v34 = vld [vmem:[#allocation134_spill] sm:$0xff]  ;;  %v16749_v13 = vld [vmem:[#allocation192_spill] sm:$0xff]  ;;  %v4896_v7 = vsel %vm161_vm5, %v16750_v22, %v13976_v16 }
 0x99c   :  { %6882 = vmatprep.subr.mxu1 %v4964_v25  ;;  %6967 = vmatprep.subr.mxu0 %v16742_v11  ;;  %v4959_v25 = vmul.f32 %v14263_v28, %v4899_v46  ;;  %v4888_v46 = vsel %vm161_vm5, %v13976_v16, %v16746_v36  ;;  %v5838_v30 = vsel %vm361_vm1, %v14184_v23, %v16748_v34  ;;  %v16752_v36 = vld [vmem:[#allocation120_spill] sm:$0xff]  ;;  %v16754_v16 = vld [vmem:[#allocation155_spill] sm:$0xff] }
 0x99d   :  { %6883 = vmatpush2.msra.mxu1 %v4963_v24  ;;  %v16745_v24 = vld [vmem:[#allocation28_spill] sm:$0xff]  ;;  %6823 = vmatprep.mubr.f32.mxu0 %v16697_v3  ;;  %v5814_v32 = vsel %vm361_vm1, %v16749_v13, %v14184_v23  ;;  %v4951_v11 = vmul.f32 %v14263_v28, %v4897_v18  ;;  %v5892_v23 = vmul.f32 %v14325_v45, %v5838_v30  ;;  %v16756_v13 = vld [vmem:[#allocation70_spill] sm:$0xff] }
 0x99e   :  { %6968 = vmatpush1.msra.mxu0 %v16745_v24  ;;  %6884 = vmatprep.subr.mxu1 %v4960_v49  ;;  %v14389_v49 = vrot.slane %v13637_v56, %v16624_v39  ;;  %v16751_v24 = vld [vmem:[#allocation196_spill] sm:$0xff]  ;;  %v4887_v56 = vsel %vm161_vm5, %v14026_v48, %v16752_v36  ;;  %v16753_v39 = vld [vmem:[#allocation86_spill] sm:$0xff]  ;;  %v5891_v34 = vmul.f32 %v14316_v10, %v5814_v32  ;;  %v16759_v36 = vld [vmem:[#allocation183_spill] sm:$0xff] }
 0x99f   :  { %6969 = vmatprep.subr.mxu0 %v16747_v57  ;;  %7771 = vmatmul.mubr.msk.f32.gmra.mxu0 %vm3252_vm9, %v14351_v12  ;;  %v6020_v18 = vpop.permute.xlu0 %6019  ;;  %v16755_v57 = vld [vmem:[#allocation211_spill] sm:$0xff]  ;;  %v4947_v30 = vmul.f32 %v14263_v28, %v4896_v7  ;;  %v4944_v32 = vmul.f32 %v14236_v2, %v4887_v56  ;;  %v16761_v7 = vld [vmem:[#allocation165_spill] sm:$0xff] }
 0x9a0   :  { %6885 = vmatpush2.msra.mxu1 %v4959_v25  ;;  %6970 = vmatpush1.msra.mxu0 %v16751_v24  ;;  %v4948_v25 = vmul.f32 %v14236_v2, %v4888_v46  ;;  %v5837_v46 = vsel %vm361_vm1, %v14078_v42, %v16755_v57  ;;  %v16758_v24 = vld [vmem:[#allocation216_spill] sm:$0xff]  ;;  %v6028_v2 = vsel %vm409_vm0, %v13664_v19, %v6020_v18  ;;  %v16762_v56 = vld [vmem:[#allocation73_spill] sm:$0xff] }
 0x9a1   :  { %6886 = vmatprep.subr.mxu1 %v4956_v6  ;;  %6971 = vmatprep.subr.mxu0 %v16753_v39  ;;  %v4895_v6 = vsel %vm161_vm5, %v16754_v16, %v14026_v48  ;;  %v5813_v48 = vsel %vm361_vm1, %v16758_v24, %v14078_v42  ;;  %v16760_v39 = vld [vmem:[#allocation157_spill] sm:$0xff]  ;;  %v6052_v16 = vsel %vm409_vm0, %v6020_v18, %v13690_v44  ;;  %v14455_v18 = vpop.permute.xlu1 %5583 }
 0x9a2   :  { %6887 = vmatpush2.msra.mxu1 %v4955_v5  ;;  %6972 = vmatpush1.msra.mxu0 %v16756_v13  ;;  %v16757_v5 = vld [vmem:[#allocation182_spill] sm:$0xff]  ;;  %v4943_v57 = vmul.f32 %v14263_v28, %v4895_v6  ;;  %v5888_v42 = vmul.f32 %v14325_v45, %v5837_v46  ;;  %v16763_v44 = vld [vmem:[#allocation205_spill] sm:$0xff]  ;;  %v6106_v6 = vmul.f32 %v14389_v49, %v6052_v16 }
 0x9a3   :  { %6888 = vmatprep.subr.mxu1 %v4952_v31  ;;  %v5836_v22 = vsel %vm361_vm1, %v14013_v35, %v16757_v5  ;;  %6973 = vmatprep.subr.mxu0 %v16759_v36  ;;  %v5812_v31 = vsel %vm361_vm1, %v16760_v39, %v14013_v35  ;;  %v5887_v35 = vmul.f32 %v14316_v10, %v5813_v48  ;;  %v16767_v48 = vld [vmem:[#allocation136_spill] sm:$0xff] }
 0x9a4   :  { %6889 = vmatpush2.msra.mxu1 %v4951_v11  ;;  %6974 = vmatpush1.msra.mxu0 %v16761_v7  ;;  %v5884_v11 = vmul.f32 %v14325_v45, %v5836_v22  ;;  %v5811_v28 = vsel %vm361_vm1, %v16763_v44, %v14133_v21  ;;  %v5883_v46 = vmul.f32 %v14316_v10, %v5812_v31  ;;  %v16766_v22 = vld [vmem:[#allocation102_spill] sm:$0xff]  ;;  %v16768_v7 = vld [vmem:[#allocation27_spill] sm:$0xff] }
 0x9a5   :  { %6890 = vmatprep.subr.mxu1 %v4948_v25  ;;  %6975 = vmatprep.subr.mxu0 %v5892_v23  ;;  %v5835_v25 = vsel %vm361_vm1, %v14133_v21, %v16762_v56  ;;  %v16764_v23 = vld [vmem:[#allocation47_spill] sm:$0xff]  ;;  %v6105_v21 = vmul.f32 %v14355_v50, %v6028_v2  ;;  %v5809_v24 = vsel %vm361_vm1, %v16766_v22, %v14191_v27  ;;  %v14506_v56 = vpop.permute.xlu1 %5581 }
 0x9a6   :  { %6891 = vmatpush2.msra.mxu1 %v4947_v30  ;;  %6976 = vmatpush2.msra.mxu0 %v5891_v34  ;;  %v5810_v19 = vsel %vm361_vm1, %v16764_v23, %v14099_v58  ;;  %v16765_v34 = vld [vmem:[#allocation49_spill] sm:$0xff]  ;;  %v5880_v5 = vmul.f32 %v14325_v45, %v5835_v25  ;;  %v5833_v36 = vsel %vm361_vm1, %v14191_v27, %v16767_v48  ;;  %v16773_v25 = vld [vmem:[#allocation112_spill] sm:$0xff]  ;;  %v16775_v23 = vld [vmem:[#allocation55_spill] sm:$0xff] }
 0x9a7   :  { %6892 = vmatprep.subr.mxu1 %v4944_v32  ;;  %6977 = vmatprep.subr.mxu0 %v5888_v42  ;;  %v5834_v13 = vsel %vm361_vm1, %v14099_v58, %v16765_v34  ;;  %v7882_v30 = vld [vmem:[#allocation5 + $0x8] sm:$0xff]  ;;  %v5879_v58 = vmul.f32 %v14316_v10, %v5811_v28  ;;  %v5875_v32 = vmul.f32 %v14316_v10, %v5810_v19  ;;  %v16770_v42 = vld [vmem:[#allocation174_spill] sm:$0xff]  ;;  %v6012_v19 = vpop.permute.xlu0 %6011 }
 0x9a8   :  { %6893 = vmatpush2.msra.mxu1 %v4943_v57  ;;  %6894 = vmatprep.mubr.f32.mxu1 %v7882_v30  ;;  %v6051_v39 = vsel %vm409_vm0, %v14228_v8, %v16642_v1  ;;  %v5876_v31 = vmul.f32 %v14325_v45, %v5834_v13  ;;  %v6027_v27 = vsel %vm409_vm0, %v16636_v38, %v14228_v8  ;;  %v16769_v57 = vld [vmem:[#allocation74_spill] sm:$0xff]  ;;  %v16777_v13 = vld [vmem:[#allocation173_spill] sm:$0xff] }
 0x9a9   :  { %6978 = vmatpush2.msra.mxu0 %v5887_v35  ;;  %6895 = vmatmul.mubr.f32.vlgmr.msra.gmra.mxu1 %v13631_v61  ;;  %v5808_v61 = vsel %vm361_vm1, %v16768_v7, %v14135_v63  ;;  %v5871_v16 = vmul.f32 %v14316_v10, %v5809_v24  ;;  %v5872_v1 = vmul.f32 %v14325_v45, %v5833_v36  ;;  %v16772_v35 = vld [vmem:[#allocation25_spill] sm:$0xff]  ;;  %v16774_v28 = vld [vmem:[#allocation106_spill] sm:$0xff]  ;;  %v16779_v36 = vld [vmem:[#allocation99_spill] sm:$0xff] }
 0x9aa   :  { %6979 = vmatprep.subr.mxu0 %v5884_v11  ;;  %6900 = vmatprep.mubr.f32.mxu1 %v13647_v15  ;;  %v5832_v15 = vsel %vm361_vm1, %v14135_v63, %v16769_v57  ;;  %v5807_v2 = vsel %vm361_vm1, %v16770_v42, %v14249_v60  ;;  %v16771_v11 = vld [vmem:[#allocation189_spill] sm:$0xff]  ;;  %v6102_v8 = vmul.f32 %v14389_v49, %v6051_v39  ;;  %v16781_v39 = vld [vmem:[#allocation148_spill] sm:$0xff]  ;;  %v16784_v57 = vld [vmem:[#allocation51_spill] sm:$0xff] }
 0x9ab   :  { %6980 = vmatpush2.msra.mxu0 %v5883_v46  ;;  %7072 = vmatprep.subr.mxu1 %v6106_v6  ;;  %v5831_v38 = vsel %vm361_vm1, %v14249_v60, %v16771_v11  ;;  %v6101_v63 = vmul.f32 %v14355_v50, %v6027_v27  ;;  %v6050_v44 = vsel %vm409_vm0, %v14270_v52, %v16773_v25  ;;  %v16776_v46 = vld [vmem:[#allocation178_spill] sm:$0xff]  ;;  %v16778_v24 = vld [vmem:[#allocation217_spill] sm:$0xff]  ;;  %v6010_v42 = vpop.permute.xlu0 %6009 }
 0x9ac   :  { %6981 = vmatprep.subr.mxu0 %v5880_v5  ;;  %7073 = vmatpush1.msra.mxu1 %v6105_v21  ;;  %v5624_v60 = vsel %vm313_vm2, %v14357_v0, %v16775_v23  ;;  %v5868_v6 = vmul.f32 %v14325_v45, %v5832_v15  ;;  %v6026_v34 = vsel %vm409_vm0, %v16776_v46, %v14270_v52  ;;  %v16786_v11 = vld [vmem:[#allocation122_spill] sm:$0xff]  ;;  %v16788_v25 = vld [vmem:[#allocation137_spill] sm:$0xff] }
 0x9ad   :  { %6982 = vmatpush2.msra.mxu0 %v5879_v58  ;;  %6901 = vmatmul.mubr.f32.gmra.mxu1 %v16772_v35  ;;  %v5600_v30 = vsel %vm313_vm2, %v16777_v13, %v14357_v0  ;;  %v5867_v21 = vmul.f32 %v14316_v10, %v5808_v61  ;;  %v5863_v5 = vmul.f32 %v14316_v10, %v5807_v2  ;;  %v16783_v61 = vld [vmem:[#allocation63_spill] sm:$0xff]  ;;  %v16790_v23 = vld [vmem:[#allocation206_spill] sm:$0xff] }
 0x9ae   :  { %6983 = vmatprep.subr.mxu0 %v5876_v31  ;;  %6906 = vmatprep.mubr.f32.mxu1 %v16774_v28  ;;  %v5864_v22 = vmul.f32 %v14325_v45, %v5831_v38  ;;  %v5623_v52 = vsel %vm313_vm2, %v14287_v33, %v16778_v24  ;;  %v6098_v48 = vmul.f32 %v14389_v49, %v6050_v44  ;;  %v16782_v31 = vld [vmem:[#allocation222_spill] sm:$0xff]  ;;  %v16789_v44 = vld [vmem:[#allocation33_spill] sm:$0xff]  ;;  %v16795_v24 = vld [vmem:[#allocation88_spill] sm:$0xff] }
 0x9af   :  { %6984 = vmatpush2.msra.mxu0 %v5875_v32  ;;  %7074 = vmatprep.subr.mxu1 %v6102_v8  ;;  %v5678_v0 = vmul.f32 %v14341_v54, %v5624_v60  ;;  %v6097_v58 = vmul.f32 %v14355_v50, %v6026_v34  ;;  %v16780_v32 = vld [vmem:[#allocation147_spill] sm:$0xff]  ;;  %v5677_v45 = vmul.f32 %v14338_v4, %v5600_v30  ;;  %v16787_v8 = vld [vmem:[#allocation188_spill] sm:$0xff] }
 0x9b0   :  { %6985 = vmatprep.subr.mxu0 %v5872_v1  ;;  %7075 = vmatpush1.msra.mxu1 %v6101_v63  ;;  %v6049_v10 = vsel %vm409_vm0, %v14302_v20, %v16780_v32  ;;  %v5599_v7 = vsel %vm313_vm2, %v16782_v31, %v14287_v33  ;;  %v6025_v27 = vsel %vm409_vm0, %v16783_v61, %v14302_v20  ;;  %v16785_v33 = vld [vmem:[#allocation159_spill] sm:$0xff] }
 0x9b1   :  { %6986 = vmatpush2.msra.mxu0 %v5871_v16  ;;  %6907 = vmatmul.mubr.f32.gmra.mxu1 %v16779_v36  ;;  %v5580_v16 = vpop.permute.xlu1 %5579  ;;  %v5674_v1 = vmul.f32 %v14341_v54, %v5623_v52  ;;  %v5622_v15 = vsel %vm313_vm2, %v14343_v9, %v16784_v57  ;;  %v5598_v2 = vsel %vm313_vm2, %v16785_v33, %v14343_v9  ;;  %v16792_v30 = vld [vmem:[#allocation59_spill] sm:$0xff] }
 0x9b2   :  { %6987 = vmatprep.subr.mxu0 %v5868_v6  ;;  %6912 = vmatprep.mubr.f32.mxu1 %v16781_v39  ;;  %v5621_v20 = vsel %vm313_vm2, %v14405_v43, %v16786_v11  ;;  %v6094_v38 = vmul.f32 %v14389_v49, %v6049_v10  ;;  %v5673_v35 = vmul.f32 %v14338_v4, %v5599_v7  ;;  %v16791_v6 = vld [vmem:[#allocation48_spill] sm:$0xff]  ;;  %v16797_v32 = vld [vmem:[#allocation231_spill] sm:$0xff]  ;;  %v6008_v10 = vpop.permute.xlu0 %6007 }
 0x9b3   :  { %6988 = vmatpush2.msra.mxu0 %v5867_v21  ;;  %7076 = vmatprep.subr.mxu1 %v6098_v48  ;;  %v6093_v63 = vmul.f32 %v14355_v50, %v6025_v27  ;;  %v6048_v9 = vsel %vm409_vm0, %v6012_v19, %v16789_v44  ;;  %v5670_v28 = vmul.f32 %v14341_v54, %v5622_v15  ;;  %v16798_v39 = vld [vmem:[#allocation43_spill] sm:$0xff]  ;;  %v16799_v27 = vld [vmem:[#allocation153_spill] sm:$0xff]  ;;  %v16806_v44 = vld [vmem:[#allocation52_spill] sm:$0xff] }
 0x9b4   :  { %6989 = vmatprep.subr.mxu0 %v5864_v22  ;;  %7077 = vmatpush1.msra.mxu1 %v6097_v58  ;;  %v5597_v60 = vsel %vm313_vm2, %v16790_v23, %v14405_v43  ;;  %v6024_v46 = vsel %vm409_vm0, %v16791_v6, %v6012_v19  ;;  %v5669_v34 = vmul.f32 %v14338_v4, %v5598_v2  ;;  %v16794_v22 = vld [vmem:[#allocation53_spill] sm:$0xff]  ;;  %v16796_v58 = vld [vmem:[#allocation76_spill] sm:$0xff]  ;;  %v16800_v57 = vld [vmem:[#allocation199_spill] sm:$0xff] }
 0x9b5   :  { %6990 = vmatpush2.msra.mxu0 %v5863_v5  ;;  %6913 = vmatmul.mubr.f32.gmra.mxu1 %v16787_v8  ;;  %v5666_v13 = vmul.f32 %v14341_v54, %v5621_v20  ;;  %v5620_v21 = vsel %vm313_vm2, %v14455_v18, %v16792_v30  ;;  %v16793_v5 = vld [vmem:[#allocation191_spill] sm:$0xff]  ;;  %v5619_v19 = vsel %vm313_vm2, %v14506_v56, %v16794_v22  ;;  %v5578_v48 = vpop.permute.xlu1 %5577  ;;  %v16808_v30 = vld [vmem:[#allocation98_spill] sm:$0xff] }
 0x9b6   :  { %6991 = vmatprep.subr.mxu0 %v5678_v0  ;;  %6918 = vmatprep.mubr.f32.mxu1 %v16788_v25  ;;  %v5596_v43 = vsel %vm313_vm2, %v16793_v5, %v14455_v18  ;;  %v6090_v52 = vmul.f32 %v14389_v49, %v6048_v9  ;;  %v5665_v36 = vmul.f32 %v14338_v4, %v5597_v60  ;;  %v16801_v33 = vld [vmem:[#allocation195_spill] sm:$0xff]  ;;  %v16809_v5 = vld [vmem:[#allocation209_spill] sm:$0xff] }
 0x9b7   :  { %6992 = vmatpush2.msra.mxu0 %v5677_v45  ;;  %7078 = vmatprep.subr.mxu1 %v6094_v38  ;;  %v6089_v0 = vmul.f32 %v14355_v50, %v6024_v46  ;;  %v6047_v18 = vsel %vm409_vm0, %v6010_v42, %v16797_v32  ;;  %v5662_v45 = vmul.f32 %v14341_v54, %v5620_v21  ;;  %v16802_v2 = vld [vmem:[#allocation163_spill] sm:$0xff]  ;;  %v16803_v38 = vld [vmem:[#allocation30_spill] sm:$0xff] }
 0x9b8   :  { %6993 = vmatprep.subr.mxu0 %v5674_v1  ;;  %7079 = vmatpush1.msra.mxu1 %v6093_v63  ;;  %v5595_v31 = vsel %vm313_vm2, %v16798_v39, %v14506_v56  ;;  %v5661_v7 = vmul.f32 %v14338_v4, %v5596_v43  ;;  %v5658_v61 = vmul.f32 %v14341_v54, %v5619_v19  ;;  %v16807_v23 = vld [vmem:[#allocation111_spill] sm:$0xff]  ;;  %v16810_v19 = vld [vmem:[#allocation96_spill] sm:$0xff] }
 0x9b9   :  { %6994 = vmatpush2.msra.mxu0 %v5673_v35  ;;  %6919 = vmatmul.mubr.f32.gmra.mxu1 %v16795_v24  ;;  %v5618_v1 = vsel %vm313_vm2, %v5580_v16, %v16799_v27  ;;  %v5594_v15 = vsel %vm313_vm2, %v16800_v57, %v5580_v16  ;;  %v6086_v56 = vmul.f32 %v14389_v49, %v6047_v18  ;;  %v16804_v35 = vld [vmem:[#allocation228_spill] sm:$0xff]  ;;  %v7883_v46 = vld [vmem:[#allocation5 + $0x18] sm:$0xff]  ;;  %v16811_v24 = vld [vmem:[#allocation186_spill] sm:$0xff] }
 0x9ba   :  { %6995 = vmatprep.subr.mxu0 %v5670_v28  ;;  %6924 = vmatprep.mubr.f32.mxu1 %v16796_v58  ;;  %v6046_v11 = vsel %vm409_vm0, %v6008_v10, %v16802_v2  ;;  %v5657_v20 = vmul.f32 %v14338_v4, %v5595_v31  ;;  %v5617_v8 = vsel %vm313_vm2, %v5578_v48, %v16803_v38  ;;  %v16805_v16 = vld [vmem:[#allocation208_spill] sm:$0xff]  ;;  %v6006_v28 = vpop.permute.xlu1 %6005  ;;  %v16814_v58 = vld [vmem:[#allocation41_spill] sm:$0xff]  ;;  %v16815_v32 = vld [vmem:[#allocation71_spill] sm:$0xff] }
 0x9bb   :  { %6996 = vmatpush2.msra.mxu0 %v5669_v34  ;;  %7080 = vmatprep.subr.mxu1 %v6090_v52  ;;  %v6023_v63 = vsel %vm409_vm0, %v16804_v35, %v6010_v42  ;;  %v5654_v25 = vmul.f32 %v14341_v54, %v5618_v1  ;;  %v5593_v9 = vsel %vm313_vm2, %v16806_v44, %v5578_v48  ;;  %v7884_v48 = vld [vmem:[#allocation5 + $0x10] sm:$0xff]  ;;  %v16818_v18 = vld [vmem:[#allocation115_spill] sm:$0xff] }
 0x9bc   :  { %6997 = vmatprep.subr.mxu0 %v5666_v13  ;;  %7081 = vmatpush1.msra.mxu1 %v6089_v0  ;;  %v6022_v60 = vsel %vm409_vm0, %v16807_v23, %v6008_v10  ;;  %v5653_v6 = vmul.f32 %v14338_v4, %v5594_v15  ;;  %v6082_v42 = vmul.f32 %v14389_v49, %v6046_v11  ;;  %v7885_v0 = vld [vmem:[#allocation5 + $0x40] sm:$0xff] }
 0x9bd   :  { %6998 = vmatpush2.msra.mxu0 %v5665_v36  ;;  %6925 = vmatmul.mubr.f32.gmra.mxu1 %v16801_v33  ;;  %v5650_v34 = vmul.f32 %v14341_v54, %v5617_v8  ;;  %v6085_v13 = vmul.f32 %v14355_v50, %v6023_v63  ;;  %v5649_v21 = vmul.f32 %v14338_v4, %v5593_v9  ;;  %v16812_v4 = vld [vmem:[#allocation118_spill] sm:$0xff]  ;;  %v16819_v10 = vld [vmem:[#allocation116_spill] sm:$0xff] }
 0x9be   :  { %6999 = vmatprep.subr.mxu0 %v5662_v45  ;;  %6930 = vmatprep.mubr.f32.mxu1 %v16805_v16  ;;  %v6045_v43 = vsel %vm409_vm0, %v6006_v28, %v16809_v5  ;;  %v6081_v22 = vmul.f32 %v14355_v50, %v6022_v60  ;;  %v6021_v54 = vsel %vm409_vm0, %v16811_v24, %v6006_v28 }
 0x9bf   :  { %7000 = vmatpush2.msra.mxu0 %v5661_v7  ;;  %7082 = vmatprep.subr.mxu1 %v6086_v56  ;;  %v6078_v52 = vmul.f32 %v14389_v49, %v6045_v43  ;;  %v6077_v36 = vmul.f32 %v14355_v50, %v6021_v54  ;;  %v16816_v49 = vld [vmem:[#allocation181_spill] sm:$0xff]  ;;  %v16817_v50 = vld [vmem:[#allocation198_spill] sm:$0xff] }
 0x9c0   :  { %7001 = vmatprep.subr.mxu0 %v5658_v61  ;;  %7007 = vmatprep.mubr.f32.mxu0 %v7883_v46 }
 0x9c1   :  { %7002 = vmatpush2.msra.mxu0 %v5657_v20  ;;  %6931 = vmatmul.mubr.f32.gmra.mxu1 %v16808_v30 }
 0x9c2   :  { %7003 = vmatprep.subr.mxu0 %v5654_v25  ;;  %6936 = vmatprep.mubr.f32.mxu1 %v16810_v19 }
 0x9c3   :  { %7004 = vmatpush2.msra.mxu0 %v5653_v6  ;;  %7083 = vmatpush1.msra.mxu1 %v6085_v13 }
 0x9c4   :  { %7005 = vmatprep.subr.mxu0 %v5650_v34  ;;  %7084 = vmatprep.subr.mxu1 %v6082_v42 }
 0x9c5   :  { %7006 = vmatpush2.msra.mxu0 %v5649_v21  ;;  %6937 = vmatmul.mubr.f32.gmra.mxu1 %v16812_v4 }
 0x9c6   :  { %7008 = vmatmul.mubr.f32.vlgmr.msra.gmra.mxu0 %v7884_v48  ;;  %7085 = vmatpush1.msra.mxu1 %v6081_v22 }
 0x9c7   :  { %7013 = vmatprep.mubr.f32.mxu0 %v7885_v0  ;;  %7086 = vmatprep.subr.mxu1 %v6078_v52 }
 0x9c8   :  { %7120 = vmatprep.mubr.f32.mxu1 %v16697_v3  ;;  %7087 = vmatpush1.msra.mxu1 %v6077_v36 }
 0x9c9   :  { %7772 = vmatmul.mubr.msk.f32.vlgmr.msra.gmra.mxu1 %vm3252_vm9, %v16814_v58 }
 0x9ca   :  { %7014 = vmatmul.mubr.f32.gmra.mxu0 %v16813_v37  ;;  %7126 = vmatprep.mubr.f32.mxu1 %v16697_v3 }
 0x9cb   :  { %7019 = vmatprep.mubr.f32.mxu0 %v16815_v32 }
 0x9cd   :  { %7773 = vmatmul.mubr.msk.f32.gmra.mxu1 %vm3252_vm9, %v14056_v26  ;;  %v16820_v26 = vld [vmem:[#allocation90_spill] sm:$0xff] }
 0x9ce   :  { %7020 = vmatmul.mubr.f32.gmra.mxu0 %v16816_v49  ;;  %7132 = vmatprep.mubr.f32.mxu1 %v16697_v3 }
 0x9cf   :  { %7025 = vmatprep.mubr.f32.mxu0 %v16817_v50 }
 0x9d1   :  { %7774 = vmatmul.mubr.msk.f32.gmra.mxu1 %vm3252_vm9, %v14116_v29 }
 0x9d2   :  { %7026 = vmatmul.mubr.f32.gmra.mxu0 %v16818_v18  ;;  %7138 = vmatprep.mubr.f32.mxu1 %v16697_v3 }
 0x9d3   :  { %7031 = vmatprep.mubr.f32.mxu0 %v14011_v53 }
 0x9d5   :  { %7775 = vmatmul.mubr.msk.f32.gmra.mxu1 %vm3252_vm9, %v14175_v59 }
 0x9d6   :  { %7032 = vmatmul.mubr.f32.gmra.mxu0 %v16819_v10  ;;  %7144 = vmatprep.mubr.f32.mxu1 %v16697_v3 }
 0x9d7   :  { %7037 = vmatprep.mubr.f32.mxu0 %v14076_v47 }
 0x9d9   :  { %7776 = vmatmul.mubr.msk.f32.gmra.mxu1 %vm3252_vm9, %v14226_v51 }
 0x9da   :  { %7038 = vmatmul.mubr.f32.gmra.mxu0 %v16820_v26  ;;  %7150 = vmatprep.mubr.f32.mxu1 %v16697_v3 }
 0x9db   :  { %7043 = vmatprep.mubr.f32.mxu0 %v14131_v17 }
 0x9dd   :  { %7777 = vmatmul.mubr.msk.f32.gmra.mxu1 %vm3252_vm9, %v14268_v41 }
 0x9de   :  { %7044 = vmatmul.mubr.f32.gmra.mxu0 %v14154_v62  ;;  %7156 = vmatprep.mubr.f32.mxu1 %v16697_v3 }
 0x9df   :  { %7049 = vmatprep.mubr.f32.mxu0 %v14189_v40 }
 0x9e1   :  { %7778 = vmatmul.mubr.msk.f32.gmra.mxu1 %vm3252_vm9, %v14300_v55 }
 0x9e2   :  { %7050 = vmatmul.mubr.f32.gmra.mxu0 %v14213_v14  ;;  %7162 = vmatprep.mubr.f32.mxu1 %v16697_v3 }
 0x9e5   :  { %7779 = vmatmul.mubr.msk.f32.gmra.mxu1 %vm3252_vm9, %v14351_v12 }
 0xa13   :  { %v6557_v53 = vpop.f32.mrf.mxu0 }
 0xa15   :  { %v6559_v47 = vpop.f32.mrf.mxu0 }
 0xa17   :  { %v14690_v29 = vpop.f32.mrf.mxu0 }
 0xa18   :  { %v6670_v3 = vpop.f32.mrf.mxu1 }
 0xa19   :  { %v6565_v17 = vpop.f32.mrf.mxu0  ;;  %v6671_v18 = vadd.f32 %v6670_v3, %v6557_v53 }
 0xa1a   :  { %v6672_v12 = vpop.f32.mrf.mxu1 }
 0xa1b   :  { %v14692_v62 = vpop.f32.mrf.mxu0  ;;  %v6673_v49 = vadd.f32 %v6672_v12, %v6559_v47 }
 0xa1d   :  { %v14694_v59 = vpop.f32.mrf.mxu0 }
 0xa1f   :  { %v14696_v40 = vpop.f32.mrf.mxu0 }
 0xa21   :  { %v14698_v14 = vpop.f32.mrf.mxu0 }
 0xa23   :  { %v14700_v51 = vpop.f32.mrf.mxu0 }
 0xa25   :  { %v14702_v41 = vpop.f32.mrf.mxu0 }
 0xa27   :  { %v14704_v55 = vpop.f32.mrf.mxu0 }
 0xa29   :  { %v14706_v45 = vpop.f32.mrf.mxu0 }
 0xa2a   :  { %v6676_v39 = vpop.f32.mrf.mxu1 }
 0xa2c   :  { %v14708_v31 = vpop.f32.mrf.mxu0  ;;  %v6678_v7 = vpop.f32.mrf.mxu1 }
 0xa2d   :  { %v6679_v10 = vadd.f32 %v6678_v7, %v6565_v17 }
 0xa2e   :  { %v14710_v61 = vpop.f32.mrf.mxu0 }
 0xa31   :  { %v6682_v27 = vpop.f32.mrf.mxu1 }
 0xa32   :  { %v14712_v1 = vpop.f32.mrf.mxu0  ;;  %v6683_v7 = vadd.f32 %v6682_v27, %v14692_v62 }
 0xa33   :  { %v6684_v57 = vpop.f32.mrf.mxu1 }
 0xa34   :  { %v14714_v15 = vpop.f32.mrf.mxu0  ;;  %v6685_v47 = vadd.f32 %v6684_v57, %v14694_v59 }
 0xa35   :  { %16821 = vst [vmem:[#allocation132_spill] sm:$0xff] %v14714_v15 }
 0xa37   :  { %v6688_v33 = vpop.f32.mrf.mxu1 }
 0xa39   :  { %v6783_v56 = vpop.f32.mrf.mxu0  ;;  %v6690_v2 = vpop.f32.mrf.mxu1 }
 0xa3b   :  { %v6785_v11 = vpop.f32.mrf.mxu0 }
 0xa3c   :  { %v6694_v20 = vpop.f32.mrf.mxu1  ;;  %v14766_v26 = vadd.f32 %v6785_v11, %v6673_v49  ;;  %v6691_v11 = vadd.f32 %v6690_v2, %v14698_v14 }
 0xa3d   :  { %v6695_v62 = vadd.f32 %v6694_v20, %v14700_v51 }
 0xa3e   :  { %v6789_v38 = vpop.f32.mrf.mxu0  ;;  %v14716_v8 = vpop.f32.mrf.mxu1  ;;  %v7218_v53 = vmul.f32 %v14766_v26, %v14766_v26 }
 0xa3f   :  { %v6697_v14 = vadd.f32 %v14716_v8, %v14702_v41 }
 0xa40   :  { %v6791_v35 = vpop.f32.mrf.mxu0 }
 0xa42   :  { %v14718_v63 = vpop.f32.mrf.mxu1 }
 0xa44   :  { %v6795_v16 = vpop.f32.mrf.mxu0  ;;  %v14720_v25 = vpop.f32.mrf.mxu1 }
 0xa45   :  { %v14804_v2 = vadd.f32 %v6795_v16, %v6683_v7 }
 0xa46   :  { %v6797_v44 = vpop.f32.mrf.mxu0 }
 0xa47   :  { %v14793_v57 = vadd.f32 %v6797_v44, %v6685_v47  ;;  %v14815_v47 = vadd.f32 %v14718_v63, %v14704_v55  ;;  %v6703_v55 = vadd.f32 %v14720_v25, %v14706_v45 }
 0xa48   :  { %v14722_v9 = vpop.f32.mrf.mxu1 }
 0xa49   :  { %v7226_v41 = vmul.f32 %v14793_v57, %v14793_v57  ;;  %v6707_v45 = vadd.f32 %v14722_v9, %v14708_v31 }
 0xa4a   :  { %v14724_v28 = vpop.f32.mrf.mxu0  ;;  %v14726_v23 = vpop.f32.mrf.mxu1 }
 0xa4c   :  { %v14728_v60 = vpop.f32.mrf.mxu0 }
 0xa4d   :  { %v14829_v63 = vadd.f32 %v14728_v60, %v6691_v11 }
 0xa4e   :  { %v14730_v6 = vpop.f32.mrf.mxu1 }
 0xa50   :  { %v14732_v42 = vpop.f32.mrf.mxu0  ;;  %v14734_v46 = vpop.f32.mrf.mxu1 }
 0xa51   :  { %16822 = vst [vmem:[#allocation68_spill] sm:$0xff] %v14734_v46  ;;  %v14852_v31 = vadd.f32 %v14732_v42, %v6695_v62 }
 0xa52   :  { %v14736_v13 = vpop.f32.mrf.mxu0 }
 0xa53   :  { %v14855_v9 = vadd.f32 %v14736_v13, %v6697_v14  ;;  %v6709_v13 = vadd.f32 %v14726_v23, %v14710_v61 }
 0xa55   :  { %v14738_v5 = vpop.f32.mrf.mxu0 }
 0xa57   :  { %v14742_v19 = vpop.f32.mrf.mxu0 }
 0xa5a   :  { %v14748_v52 = vpop.f32.mrf.mxu0 }
 0xa5b   :  { %16823 = vst [vmem:[#allocation160_spill] sm:$0xff] %v14748_v52  ;;  %v14773_v52 = vadd.f32 %v6783_v56, %v6671_v18 }
 0xa5c   :  { %v14754_v36 = vpop.f32.mrf.mxu0 }
 0xa5d   :  { %16824 = vst [vmem:[#allocation144_spill] sm:$0xff] %v14754_v36  ;;  %v6677_v36 = vadd.f32 %v6676_v39, %v14690_v29  ;;  %v6689_v29 = vadd.f32 %v6688_v33, %v14696_v40  ;;  %v7217_v56 = vmul.f32 %v14773_v52, %v14773_v52 }
 0xa5f   :  { %v14760_v58 = vpop.f32.mrf.mxu0  ;;  %v14782_v17 = vadd.f32 %v6789_v38, %v6677_v36  ;;  %v7169_v36 = vadd.f32 %v14766_v26, %v14773_v52  ;;  %v7249_v33 = vadd.f32 %v7218_v53, %v7217_v56  ;;  %v14841_v25 = vadd.f32 %v14724_v28, %v6689_v29 }
 0xa60   :  { %16826 = vst [vmem:[#allocation156_spill] sm:$0xff] %v14760_v58 }
 0xa61   :  { %v14768_v46 = vpop.f32.mrf.mxu0  ;;  %v7229_v42 = vmul.f32 %v14841_v25, %v14841_v25 }
 0xa69   :  { %v6896_v34 = vpop.f32.mrf.mxu1 }
 0xa6b   :  { %v6898_v30 = vpop.f32.mrf.mxu1 }
 0xa6d   :  { %v6902_v21 = vpop.f32.mrf.mxu1 }
 0xa6f   :  { %v6904_v43 = vpop.f32.mrf.mxu1 }
 0xa71   :  { %v14740_v22 = vpop.f32.mrf.mxu1 }
 0xa73   :  { %v14744_v24 = vpop.f32.mrf.mxu1 }
 0xa75   :  { %v14746_v54 = vpop.f32.mrf.mxu1 }
 0xa77   :  { %v14750_v4 = vpop.f32.mrf.mxu1 }
 0xa79   :  { %v14752_v48 = vpop.f32.mrf.mxu1 }
 0xa7b   :  { %v14756_v0 = vpop.f32.mrf.mxu1 }
 0xa7d   :  { %v14758_v37 = vpop.f32.mrf.mxu1 }
 0xa7e   :  { %16825 = vst [vmem:[#allocation162_spill] sm:$0xff] %v14758_v37  ;;  %v14775_v37 = vadd.f32 %v6791_v35, %v6679_v10 }
 0xa7f   :  { %v14762_v32 = vpop.f32.mrf.mxu1 }
 0xa80   :  { %16827 = vst [vmem:[#allocation158_spill] sm:$0xff] %v14762_v32  ;;  %v7222_v59 = vmul.f32 %v14775_v37, %v14775_v37 }
 0xa81   :  { %v14764_v50 = vpop.f32.mrf.mxu1 }
 0xa83   :  { %v14770_v15 = vpop.f32.mrf.mxu1 }
 0xa85   :  { %v14777_v58 = vpop.f32.mrf.mxu1 }
 0xa86   :  { %v7009_v32 = vpop.f32.mrf.mxu0 }
 0xa87   :  { %v14784_v3 = vpop.f32.mrf.mxu1  ;;  %v7010_v39 = vadd.f32 %v7009_v32, %v6896_v34  ;;  %v7221_v34 = vmul.f32 %v14782_v17, %v14782_v17 }
 0xa88   :  { %v7011_v12 = vpop.f32.mrf.mxu0 }
 0xa89   :  { %v7122_v35 = vpop.f32.mrf.mxu1  ;;  %v7012_v27 = vadd.f32 %v7011_v12, %v6898_v30  ;;  %v7174_v30 = vadd.f32 %v14775_v37, %v14782_v17  ;;  %v7254_v10 = vadd.f32 %v7222_v59, %v7221_v34 }
 0xa8a   :  { %v7015_v38 = vpop.f32.mrf.mxu0  ;;  %v14798_v40 = vadd.f32 %v7122_v35, %v7010_v39  ;;  %v7225_v39 = vmul.f32 %v14804_v2, %v14804_v2 }
 0xa8b   :  { %v7124_v32 = vpop.f32.mrf.mxu1  ;;  %v7016_v49 = vadd.f32 %v7015_v38, %v6902_v21 }
 0xa8c   :  { %v7017_v44 = vpop.f32.mrf.mxu0  ;;  %v7170_v18 = vadd.f32 %v7169_v36, %v14798_v40  ;;  %v7219_v51 = vmul.f32 %v14798_v40, %v14798_v40  ;;  %v14809_v20 = vadd.f32 %v7124_v32, %v7012_v27 }
 0xa8d   :  { %v7128_v16 = vpop.f32.mrf.mxu1  ;;  %v7018_v21 = vadd.f32 %v7017_v44, %v6904_v43  ;;  %v7179_v43 = vadd.f32 %v14793_v57, %v14804_v2  ;;  %v7259_v44 = vadd.f32 %v7226_v41, %v7225_v39 }
 0xa8e   :  { %v7021_v8 = vpop.f32.mrf.mxu0  ;;  %v7220_v53 = vmul.f32 %v14809_v20, %v14809_v20  ;;  %v14821_v12 = vadd.f32 %v7128_v16, %v7016_v49  ;;  %v7171_v7 = vadd.f32 %v7170_v18, %v14809_v20  ;;  %v7250_v38 = vadd.f32 %v7249_v33, %v7219_v51 }
 0xa8f   :  { %v7130_v59 = vpop.f32.mrf.mxu1  ;;  %v7022_v35 = vadd.f32 %v7021_v8, %v14740_v22  ;;  %v7230_v18 = vmul.f32 %v14829_v63, %v14829_v63 }
 0xa90   :  { %v7023_v56 = vpop.f32.mrf.mxu0  ;;  %v7223_v36 = vmul.f32 %v14821_v12, %v14821_v12  ;;  %v14836_v27 = vadd.f32 %v7130_v59, %v7018_v21  ;;  %7172 = vadd.xlane.f32.xlu0 %v7171_v7  ;;  %v7175_v60 = vadd.f32 %v7174_v30, %v14821_v12  ;;  %v7251_v34 = vadd.f32 %v7250_v38, %v7220_v53 }
 0xa91   :  { %v7134_v33 = vpop.f32.mrf.mxu1  ;;  %v7024_v22 = vadd.f32 %v7023_v56, %v14744_v24  ;;  %v7264_v39 = vadd.f32 %v7230_v18, %v7229_v42  ;;  %v14876_v56 = vadd.f32 %v14730_v6, %v14712_v1  ;;  %v7233_v38 = vmul.f32 %v14852_v31, %v14852_v31  ;;  %v16828_v18 = vld [vmem:[#allocation160_spill] sm:$0xff] }
 0xa92   :  { %v7027_v11 = vpop.f32.mrf.mxu0  ;;  %v7224_v32 = vmul.f32 %v14836_v27, %v14836_v27  ;;  %v14847_v49 = vadd.f32 %v7134_v33, %v7022_v35  ;;  %7252 = vadd.xlane.f32.xlu1 %v7251_v34  ;;  %v7255_v51 = vadd.f32 %v7254_v10, %v7223_v36  ;;  %v7176_v16 = vadd.f32 %v7175_v60, %v14836_v27 }
 0xa93   :  { %v7136_v29 = vpop.f32.mrf.mxu1  ;;  %v7028_v24 = vadd.f32 %v7027_v11, %v14746_v54  ;;  %v7184_v54 = vadd.f32 %v14829_v63, %v14841_v25  ;;  %v7189_v34 = vadd.f32 %v14855_v9, %v14852_v31 }
 0xa94   :  { %v7029_v28 = vpop.f32.mrf.mxu0  ;;  %v7180_v30 = vadd.f32 %v7179_v43, %v14847_v49  ;;  %v7227_v41 = vmul.f32 %v14847_v49, %v14847_v49  ;;  %v14861_v8 = vadd.f32 %v7136_v29, %v7024_v22  ;;  %v7256_v10 = vadd.f32 %v7255_v51, %v7224_v32  ;;  %v16829_v29 = vld [vmem:[#allocation144_spill] sm:$0xff] }
 0xa95   :  { %v7140_v14 = vpop.f32.mrf.mxu1  ;;  %v7030_v61 = vadd.f32 %v7029_v28, %v14750_v4  ;;  %v7234_v43 = vmul.f32 %v14855_v9, %v14855_v9  ;;  %v14900_v32 = vadd.f32 %v14738_v5, %v14815_v47  ;;  %v14903_v28 = vadd.f32 %v16828_v18, %v6707_v45 }
 0xa96   :  { %v7033_v62 = vpop.f32.mrf.mxu0  ;;  %v7228_v21 = vmul.f32 %v14861_v8, %v14861_v8  ;;  %v14872_v53 = vadd.f32 %v7140_v14, %v7028_v24  ;;  %v7260_v7 = vadd.f32 %v7259_v44, %v7227_v41  ;;  %7177 = vadd.xlane.f32.xlu1 %v7176_v16  ;;  %7257 = vadd.xlane.f32.xlu0 %v7256_v10 }
 0xa97   :  { %v7142_v59 = vpop.f32.mrf.mxu1  ;;  %v7034_v35 = vadd.f32 %v7033_v62, %v14752_v48  ;;  %v7181_v36 = vadd.f32 %v7180_v30, %v14861_v8  ;;  %v14893_v44 = vadd.f32 %v14742_v19, %v6703_v55  ;;  %v14906_v51 = vadd.f32 %v16829_v29, %v6709_v13  ;;  %v16830_v19 = vld [vmem:[#allocation162_spill] sm:$0xff] }
 0xa98   :  { %v7035_v23 = vpop.f32.mrf.mxu0  ;;  %v7185_v60 = vadd.f32 %v7184_v54, %v14872_v53  ;;  %v7231_v1 = vmul.f32 %v14872_v53, %v14872_v53  ;;  %v14888_v6 = vadd.f32 %v7142_v59, %v7030_v61  ;;  %v7261_v33 = vadd.f32 %v7260_v7, %v7228_v21 }
 0xa99   :  { %v7146_v11 = vpop.f32.mrf.mxu1  ;;  %v7036_v48 = vadd.f32 %v7035_v23, %v14756_v0  ;;  %v7269_v5 = vadd.f32 %v7234_v43, %v7233_v38  ;;  %v7194_v16 = vadd.f32 %v14893_v44, %v14900_v32  ;;  %v7238_v7 = vmul.f32 %v14893_v44, %v14893_v44  ;;  %v16831_v23 = vld [vmem:[#allocation158_spill] sm:$0xff] }
 0xa9a   :  { %v7039_v4 = vpop.f32.mrf.mxu0  ;;  %v14896_v22 = vadd.f32 %v7146_v11, %v7034_v35  ;;  %7262 = vadd.xlane.f32.xlu1 %v7261_v33  ;;  %7182 = vadd.xlane.f32.xlu0 %v7181_v36  ;;  %v7232_v47 = vmul.f32 %v14888_v6, %v14888_v6  ;;  %v7186_v62 = vadd.f32 %v7185_v60, %v14888_v6  ;;  %v16832_v35 = vld [vmem:[#allocation132_spill] sm:$0xff] }
 0xa9b   :  { %v7148_v30 = vpop.f32.mrf.mxu1  ;;  %v7040_v55 = vadd.f32 %v7039_v4, %v16830_v19  ;;  %v7265_v14 = vadd.f32 %v7264_v39, %v7231_v1  ;;  %v7242_v61 = vmul.f32 %v14906_v51, %v14906_v51  ;;  %v16833_v36 = vld [vmem:[#allocation68_spill] sm:$0xff]  ;;  %v7237_v1 = vmul.f32 %v14900_v32, %v14900_v32 }
 0xa9c   :  { %v7041_v24 = vpop.f32.mrf.mxu0  ;;  %v7190_v0 = vadd.f32 %v7189_v34, %v14896_v22  ;;  %v7235_v41 = vmul.f32 %v14896_v22, %v14896_v22  ;;  %v14912_v42 = vadd.f32 %v7148_v30, %v7036_v48  ;;  %v6715_v60 = vadd.f32 %v16833_v36, %v16832_v35 }
 0xa9d   :  { %v7152_v13 = vpop.f32.mrf.mxu1  ;;  %v7042_v59 = vadd.f32 %v7041_v24, %v16831_v23  ;;  %v7241_v4 = vmul.f32 %v14903_v28, %v14903_v28  ;;  %v7266_v24 = vadd.f32 %v7265_v14, %v7232_v47  ;;  %v7199_v30 = vadd.f32 %v14906_v51, %v14903_v28 }
 0xa9e   :  { %v7045_v45 = vpop.f32.mrf.mxu0  ;;  %v7236_v10 = vmul.f32 %v14912_v42, %v14912_v42  ;;  %v14921_v54 = vadd.f32 %v7152_v13, %v7040_v55  ;;  %v7191_v21 = vadd.f32 %v7190_v0, %v14912_v42  ;;  %7187 = vadd.xlane.f32.xlu0 %v7186_v62  ;;  %v7270_v43 = vadd.f32 %v7269_v5, %v7235_v41  ;;  %v16834_v5 = vld [vmem:[#allocation156_spill] sm:$0xff] }
 0xa9f   :  { %v7154_v38 = vpop.f32.mrf.mxu1  ;;  %v7046_v11 = vadd.f32 %v7045_v45, %v14764_v50  ;;  %v7274_v50 = vadd.f32 %v7238_v7, %v7237_v1  ;;  %v7279_v41 = vadd.f32 %v7242_v61, %v7241_v4  ;;  %v14948_v45 = vadd.f32 %v16834_v5, %v14876_v56 }
 0xaa0   :  { %v7047_v39 = vpop.f32.mrf.mxu0  ;;  %7192 = vadd.xlane.f32.xlu1 %v7191_v21  ;;  %v7195_v33 = vadd.f32 %v7194_v16, %v14921_v54  ;;  %v7239_v34 = vmul.f32 %v14921_v54, %v14921_v54  ;;  %v14939_v48 = vadd.f32 %v7154_v38, %v7042_v59  ;;  %v7271_v0 = vadd.f32 %v7270_v43, %v7236_v10 }
 0xaa1   :  { %v7158_v29 = vpop.f32.mrf.mxu1  ;;  %v7048_v19 = vadd.f32 %v7047_v39, %v14770_v15  ;;  %v14951_v13 = vadd.f32 %v14768_v46, %v6715_v60  ;;  %v7245_v36 = vmul.f32 %v14948_v45, %v14948_v45 }
 0xaa2   :  { %v7051_v18 = vpop.f32.mrf.mxu0  ;;  %v14944_v55 = vadd.f32 %v7158_v29, %v7046_v11  ;;  %7267 = vadd.xlane.f32.xlu0 %v7266_v24  ;;  %v7240_v56 = vmul.f32 %v14939_v48, %v14939_v48  ;;  %v7196_v46 = vadd.f32 %v7195_v33, %v14939_v48  ;;  %v7275_v7 = vadd.f32 %v7274_v50, %v7239_v34 }
 0xaa3   :  { %v7160_v62 = vpop.f32.mrf.mxu1  ;;  %v7052_v47 = vadd.f32 %v7051_v18, %v14777_v58  ;;  %v7204_v39 = vadd.f32 %v14951_v13, %v14948_v45  ;;  %v7246_v38 = vmul.f32 %v14951_v13, %v14951_v13 }
 0xaa4   :  { %v7200_v14 = vadd.f32 %v7199_v30, %v14944_v55  ;;  %v7243_v15 = vmul.f32 %v14944_v55, %v14944_v55  ;;  %v7053_v16 = vpop.f32.mrf.mxu0  ;;  %v14957_v10 = vadd.f32 %v7160_v62, %v7048_v19  ;;  %7272 = vadd.xlane.f32.xlu1 %v7271_v0  ;;  %v7276_v11 = vadd.f32 %v7275_v7, %v7240_v56 }
 0xaa5   :  { %v7164_v21 = vpop.f32.mrf.mxu1  ;;  %v7054_v43 = vadd.f32 %v7053_v16, %v14784_v3  ;;  %v7284_v34 = vadd.f32 %v7246_v38, %v7245_v36 }
 0xaa6   :  { %v7244_v61 = vmul.f32 %v14957_v10, %v14957_v10  ;;  %v14964_v58 = vadd.f32 %v7164_v21, %v7052_v47  ;;  %v7201_v23 = vadd.f32 %v7200_v14, %v14957_v10  ;;  %v7280_v59 = vadd.f32 %v7279_v41, %v7243_v15  ;;  %7197 = vadd.xlane.f32.xlu0 %v7196_v46 }
 0xaa7   :  { %v7166_v35 = vpop.f32.mrf.mxu1 }
 0xaa8   :  { %7202 = vadd.xlane.f32.xlu1 %v7201_v23  ;;  %v7205_v60 = vadd.f32 %v7204_v39, %v14964_v58  ;;  %v7247_v1 = vmul.f32 %v14964_v58, %v14964_v58  ;;  %v14977_v4 = vadd.f32 %v7166_v35, %v7054_v43  ;;  %v7281_v33 = vadd.f32 %v7280_v59, %v7244_v61 }
 0xaaa   :  { %7277 = vadd.xlane.f32.xlu0 %v7276_v11  ;;  %v7248_v3 = vmul.f32 %v14977_v4, %v14977_v4  ;;  %v7206_v18 = vadd.f32 %v7205_v60, %v14977_v4  ;;  %v7285_v29 = vadd.f32 %v7284_v34, %v7247_v1 }
 0xaac   :  { %7282 = vadd.xlane.f32.xlu1 %v7281_v33  ;;  %v7286_v24 = vadd.f32 %v7285_v29, %v7248_v3 }
 0xaae   :  { %7207 = vadd.xlane.f32.xlu0 %v7206_v18 }
 0xab2   :  { %7287 = vadd.xlane.f32.xlu0 %v7286_v24  ;;  %v7313_v24 = vld [vmem:[%s15219_s9] sm:$0xff] }
 0xb19   :  { %v7173_v30 = vpop.xlane.xlu0 %7172 }
 0xb1a   :  { %v7209_v19 = vmul.f32 0.001953125, %v7173_v30 }
 0xb1b   :  { %v7253_v50 = vpop.xlane.xlu1 %7252 }
 0xb1c   :  { %v7297_v0 = vmul.f32 %v7209_v19, %v7209_v19  ;;  %v7289_v41 = vmul.f32 0.001953125, %v7253_v50 }
 0xb1e   :  { %v7305_v5 = vsub.f32 %v7289_v41, %v7297_v0 }
 0xb1f   :  { %v7178_v62 = vpop.xlane.xlu1 %7177  ;;  %v7258_v47 = vpop.xlane.xlu0 %7257 }
 0xb20   :  { %v7321_v14 = vadd.f32 1e-05, %v7305_v5  ;;  %v7210_v15 = vmul.f32 0.001953125, %v7178_v62  ;;  %v7290_v56 = vmul.f32 0.001953125, %v7258_v47 }
 0xb22   :  { %7843 = vrsqrt.f32 %v7321_v14  ;;  %v7298_v16 = vmul.f32 %v7210_v15, %v7210_v15 }
 0xb23   :  { %v7263_v21 = vpop.xlane.xlu1 %7262  ;;  %v7183_v46 = vpop.xlane.xlu0 %7182 }
 0xb24   :  { %v7306_v7 = vsub.f32 %v7290_v56, %v7298_v16  ;;  %v7211_v61 = vmul.f32 0.001953125, %v7183_v46  ;;  %v7291_v59 = vmul.f32 0.001953125, %v7263_v21  ;;  %v7314_v46 = vld [vmem:[%s15219_s9 + $0x8] sm:$0xff] }
 0xb26   :  { %v7322_v23 = vadd.f32 1e-05, %v7306_v7  ;;  %v7299_v39 = vmul.f32 %v7211_v61, %v7211_v61 }
 0xb27   :  { %v7188_v38 = vpop.xlane.xlu0 %7187 }
 0xb28   :  { %7845 = vrsqrt.f32 %v7322_v23  ;;  %v7307_v43 = vsub.f32 %v7291_v59, %v7299_v39  ;;  %v14982_v35 = vmul.f32 0.001953125, %v7188_v38 }
 0xb29   :  { %v7193_v36 = vpop.xlane.xlu1 %7192 }
 0xb2a   :  { %v14984_v60 = vmul.f32 0.001953125, %v7193_v36  ;;  %v7323_v1 = vadd.f32 1e-05, %v7307_v43  ;;  %v7300_v33 = vmul.f32 %v14982_v35, %v14982_v35 }
 0xb2b   :  { %v7268_v11 = vpop.xlane.xlu0 %7267 }
 0xb2c   :  { %7847 = vrsqrt.f32 %v7323_v1  ;;  %v7292_v34 = vmul.f32 0.001953125, %v7268_v11  ;;  %v7301_v18 = vmul.f32 %v14984_v60, %v14984_v60 }
 0xb2d   :  { %v7273_v3 = vpop.xlane.xlu1 %7272 }
 0xb2e   :  { %v7293_v29 = vmul.f32 0.001953125, %v7273_v3  ;;  %v7308_v30 = vsub.f32 %v7292_v34, %v7300_v33  ;;  %v7315_v33 = vld [vmem:[%s15219_s9 + $0x10] sm:$0xff] }
 0xb2f   :  { %v7844_v0 = vpop.eup %7843  ;;  %v7198_v41 = vpop.xlane.xlu0 %7197 }
 0xb30   :  { %v7309_v50 = vsub.f32 %v7293_v29, %v7301_v18  ;;  %v7324_v5 = vadd.f32 1e-05, %v7308_v30  ;;  %v14993_v62 = vmul.f32 0.001953125, %v7198_v41  ;;  %v7337_v14 = vmul.f32 %v7844_v0, %v7313_v24  ;;  %v7345_v18 = vld [vmem:[%s15220_s10] sm:$0xff] }
 0xb31   :  { %v7203_v47 = vpop.xlane.xlu1 %7202 }
 0xb32   :  { %v7325_v16 = vadd.f32 1e-05, %v7309_v50  ;;  %v14995_v56 = vmul.f32 0.001953125, %v7203_v47  ;;  %7849 = vrsqrt.f32 %v7324_v5  ;;  %7371 = vperm.xlu1 %7809, %v7337_v14   ;;  %v7302_v7 = vmul.f32 %v14993_v62, %v14993_v62 }
 0xb33   :  { %v7278_v21 = vpop.xlane.xlu0 %7277  ;;  %v7353_v11 = vmul.f32 %v7337_v14, %v7209_v19  ;;  %v7347_v19 = vld [vmem:[%s15220_s10 + $0x10] sm:$0xff]  ;;  %v7346_v14 = vld [vmem:[%s15220_s10 + $0x8] sm:$0xff] }
 0xb34   :  { %7851 = vrsqrt.f32 %v7325_v16  ;;  %v7294_v23 = vmul.f32 0.001953125, %v7278_v21  ;;  %v7303_v38 = vmul.f32 %v14995_v56, %v14995_v56 }
 0xb35   :  { %v7283_v59 = vpop.xlane.xlu1 %7282  ;;  %v7846_v39 = vpop.eup %7845  ;;  %v7361_v41 = vsub.f32 %v7345_v18, %v7353_v11  ;;  %v7349_v11 = vld [vmem:[%s15220_s10 + $0x20] sm:$0xff] }
 0xb36   :  { %v7295_v43 = vmul.f32 0.001953125, %v7283_v59  ;;  %v7310_v36 = vsub.f32 %v7294_v23, %v7302_v7  ;;  %v7338_v1 = vmul.f32 %v7846_v39, %v7314_v46  ;;  %v7316_v7 = vld [vmem:[%s15219_s9 + $0x18] sm:$0xff]  ;;  %v7317_v39 = vld [vmem:[%s15219_s9 + $0x20] sm:$0xff] }
 0xb37   :  { %v7208_v3 = vpop.xlane.xlu0 %7207 }
 0xb38   :  { %v7311_v34 = vsub.f32 %v7295_v43, %v7303_v38  ;;  %v7326_v29 = vadd.f32 1e-05, %v7310_v36  ;;  %v7216_v24 = vmul.f32 0.001953125, %v7208_v3  ;;  %7376 = vperm.xlu0 %7810, %v7338_v1   ;;  %v7354_v5 = vmul.f32 %v7338_v1, %v7210_v15  ;;  %v7348_v3 = vld [vmem:[%s15220_s10 + $0x18] sm:$0xff] }
 0xb39   :  { %v7848_v30 = vpop.eup %7847 }
 0xb3a   :  { %v7327_v0 = vadd.f32 1e-05, %v7311_v34  ;;  %v7339_v50 = vmul.f32 %v7848_v30, %v7315_v33  ;;  %7853 = vrsqrt.f32 %v7326_v29  ;;  %v7304_v21 = vmul.f32 %v7216_v24, %v7216_v24  ;;  %v7318_v29 = vld [vmem:[%s15219_s9 + $0x28] sm:$0xff] }
 0xb3b   :  { %v7288_v47 = vpop.xlane.xlu0 %7287  ;;  %v7362_v59 = vsub.f32 %v7346_v14, %v7354_v5  ;;  %v7351_v5 = vld [vmem:[%s15220_s10 + $0x30] sm:$0xff]  ;;  %v7350_v14 = vld [vmem:[%s15220_s10 + $0x28] sm:$0xff] }
 0xb3c   :  { %7855 = vrsqrt.f32 %v7327_v0  ;;  %v7355_v16 = vmul.f32 %v7339_v50, %v7211_v61  ;;  %v7296_v46 = vmul.f32 0.001953125, %v7288_v47  ;;  %7443 = vperm.xlu0 %7810, %v7361_v41   ;;  %7381 = vperm.xlu1 %7809, %v7339_v50   ;;  %v7319_v0 = vld [vmem:[%s15219_s9 + $0x30] sm:$0xff] }
 0xb3e   :  { %v7363_v15 = vsub.f32 %v7347_v19, %v7355_v16  ;;  %v7312_v23 = vsub.f32 %v7296_v46, %v7304_v21  ;;  %v7320_v21 = vld [vmem:[%s15219_s9 + $0x38] sm:$0xff] }
 0xb3f   :  { %v7850_v38 = vpop.eup %7849 }
 0xb40   :  { %v7328_v36 = vadd.f32 1e-05, %v7312_v23  ;;  %7448 = vperm.xlu1 %7809, %v7362_v59   ;;  %7453 = vperm.xlu0 %7810, %v7363_v15   ;;  %v7340_v61 = vmul.f32 %v7850_v38, %v7316_v7 }
 0xb41   :  { %v7852_v43 = vpop.eup %7851 }
 0xb42   :  { %v7341_v1 = vmul.f32 %v7852_v43, %v7317_v39  ;;  %7857 = vrsqrt.f32 %v7328_v36  ;;  %v7356_v33 = vmul.f32 %v7340_v61, %v14982_v35 }
 0xb44   :  { %v7357_v34 = vmul.f32 %v7341_v1, %v14984_v60  ;;  %7391 = vperm.xlu0 %7810, %v7341_v1   ;;  %7386 = vperm.xlu1 %7809, %v7340_v61   ;;  %v7364_v30 = vsub.f32 %v7348_v3, %v7356_v33 }
 0xb46   :  { %v7365_v18 = vsub.f32 %v7349_v11, %v7357_v34 }
 0xb47   :  { %v7854_v50 = vpop.eup %7853 }
 0xb48   :  { %7463 = vperm.xlu0 %7810, %v7365_v18   ;;  %7458 = vperm.xlu1 %7809, %v7364_v30   ;;  %v7342_v60 = vmul.f32 %v7854_v50, %v7318_v29  ;;  %v16835_v50 = vld [vmem:[#allocation13_spill] sm:$0xff] }
 0xb49   :  { %v7856_v35 = vpop.eup %7855 }
 0xb4a   :  { %v7343_v41 = vmul.f32 %v7856_v35, %v7319_v0  ;;  %v7358_v19 = vmul.f32 %v7342_v60, %v14993_v62  ;;  %v7352_v62 = vld [vmem:[%s15220_s10 + $0x38] sm:$0xff]  ;;  %v16836_v35 = vld [vmem:[#allocation14_spill] sm:$0xff] }
 0xb4c   :  { %v7359_v47 = vmul.f32 %v7343_v41, %v14995_v56  ;;  %7401 = vperm.xlu0 %7810, %v7343_v41   ;;  %7396 = vperm.xlu1 %7809, %v7342_v60   ;;  %v7366_v46 = vsub.f32 %v7350_v14, %v7358_v19  ;;  %v16837_v60 = vld [vmem:[#allocation16_spill] sm:$0xff]  ;;  %v16838_v41 = vld [vmem:[#allocation15_spill] sm:$0xff] }
 0xb4e   :  { %v7367_v16 = vsub.f32 %v7351_v5, %v7359_v47 }
 0xb4f   :  { %v7858_v7 = vpop.eup %7857 }
 0xb50   :  { %7473 = vperm.xlu0 %7810, %v7367_v16   ;;  %7468 = vperm.xlu1 %7809, %v7366_v46   ;;  %v7344_v15 = vmul.f32 %v7858_v7, %v7320_v21  ;;  %v16839_v7 = vld [vmem:[#allocation17_spill] sm:$0xff] }
 0xb52   :  { %v7360_v23 = vmul.f32 %v7344_v15, %v7216_v24 }
 0xb54   :  { %7406 = vperm.xlu1 %7809, %v7344_v15   ;;  %v7368_v56 = vsub.f32 %v7352_v62, %v7360_v23  ;;  %v16840_v15 = vld [vmem:[#allocation18_spill] sm:$0xff]  ;;  %v16841_v62 = vld [vmem:[#allocation19_spill] sm:$0xff] }
 0xb58   :  { %7478 = vperm.xlu1 %7809, %v7368_v56  }
 0xbad   :  { %v7372_v59 = vpop.permute.xlu1 %7371 }
 0xbae   :  { %v7409_v38 = vmul.f32 %v7372_v59, %v14773_v52  ;;  %v7410_v43 = vmul.f32 %v7372_v59, %v14766_v26  ;;  %v7411_v36 = vmul.f32 %v7372_v59, %v14798_v40  ;;  %v7412_v61 = vmul.f32 %v7372_v59, %v14809_v20  ;;  %v16842_v59 = vld [vmem:[#allocation20_spill] sm:$0xff] }
 0xbb3   :  { %v7377_v39 = vpop.permute.xlu0 %7376 }
 0xbb4   :  { %v7413_v24 = vmul.f32 %v7377_v39, %v14782_v17  ;;  %v7414_v33 = vmul.f32 %v7377_v39, %v14775_v37  ;;  %v7415_v34 = vmul.f32 %v7377_v39, %v14821_v12  ;;  %v7416_v3 = vmul.f32 %v7377_v39, %v14836_v27 }
 0xbb7   :  { %v7382_v1 = vpop.permute.xlu1 %7381  ;;  %v7444_v11 = vpop.permute.xlu0 %7443 }
 0xbb8   :  { %v7481_v18 = vadd.f32 %v7444_v11, %v7409_v38  ;;  %v7482_v29 = vadd.f32 %v7444_v11, %v7410_v43  ;;  %v7483_v30 = vadd.f32 %v7444_v11, %v7411_v36  ;;  %v7484_v52 = vadd.f32 %v7444_v11, %v7412_v61 }
 0xbb9   :  { %v7417_v26 = vmul.f32 %v7382_v1, %v14804_v2  ;;  %v7418_v40 = vmul.f32 %v7382_v1, %v14793_v57  ;;  %v7419_v20 = vmul.f32 %v7382_v1, %v14847_v49  ;;  %v7420_v0 = vmul.f32 %v7382_v1, %v14861_v8 }
 0xbba   :  { %v7545_v17 = vadd.f32 %v7481_v18, %v16835_v50  ;;  %v7546_v37 = vadd.f32 %v7482_v29, %v16836_v35  ;;  %v7547_v12 = vadd.f32 %v7483_v30, %v16837_v60  ;;  %v7548_v27 = vadd.f32 %v7484_v52, %v16838_v41  ;;  %v16843_v18 = vld [vmem:[#allocation21_spill] sm:$0xff]  ;;  %v16844_v30 = vld [vmem:[#allocation22_spill] sm:$0xff]  ;;  %v16845_v50 = vld [vmem:[#allocation24_spill] sm:$0xff] }
 0xbbb   :  { %v7449_v5 = vpop.permute.xlu1 %7448  ;;  %v7454_v19 = vpop.permute.xlu0 %7453  ;;  %v16846_v35 = vld [vmem:[#allocation23_spill] sm:$0xff] }
 0xbbc   :  { %v7485_v47 = vadd.f32 %v7449_v5, %v7413_v24  ;;  %v7486_v14 = vadd.f32 %v7449_v5, %v7414_v33  ;;  %v7487_v16 = vadd.f32 %v7449_v5, %v7415_v34  ;;  %v7488_v2 = vadd.f32 %v7449_v5, %v7416_v3 }
 0xbbd   :  { %v7577_v21 = vmax.f32 %v7545_v17, 0.0  ;;  %v7578_v57 = vmax.f32 %v7546_v37, 0.0  ;;  %v7579_v46 = vmax.f32 %v7547_v12, 0.0  ;;  %v7580_v49 = vmax.f32 %v7548_v27, 0.0 }
 0xbbe   :  { %v7549_v8 = vadd.f32 %v7485_v47, %v16839_v7  ;;  %v7550_v23 = vadd.f32 %v7486_v14, %v16840_v15  ;;  %v7551_v56 = vadd.f32 %v7487_v16, %v16841_v62  ;;  %v7552_v39 = vadd.f32 %v7488_v2, %v16842_v59  ;;  %v16849_v7 = vld [vmem:[#allocation37_spill] sm:$0xff]  ;;  %v16850_v15 = vld [vmem:[#allocation42_spill] sm:$0xff]  ;;  %v16851_v59 = vld [vmem:[#allocation60_spill] sm:$0xff] }
 0xbbf   :  { %7673 = vst [vmem:[%s15221_s11] sm:$0xff] %v7577_v21  ;;  %7674 = vst [vmem:[%s15221_s11 + $0x8] sm:$0xff] %v7578_v57  ;;  %v7489_v38 = vadd.f32 %v7454_v19, %v7417_v26  ;;  %v7490_v43 = vadd.f32 %v7454_v19, %v7418_v40  ;;  %v7491_v36 = vadd.f32 %v7454_v19, %v7419_v20  ;;  %v7387_v1 = vpop.permute.xlu1 %7386  ;;  %v7392_v11 = vpop.permute.xlu0 %7391  ;;  %v16847_v21 = vld [vmem:[#allocation32_spill] sm:$0xff] }
 0xbc0   :  { %7780 = vst [vmem:[%s15221_s11 + $0x80] sm:$0xff] %v7579_v46  ;;  %7781 = vst [vmem:[%s15221_s11 + $0x88] sm:$0xff] %v7580_v49  ;;  %v7492_v61 = vadd.f32 %v7454_v19, %v7420_v0  ;;  %v7581_v24 = vmax.f32 %v7549_v8, 0.0  ;;  %v7582_v33 = vmax.f32 %v7550_v23, 0.0  ;;  %v7583_v34 = vmax.f32 %v7551_v56, 0.0  ;;  %v16848_v46 = vld [vmem:[#allocation34_spill] sm:$0xff] }
 0xbc1   :  { %v7584_v3 = vmax.f32 %v7552_v39, 0.0  ;;  %v7553_v29 = vadd.f32 %v7489_v38, %v16843_v18  ;;  %v7554_v52 = vadd.f32 %v7490_v43, %v16844_v30  ;;  %v7555_v17 = vadd.f32 %v7491_v36, %v16845_v50  ;;  %v16852_v38 = vld [vmem:[#allocation57_spill] sm:$0xff]  ;;  %v16853_v36 = vld [vmem:[#allocation64_spill] sm:$0xff] }
 0xbc2   :  { %v7556_v37 = vadd.f32 %v7492_v61, %v16846_v35  ;;  %7675 = vst [vmem:[%s15221_s11 + $0x10] sm:$0xff] %v7581_v24  ;;  %7676 = vst [vmem:[%s15221_s11 + $0x18] sm:$0xff] %v7582_v33  ;;  %v7421_v26 = vmul.f32 %v7387_v1, %v14841_v25  ;;  %v7422_v40 = vmul.f32 %v7387_v1, %v14829_v63 }
 0xbc3   :  { %7782 = vst [vmem:[%s15221_s11 + $0x90] sm:$0xff] %v7583_v34  ;;  %7783 = vst [vmem:[%s15221_s11 + $0x98] sm:$0xff] %v7584_v3  ;;  %v7423_v20 = vmul.f32 %v7387_v1, %v14872_v53  ;;  %v7424_v0 = vmul.f32 %v7387_v1, %v14888_v6  ;;  %v7585_v60 = vmax.f32 %v7553_v29, 0.0  ;;  %v7586_v12 = vmax.f32 %v7554_v52, 0.0  ;;  %v7459_v5 = vpop.permute.xlu1 %7458  ;;  %v7464_v19 = vpop.permute.xlu0 %7463  ;;  %v16854_v1 = vld [vmem:[#allocation61_spill] sm:$0xff] }
 0xbc4   :  { %v7587_v41 = vmax.f32 %v7555_v17, 0.0  ;;  %v7588_v27 = vmax.f32 %v7556_v37, 0.0  ;;  %v7425_v47 = vmul.f32 %v7392_v11, %v14852_v31  ;;  %v7426_v14 = vmul.f32 %v7392_v11, %v14855_v9 }
 0xbc5   :  { %v7427_v16 = vmul.f32 %v7392_v11, %v14896_v22  ;;  %v7428_v25 = vmul.f32 %v7392_v11, %v14912_v42  ;;  %7677 = vst [vmem:[%s15221_s11 + $0x20] sm:$0xff] %v7585_v60  ;;  %7678 = vst [vmem:[%s15221_s11 + $0x28] sm:$0xff] %v7586_v12  ;;  %v7493_v63 = vadd.f32 %v7459_v5, %v7421_v26 }
 0xbc6   :  { %7784 = vst [vmem:[%s15221_s11 + $0xa0] sm:$0xff] %v7587_v41  ;;  %7785 = vst [vmem:[%s15221_s11 + $0xa8] sm:$0xff] %v7588_v27  ;;  %v7494_v31 = vadd.f32 %v7459_v5, %v7422_v40  ;;  %v7495_v9 = vadd.f32 %v7459_v5, %v7423_v20  ;;  %v7496_v53 = vadd.f32 %v7459_v5, %v7424_v0 }
 0xbc7   :  { %v7497_v6 = vadd.f32 %v7464_v19, %v7425_v47  ;;  %v7498_v22 = vadd.f32 %v7464_v19, %v7426_v14  ;;  %v7499_v42 = vadd.f32 %v7464_v19, %v7427_v16  ;;  %v7500_v2 = vadd.f32 %v7464_v19, %v7428_v25  ;;  %v7397_v62 = vpop.permute.xlu1 %7396  ;;  %v7402_v56 = vpop.permute.xlu0 %7401  ;;  %v16855_v47 = vld [vmem:[#allocation81_spill] sm:$0xff]  ;;  %v16856_v16 = vld [vmem:[#allocation84_spill] sm:$0xff] }
 0xbc8   :  { %v7557_v57 = vadd.f32 %v7493_v63, %v16847_v21  ;;  %v7558_v49 = vadd.f32 %v7494_v31, %v16848_v46  ;;  %v7559_v8 = vadd.f32 %v7495_v9, %v16849_v7  ;;  %v7560_v23 = vadd.f32 %v7496_v53, %v16850_v15  ;;  %v16857_v63 = vld [vmem:[#allocation87_spill] sm:$0xff]  ;;  %v16858_v31 = vld [vmem:[#allocation92_spill] sm:$0xff] }
 0xbc9   :  { %v7561_v39 = vadd.f32 %v7497_v6, %v16851_v59  ;;  %v7562_v43 = vadd.f32 %v7498_v22, %v16852_v38  ;;  %v7563_v61 = vadd.f32 %v7499_v42, %v16853_v36  ;;  %v7564_v11 = vadd.f32 %v7500_v2, %v16854_v1  ;;  %v16861_v22 = vld [vmem:[#allocation117_spill] sm:$0xff]  ;;  %v16862_v2 = vld [vmem:[#allocation114_spill] sm:$0xff]  ;;  %v16863_v36 = vld [vmem:[#allocation135_spill] sm:$0xff] }
 0xbca   :  { %v7589_v24 = vmax.f32 %v7557_v57, 0.0  ;;  %v7590_v33 = vmax.f32 %v7558_v49, 0.0  ;;  %v7591_v34 = vmax.f32 %v7559_v8, 0.0  ;;  %v7592_v3 = vmax.f32 %v7560_v23, 0.0  ;;  %v16864_v1 = vld [vmem:[#allocation138_spill] sm:$0xff] }
 0xbcb   :  { %v7593_v18 = vmax.f32 %v7561_v39, 0.0  ;;  %v7594_v29 = vmax.f32 %v7562_v43, 0.0  ;;  %v7595_v30 = vmax.f32 %v7563_v61, 0.0  ;;  %v7596_v52 = vmax.f32 %v7564_v11, 0.0  ;;  %v7469_v26 = vpop.permute.xlu1 %7468  ;;  %v7474_v40 = vpop.permute.xlu0 %7473 }
 0xbcc   :  { %7679 = vst [vmem:[%s15221_s11 + $0x30] sm:$0xff] %v7589_v24  ;;  %7680 = vst [vmem:[%s15221_s11 + $0x38] sm:$0xff] %v7590_v33  ;;  %v7429_v50 = vmul.f32 %v7397_v62, %v14900_v32  ;;  %v7430_v17 = vmul.f32 %v7397_v62, %v14893_v44  ;;  %v7431_v35 = vmul.f32 %v7397_v62, %v14921_v54  ;;  %v16865_v24 = vld [vmem:[#allocation141_spill] sm:$0xff] }
 0xbcd   :  { %7786 = vst [vmem:[%s15221_s11 + $0xb0] sm:$0xff] %v7591_v34  ;;  %7787 = vst [vmem:[%s15221_s11 + $0xb8] sm:$0xff] %v7592_v3  ;;  %v7432_v37 = vmul.f32 %v7397_v62, %v14939_v48  ;;  %v7433_v44 = vmul.f32 %v7402_v56, %v14903_v28  ;;  %v7434_v32 = vmul.f32 %v7402_v56, %v14906_v51  ;;  %v16866_v34 = vld [vmem:[#allocation146_spill] sm:$0xff] }
 0xbce   :  { %7681 = vst [vmem:[%s15221_s11 + $0x40] sm:$0xff] %v7593_v18  ;;  %7682 = vst [vmem:[%s15221_s11 + $0x48] sm:$0xff] %v7594_v29  ;;  %v7435_v54 = vmul.f32 %v7402_v56, %v14944_v55  ;;  %v7436_v48 = vmul.f32 %v7402_v56, %v14957_v10  ;;  %v7501_v20 = vadd.f32 %v7469_v26, %v7429_v50  ;;  %v16859_v55 = vld [vmem:[#allocation113_spill] sm:$0xff]  ;;  %v16860_v10 = vld [vmem:[#allocation110_spill] sm:$0xff] }
 0xbcf   :  { %7788 = vst [vmem:[%s15221_s11 + $0xc0] sm:$0xff] %v7595_v30  ;;  %7789 = vst [vmem:[%s15221_s11 + $0xc8] sm:$0xff] %v7596_v52  ;;  %v7502_v0 = vadd.f32 %v7469_v26, %v7430_v17  ;;  %v7503_v60 = vadd.f32 %v7469_v26, %v7431_v35  ;;  %v7504_v12 = vadd.f32 %v7469_v26, %v7432_v37  ;;  %v7407_v9 = vpop.permute.xlu1 %7406 }
 0xbd0   :  { %v7505_v41 = vadd.f32 %v7474_v40, %v7433_v44  ;;  %v7506_v27 = vadd.f32 %v7474_v40, %v7434_v32  ;;  %v7507_v5 = vadd.f32 %v7474_v40, %v7435_v54  ;;  %v7508_v19 = vadd.f32 %v7474_v40, %v7436_v48 }
 0xbd1   :  { %v7565_v14 = vadd.f32 %v7501_v20, %v16855_v47  ;;  %v7566_v25 = vadd.f32 %v7502_v0, %v16856_v16  ;;  %v7567_v28 = vadd.f32 %v7503_v60, %v16857_v63  ;;  %v7568_v51 = vadd.f32 %v7504_v12, %v16858_v31 }
 0xbd2   :  { %v7569_v53 = vadd.f32 %v7505_v41, %v16859_v55  ;;  %v7570_v6 = vadd.f32 %v7506_v27, %v16860_v10  ;;  %v7571_v42 = vadd.f32 %v7507_v5, %v16861_v22  ;;  %v7572_v21 = vadd.f32 %v7508_v19, %v16862_v2 }
 0xbd3   :  { %v7597_v57 = vmax.f32 %v7565_v14, 0.0  ;;  %v7598_v46 = vmax.f32 %v7566_v25, 0.0  ;;  %v7599_v49 = vmax.f32 %v7567_v28, 0.0  ;;  %v7600_v7 = vmax.f32 %v7568_v51, 0.0  ;;  %v7479_v43 = vpop.permute.xlu1 %7478 }
 0xbd4   :  { %v7601_v8 = vmax.f32 %v7569_v53, 0.0  ;;  %v7602_v15 = vmax.f32 %v7570_v6, 0.0  ;;  %v7603_v23 = vmax.f32 %v7571_v42, 0.0  ;;  %v7604_v62 = vmax.f32 %v7572_v21, 0.0 }
 0xbd5   :  { %7683 = vst [vmem:[%s15221_s11 + $0x50] sm:$0xff] %v7597_v57  ;;  %7684 = vst [vmem:[%s15221_s11 + $0x58] sm:$0xff] %v7598_v46  ;;  %v7437_v56 = vmul.f32 %v7407_v9, %v14948_v45  ;;  %v7438_v59 = vmul.f32 %v7407_v9, %v14951_v13  ;;  %v7439_v39 = vmul.f32 %v7407_v9, %v14964_v58 }
 0xbd6   :  { %7790 = vst [vmem:[%s15221_s11 + $0xd0] sm:$0xff] %v7599_v49  ;;  %7791 = vst [vmem:[%s15221_s11 + $0xd8] sm:$0xff] %v7600_v7  ;;  %v7440_v38 = vmul.f32 %v7407_v9, %v14977_v4 }
 0xbd7   :  { %7685 = vst [vmem:[%s15221_s11 + $0x60] sm:$0xff] %v7601_v8  ;;  %7686 = vst [vmem:[%s15221_s11 + $0x68] sm:$0xff] %v7602_v15  ;;  %v7509_v45 = vadd.f32 %v7479_v43, %v7437_v56  ;;  %v7510_v13 = vadd.f32 %v7479_v43, %v7438_v59  ;;  %v7511_v58 = vadd.f32 %v7479_v43, %v7439_v39 }
 0xbd8   :  { %7792 = vst [vmem:[%s15221_s11 + $0xe0] sm:$0xff] %v7603_v23  ;;  %7793 = vst [vmem:[%s15221_s11 + $0xe8] sm:$0xff] %v7604_v62  ;;  %v7512_v4 = vadd.f32 %v7479_v43, %v7440_v38 }
 0xbd9   :  { %v7573_v61 = vadd.f32 %v7509_v45, %v16863_v36  ;;  %v7574_v11 = vadd.f32 %v7510_v13, %v16864_v1  ;;  %v7575_v33 = vadd.f32 %v7511_v58, %v16865_v24 }
 0xbda   :  { %v7576_v3 = vadd.f32 %v7512_v4, %v16866_v34 }
 0xbdb   :  { %v7605_v18 = vmax.f32 %v7573_v61, 0.0  ;;  %v7606_v29 = vmax.f32 %v7574_v11, 0.0  ;;  %v7607_v30 = vmax.f32 %v7575_v33, 0.0 }
 0xbdc   :  { %v7608_v52 = vmax.f32 %v7576_v3, 0.0 }
 0xbdd   :  { %7687 = vst [vmem:[%s15221_s11 + $0x70] sm:$0xff] %v7605_v18  ;;  %7688 = vst [vmem:[%s15221_s11 + $0x78] sm:$0xff] %v7606_v29 }
 0xbde   :  { %7794 = vst [vmem:[%s15221_s11 + $0xf0] sm:$0xff] %v7607_v30  ;;  %7795 = vst [vmem:[%s15221_s11 + $0xf8] sm:$0xff] %v7608_v52 }
 0xbdf   :  { %7710 = vsyncpa [#allocation6], 1 }

</bundles_post_ra>
